<compile_context>
chip_gen: v5e
topology: v5e:2x2
jax: 0.10.0
libtpu: 0.0.40
codegen_flags: <defaults>
</compile_context>

<pallas_src>
import jax
import jax.numpy as jnp
import numpy as np
from jax.experimental import pallas as pl
from jax.experimental.pallas import tpu as pltpu

NEG_SLOPE = 0.01   # nn.LeakyReLU() default negative_slope
F_BLOCK = 1024     # reduction block over linear1's flattened-feature dim


def _leaky_relu(y):
    return jnp.where(y > 0, y, NEG_SLOPE * y)


# --------------- Pallas kernel: conv-as-matmul + bias + LeakyReLU ----------- #
def _conv_mm_kernel(a_ref, b_ref, bias_ref, o_ref):
    # a: (M, K) im2col patches, b: (K, Co), bias: (1, Co) -- all resident in VMEM.
    y = jnp.dot(a_ref[...], b_ref[...], preferred_element_type=jnp.float32)
    y = y + bias_ref[...]
    o_ref[...] = _leaky_relu(y).astype(o_ref.dtype)


def matmul_bias_leaky(a, b, bias):
    """leaky_relu(a @ b + bias); single kernel invocation, everything in VMEM."""
    M, K = a.shape
    K2, N = b.shape
    assert K == K2
    return pl.pallas_call(
        _conv_mm_kernel,
        out_shape=jax.ShapeDtypeStruct((M, N), jnp.float32),
    )(a, b, bias.reshape(1, N))


# --------------- Pallas kernel: fused linear1 + output layer ---------------- #
def _fused_linear_kernel(x_ref, w1_ref, b1_ref, w2_ref, b2_ref, o_ref, h_acc):
    k = pl.program_id(0)

    @pl.when(k == 0)
    def _():
        h_acc[...] = jnp.zeros_like(h_acc)

    # bf16 x bf16 -> f32 accumulation on the MXU; the next weight block's DMA
    # overlaps this step via BlockSpec double-buffering.
    h_acc[...] += jnp.dot(x_ref[...], w1_ref[...],
                          preferred_element_type=jnp.float32)

    @pl.when(k == pl.num_programs(0) - 1)
    def _():
        h = _leaky_relu(h_acc[...] + b1_ref[...])          # f32 epilogue (v5e-safe)
        o_ref[...] = (jnp.dot(h, w2_ref[...],
                              preferred_element_type=jnp.float32)
                      + b2_ref[...]).astype(o_ref.dtype)


def fused_linear(x_bf16, w1_bf16, b1, w2, b2):
    """output_layer(leaky_relu(x @ w1 + b1)) in one pallas_call.

    x:(B, F_pad) bf16, w1:(F_pad, H) bf16, w2:(H, O) f32.  Reduction grid over
    F_pad; hidden activation lives in a VMEM scratch accumulator."""
    B, f_pad = x_bf16.shape
    f2, H = w1_bf16.shape
    assert f_pad == f2 and f_pad % F_BLOCK == 0
    n_out = w2.shape[1]
    n_k = f_pad // F_BLOCK

    grid_spec = pltpu.PrefetchScalarGridSpec(
        num_scalar_prefetch=0,
        grid=(n_k,),
        in_specs=[
            pl.BlockSpec((B, F_BLOCK), lambda k: (0, k)),   # activation slab
            pl.BlockSpec((F_BLOCK, H), lambda k: (k, 0)),   # wl1 block (bf16)
            pl.BlockSpec((1, H), lambda k: (0, 0)),          # b1 (resident)
            pl.BlockSpec((H, n_out), lambda k: (0, 0)),      # wo (resident)
            pl.BlockSpec((1, n_out), lambda k: (0, 0)),      # bo (resident)
        ],
        out_specs=pl.BlockSpec((B, n_out), lambda k: (0, 0)),
        scratch_shapes=[pltpu.VMEM((B, H), jnp.float32)],
    )
    return pl.pallas_call(
        _fused_linear_kernel,
        out_shape=jax.ShapeDtypeStruct((B, n_out), jnp.float32),
        grid_spec=grid_spec,
        compiler_params=pltpu.CompilerParams(
            dimension_semantics=("arbitrary",),
            vmem_limit_bytes=32 << 20,
        ),
    )(x_bf16, w1_bf16, b1.reshape(1, H), w2, b2.reshape(1, n_out))


# ------------------------------ conv plumbing ------------------------------- #
def im2col(x, kh, kw, stride):
    # x: (N, H, W, C) NHWC.  Returns (N*OH*OW, KH*KW*C) with (kh, kw, c) order.
    n, h, w, c = x.shape
    oh = (h - kh) // stride + 1
    ow = (w - kw) // stride + 1
    patches = []
    for i in range(kh):
        for j in range(kw):
            patches.append(x[:, i:i + (oh - 1) * stride + 1:stride,
                              j:j + (ow - 1) * stride + 1:stride, :])
    p = jnp.stack(patches, axis=3)               # (N, OH, OW, KH*KW, C)
    return p.reshape(n * oh * ow, kh * kw * c), oh, ow


def conv2d_pallas(x, w, b, stride):
    # x: NHWC, w: HWIO (KH, KW, Ci, Co), b: (Co,).  VALID padding, LeakyReLU fused.
    kh, kw, ci, co = w.shape
    n = x.shape[0]
    patches, oh, ow = im2col(x, kh, kw, stride)
    w_mat = w.reshape(kh * kw * ci, co)
    y = matmul_bias_leaky(patches, w_mat, b)
    return y.reshape(n, oh, ow, co)


# ------------------------------ AgentNetwork -------------------------------- #
def prepare_params(params, c, h, w):
    """One-time: permute wl1 rows from PyTorch CHW-flatten order to HWC order
    (so the NHWC conv output flattens with no runtime transpose), zero-pad the
    reduction dim up to a multiple of F_BLOCK, and cast to bf16 -- the f32 wl1
    HBM DMA was the single dominant cost of the network."""
    wl1 = params['wl1']                                  # (C*H*W, hidden), CHW rows
    flat, hidden = wl1.shape
    assert flat == c * h * w
    wl1_nhwc = (wl1.reshape(c, h, w, hidden)
                   .transpose(1, 2, 0, 3)
                   .reshape(flat, hidden))
    f_pad = ((flat + F_BLOCK - 1) // F_BLOCK) * F_BLOCK
    wl1_bf16 = jnp.zeros((f_pad, hidden), jnp.bfloat16)
    wl1_bf16 = wl1_bf16.at[:flat].set(wl1_nhwc.astype(jnp.bfloat16))
    p = dict(params)
    del p['wl1']
    p['wl1_bf16'] = wl1_bf16
    return p


def agent_network_forward(prepared, x_nchw):
    # layout: input NCHW (PyTorch convention) -> NHWC internally (lane = channels).
    x = jnp.transpose(x_nchw, (0, 2, 3, 1))
    x = conv2d_pallas(x, prepared['w1'], prepared['b1'], stride=1)   # k=6, s=1
    x = conv2d_pallas(x, prepared['w2'], prepared['b2'], stride=2)   # k=3, s=2
    x = conv2d_pallas(x, prepared['w3'], prepared['b3'], stride=1)   # k=3, s=1
    # NHWC flatten; wl1 rows were permuted at prepare time to match CHW semantics.
    x = x.reshape(x.shape[0], -1)                                    # (B, flat)
    f_pad = prepared['wl1_bf16'].shape[0]
    x = jnp.pad(x, ((0, 0), (0, f_pad - x.shape[1]))).astype(jnp.bfloat16)
    return fused_linear(x, prepared['wl1_bf16'], prepared['bl1'],
                        prepared['wo'], prepared['bo'])


def init_params(key, in_ch, feature_maps, kernel_size, spatial, hidden, n_out):
    k2 = kernel_size // 2
    s1 = spatial - kernel_size + 1
    s2 = (s1 - k2) // 2 + 1
    s3 = s2 - k2 + 1
    assert s3 >= 1
    flat = feature_maps * s3 * s3
    keys = jax.random.split(key, 10)

    def w(k, shape, fan_in):
        return (jax.random.normal(k, shape, jnp.float32) /
                jnp.sqrt(jnp.float32(fan_in)))

    params = {
        'w1': w(keys[0], (kernel_size, kernel_size, in_ch, feature_maps),
                kernel_size * kernel_size * in_ch),
        'b1': w(keys[1], (feature_maps,), 10.0),
        'w2': w(keys[2], (k2, k2, feature_maps, feature_maps * 2),
                k2 * k2 * feature_maps),
        'b2': w(keys[3], (feature_maps * 2,), 10.0),
        'w3': w(keys[4], (k2, k2, feature_maps * 2, feature_maps),
                k2 * k2 * feature_maps * 2),
        'b3': w(keys[5], (feature_maps,), 10.0),
        'wl1': w(keys[6], (flat, hidden), flat),
        'bl1': w(keys[7], (hidden,), 10.0),
        'wo': w(keys[8], (hidden, n_out), hidden),
        'bo': w(keys[9], (n_out,), 10.0),
    }
    return params


def reference_forward(params, x_nchw):
    # Pure-JAX f32 reference with PyTorch semantics (NCHW flatten order).
    x = jnp.transpose(x_nchw, (0, 2, 3, 1))

    def conv(x, w, b, s):
        y = jax.lax.conv_general_dilated(
            x, w, (s, s), 'VALID',
            dimension_numbers=('NHWC', 'HWIO', 'NHWC')) + b
        return _leaky_relu(y)

    x = conv(x, params['w1'], params['b1'], 1)
    x = conv(x, params['w2'], params['b2'], 2)
    x = conv(x, params['w3'], params['b3'], 1)
    x = jnp.transpose(x, (0, 3, 1, 2)).reshape(x.shape[0], -1)
    x = _leaky_relu(x @ params['wl1'] + params['bl1'])
    return x @ params['wo'] + params['bo']


if __name__ == "__main__":
    # Small-but-consistent shapes: batch=2, 1 input channel, 32x32 spatial,
    # 32 feature maps, kernel 6 (module defaults except spatial size).
    batch, in_ch, spatial = 2, 1, 32
    feature_maps, kernel_size, hidden, n_out = 32, 6, 512, 4

    key = jax.random.PRNGKey(0)
    kx, kp = jax.random.split(key)
    x = jax.random.normal(kx, (batch, in_ch, spatial, spatial), jnp.float32)
    params = init_params(kp, in_ch, feature_maps, kernel_size, spatial,
                         hidden, n_out)

    # Spatial size of conv3's output (needed for the one-time wl1 permutation).
    k2 = kernel_size // 2
    s1 = spatial - kernel_size + 1
    s2 = (s1 - k2) // 2 + 1
    s3 = s2 - k2 + 1
    prepared = prepare_params(params, feature_maps, s3, s3)

    fwd = jax.jit(agent_network_forward)
    out = jax.block_until_ready(fwd(prepared, x))
    assert out.shape == (batch, n_out)

    ref = reference_forward(params, x)
    # Tolerance relaxed for the bf16 cast of wl1 / the flattened activation.
    np.testing.assert_allclose(np.asarray(out), np.asarray(ref),
                               rtol=1e-2, atol=1e-2)
    print("KERNEL_OK")
</pallas_src>

<mosaic_0001>
module attributes {stable_mosaic.version = 11 : i64} {
  func.func @_conv_mm_kernel(%arg0: memref<1458x36xf32, #tpu.memory_space<vmem>>, %arg1: memref<36x32xf32, #tpu.memory_space<vmem>>, %arg2: memref<1x32xf32, #tpu.memory_space<vmem>>, %arg3: memref<1458x32xf32, #tpu.memory_space<vmem>>) attributes {dimension_semantics = [], scalar_prefetch = 0 : i64, scratch_operands = 0 : i64, tpu.core_type = #tpu.core_type<tc>} {
    %c0 = arith.constant 0 : index
    %c0_0 = arith.constant 0 : index
    %0 = vector.load %arg0[%c0, %c0_0] : memref<1458x36xf32, #tpu.memory_space<vmem>>, vector<1458x36xf32>
    %c0_1 = arith.constant 0 : index
    %c0_2 = arith.constant 0 : index
    %1 = vector.load %arg1[%c0_1, %c0_2] : memref<36x32xf32, #tpu.memory_space<vmem>>, vector<36x32xf32>
    %cst = arith.constant dense<0.000000e+00> : vector<1458x32xf32>
    %2 = tpu.matmul %0, %1, %cst {dimension_numbers = #tpu.dot_dimension_numbers<[1], [0], [0], [1], [0, 0, 1, 1], [], []>} : vector<1458x36xf32>, vector<36x32xf32>, vector<1458x32xf32> -> vector<1458x32xf32>
    %c0_3 = arith.constant 0 : index
    %c0_4 = arith.constant 0 : index
    %3 = vector.load %arg2[%c0_3, %c0_4] : memref<1x32xf32, #tpu.memory_space<vmem>>, vector<1x32xf32>
    %4 = vector.broadcast %3 : vector<1x32xf32> to vector<1458x32xf32>
    %5 = arith.addf %2, %4 : vector<1458x32xf32>
    %cst_5 = arith.constant 0.000000e+00 : f32
    %6 = vector.broadcast %cst_5 : f32 to vector<1458x32xf32>
    %7 = arith.cmpf ogt, %5, %6 : vector<1458x32xf32>
    %cst_6 = arith.constant 0.00999999977 : f32
    %8 = vector.broadcast %cst_6 : f32 to vector<1458x32xf32>
    %9 = arith.mulf %8, %5 : vector<1458x32xf32>
    %10 = arith.select %7, %5, %9 : vector<1458x32xi1>, vector<1458x32xf32>
    %c0_7 = arith.constant 0 : index
    %c0_8 = arith.constant 0 : index
    %11 = vector.load %arg3[%c0_7, %c0_8] : memref<1458x32xf32, #tpu.memory_space<vmem>>, vector<1458x32xf32>
    tpu.vector_store %arg3[%c0_7, %c0_8], %10 {strides = array<i32>} : memref<1458x32xf32, #tpu.memory_space<vmem>>, vector<1458x32xf32>,
    return
  }
}

module attributes {stable_mosaic.version = 11 : i64} {
  func.func @_conv_mm_kernel(%arg0: memref<338x288xf32, #tpu.memory_space<vmem>>, %arg1: memref<288x64xf32, #tpu.memory_space<vmem>>, %arg2: memref<1x64xf32, #tpu.memory_space<vmem>>, %arg3: memref<338x64xf32, #tpu.memory_space<vmem>>) attributes {dimension_semantics = [], scalar_prefetch = 0 : i64, scratch_operands = 0 : i64, tpu.core_type = #tpu.core_type<tc>} {
    %c0 = arith.constant 0 : index
    %c0_0 = arith.constant 0 : index
    %0 = vector.load %arg0[%c0, %c0_0] : memref<338x288xf32, #tpu.memory_space<vmem>>, vector<338x288xf32>
    %c0_1 = arith.constant 0 : index
    %c0_2 = arith.constant 0 : index
    %1 = vector.load %arg1[%c0_1, %c0_2] : memref<288x64xf32, #tpu.memory_space<vmem>>, vector<288x64xf32>
    %cst = arith.constant dense<0.000000e+00> : vector<338x64xf32>
    %2 = tpu.matmul %0, %1, %cst {dimension_numbers = #tpu.dot_dimension_numbers<[1], [0], [0], [1], [0, 0, 1, 1], [], []>} : vector<338x288xf32>, vector<288x64xf32>, vector<338x64xf32> -> vector<338x64xf32>
    %c0_3 = arith.constant 0 : index
    %c0_4 = arith.constant 0 : index
    %3 = vector.load %arg2[%c0_3, %c0_4] : memref<1x64xf32, #tpu.memory_space<vmem>>, vector<1x64xf32>
    %4 = vector.broadcast %3 : vector<1x64xf32> to vector<338x64xf32>
    %5 = arith.addf %2, %4 : vector<338x64xf32>
    %cst_5 = arith.constant 0.000000e+00 : f32
    %6 = vector.broadcast %cst_5 : f32 to vector<338x64xf32>
    %7 = arith.cmpf ogt, %5, %6 : vector<338x64xf32>
    %cst_6 = arith.constant 0.00999999977 : f32
    %8 = vector.broadcast %cst_6 : f32 to vector<338x64xf32>
    %9 = arith.mulf %8, %5 : vector<338x64xf32>
    %10 = arith.select %7, %5, %9 : vector<338x64xi1>, vector<338x64xf32>
    %c0_7 = arith.constant 0 : index
    %c0_8 = arith.constant 0 : index
    %11 = vector.load %arg3[%c0_7, %c0_8] : memref<338x64xf32, #tpu.memory_space<vmem>>, vector<338x64xf32>
    tpu.vector_store %arg3[%c0_7, %c0_8], %10 {strides = array<i32>} : memref<338x64xf32, #tpu.memory_space<vmem>>, vector<338x64xf32>,
    return
  }
}

module attributes {stable_mosaic.version = 11 : i64} {
  func.func @_conv_mm_kernel(%arg0: memref<242x576xf32, #tpu.memory_space<vmem>>, %arg1: memref<576x32xf32, #tpu.memory_space<vmem>>, %arg2: memref<1x32xf32, #tpu.memory_space<vmem>>, %arg3: memref<242x32xf32, #tpu.memory_space<vmem>>) attributes {dimension_semantics = [], scalar_prefetch = 0 : i64, scratch_operands = 0 : i64, tpu.core_type = #tpu.core_type<tc>} {
    %c0 = arith.constant 0 : index
    %c0_0 = arith.constant 0 : index
    %0 = vector.load %arg0[%c0, %c0_0] : memref<242x576xf32, #tpu.memory_space<vmem>>, vector<242x576xf32>
    %c0_1 = arith.constant 0 : index
    %c0_2 = arith.constant 0 : index
    %1 = vector.load %arg1[%c0_1, %c0_2] : memref<576x32xf32, #tpu.memory_space<vmem>>, vector<576x32xf32>
    %cst = arith.constant dense<0.000000e+00> : vector<242x32xf32>
    %2 = tpu.matmul %0, %1, %cst {dimension_numbers = #tpu.dot_dimension_numbers<[1], [0], [0], [1], [0, 0, 1, 1], [], []>} : vector<242x576xf32>, vector<576x32xf32>, vector<242x32xf32> -> vector<242x32xf32>
    %c0_3 = arith.constant 0 : index
    %c0_4 = arith.constant 0 : index
    %3 = vector.load %arg2[%c0_3, %c0_4] : memref<1x32xf32, #tpu.memory_space<vmem>>, vector<1x32xf32>
    %4 = vector.broadcast %3 : vector<1x32xf32> to vector<242x32xf32>
    %5 = arith.addf %2, %4 : vector<242x32xf32>
    %cst_5 = arith.constant 0.000000e+00 : f32
    %6 = vector.broadcast %cst_5 : f32 to vector<242x32xf32>
    %7 = arith.cmpf ogt, %5, %6 : vector<242x32xf32>
    %cst_6 = arith.constant 0.00999999977 : f32
    %8 = vector.broadcast %cst_6 : f32 to vector<242x32xf32>
    %9 = arith.mulf %8, %5 : vector<242x32xf32>
    %10 = arith.select %7, %5, %9 : vector<242x32xi1>, vector<242x32xf32>
    %c0_7 = arith.constant 0 : index
    %c0_8 = arith.constant 0 : index
    %11 = vector.load %arg3[%c0_7, %c0_8] : memref<242x32xf32, #tpu.memory_space<vmem>>, vector<242x32xf32>
    tpu.vector_store %arg3[%c0_7, %c0_8], %10 {strides = array<i32>} : memref<242x32xf32, #tpu.memory_space<vmem>>, vector<242x32xf32>,
    return
  }
}

module attributes {stable_mosaic.version = 11 : i64} {
  func.func @_fused_linear_kernel(%arg0: i32, %arg1: memref<2x1024xbf16, #tpu.memory_space<vmem>>, %arg2: memref<1024x512xbf16, #tpu.memory_space<vmem>>, %arg3: memref<1x512xf32, #tpu.memory_space<vmem>>, %arg4: memref<512x4xf32, #tpu.memory_space<vmem>>, %arg5: memref<1x4xf32, #tpu.memory_space<vmem>>, %arg6: memref<2x4xf32, #tpu.memory_space<vmem>>, %arg7: memref<2x512xf32, #tpu.memory_space<vmem>>) attributes {dimension_semantics = [#tpu.dimension_semantics<arbitrary>], iteration_bounds = array<i64: 4>, scalar_prefetch = 0 : i64, scratch_operands = 1 : i64, tpu.core_type = #tpu.core_type<tc>, window_params = [{transform_indices = @transform_0, window_bounds = array<i64: 2, 1024>}, {transform_indices = @transform_1, window_bounds = array<i64: 1024, 512>}, {pipeline_mode = #tpu.pipeline_mode<synchronous>, transform_indices = @transform_2, window_bounds = array<i64: 1, 512>}, {pipeline_mode = #tpu.pipeline_mode<synchronous>, transform_indices = @transform_3, window_bounds = array<i64: 512, 4>}, {pipeline_mode = #tpu.pipeline_mode<synchronous>, transform_indices = @transform_4, window_bounds = array<i64: 1, 4>}, {pipeline_mode = #tpu.pipeline_mode<synchronous>, transform_indices = @transform_5, window_bounds = array<i64: 2, 4>}]} {
    %c0_i32 = arith.constant 0 : i32
    %0 = arith.cmpi eq, %arg0, %c0_i32 : i32
    %1 = arith.extui %0 : i1 to i32
    %c0_i32_0 = arith.constant 0 : i32
    %2 = arith.cmpi ne, %1, %c0_i32_0 : i32
    scf.if %2 {
      %cst_9 = arith.constant 0.000000e+00 : f32
      %12 = vector.broadcast %cst_9 : f32 to vector<2x512xf32>
      %c0_10 = arith.constant 0 : index
      %c0_11 = arith.constant 0 : index
      %13 = vector.load %arg7[%c0_10, %c0_11] : memref<2x512xf32, #tpu.memory_space<vmem>>, vector<2x512xf32>
      tpu.vector_store %arg7[%c0_10, %c0_11], %12 {strides = array<i32>} : memref<2x512xf32, #tpu.memory_space<vmem>>, vector<2x512xf32>,
    } else {
    }
    %c0 = arith.constant 0 : index
    %c0_1 = arith.constant 0 : index
    %3 = vector.load %arg7[%c0, %c0_1] : memref<2x512xf32, #tpu.memory_space<vmem>>, vector<2x512xf32>
    %c0_2 = arith.constant 0 : index
    %c0_3 = arith.constant 0 : index
    %4 = vector.load %arg1[%c0_2, %c0_3] : memref<2x1024xbf16, #tpu.memory_space<vmem>>, vector<2x1024xbf16>
    %c0_4 = arith.constant 0 : index
    %c0_5 = arith.constant 0 : index
    %5 = vector.load %arg2[%c0_4, %c0_5] : memref<1024x512xbf16, #tpu.memory_space<vmem>>, vector<1024x512xbf16>
    %cst = arith.constant dense<0.000000e+00> : vector<2x512xf32>
    %6 = tpu.matmul %4, %5, %cst {dimension_numbers = #tpu.dot_dimension_numbers<[1], [0], [0], [1], [0, 0, 1, 1], [], []>} : vector<2x1024xbf16>, vector<1024x512xbf16>, vector<2x512xf32> -> vector<2x512xf32>
    %7 = arith.addf %3, %6 : vector<2x512xf32>
    %c0_6 = arith.constant 0 : index
    %c0_7 = arith.constant 0 : index
    %8 = vector.load %arg7[%c0_6, %c0_7] : memref<2x512xf32, #tpu.memory_space<vmem>>, vector<2x512xf32>
    tpu.vector_store %arg7[%c0_6, %c0_7], %7 {strides = array<i32>} : memref<2x512xf32, #tpu.memory_space<vmem>>, vector<2x512xf32>,
    %c3_i32 = arith.constant 3 : i32
    %9 = arith.cmpi eq, %arg0, %c3_i32 : i32
    %10 = arith.extui %9 : i1 to i32
    %c0_i32_8 = arith.constant 0 : i32
    %11 = arith.cmpi ne, %10, %c0_i32_8 : i32
    scf.if %11 {
      %c0_9 = arith.constant 0 : index
      %c0_10 = arith.constant 0 : index
      %12 = vector.load %arg7[%c0_9, %c0_10] : memref<2x512xf32, #tpu.memory_space<vmem>>, vector<2x512xf32>
      %c0_11 = arith.constant 0 : index
      %c0_12 = arith.constant 0 : index
      %13 = vector.load %arg3[%c0_11, %c0_12] : memref<1x512xf32, #tpu.memory_space<vmem>>, vector<1x512xf32>
      %14 = vector.broadcast %13 : vector<1x512xf32> to vector<2x512xf32>
      %15 = arith.addf %12, %14 : vector<2x512xf32>
      %cst_13 = arith.constant 0.000000e+00 : f32
      %16 = vector.broadcast %cst_13 : f32 to vector<2x512xf32>
      %17 = arith.cmpf ogt, %15, %16 : vector<2x512xf32>
      %cst_14 = arith.constant 0.00999999977 : f32
      %18 = vector.broadcast %cst_14 : f32 to vector<2x512xf32>
      %19 = arith.mulf %18, %15 : vector<2x512xf32>
      %20 = arith.select %17, %15, %19 : vector<2x512xi1>, vector<2x512xf32>
      %c0_15 = arith.constant 0 : index
      %c0_16 = arith.constant 0 : index
      %21 = vector.load %arg4[%c0_15, %c0_16] : memref<512x4xf32, #tpu.memory_space<vmem>>, vector<512x4xf32>
      %cst_17 = arith.constant dense<0.000000e+00> : vector<2x4xf32>
      %22 = tpu.matmul %20, %21, %cst_17 {dimension_numbers = #tpu.dot_dimension_numbers<[1], [0], [0], [1], [0, 0, 1, 1], [], []>} : vector<2x512xf32>, vector<512x4xf32>, vector<2x4xf32> -> vector<2x4xf32>
      %c0_18 = arith.constant 0 : index
      %c0_19 = arith.constant 0 : index
      %23 = vector.load %arg5[%c0_18, %c0_19] : memref<1x4xf32, #tpu.memory_space<vmem>>, vector<1x4xf32>
      %24 = vector.broadcast %23 : vector<1x4xf32> to vector<2x4xf32>
      %25 = arith.addf %22, %24 : vector<2x4xf32>
      %c0_20 = arith.constant 0 : index
      %c0_21 = arith.constant 0 : index
      %26 = vector.load %arg6[%c0_20, %c0_21] : memref<2x4xf32, #tpu.memory_space<vmem>>, vector<2x4xf32>
      tpu.vector_store %arg6[%c0_20, %c0_21], %25 {strides = array<i32>} : memref<2x4xf32, #tpu.memory_space<vmem>>, vector<2x4xf32>,
    } else {
    }
    return
  }
  func.func @transform_0(%arg0: i32) -> (i32, i32) {
    %c0_i32 = arith.constant 0 : i32
    %c0_i32_0 = arith.constant 0 : i32
    return %c0_i32, %arg0 : i32, i32
  }
  func.func @transform_1(%arg0: i32) -> (i32, i32) {
    %c0_i32 = arith.constant 0 : i32
    %c0_i32_0 = arith.constant 0 : i32
    return %arg0, %c0_i32 : i32, i32
  }
  func.func @transform_2(%arg0: i32) -> (i32, i32) {
    %c0_i32 = arith.constant 0 : i32
    %c0_i32_0 = arith.constant 0 : i32
    %c0_i32_1 = arith.constant 0 : i32
    return %c0_i32, %c0_i32_0 : i32, i32
  }
  func.func @transform_3(%arg0: i32) -> (i32, i32) {
    %c0_i32 = arith.constant 0 : i32
    %c0_i32_0 = arith.constant 0 : i32
    %c0_i32_1 = arith.constant 0 : i32
    return %c0_i32, %c0_i32_0 : i32, i32
  }
  func.func @transform_4(%arg0: i32) -> (i32, i32) {
    %c0_i32 = arith.constant 0 : i32
    %c0_i32_0 = arith.constant 0 : i32
    %c0_i32_1 = arith.constant 0 : i32
    return %c0_i32, %c0_i32_0 : i32, i32
  }
  func.func @transform_5(%arg0: i32) -> (i32, i32) {
    %c0_i32 = arith.constant 0 : i32
    %c0_i32_0 = arith.constant 0 : i32
    %c0_i32_1 = arith.constant 0 : i32
    return %c0_i32, %c0_i32_0 : i32, i32
  }
}

</mosaic_0001>

<bundles_post_ra>
// kernel: agent_network_forward.4
= control target key start
LH: loop header
LB: loop body
LE: loop exit
PB: predicated region body
PF: predicated region fallthrough
CT: control target
= control target key end

     0   :  { %vm756_vm0 = vcmask 1043456   ;;  %vm206_vm1 = vcmask 293888   ;;  %vm1875_vm2 = vcmask 261120   ;;  %s3962_s1 = inlined_call_operand.vmem [shape: f32[36,32], index: 1, kind: input, shape index: {}]   ;;  %s3963_s0 = inlined_call_operand.vmem [shape: f32[1458,36], index: 0, kind: input, shape index: {}]   ;;  %s3964_s2 = inlined_call_operand.vmem [shape: f32[1,32], index: 2, kind: input, shape index: {}]   ;;  %s3965_s3 = inlined_call_operand.vmem [shape: f32[1458,32], index: 3, kind: output, shape index: {}]  }
   0x1   :  { %v201_v0 = vld [vmem:[%s3962_s1 + $0x20] sm:$0xf]  ;;  %v200_v1 = vld [vmem:[%s3962_s1 + $0x18] sm:$0xff]  ;;  %v199_v2 = vld [vmem:[%s3962_s1 + $0x10] sm:$0xff] }
   0x2   :  { %2249 = vmatpush.msk.msra.mxu2 %vm756_vm0, %v201_v0  ;;  %2064 = vmatpush.msk.msra.mxu0 %vm756_vm0, %v201_v0  ;;  %v198_v3 = vld [vmem:[%s3962_s1 + $0x8] sm:$0xff]  ;;  %v197_v4 = vld [vmem:[%s3962_s1] sm:$0xff]  ;;  %v60_v7 = vld [vmem:[%s3963_s0 + $0x170] sm:$0xff] }
   0x3   :  { %2248 = vmatpush.msk.msra.mxu1 %vm756_vm0, %v201_v0  ;;  %2250 = vmatpush.msk.msra.mxu3 %vm756_vm0, %v201_v0  ;;  %v106_v5 = vld [vmem:[%s3963_s0 + $0x2e0] sm:$0xff]  ;;  %v152_v8 = vld [vmem:[%s3963_s0 + $0x450] sm:$0xff]  ;;  %v107_v9 = vld [vmem:[%s3963_s0 + $0x2e8] sm:$0xff] }
   0x4   :  { %2252 = vmatpush.msra.mxu2 %v200_v1  ;;  %772 = vmatpush.msra.mxu0 %v200_v1  ;;  %v14_v6 = vld [vmem:[%s3963_s0] sm:$0xff]  ;;  %v15_v10 = vld [vmem:[%s3963_s0 + $0x8] sm:$0xff]  ;;  %v61_v11 = vld [vmem:[%s3963_s0 + $0x178] sm:$0xff] }
   0x5   :  { %2251 = vmatpush.msra.mxu1 %v200_v1  ;;  %2253 = vmatpush.msra.mxu3 %v200_v1  ;;  %v153_v12 = vld [vmem:[%s3963_s0 + $0x458] sm:$0xff]  ;;  %v108_v13 = vld [vmem:[%s3963_s0 + $0x2f0] sm:$0xff]  ;;  %v62_v15 = vld [vmem:[%s3963_s0 + $0x180] sm:$0xff] }
   0x6   :  { %2255 = vmatpush.msra.mxu2 %v199_v2  ;;  %773 = vmatpush.msra.mxu0 %v199_v2  ;;  %v16_v14 = vld [vmem:[%s3963_s0 + $0x10] sm:$0xff]  ;;  %v154_v16 = vld [vmem:[%s3963_s0 + $0x460] sm:$0xff]  ;;  %v109_v17 = vld [vmem:[%s3963_s0 + $0x2f8] sm:$0xff] }
   0x7   :  { %2254 = vmatpush.msra.mxu1 %v199_v2  ;;  %2256 = vmatpush.msra.mxu3 %v199_v2  ;;  %v17_v18 = vld [vmem:[%s3963_s0 + $0x18] sm:$0xff]  ;;  %v63_v19 = vld [vmem:[%s3963_s0 + $0x188] sm:$0xff]  ;;  %v110_v21 = vld [vmem:[%s3963_s0 + $0x300] sm:$0xff] }
   0x8   :  { %2258 = vmatpush.msra.mxu2 %v198_v3  ;;  %774 = vmatpush.msra.mxu0 %v198_v3  ;;  %v155_v20 = vld [vmem:[%s3963_s0 + $0x468] sm:$0xff]  ;;  %v18_v22 = vld [vmem:[%s3963_s0 + $0x20] sm:$0xff]  ;;  %v64_v23 = vld [vmem:[%s3963_s0 + $0x190] sm:$0xff] }
   0x9   :  { %2257 = vmatpush.msra.mxu1 %v198_v3  ;;  %2259 = vmatpush.msra.mxu3 %v198_v3  ;;  %v156_v24 = vld [vmem:[%s3963_s0 + $0x470] sm:$0xff]  ;;  %v111_v25 = vld [vmem:[%s3963_s0 + $0x308] sm:$0xff]  ;;  %v65_v27 = vld [vmem:[%s3963_s0 + $0x198] sm:$0xff] }
   0xa   :  { %2261 = vmatpush.msra.mxu2 %v197_v4  ;;  %775 = vmatpush.msra.mxu0 %v197_v4  ;;  %v19_v26 = vld [vmem:[%s3963_s0 + $0x28] sm:$0xff]  ;;  %v157_v28 = vld [vmem:[%s3963_s0 + $0x478] sm:$0xff]  ;;  %v112_v29 = vld [vmem:[%s3963_s0 + $0x310] sm:$0xff] }
   0xb   :  { %2157 = vmatmul.msk.f32.vlgmr.msra.gmra.mxu2 %vm206_vm1, %v106_v5  ;;  %2260 = vmatpush.msra.mxu1 %v197_v4  ;;  %v20_v30 = vld [vmem:[%s3963_s0 + $0x30] sm:$0xff]  ;;  %v66_v31 = vld [vmem:[%s3963_s0 + $0x1a0] sm:$0xff]  ;;  %v113_v33 = vld [vmem:[%s3963_s0 + $0x318] sm:$0xff] }
   0xc   :  { %2065 = vmatmul.msk.f32.vlgmr.msra.gmra.mxu0 %vm206_vm1, %v14_v6  ;;  %2111 = vmatmul.msk.f32.vlgmr.msra.gmra.mxu1 %vm206_vm1, %v60_v7  ;;  %v158_v32 = vld [vmem:[%s3963_s0 + $0x480] sm:$0xff]  ;;  %v21_v34 = vld [vmem:[%s3963_s0 + $0x38] sm:$0xff]  ;;  %v67_v35 = vld [vmem:[%s3963_s0 + $0x1a8] sm:$0xff] }
   0xd   :  { %2262 = vmatpush.msra.mxu3 %v197_v4  ;;  %v159_v36 = vld [vmem:[%s3963_s0 + $0x488] sm:$0xff]  ;;  %v114_v37 = vld [vmem:[%s3963_s0 + $0x320] sm:$0xff]  ;;  %v68_v39 = vld [vmem:[%s3963_s0 + $0x1b0] sm:$0xff] }
   0xe   :  { %2203 = vmatmul.msk.f32.vlgmr.msra.gmra.mxu3 %vm206_vm1, %v152_v8  ;;  %v22_v38 = vld [vmem:[%s3963_s0 + $0x40] sm:$0xff]  ;;  %v160_v40 = vld [vmem:[%s3963_s0 + $0x490] sm:$0xff]  ;;  %v115_v41 = vld [vmem:[%s3963_s0 + $0x328] sm:$0xff] }
   0xf   :  { %v23_v42 = vld [vmem:[%s3963_s0 + $0x48] sm:$0xff]  ;;  %v69_v43 = vld [vmem:[%s3963_s0 + $0x1b8] sm:$0xff]  ;;  %v116_v45 = vld [vmem:[%s3963_s0 + $0x330] sm:$0xff] }
  0x10   :  { %v161_v44 = vld [vmem:[%s3963_s0 + $0x498] sm:$0xff]  ;;  %v24_v46 = vld [vmem:[%s3963_s0 + $0x50] sm:$0xff]  ;;  %v70_v47 = vld [vmem:[%s3963_s0 + $0x1c0] sm:$0xff] }
  0x11   :  { %v162_v48 = vld [vmem:[%s3963_s0 + $0x4a0] sm:$0xff]  ;;  %v117_v49 = vld [vmem:[%s3963_s0 + $0x338] sm:$0xff]  ;;  %v71_v51 = vld [vmem:[%s3963_s0 + $0x1c8] sm:$0xff] }
  0x12   :  { %v25_v50 = vld [vmem:[%s3963_s0 + $0x58] sm:$0xff]  ;;  %v163_v52 = vld [vmem:[%s3963_s0 + $0x4a8] sm:$0xff]  ;;  %v118_v53 = vld [vmem:[%s3963_s0 + $0x340] sm:$0xff] }
  0x13   :  { %2158 = vmatmul.msk.f32.gmra.mxu2 %vm206_vm1, %v107_v9  ;;  %v26_v54 = vld [vmem:[%s3963_s0 + $0x60] sm:$0xff]  ;;  %v72_v55 = vld [vmem:[%s3963_s0 + $0x1d0] sm:$0xff]  ;;  %v119_v57 = vld [vmem:[%s3963_s0 + $0x348] sm:$0xff] }
  0x14   :  { %2066 = vmatmul.msk.f32.gmra.mxu0 %vm206_vm1, %v15_v10  ;;  %2112 = vmatmul.msk.f32.gmra.mxu1 %vm206_vm1, %v61_v11  ;;  %v164_v56 = vld [vmem:[%s3963_s0 + $0x4b0] sm:$0xff]  ;;  %v27_v58 = vld [vmem:[%s3963_s0 + $0x68] sm:$0xff]  ;;  %v73_v59 = vld [vmem:[%s3963_s0 + $0x1d8] sm:$0xff] }
  0x15   :  { %v165_v60 = vld [vmem:[%s3963_s0 + $0x4b8] sm:$0xff]  ;;  %v120_v61 = vld [vmem:[%s3963_s0 + $0x350] sm:$0xff]  ;;  %v74_v63 = vld [vmem:[%s3963_s0 + $0x1e0] sm:$0xff] }
  0x16   :  { %2204 = vmatmul.msk.f32.gmra.mxu3 %vm206_vm1, %v153_v12  ;;  %v28_v62 = vld [vmem:[%s3963_s0 + $0x70] sm:$0xff]  ;;  %v166_v0 = vld [vmem:[%s3963_s0 + $0x4c0] sm:$0xff]  ;;  %v121_v1 = vld [vmem:[%s3963_s0 + $0x358] sm:$0xff] }
  0x17   :  { %v29_v2 = vld [vmem:[%s3963_s0 + $0x78] sm:$0xff]  ;;  %v75_v3 = vld [vmem:[%s3963_s0 + $0x1e8] sm:$0xff]  ;;  %v2560_v5 = vld [vmem:[%s3964_s2] ss:$0 sm:$0xff] }
  0x18   :  { %v167_v4 = vld [vmem:[%s3963_s0 + $0x4c8] sm:$0xff]  ;;  %v122_v6 = vld [vmem:[%s3963_s0 + $0x360] sm:$0xff]  ;;  %v76_v10 = vld [vmem:[%s3963_s0 + $0x1f0] sm:$0xff] }
  0x19   :  { %v30_v9 = vld [vmem:[%s3963_s0 + $0x80] sm:$0xff] }
  0x1b   :  { %2159 = vmatmul.msk.f32.gmra.mxu2 %vm206_vm1, %v108_v13  ;;  %v168_v13 = vld [vmem:[%s3963_s0 + $0x4d0] sm:$0xff] }
  0x1c   :  { %2067 = vmatmul.msk.f32.gmra.mxu0 %vm206_vm1, %v16_v14  ;;  %2113 = vmatmul.msk.f32.gmra.mxu1 %vm206_vm1, %v62_v15 }
  0x1e   :  { %2205 = vmatmul.msk.f32.gmra.mxu3 %vm206_vm1, %v154_v16 }
  0x23   :  { %2160 = vmatmul.msk.f32.gmra.mxu2 %vm206_vm1, %v109_v17 }
  0x24   :  { %2068 = vmatmul.msk.f32.gmra.mxu0 %vm206_vm1, %v17_v18  ;;  %2114 = vmatmul.msk.f32.gmra.mxu1 %vm206_vm1, %v63_v19 }
  0x26   :  { %2206 = vmatmul.msk.f32.gmra.mxu3 %vm206_vm1, %v155_v20  ;;  %v123_v20 = vld [vmem:[%s3963_s0 + $0x368] sm:$0xff] }
  0x2b   :  { %2161 = vmatmul.msk.f32.gmra.mxu2 %vm206_vm1, %v110_v21 }
  0x2c   :  { %2069 = vmatmul.msk.f32.gmra.mxu0 %vm206_vm1, %v18_v22  ;;  %2115 = vmatmul.msk.f32.gmra.mxu1 %vm206_vm1, %v64_v23 }
  0x2e   :  { %2207 = vmatmul.msk.f32.gmra.mxu3 %vm206_vm1, %v156_v24  ;;  %v31_v24 = vld [vmem:[%s3963_s0 + $0x88] sm:$0xff] }
  0x33   :  { %2162 = vmatmul.msk.f32.gmra.mxu2 %vm206_vm1, %v111_v25  ;;  %v77_v25 = vld [vmem:[%s3963_s0 + $0x1f8] sm:$0xff] }
  0x34   :  { %2070 = vmatmul.msk.f32.gmra.mxu0 %vm206_vm1, %v19_v26  ;;  %2116 = vmatmul.msk.f32.gmra.mxu1 %vm206_vm1, %v65_v27 }
  0x36   :  { %2208 = vmatmul.msk.f32.gmra.mxu3 %vm206_vm1, %v157_v28 }
  0x3b   :  { %2163 = vmatmul.msk.f32.gmra.mxu2 %vm206_vm1, %v112_v29 }
  0x3c   :  { %2071 = vmatmul.msk.f32.gmra.mxu0 %vm206_vm1, %v20_v30  ;;  %2117 = vmatmul.msk.f32.gmra.mxu1 %vm206_vm1, %v66_v31  ;;  %v169_v31 = vld [vmem:[%s3963_s0 + $0x4d8] sm:$0xff] }
  0x3e   :  { %2209 = vmatmul.msk.f32.gmra.mxu3 %vm206_vm1, %v158_v32 }
  0x43   :  { %2164 = vmatmul.msk.f32.gmra.mxu2 %vm206_vm1, %v113_v33 }
  0x44   :  { %2072 = vmatmul.msk.f32.gmra.mxu0 %vm206_vm1, %v21_v34  ;;  %2118 = vmatmul.msk.f32.gmra.mxu1 %vm206_vm1, %v67_v35 }
  0x46   :  { %2210 = vmatmul.msk.f32.gmra.mxu3 %vm206_vm1, %v159_v36 }
  0x4b   :  { %2165 = vmatmul.msk.f32.gmra.mxu2 %vm206_vm1, %v114_v37 }
  0x4c   :  { %2073 = vmatmul.msk.f32.gmra.mxu0 %vm206_vm1, %v22_v38  ;;  %2119 = vmatmul.msk.f32.gmra.mxu1 %vm206_vm1, %v68_v39 }
  0x4e   :  { %2211 = vmatmul.msk.f32.gmra.mxu3 %vm206_vm1, %v160_v40  ;;  %v124_v40 = vld [vmem:[%s3963_s0 + $0x370] sm:$0xff] }
  0x53   :  { %2166 = vmatmul.msk.f32.gmra.mxu2 %vm206_vm1, %v115_v41 }
  0x54   :  { %2074 = vmatmul.msk.f32.gmra.mxu0 %vm206_vm1, %v23_v42  ;;  %2120 = vmatmul.msk.f32.gmra.mxu1 %vm206_vm1, %v69_v43 }
  0x56   :  { %2212 = vmatmul.msk.f32.gmra.mxu3 %vm206_vm1, %v161_v44  ;;  %v32_v44 = vld [vmem:[%s3963_s0 + $0x90] sm:$0xff] }
  0x5b   :  { %2167 = vmatmul.msk.f32.gmra.mxu2 %vm206_vm1, %v116_v45  ;;  %v78_v45 = vld [vmem:[%s3963_s0 + $0x200] sm:$0xff] }
  0x5c   :  { %2075 = vmatmul.msk.f32.gmra.mxu0 %vm206_vm1, %v24_v46  ;;  %2121 = vmatmul.msk.f32.gmra.mxu1 %vm206_vm1, %v70_v47 }
  0x5e   :  { %2213 = vmatmul.msk.f32.gmra.mxu3 %vm206_vm1, %v162_v48 }
  0x63   :  { %2168 = vmatmul.msk.f32.gmra.mxu2 %vm206_vm1, %v117_v49 }
  0x64   :  { %2076 = vmatmul.msk.f32.gmra.mxu0 %vm206_vm1, %v25_v50  ;;  %2122 = vmatmul.msk.f32.gmra.mxu1 %vm206_vm1, %v71_v51  ;;  %v170_v51 = vld [vmem:[%s3963_s0 + $0x4e0] sm:$0xff] }
  0x66   :  { %2214 = vmatmul.msk.f32.gmra.mxu3 %vm206_vm1, %v163_v52 }
  0x6b   :  { %2169 = vmatmul.msk.f32.gmra.mxu2 %vm206_vm1, %v118_v53 }
  0x6c   :  { %2077 = vmatmul.msk.f32.gmra.mxu0 %vm206_vm1, %v26_v54  ;;  %2123 = vmatmul.msk.f32.gmra.mxu1 %vm206_vm1, %v72_v55 }
  0x6e   :  { %2215 = vmatmul.msk.f32.gmra.mxu3 %vm206_vm1, %v164_v56 }
  0x73   :  { %2170 = vmatmul.msk.f32.gmra.mxu2 %vm206_vm1, %v119_v57 }
  0x74   :  { %2078 = vmatmul.msk.f32.gmra.mxu0 %vm206_vm1, %v27_v58  ;;  %2124 = vmatmul.msk.f32.gmra.mxu1 %vm206_vm1, %v73_v59 }
  0x76   :  { %2216 = vmatmul.msk.f32.gmra.mxu3 %vm206_vm1, %v165_v60  ;;  %v125_v60 = vld [vmem:[%s3963_s0 + $0x378] sm:$0xff] }
  0x7b   :  { %2171 = vmatmul.msk.f32.gmra.mxu2 %vm206_vm1, %v120_v61 }
  0x7c   :  { %2079 = vmatmul.msk.f32.gmra.mxu0 %vm206_vm1, %v28_v62  ;;  %2125 = vmatmul.msk.f32.gmra.mxu1 %vm206_vm1, %v74_v63 }
  0x7e   :  { %2217 = vmatmul.msk.f32.gmra.mxu3 %vm206_vm1, %v166_v0  ;;  %v33_v0 = vld [vmem:[%s3963_s0 + $0x98] sm:$0xff] }
  0x83   :  { %2172 = vmatmul.msk.f32.gmra.mxu2 %vm206_vm1, %v121_v1  ;;  %v79_v1 = vld [vmem:[%s3963_s0 + $0x208] sm:$0xff] }
  0x84   :  { %2080 = vmatmul.msk.f32.gmra.mxu0 %vm206_vm1, %v29_v2  ;;  %2126 = vmatmul.msk.f32.gmra.mxu1 %vm206_vm1, %v75_v3 }
  0x86   :  { %2218 = vmatmul.msk.f32.gmra.mxu3 %vm206_vm1, %v167_v4 }
  0x89   :  { %v777_v7 = vpop.f32.mrf.mxu0  ;;  %v915_v8 = vpop.f32.mrf.mxu1 }
  0x8a   :  { %v778_v11 = vadd.f32 %v2560_v5, %v777_v7  ;;  %v916_v12 = vadd.f32 %v2560_v5, %v915_v8  ;;  %v171_v8 = vld [vmem:[%s3963_s0 + $0x4e8] sm:$0xff] }
  0x8b   :  { %2173 = vmatmul.msk.f32.gmra.mxu2 %vm206_vm1, %v122_v6 }
  0x8c   :  { %vm1326_vm3 = vcmp.gt.f32.partialorder %v778_v11, 0.0  ;;  %v1509_v14 = vmul.f32 0.01, %v778_v11  ;;  %vm1372_vm4 = vcmp.gt.f32.partialorder %v916_v12, 0.0  ;;  %v1555_v15 = vmul.f32 0.01, %v916_v12  ;;  %2081 = vmatmul.msk.f32.gmra.mxu0 %vm206_vm1, %v30_v9  ;;  %2127 = vmatmul.msk.f32.gmra.mxu1 %vm206_vm1, %v76_v10 }
  0x8e   :  { %v1692_v16 = vsel %vm1326_vm3, %v778_v11, %v1509_v14  ;;  %v1738_v17 = vsel %vm1372_vm4, %v916_v12, %v1555_v15  ;;  %v1053_v18 = vpop.f32.mrf.mxu2  ;;  %2219 = vmatmul.msk.f32.gmra.mxu3 %vm206_vm1, %v168_v13 }
  0x8f   :  { %1876 = vst.msk [vmem:[%s3965_s3] sm:$0xff] %vm1875_vm2, %v1692_v16  ;;  %v1054_v19 = vadd.f32 %v2560_v5, %v1053_v18 }
  0x90   :  { %1922 = vst.msk [vmem:[%s3965_s3 + $0x170] sm:$0xff] %vm1875_vm2, %v1738_v17  ;;  %v126_v17 = vld [vmem:[%s3963_s0 + $0x380] sm:$0xff] }
  0x91   :  { %vm1418_vm5 = vcmp.gt.f32.partialorder %v1054_v19, 0.0  ;;  %v1601_v21 = vmul.f32 0.01, %v1054_v19  ;;  %v780_v22 = vpop.f32.mrf.mxu0  ;;  %v918_v23 = vpop.f32.mrf.mxu1 }
  0x92   :  { %v781_v26 = vadd.f32 %v2560_v5, %v780_v22  ;;  %v919_v27 = vadd.f32 %v2560_v5, %v918_v23  ;;  %v1191_v28 = vpop.f32.mrf.mxu3  ;;  %v80_v22 = vld [vmem:[%s3963_s0 + $0x210] sm:$0xff] }
  0x93   :  { %v1784_v29 = vsel %vm1418_vm5, %v1054_v19, %v1601_v21  ;;  %2174 = vmatmul.msk.f32.gmra.mxu2 %vm206_vm1, %v123_v20  ;;  %v1192_v30 = vadd.f32 %v2560_v5, %v1191_v28  ;;  %v34_v21 = vld [vmem:[%s3963_s0 + $0xa0] sm:$0xff]  ;;  %v172_v28 = vld [vmem:[%s3963_s0 + $0x4f0] sm:$0xff] }
  0x94   :  { %1968 = vst.msk [vmem:[%s3965_s3 + $0x2e0] sm:$0xff] %vm1875_vm2, %v1784_v29  ;;  %vm1327_vm6 = vcmp.gt.f32.partialorder %v781_v26, 0.0  ;;  %v1510_v32 = vmul.f32 0.01, %v781_v26  ;;  %vm1373_vm7 = vcmp.gt.f32.partialorder %v919_v27, 0.0  ;;  %2082 = vmatmul.msk.f32.gmra.mxu0 %vm206_vm1, %v31_v24  ;;  %2128 = vmatmul.msk.f32.gmra.mxu1 %vm206_vm1, %v77_v25 }
  0x95   :  { %v1556_v33 = vmul.f32 0.01, %v919_v27  ;;  %vm1464_vm8 = vcmp.gt.f32.partialorder %v1192_v30, 0.0  ;;  %v1647_v34 = vmul.f32 0.01, %v1192_v30 }
  0x96   :  { %v1693_v35 = vsel %vm1327_vm6, %v781_v26, %v1510_v32  ;;  %v1056_v36 = vpop.f32.mrf.mxu2  ;;  %2220 = vmatmul.msk.f32.gmra.mxu3 %vm206_vm1, %v169_v31 }
  0x97   :  { %1877 = vst.msk [vmem:[%s3965_s3 + $0x8] sm:$0xff] %vm1875_vm2, %v1693_v35  ;;  %v1739_v37 = vsel %vm1373_vm7, %v919_v27, %v1556_v33  ;;  %v1830_v38 = vsel %vm1464_vm8, %v1192_v30, %v1647_v34  ;;  %v1057_v39 = vadd.f32 %v2560_v5, %v1056_v36 }
  0x98   :  { %1923 = vst.msk [vmem:[%s3965_s3 + $0x178] sm:$0xff] %vm1875_vm2, %v1739_v37  ;;  %v127_v37 = vld [vmem:[%s3963_s0 + $0x388] sm:$0xff] }
  0x99   :  { %2014 = vst.msk [vmem:[%s3965_s3 + $0x450] sm:$0xff] %vm1875_vm2, %v1830_v38  ;;  %vm1419_vm9 = vcmp.gt.f32.partialorder %v1057_v39, 0.0  ;;  %v1602_v41 = vmul.f32 0.01, %v1057_v39  ;;  %v783_v42 = vpop.f32.mrf.mxu0  ;;  %v921_v43 = vpop.f32.mrf.mxu1 }
  0x9a   :  { %v784_v46 = vadd.f32 %v2560_v5, %v783_v42  ;;  %v922_v47 = vadd.f32 %v2560_v5, %v921_v43  ;;  %v1194_v48 = vpop.f32.mrf.mxu3  ;;  %v81_v42 = vld [vmem:[%s3963_s0 + $0x218] sm:$0xff] }
  0x9b   :  { %v1785_v49 = vsel %vm1419_vm9, %v1057_v39, %v1602_v41  ;;  %2175 = vmatmul.msk.f32.gmra.mxu2 %vm206_vm1, %v124_v40  ;;  %v1195_v50 = vadd.f32 %v2560_v5, %v1194_v48  ;;  %v35_v41 = vld [vmem:[%s3963_s0 + $0xa8] sm:$0xff]  ;;  %v173_v48 = vld [vmem:[%s3963_s0 + $0x4f8] sm:$0xff] }
  0x9c   :  { %1969 = vst.msk [vmem:[%s3965_s3 + $0x2e8] sm:$0xff] %vm1875_vm2, %v1785_v49  ;;  %vm1328_vm10 = vcmp.gt.f32.partialorder %v784_v46, 0.0  ;;  %v1511_v52 = vmul.f32 0.01, %v784_v46  ;;  %vm1374_vm11 = vcmp.gt.f32.partialorder %v922_v47, 0.0  ;;  %2083 = vmatmul.msk.f32.gmra.mxu0 %vm206_vm1, %v32_v44  ;;  %2129 = vmatmul.msk.f32.gmra.mxu1 %vm206_vm1, %v78_v45 }
  0x9d   :  { %v1557_v53 = vmul.f32 0.01, %v922_v47  ;;  %vm1465_vm12 = vcmp.gt.f32.partialorder %v1195_v50, 0.0  ;;  %v1648_v54 = vmul.f32 0.01, %v1195_v50 }
  0x9e   :  { %v1694_v55 = vsel %vm1328_vm10, %v784_v46, %v1511_v52  ;;  %v1059_v56 = vpop.f32.mrf.mxu2  ;;  %2221 = vmatmul.msk.f32.gmra.mxu3 %vm206_vm1, %v170_v51 }
  0x9f   :  { %1878 = vst.msk [vmem:[%s3965_s3 + $0x10] sm:$0xff] %vm1875_vm2, %v1694_v55  ;;  %v1740_v57 = vsel %vm1374_vm11, %v922_v47, %v1557_v53  ;;  %v1831_v58 = vsel %vm1465_vm12, %v1195_v50, %v1648_v54  ;;  %v1060_v59 = vadd.f32 %v2560_v5, %v1059_v56 }
  0xa0   :  { %1924 = vst.msk [vmem:[%s3965_s3 + $0x180] sm:$0xff] %vm1875_vm2, %v1740_v57  ;;  %v128_v57 = vld [vmem:[%s3963_s0 + $0x390] sm:$0xff] }
  0xa1   :  { %2015 = vst.msk [vmem:[%s3965_s3 + $0x458] sm:$0xff] %vm1875_vm2, %v1831_v58  ;;  %vm1420_vm13 = vcmp.gt.f32.partialorder %v1060_v59, 0.0  ;;  %v1603_v61 = vmul.f32 0.01, %v1060_v59  ;;  %v786_v62 = vpop.f32.mrf.mxu0  ;;  %v924_v63 = vpop.f32.mrf.mxu1 }
  0xa2   :  { %v787_v2 = vadd.f32 %v2560_v5, %v786_v62  ;;  %v925_v3 = vadd.f32 %v2560_v5, %v924_v63  ;;  %v1197_v4 = vpop.f32.mrf.mxu3  ;;  %v82_v62 = vld [vmem:[%s3963_s0 + $0x220] sm:$0xff] }
  0xa3   :  { %v1786_v6 = vsel %vm1420_vm13, %v1060_v59, %v1603_v61  ;;  %2176 = vmatmul.msk.f32.gmra.mxu2 %vm206_vm1, %v125_v60  ;;  %v1198_v7 = vadd.f32 %v2560_v5, %v1197_v4  ;;  %v36_v61 = vld [vmem:[%s3963_s0 + $0xb0] sm:$0xff]  ;;  %v174_v4 = vld [vmem:[%s3963_s0 + $0x500] sm:$0xff] }
  0xa4   :  { %1970 = vst.msk [vmem:[%s3965_s3 + $0x2f0] sm:$0xff] %vm1875_vm2, %v1786_v6  ;;  %vm1329_vm14 = vcmp.gt.f32.partialorder %v787_v2, 0.0  ;;  %v1512_v9 = vmul.f32 0.01, %v787_v2  ;;  %vm1375_vm15 = vcmp.gt.f32.partialorder %v925_v3, 0.0  ;;  %2084 = vmatmul.msk.f32.gmra.mxu0 %vm206_vm1, %v33_v0  ;;  %2130 = vmatmul.msk.f32.gmra.mxu1 %vm206_vm1, %v79_v1 }
  0xa5   :  { %v1558_v10 = vmul.f32 0.01, %v925_v3  ;;  %vm1466_vm0 = vcmp.gt.f32.partialorder %v1198_v7, 0.0  ;;  %v1649_v11 = vmul.f32 0.01, %v1198_v7 }
  0xa6   :  { %v1695_v12 = vsel %vm1329_vm14, %v787_v2, %v1512_v9  ;;  %v1062_v13 = vpop.f32.mrf.mxu2  ;;  %2222 = vmatmul.msk.f32.gmra.mxu3 %vm206_vm1, %v171_v8 }
  0xa7   :  { %1879 = vst.msk [vmem:[%s3965_s3 + $0x18] sm:$0xff] %vm1875_vm2, %v1695_v12  ;;  %v1741_v14 = vsel %vm1375_vm15, %v925_v3, %v1558_v10  ;;  %v1832_v15 = vsel %vm1466_vm0, %v1198_v7, %v1649_v11  ;;  %v1063_v16 = vadd.f32 %v2560_v5, %v1062_v13 }
  0xa8   :  { %1925 = vst.msk [vmem:[%s3965_s3 + $0x188] sm:$0xff] %vm1875_vm2, %v1741_v14  ;;  %v129_v14 = vld [vmem:[%s3963_s0 + $0x398] sm:$0xff] }
  0xa9   :  { %2016 = vst.msk [vmem:[%s3965_s3 + $0x460] sm:$0xff] %vm1875_vm2, %v1832_v15  ;;  %vm1421_vm3 = vcmp.gt.f32.partialorder %v1063_v16, 0.0  ;;  %v1604_v18 = vmul.f32 0.01, %v1063_v16  ;;  %v789_v19 = vpop.f32.mrf.mxu0  ;;  %v927_v20 = vpop.f32.mrf.mxu1 }
  0xaa   :  { %v790_v23 = vadd.f32 %v2560_v5, %v789_v19  ;;  %v928_v24 = vadd.f32 %v2560_v5, %v927_v20  ;;  %v1200_v25 = vpop.f32.mrf.mxu3  ;;  %v83_v19 = vld [vmem:[%s3963_s0 + $0x228] sm:$0xff] }
  0xab   :  { %v1787_v26 = vsel %vm1421_vm3, %v1063_v16, %v1604_v18  ;;  %2177 = vmatmul.msk.f32.gmra.mxu2 %vm206_vm1, %v126_v17  ;;  %v1201_v27 = vadd.f32 %v2560_v5, %v1200_v25  ;;  %v37_v18 = vld [vmem:[%s3963_s0 + $0xb8] sm:$0xff]  ;;  %v175_v25 = vld [vmem:[%s3963_s0 + $0x508] sm:$0xff] }
  0xac   :  { %1971 = vst.msk [vmem:[%s3965_s3 + $0x2f8] sm:$0xff] %vm1875_vm2, %v1787_v26  ;;  %vm1330_vm4 = vcmp.gt.f32.partialorder %v790_v23, 0.0  ;;  %v1513_v29 = vmul.f32 0.01, %v790_v23  ;;  %vm1376_vm5 = vcmp.gt.f32.partialorder %v928_v24, 0.0  ;;  %2085 = vmatmul.msk.f32.gmra.mxu0 %vm206_vm1, %v34_v21  ;;  %2131 = vmatmul.msk.f32.gmra.mxu1 %vm206_vm1, %v80_v22 }
  0xad   :  { %v1559_v30 = vmul.f32 0.01, %v928_v24  ;;  %vm1467_vm6 = vcmp.gt.f32.partialorder %v1201_v27, 0.0  ;;  %v1650_v31 = vmul.f32 0.01, %v1201_v27 }
  0xae   :  { %v1696_v32 = vsel %vm1330_vm4, %v790_v23, %v1513_v29  ;;  %v1065_v33 = vpop.f32.mrf.mxu2  ;;  %2223 = vmatmul.msk.f32.gmra.mxu3 %vm206_vm1, %v172_v28 }
  0xaf   :  { %1880 = vst.msk [vmem:[%s3965_s3 + $0x20] sm:$0xff] %vm1875_vm2, %v1696_v32  ;;  %v1742_v34 = vsel %vm1376_vm5, %v928_v24, %v1559_v30  ;;  %v1833_v35 = vsel %vm1467_vm6, %v1201_v27, %v1650_v31  ;;  %v1066_v36 = vadd.f32 %v2560_v5, %v1065_v33 }
  0xb0   :  { %1926 = vst.msk [vmem:[%s3965_s3 + $0x190] sm:$0xff] %vm1875_vm2, %v1742_v34  ;;  %v130_v34 = vld [vmem:[%s3963_s0 + $0x3a0] sm:$0xff] }
  0xb1   :  { %2017 = vst.msk [vmem:[%s3965_s3 + $0x468] sm:$0xff] %vm1875_vm2, %v1833_v35  ;;  %vm1422_vm7 = vcmp.gt.f32.partialorder %v1066_v36, 0.0  ;;  %v1605_v38 = vmul.f32 0.01, %v1066_v36  ;;  %v792_v39 = vpop.f32.mrf.mxu0  ;;  %v930_v40 = vpop.f32.mrf.mxu1 }
  0xb2   :  { %v793_v43 = vadd.f32 %v2560_v5, %v792_v39  ;;  %v931_v44 = vadd.f32 %v2560_v5, %v930_v40  ;;  %v1203_v45 = vpop.f32.mrf.mxu3  ;;  %v84_v39 = vld [vmem:[%s3963_s0 + $0x230] sm:$0xff] }
  0xb3   :  { %v1788_v46 = vsel %vm1422_vm7, %v1066_v36, %v1605_v38  ;;  %2178 = vmatmul.msk.f32.gmra.mxu2 %vm206_vm1, %v127_v37  ;;  %v1204_v47 = vadd.f32 %v2560_v5, %v1203_v45  ;;  %v38_v38 = vld [vmem:[%s3963_s0 + $0xc0] sm:$0xff]  ;;  %v176_v45 = vld [vmem:[%s3963_s0 + $0x510] sm:$0xff] }
  0xb4   :  { %1972 = vst.msk [vmem:[%s3965_s3 + $0x300] sm:$0xff] %vm1875_vm2, %v1788_v46  ;;  %vm1331_vm8 = vcmp.gt.f32.partialorder %v793_v43, 0.0  ;;  %v1514_v49 = vmul.f32 0.01, %v793_v43  ;;  %vm1377_vm9 = vcmp.gt.f32.partialorder %v931_v44, 0.0  ;;  %2086 = vmatmul.msk.f32.gmra.mxu0 %vm206_vm1, %v35_v41  ;;  %2132 = vmatmul.msk.f32.gmra.mxu1 %vm206_vm1, %v81_v42 }
  0xb5   :  { %v1560_v50 = vmul.f32 0.01, %v931_v44  ;;  %vm1468_vm10 = vcmp.gt.f32.partialorder %v1204_v47, 0.0  ;;  %v1651_v51 = vmul.f32 0.01, %v1204_v47 }
  0xb6   :  { %v1697_v52 = vsel %vm1331_vm8, %v793_v43, %v1514_v49  ;;  %v1068_v53 = vpop.f32.mrf.mxu2  ;;  %2224 = vmatmul.msk.f32.gmra.mxu3 %vm206_vm1, %v173_v48 }
  0xb7   :  { %1881 = vst.msk [vmem:[%s3965_s3 + $0x28] sm:$0xff] %vm1875_vm2, %v1697_v52  ;;  %v1743_v54 = vsel %vm1377_vm9, %v931_v44, %v1560_v50  ;;  %v1834_v55 = vsel %vm1468_vm10, %v1204_v47, %v1651_v51  ;;  %v1069_v56 = vadd.f32 %v2560_v5, %v1068_v53 }
  0xb8   :  { %1927 = vst.msk [vmem:[%s3965_s3 + $0x198] sm:$0xff] %vm1875_vm2, %v1743_v54  ;;  %v131_v54 = vld [vmem:[%s3963_s0 + $0x3a8] sm:$0xff] }
  0xb9   :  { %2018 = vst.msk [vmem:[%s3965_s3 + $0x470] sm:$0xff] %vm1875_vm2, %v1834_v55  ;;  %vm1423_vm11 = vcmp.gt.f32.partialorder %v1069_v56, 0.0  ;;  %v1606_v58 = vmul.f32 0.01, %v1069_v56  ;;  %v795_v59 = vpop.f32.mrf.mxu0  ;;  %v933_v60 = vpop.f32.mrf.mxu1 }
  0xba   :  { %v796_v63 = vadd.f32 %v2560_v5, %v795_v59  ;;  %v934_v0 = vadd.f32 %v2560_v5, %v933_v60  ;;  %v1206_v1 = vpop.f32.mrf.mxu3  ;;  %v85_v59 = vld [vmem:[%s3963_s0 + $0x238] sm:$0xff] }
  0xbb   :  { %v1789_v2 = vsel %vm1423_vm11, %v1069_v56, %v1606_v58  ;;  %2179 = vmatmul.msk.f32.gmra.mxu2 %vm206_vm1, %v128_v57  ;;  %v1207_v3 = vadd.f32 %v2560_v5, %v1206_v1  ;;  %v39_v58 = vld [vmem:[%s3963_s0 + $0xc8] sm:$0xff]  ;;  %v177_v1 = vld [vmem:[%s3963_s0 + $0x518] sm:$0xff] }
  0xbc   :  { %1973 = vst.msk [vmem:[%s3965_s3 + $0x308] sm:$0xff] %vm1875_vm2, %v1789_v2  ;;  %vm1332_vm12 = vcmp.gt.f32.partialorder %v796_v63, 0.0  ;;  %v1515_v6 = vmul.f32 0.01, %v796_v63  ;;  %vm1378_vm13 = vcmp.gt.f32.partialorder %v934_v0, 0.0  ;;  %2087 = vmatmul.msk.f32.gmra.mxu0 %vm206_vm1, %v36_v61  ;;  %2133 = vmatmul.msk.f32.gmra.mxu1 %vm206_vm1, %v82_v62 }
  0xbd   :  { %v1561_v7 = vmul.f32 0.01, %v934_v0  ;;  %vm1469_vm14 = vcmp.gt.f32.partialorder %v1207_v3, 0.0  ;;  %v1652_v8 = vmul.f32 0.01, %v1207_v3 }
  0xbe   :  { %v1698_v9 = vsel %vm1332_vm12, %v796_v63, %v1515_v6  ;;  %v1071_v10 = vpop.f32.mrf.mxu2  ;;  %2225 = vmatmul.msk.f32.gmra.mxu3 %vm206_vm1, %v174_v4 }
  0xbf   :  { %1882 = vst.msk [vmem:[%s3965_s3 + $0x30] sm:$0xff] %vm1875_vm2, %v1698_v9  ;;  %v1744_v11 = vsel %vm1378_vm13, %v934_v0, %v1561_v7  ;;  %v1835_v12 = vsel %vm1469_vm14, %v1207_v3, %v1652_v8  ;;  %v1072_v13 = vadd.f32 %v2560_v5, %v1071_v10 }
  0xc0   :  { %1928 = vst.msk [vmem:[%s3965_s3 + $0x1a0] sm:$0xff] %vm1875_vm2, %v1744_v11  ;;  %v132_v11 = vld [vmem:[%s3963_s0 + $0x3b0] sm:$0xff] }
  0xc1   :  { %2019 = vst.msk [vmem:[%s3965_s3 + $0x478] sm:$0xff] %vm1875_vm2, %v1835_v12  ;;  %vm1424_vm15 = vcmp.gt.f32.partialorder %v1072_v13, 0.0  ;;  %v1607_v15 = vmul.f32 0.01, %v1072_v13  ;;  %v798_v16 = vpop.f32.mrf.mxu0  ;;  %v936_v17 = vpop.f32.mrf.mxu1 }
  0xc2   :  { %v799_v20 = vadd.f32 %v2560_v5, %v798_v16  ;;  %v937_v21 = vadd.f32 %v2560_v5, %v936_v17  ;;  %v1209_v22 = vpop.f32.mrf.mxu3  ;;  %v86_v16 = vld [vmem:[%s3963_s0 + $0x240] sm:$0xff] }
  0xc3   :  { %v1790_v23 = vsel %vm1424_vm15, %v1072_v13, %v1607_v15  ;;  %2180 = vmatmul.msk.f32.gmra.mxu2 %vm206_vm1, %v129_v14  ;;  %v1210_v24 = vadd.f32 %v2560_v5, %v1209_v22  ;;  %v40_v15 = vld [vmem:[%s3963_s0 + $0xd0] sm:$0xff]  ;;  %v178_v22 = vld [vmem:[%s3963_s0 + $0x520] sm:$0xff] }
  0xc4   :  { %1974 = vst.msk [vmem:[%s3965_s3 + $0x310] sm:$0xff] %vm1875_vm2, %v1790_v23  ;;  %vm1333_vm0 = vcmp.gt.f32.partialorder %v799_v20, 0.0  ;;  %v1516_v26 = vmul.f32 0.01, %v799_v20  ;;  %vm1379_vm3 = vcmp.gt.f32.partialorder %v937_v21, 0.0  ;;  %2088 = vmatmul.msk.f32.gmra.mxu0 %vm206_vm1, %v37_v18  ;;  %2134 = vmatmul.msk.f32.gmra.mxu1 %vm206_vm1, %v83_v19 }
  0xc5   :  { %v1562_v27 = vmul.f32 0.01, %v937_v21  ;;  %vm1470_vm4 = vcmp.gt.f32.partialorder %v1210_v24, 0.0  ;;  %v1653_v28 = vmul.f32 0.01, %v1210_v24 }
  0xc6   :  { %v1699_v29 = vsel %vm1333_vm0, %v799_v20, %v1516_v26  ;;  %v1074_v30 = vpop.f32.mrf.mxu2  ;;  %2226 = vmatmul.msk.f32.gmra.mxu3 %vm206_vm1, %v175_v25 }
  0xc7   :  { %1883 = vst.msk [vmem:[%s3965_s3 + $0x38] sm:$0xff] %vm1875_vm2, %v1699_v29  ;;  %v1745_v31 = vsel %vm1379_vm3, %v937_v21, %v1562_v27  ;;  %v1836_v32 = vsel %vm1470_vm4, %v1210_v24, %v1653_v28  ;;  %v1075_v33 = vadd.f32 %v2560_v5, %v1074_v30 }
  0xc8   :  { %1929 = vst.msk [vmem:[%s3965_s3 + $0x1a8] sm:$0xff] %vm1875_vm2, %v1745_v31  ;;  %v133_v31 = vld [vmem:[%s3963_s0 + $0x3b8] sm:$0xff] }
  0xc9   :  { %2020 = vst.msk [vmem:[%s3965_s3 + $0x480] sm:$0xff] %vm1875_vm2, %v1836_v32  ;;  %vm1425_vm5 = vcmp.gt.f32.partialorder %v1075_v33, 0.0  ;;  %v1608_v35 = vmul.f32 0.01, %v1075_v33  ;;  %v801_v36 = vpop.f32.mrf.mxu0  ;;  %v939_v37 = vpop.f32.mrf.mxu1 }
  0xca   :  { %v802_v40 = vadd.f32 %v2560_v5, %v801_v36  ;;  %v940_v41 = vadd.f32 %v2560_v5, %v939_v37  ;;  %v1212_v42 = vpop.f32.mrf.mxu3  ;;  %v87_v36 = vld [vmem:[%s3963_s0 + $0x248] sm:$0xff] }
  0xcb   :  { %v1791_v43 = vsel %vm1425_vm5, %v1075_v33, %v1608_v35  ;;  %2181 = vmatmul.msk.f32.gmra.mxu2 %vm206_vm1, %v130_v34  ;;  %v1213_v44 = vadd.f32 %v2560_v5, %v1212_v42  ;;  %v41_v35 = vld [vmem:[%s3963_s0 + $0xd8] sm:$0xff]  ;;  %v179_v42 = vld [vmem:[%s3963_s0 + $0x528] sm:$0xff] }
  0xcc   :  { %1975 = vst.msk [vmem:[%s3965_s3 + $0x318] sm:$0xff] %vm1875_vm2, %v1791_v43  ;;  %vm1334_vm6 = vcmp.gt.f32.partialorder %v802_v40, 0.0  ;;  %v1517_v46 = vmul.f32 0.01, %v802_v40  ;;  %vm1380_vm7 = vcmp.gt.f32.partialorder %v940_v41, 0.0  ;;  %2089 = vmatmul.msk.f32.gmra.mxu0 %vm206_vm1, %v38_v38  ;;  %2135 = vmatmul.msk.f32.gmra.mxu1 %vm206_vm1, %v84_v39 }
  0xcd   :  { %v1563_v47 = vmul.f32 0.01, %v940_v41  ;;  %vm1471_vm8 = vcmp.gt.f32.partialorder %v1213_v44, 0.0  ;;  %v1654_v48 = vmul.f32 0.01, %v1213_v44 }
  0xce   :  { %v1700_v49 = vsel %vm1334_vm6, %v802_v40, %v1517_v46  ;;  %v1077_v50 = vpop.f32.mrf.mxu2  ;;  %2227 = vmatmul.msk.f32.gmra.mxu3 %vm206_vm1, %v176_v45 }
  0xcf   :  { %1884 = vst.msk [vmem:[%s3965_s3 + $0x40] sm:$0xff] %vm1875_vm2, %v1700_v49  ;;  %v1746_v51 = vsel %vm1380_vm7, %v940_v41, %v1563_v47  ;;  %v1837_v52 = vsel %vm1471_vm8, %v1213_v44, %v1654_v48  ;;  %v1078_v53 = vadd.f32 %v2560_v5, %v1077_v50 }
  0xd0   :  { %1930 = vst.msk [vmem:[%s3965_s3 + $0x1b0] sm:$0xff] %vm1875_vm2, %v1746_v51  ;;  %v134_v51 = vld [vmem:[%s3963_s0 + $0x3c0] sm:$0xff] }
  0xd1   :  { %2021 = vst.msk [vmem:[%s3965_s3 + $0x488] sm:$0xff] %vm1875_vm2, %v1837_v52  ;;  %vm1426_vm9 = vcmp.gt.f32.partialorder %v1078_v53, 0.0  ;;  %v1609_v55 = vmul.f32 0.01, %v1078_v53  ;;  %v804_v56 = vpop.f32.mrf.mxu0  ;;  %v942_v57 = vpop.f32.mrf.mxu1 }
  0xd2   :  { %v805_v60 = vadd.f32 %v2560_v5, %v804_v56  ;;  %v943_v61 = vadd.f32 %v2560_v5, %v942_v57  ;;  %v1215_v62 = vpop.f32.mrf.mxu3  ;;  %v88_v56 = vld [vmem:[%s3963_s0 + $0x250] sm:$0xff] }
  0xd3   :  { %v1792_v63 = vsel %vm1426_vm9, %v1078_v53, %v1609_v55  ;;  %2182 = vmatmul.msk.f32.gmra.mxu2 %vm206_vm1, %v131_v54  ;;  %v1216_v0 = vadd.f32 %v2560_v5, %v1215_v62  ;;  %v42_v55 = vld [vmem:[%s3963_s0 + $0xe0] sm:$0xff]  ;;  %v180_v62 = vld [vmem:[%s3963_s0 + $0x530] sm:$0xff] }
  0xd4   :  { %1976 = vst.msk [vmem:[%s3965_s3 + $0x320] sm:$0xff] %vm1875_vm2, %v1792_v63  ;;  %vm1335_vm10 = vcmp.gt.f32.partialorder %v805_v60, 0.0  ;;  %v1518_v2 = vmul.f32 0.01, %v805_v60  ;;  %vm1381_vm11 = vcmp.gt.f32.partialorder %v943_v61, 0.0  ;;  %2090 = vmatmul.msk.f32.gmra.mxu0 %vm206_vm1, %v39_v58  ;;  %2136 = vmatmul.msk.f32.gmra.mxu1 %vm206_vm1, %v85_v59 }
  0xd5   :  { %v1564_v3 = vmul.f32 0.01, %v943_v61  ;;  %vm1472_vm12 = vcmp.gt.f32.partialorder %v1216_v0, 0.0  ;;  %v1655_v4 = vmul.f32 0.01, %v1216_v0 }
  0xd6   :  { %v1701_v6 = vsel %vm1335_vm10, %v805_v60, %v1518_v2  ;;  %v1080_v7 = vpop.f32.mrf.mxu2  ;;  %2228 = vmatmul.msk.f32.gmra.mxu3 %vm206_vm1, %v177_v1 }
  0xd7   :  { %1885 = vst.msk [vmem:[%s3965_s3 + $0x48] sm:$0xff] %vm1875_vm2, %v1701_v6  ;;  %v1747_v8 = vsel %vm1381_vm11, %v943_v61, %v1564_v3  ;;  %v1838_v9 = vsel %vm1472_vm12, %v1216_v0, %v1655_v4  ;;  %v1081_v10 = vadd.f32 %v2560_v5, %v1080_v7 }
  0xd8   :  { %1931 = vst.msk [vmem:[%s3965_s3 + $0x1b8] sm:$0xff] %vm1875_vm2, %v1747_v8  ;;  %v135_v8 = vld [vmem:[%s3963_s0 + $0x3c8] sm:$0xff] }
  0xd9   :  { %2022 = vst.msk [vmem:[%s3965_s3 + $0x490] sm:$0xff] %vm1875_vm2, %v1838_v9  ;;  %vm1427_vm13 = vcmp.gt.f32.partialorder %v1081_v10, 0.0  ;;  %v1610_v12 = vmul.f32 0.01, %v1081_v10  ;;  %v807_v13 = vpop.f32.mrf.mxu0  ;;  %v945_v14 = vpop.f32.mrf.mxu1 }
  0xda   :  { %v808_v17 = vadd.f32 %v2560_v5, %v807_v13  ;;  %v946_v18 = vadd.f32 %v2560_v5, %v945_v14  ;;  %v1218_v19 = vpop.f32.mrf.mxu3  ;;  %v89_v13 = vld [vmem:[%s3963_s0 + $0x258] sm:$0xff] }
  0xdb   :  { %v1793_v20 = vsel %vm1427_vm13, %v1081_v10, %v1610_v12  ;;  %2183 = vmatmul.msk.f32.gmra.mxu2 %vm206_vm1, %v132_v11  ;;  %v1219_v21 = vadd.f32 %v2560_v5, %v1218_v19  ;;  %v43_v12 = vld [vmem:[%s3963_s0 + $0xe8] sm:$0xff]  ;;  %v181_v19 = vld [vmem:[%s3963_s0 + $0x538] sm:$0xff] }
  0xdc   :  { %1977 = vst.msk [vmem:[%s3965_s3 + $0x328] sm:$0xff] %vm1875_vm2, %v1793_v20  ;;  %vm1336_vm14 = vcmp.gt.f32.partialorder %v808_v17, 0.0  ;;  %v1519_v23 = vmul.f32 0.01, %v808_v17  ;;  %vm1382_vm15 = vcmp.gt.f32.partialorder %v946_v18, 0.0  ;;  %2091 = vmatmul.msk.f32.gmra.mxu0 %vm206_vm1, %v40_v15  ;;  %2137 = vmatmul.msk.f32.gmra.mxu1 %vm206_vm1, %v86_v16 }
  0xdd   :  { %v1565_v24 = vmul.f32 0.01, %v946_v18  ;;  %vm1473_vm0 = vcmp.gt.f32.partialorder %v1219_v21, 0.0  ;;  %v1656_v25 = vmul.f32 0.01, %v1219_v21 }
  0xde   :  { %v1702_v26 = vsel %vm1336_vm14, %v808_v17, %v1519_v23  ;;  %v1083_v27 = vpop.f32.mrf.mxu2  ;;  %2229 = vmatmul.msk.f32.gmra.mxu3 %vm206_vm1, %v178_v22 }
  0xdf   :  { %1886 = vst.msk [vmem:[%s3965_s3 + $0x50] sm:$0xff] %vm1875_vm2, %v1702_v26  ;;  %v1748_v28 = vsel %vm1382_vm15, %v946_v18, %v1565_v24  ;;  %v1839_v29 = vsel %vm1473_vm0, %v1219_v21, %v1656_v25  ;;  %v1084_v30 = vadd.f32 %v2560_v5, %v1083_v27 }
  0xe0   :  { %1932 = vst.msk [vmem:[%s3965_s3 + $0x1c0] sm:$0xff] %vm1875_vm2, %v1748_v28  ;;  %v136_v28 = vld [vmem:[%s3963_s0 + $0x3d0] sm:$0xff] }
  0xe1   :  { %2023 = vst.msk [vmem:[%s3965_s3 + $0x498] sm:$0xff] %vm1875_vm2, %v1839_v29  ;;  %vm1428_vm3 = vcmp.gt.f32.partialorder %v1084_v30, 0.0  ;;  %v1611_v32 = vmul.f32 0.01, %v1084_v30  ;;  %v810_v33 = vpop.f32.mrf.mxu0  ;;  %v948_v34 = vpop.f32.mrf.mxu1 }
  0xe2   :  { %v811_v37 = vadd.f32 %v2560_v5, %v810_v33  ;;  %v949_v38 = vadd.f32 %v2560_v5, %v948_v34  ;;  %v1221_v39 = vpop.f32.mrf.mxu3  ;;  %v90_v33 = vld [vmem:[%s3963_s0 + $0x260] sm:$0xff] }
  0xe3   :  { %v1794_v40 = vsel %vm1428_vm3, %v1084_v30, %v1611_v32  ;;  %2184 = vmatmul.msk.f32.gmra.mxu2 %vm206_vm1, %v133_v31  ;;  %v1222_v41 = vadd.f32 %v2560_v5, %v1221_v39  ;;  %v44_v32 = vld [vmem:[%s3963_s0 + $0xf0] sm:$0xff]  ;;  %v182_v39 = vld [vmem:[%s3963_s0 + $0x540] sm:$0xff] }
  0xe4   :  { %1978 = vst.msk [vmem:[%s3965_s3 + $0x330] sm:$0xff] %vm1875_vm2, %v1794_v40  ;;  %vm1337_vm4 = vcmp.gt.f32.partialorder %v811_v37, 0.0  ;;  %v1520_v43 = vmul.f32 0.01, %v811_v37  ;;  %vm1383_vm5 = vcmp.gt.f32.partialorder %v949_v38, 0.0  ;;  %2092 = vmatmul.msk.f32.gmra.mxu0 %vm206_vm1, %v41_v35  ;;  %2138 = vmatmul.msk.f32.gmra.mxu1 %vm206_vm1, %v87_v36 }
  0xe5   :  { %v1566_v44 = vmul.f32 0.01, %v949_v38  ;;  %vm1474_vm6 = vcmp.gt.f32.partialorder %v1222_v41, 0.0  ;;  %v1657_v45 = vmul.f32 0.01, %v1222_v41 }
  0xe6   :  { %v1703_v46 = vsel %vm1337_vm4, %v811_v37, %v1520_v43  ;;  %v1086_v47 = vpop.f32.mrf.mxu2  ;;  %2230 = vmatmul.msk.f32.gmra.mxu3 %vm206_vm1, %v179_v42 }
  0xe7   :  { %1887 = vst.msk [vmem:[%s3965_s3 + $0x58] sm:$0xff] %vm1875_vm2, %v1703_v46  ;;  %v1749_v48 = vsel %vm1383_vm5, %v949_v38, %v1566_v44  ;;  %v1840_v49 = vsel %vm1474_vm6, %v1222_v41, %v1657_v45  ;;  %v1087_v50 = vadd.f32 %v2560_v5, %v1086_v47 }
  0xe8   :  { %1933 = vst.msk [vmem:[%s3965_s3 + $0x1c8] sm:$0xff] %vm1875_vm2, %v1749_v48  ;;  %v137_v48 = vld [vmem:[%s3963_s0 + $0x3d8] sm:$0xff] }
  0xe9   :  { %2024 = vst.msk [vmem:[%s3965_s3 + $0x4a0] sm:$0xff] %vm1875_vm2, %v1840_v49  ;;  %vm1429_vm7 = vcmp.gt.f32.partialorder %v1087_v50, 0.0  ;;  %v1612_v52 = vmul.f32 0.01, %v1087_v50  ;;  %v813_v53 = vpop.f32.mrf.mxu0  ;;  %v951_v54 = vpop.f32.mrf.mxu1 }
  0xea   :  { %v814_v57 = vadd.f32 %v2560_v5, %v813_v53  ;;  %v952_v58 = vadd.f32 %v2560_v5, %v951_v54  ;;  %v1224_v59 = vpop.f32.mrf.mxu3  ;;  %v91_v53 = vld [vmem:[%s3963_s0 + $0x268] sm:$0xff] }
  0xeb   :  { %v1795_v60 = vsel %vm1429_vm7, %v1087_v50, %v1612_v52  ;;  %2185 = vmatmul.msk.f32.gmra.mxu2 %vm206_vm1, %v134_v51  ;;  %v1225_v61 = vadd.f32 %v2560_v5, %v1224_v59  ;;  %v45_v52 = vld [vmem:[%s3963_s0 + $0xf8] sm:$0xff]  ;;  %v183_v59 = vld [vmem:[%s3963_s0 + $0x548] sm:$0xff] }
  0xec   :  { %1979 = vst.msk [vmem:[%s3965_s3 + $0x338] sm:$0xff] %vm1875_vm2, %v1795_v60  ;;  %vm1338_vm8 = vcmp.gt.f32.partialorder %v814_v57, 0.0  ;;  %v1521_v63 = vmul.f32 0.01, %v814_v57  ;;  %vm1384_vm9 = vcmp.gt.f32.partialorder %v952_v58, 0.0  ;;  %2093 = vmatmul.msk.f32.gmra.mxu0 %vm206_vm1, %v42_v55  ;;  %2139 = vmatmul.msk.f32.gmra.mxu1 %vm206_vm1, %v88_v56 }
  0xed   :  { %v1567_v0 = vmul.f32 0.01, %v952_v58  ;;  %vm1475_vm10 = vcmp.gt.f32.partialorder %v1225_v61, 0.0  ;;  %v1658_v1 = vmul.f32 0.01, %v1225_v61 }
  0xee   :  { %v1704_v2 = vsel %vm1338_vm8, %v814_v57, %v1521_v63  ;;  %v1089_v3 = vpop.f32.mrf.mxu2  ;;  %2231 = vmatmul.msk.f32.gmra.mxu3 %vm206_vm1, %v180_v62 }
  0xef   :  { %1888 = vst.msk [vmem:[%s3965_s3 + $0x60] sm:$0xff] %vm1875_vm2, %v1704_v2  ;;  %v1750_v4 = vsel %vm1384_vm9, %v952_v58, %v1567_v0  ;;  %v1841_v6 = vsel %vm1475_vm10, %v1225_v61, %v1658_v1  ;;  %v1090_v7 = vadd.f32 %v2560_v5, %v1089_v3 }
  0xf0   :  { %1934 = vst.msk [vmem:[%s3965_s3 + $0x1d0] sm:$0xff] %vm1875_vm2, %v1750_v4  ;;  %v138_v4 = vld [vmem:[%s3963_s0 + $0x3e0] sm:$0xff] }
  0xf1   :  { %2025 = vst.msk [vmem:[%s3965_s3 + $0x4a8] sm:$0xff] %vm1875_vm2, %v1841_v6  ;;  %vm1430_vm11 = vcmp.gt.f32.partialorder %v1090_v7, 0.0  ;;  %v1613_v9 = vmul.f32 0.01, %v1090_v7  ;;  %v816_v10 = vpop.f32.mrf.mxu0  ;;  %v954_v11 = vpop.f32.mrf.mxu1 }
  0xf2   :  { %v817_v14 = vadd.f32 %v2560_v5, %v816_v10  ;;  %v955_v15 = vadd.f32 %v2560_v5, %v954_v11  ;;  %v1227_v16 = vpop.f32.mrf.mxu3  ;;  %v3141_v10 = vld [vmem:[%s3964_s2] ss:$0 sm:$0xff] }
  0xf3   :  { %v1796_v17 = vsel %vm1430_vm11, %v1090_v7, %v1613_v9  ;;  %2186 = vmatmul.msk.f32.gmra.mxu2 %vm206_vm1, %v135_v8  ;;  %v1228_v18 = vadd.f32 %v2560_v5, %v1227_v16  ;;  %v92_v9 = vld [vmem:[%s3963_s0 + $0x270] sm:$0xff] }
  0xf4   :  { %1980 = vst.msk [vmem:[%s3965_s3 + $0x340] sm:$0xff] %vm1875_vm2, %v1796_v17  ;;  %vm1339_vm12 = vcmp.gt.f32.partialorder %v817_v14, 0.0  ;;  %v1522_v20 = vmul.f32 0.01, %v817_v14  ;;  %vm1385_vm13 = vcmp.gt.f32.partialorder %v955_v15, 0.0  ;;  %2094 = vmatmul.msk.f32.gmra.mxu0 %vm206_vm1, %v43_v12  ;;  %2140 = vmatmul.msk.f32.gmra.mxu1 %vm206_vm1, %v89_v13  ;;  %v184_v16 = vld [vmem:[%s3963_s0 + $0x550] sm:$0xff] }
  0xf5   :  { %v1568_v21 = vmul.f32 0.01, %v955_v15  ;;  %vm1476_vm14 = vcmp.gt.f32.partialorder %v1228_v18, 0.0  ;;  %v1659_v22 = vmul.f32 0.01, %v1228_v18 }
  0xf6   :  { %v1705_v23 = vsel %vm1339_vm12, %v817_v14, %v1522_v20  ;;  %v1092_v24 = vpop.f32.mrf.mxu2  ;;  %2232 = vmatmul.msk.f32.gmra.mxu3 %vm206_vm1, %v181_v19 }
  0xf7   :  { %1889 = vst.msk [vmem:[%s3965_s3 + $0x68] sm:$0xff] %vm1875_vm2, %v1705_v23  ;;  %v1751_v25 = vsel %vm1385_vm13, %v955_v15, %v1568_v21  ;;  %v1842_v26 = vsel %vm1476_vm14, %v1228_v18, %v1659_v22  ;;  %v1093_v27 = vadd.f32 %v2560_v5, %v1092_v24 }
  0xf8   :  { %1935 = vst.msk [vmem:[%s3965_s3 + $0x1d8] sm:$0xff] %vm1875_vm2, %v1751_v25  ;;  %v139_v25 = vld [vmem:[%s3963_s0 + $0x3e8] sm:$0xff] }
  0xf9   :  { %2026 = vst.msk [vmem:[%s3965_s3 + $0x4b0] sm:$0xff] %vm1875_vm2, %v1842_v26  ;;  %vm1431_vm15 = vcmp.gt.f32.partialorder %v1093_v27, 0.0  ;;  %v1614_v29 = vmul.f32 0.01, %v1093_v27  ;;  %v819_v30 = vpop.f32.mrf.mxu0  ;;  %v957_v31 = vpop.f32.mrf.mxu1 }
  0xfa   :  { %v820_v34 = vadd.f32 %v2560_v5, %v819_v30  ;;  %v958_v35 = vadd.f32 %v2560_v5, %v957_v31  ;;  %v1230_v36 = vpop.f32.mrf.mxu3  ;;  %v93_v30 = vld [vmem:[%s3963_s0 + $0x278] sm:$0xff] }
  0xfb   :  { %v1797_v37 = vsel %vm1431_vm15, %v1093_v27, %v1614_v29  ;;  %2187 = vmatmul.msk.f32.gmra.mxu2 %vm206_vm1, %v136_v28  ;;  %v1231_v38 = vadd.f32 %v2560_v5, %v1230_v36  ;;  %v47_v29 = vld [vmem:[%s3963_s0 + $0x108] sm:$0xff]  ;;  %v185_v36 = vld [vmem:[%s3963_s0 + $0x558] sm:$0xff] }
  0xfc   :  { %1981 = vst.msk [vmem:[%s3965_s3 + $0x348] sm:$0xff] %vm1875_vm2, %v1797_v37  ;;  %vm1340_vm0 = vcmp.gt.f32.partialorder %v820_v34, 0.0  ;;  %v1523_v40 = vmul.f32 0.01, %v820_v34  ;;  %vm1386_vm3 = vcmp.gt.f32.partialorder %v958_v35, 0.0  ;;  %2095 = vmatmul.msk.f32.gmra.mxu0 %vm206_vm1, %v44_v32  ;;  %2141 = vmatmul.msk.f32.gmra.mxu1 %vm206_vm1, %v90_v33 }
  0xfd   :  { %v1569_v41 = vmul.f32 0.01, %v958_v35  ;;  %vm1477_vm4 = vcmp.gt.f32.partialorder %v1231_v38, 0.0  ;;  %v1660_v42 = vmul.f32 0.01, %v1231_v38 }
  0xfe   :  { %v1706_v43 = vsel %vm1340_vm0, %v820_v34, %v1523_v40  ;;  %v1095_v44 = vpop.f32.mrf.mxu2  ;;  %2233 = vmatmul.msk.f32.gmra.mxu3 %vm206_vm1, %v182_v39 }
  0xff   :  { %1890 = vst.msk [vmem:[%s3965_s3 + $0x70] sm:$0xff] %vm1875_vm2, %v1706_v43  ;;  %v1752_v45 = vsel %vm1386_vm3, %v958_v35, %v1569_v41  ;;  %v1843_v46 = vsel %vm1477_vm4, %v1231_v38, %v1660_v42  ;;  %v1096_v47 = vadd.f32 %v2560_v5, %v1095_v44 }
 0x100   :  { %1936 = vst.msk [vmem:[%s3965_s3 + $0x1e0] sm:$0xff] %vm1875_vm2, %v1752_v45  ;;  %v140_v45 = vld [vmem:[%s3963_s0 + $0x3f0] sm:$0xff] }
 0x101   :  { %2027 = vst.msk [vmem:[%s3965_s3 + $0x4b8] sm:$0xff] %vm1875_vm2, %v1843_v46  ;;  %vm1432_vm5 = vcmp.gt.f32.partialorder %v1096_v47, 0.0  ;;  %v1615_v49 = vmul.f32 0.01, %v1096_v47  ;;  %v822_v50 = vpop.f32.mrf.mxu0  ;;  %v960_v51 = vpop.f32.mrf.mxu1 }
 0x102   :  { %v823_v54 = vadd.f32 %v2560_v5, %v822_v50  ;;  %v961_v55 = vadd.f32 %v2560_v5, %v960_v51  ;;  %v1233_v56 = vpop.f32.mrf.mxu3  ;;  %v94_v50 = vld [vmem:[%s3963_s0 + $0x280] sm:$0xff] }
 0x103   :  { %v1798_v57 = vsel %vm1432_vm5, %v1096_v47, %v1615_v49  ;;  %2188 = vmatmul.msk.f32.gmra.mxu2 %vm206_vm1, %v137_v48  ;;  %v1234_v58 = vadd.f32 %v2560_v5, %v1233_v56  ;;  %v48_v49 = vld [vmem:[%s3963_s0 + $0x110] sm:$0xff]  ;;  %v186_v56 = vld [vmem:[%s3963_s0 + $0x560] sm:$0xff] }
 0x104   :  { %1982 = vst.msk [vmem:[%s3965_s3 + $0x350] sm:$0xff] %vm1875_vm2, %v1798_v57  ;;  %vm1341_vm6 = vcmp.gt.f32.partialorder %v823_v54, 0.0  ;;  %v1524_v60 = vmul.f32 0.01, %v823_v54  ;;  %vm1387_vm7 = vcmp.gt.f32.partialorder %v961_v55, 0.0  ;;  %2096 = vmatmul.msk.f32.gmra.mxu0 %vm206_vm1, %v45_v52  ;;  %2142 = vmatmul.msk.f32.gmra.mxu1 %vm206_vm1, %v91_v53 }
 0x105   :  { %v1570_v61 = vmul.f32 0.01, %v961_v55  ;;  %vm1478_vm8 = vcmp.gt.f32.partialorder %v1234_v58, 0.0  ;;  %v1661_v62 = vmul.f32 0.01, %v1234_v58 }
 0x106   :  { %v1707_v63 = vsel %vm1341_vm6, %v823_v54, %v1524_v60  ;;  %v1098_v0 = vpop.f32.mrf.mxu2  ;;  %2234 = vmatmul.msk.f32.gmra.mxu3 %vm206_vm1, %v183_v59 }
 0x107   :  { %1891 = vst.msk [vmem:[%s3965_s3 + $0x78] sm:$0xff] %vm1875_vm2, %v1707_v63  ;;  %v1753_v1 = vsel %vm1387_vm7, %v961_v55, %v1570_v61  ;;  %v1844_v2 = vsel %vm1478_vm8, %v1234_v58, %v1661_v62  ;;  %v1099_v3 = vadd.f32 %v2560_v5, %v1098_v0  ;;  %v46_v5 = vld [vmem:[%s3963_s0 + $0x100] sm:$0xff] }
 0x108   :  { %1937 = vst.msk [vmem:[%s3965_s3 + $0x1e8] sm:$0xff] %vm1875_vm2, %v1753_v1  ;;  %v141_v1 = vld [vmem:[%s3963_s0 + $0x3f8] sm:$0xff] }
 0x109   :  { %2028 = vst.msk [vmem:[%s3965_s3 + $0x4c0] sm:$0xff] %vm1875_vm2, %v1844_v2  ;;  %vm1433_vm9 = vcmp.gt.f32.partialorder %v1099_v3, 0.0  ;;  %v1616_v6 = vmul.f32 0.01, %v1099_v3  ;;  %v825_v7 = vpop.f32.mrf.mxu0  ;;  %v963_v8 = vpop.f32.mrf.mxu1 }
 0x10a   :  { %v826_v11 = vadd.f32 %v3141_v10, %v825_v7  ;;  %v964_v12 = vadd.f32 %v3141_v10, %v963_v8  ;;  %v1236_v13 = vpop.f32.mrf.mxu3  ;;  %v95_v7 = vld [vmem:[%s3963_s0 + $0x288] sm:$0xff] }
 0x10b   :  { %v1799_v14 = vsel %vm1433_vm9, %v1099_v3, %v1616_v6  ;;  %2189 = vmatmul.msk.f32.gmra.mxu2 %vm206_vm1, %v138_v4  ;;  %v1237_v15 = vadd.f32 %v3141_v10, %v1236_v13  ;;  %v49_v6 = vld [vmem:[%s3963_s0 + $0x118] sm:$0xff]  ;;  %v187_v13 = vld [vmem:[%s3963_s0 + $0x568] sm:$0xff] }
 0x10c   :  { %1983 = vst.msk [vmem:[%s3965_s3 + $0x358] sm:$0xff] %vm1875_vm2, %v1799_v14  ;;  %vm1342_vm10 = vcmp.gt.f32.partialorder %v826_v11, 0.0  ;;  %v1525_v17 = vmul.f32 0.01, %v826_v11  ;;  %vm1388_vm11 = vcmp.gt.f32.partialorder %v964_v12, 0.0  ;;  %2097 = vmatmul.msk.f32.gmra.mxu0 %vm206_vm1, %v46_v5  ;;  %2143 = vmatmul.msk.f32.gmra.mxu1 %vm206_vm1, %v92_v9 }
 0x10d   :  { %v1571_v18 = vmul.f32 0.01, %v964_v12  ;;  %vm1479_vm12 = vcmp.gt.f32.partialorder %v1237_v15, 0.0  ;;  %v1662_v19 = vmul.f32 0.01, %v1237_v15 }
 0x10e   :  { %v1708_v20 = vsel %vm1342_vm10, %v826_v11, %v1525_v17  ;;  %v1101_v21 = vpop.f32.mrf.mxu2  ;;  %2235 = vmatmul.msk.f32.gmra.mxu3 %vm206_vm1, %v184_v16 }
 0x10f   :  { %1892 = vst.msk [vmem:[%s3965_s3 + $0x80] sm:$0xff] %vm1875_vm2, %v1708_v20  ;;  %v1754_v22 = vsel %vm1388_vm11, %v964_v12, %v1571_v18  ;;  %v1845_v23 = vsel %vm1479_vm12, %v1237_v15, %v1662_v19  ;;  %v1102_v24 = vadd.f32 %v3141_v10, %v1101_v21 }
 0x110   :  { %1938 = vst.msk [vmem:[%s3965_s3 + $0x1f0] sm:$0xff] %vm1875_vm2, %v1754_v22  ;;  %v142_v22 = vld [vmem:[%s3963_s0 + $0x400] sm:$0xff] }
 0x111   :  { %2029 = vst.msk [vmem:[%s3965_s3 + $0x4c8] sm:$0xff] %vm1875_vm2, %v1845_v23  ;;  %vm1434_vm13 = vcmp.gt.f32.partialorder %v1102_v24, 0.0  ;;  %v1617_v26 = vmul.f32 0.01, %v1102_v24  ;;  %v828_v27 = vpop.f32.mrf.mxu0  ;;  %v966_v28 = vpop.f32.mrf.mxu1 }
 0x112   :  { %v829_v31 = vadd.f32 %v3141_v10, %v828_v27  ;;  %v967_v32 = vadd.f32 %v3141_v10, %v966_v28  ;;  %v1239_v33 = vpop.f32.mrf.mxu3  ;;  %v96_v27 = vld [vmem:[%s3963_s0 + $0x290] sm:$0xff] }
 0x113   :  { %v1800_v34 = vsel %vm1434_vm13, %v1102_v24, %v1617_v26  ;;  %2190 = vmatmul.msk.f32.gmra.mxu2 %vm206_vm1, %v139_v25  ;;  %v1240_v35 = vadd.f32 %v3141_v10, %v1239_v33  ;;  %v50_v26 = vld [vmem:[%s3963_s0 + $0x120] sm:$0xff]  ;;  %v188_v33 = vld [vmem:[%s3963_s0 + $0x570] sm:$0xff] }
 0x114   :  { %1984 = vst.msk [vmem:[%s3965_s3 + $0x360] sm:$0xff] %vm1875_vm2, %v1800_v34  ;;  %vm1343_vm14 = vcmp.gt.f32.partialorder %v829_v31, 0.0  ;;  %v1526_v37 = vmul.f32 0.01, %v829_v31  ;;  %vm1389_vm15 = vcmp.gt.f32.partialorder %v967_v32, 0.0  ;;  %2098 = vmatmul.msk.f32.gmra.mxu0 %vm206_vm1, %v47_v29  ;;  %2144 = vmatmul.msk.f32.gmra.mxu1 %vm206_vm1, %v93_v30 }
 0x115   :  { %v1572_v38 = vmul.f32 0.01, %v967_v32  ;;  %vm1480_vm0 = vcmp.gt.f32.partialorder %v1240_v35, 0.0  ;;  %v1663_v39 = vmul.f32 0.01, %v1240_v35 }
 0x116   :  { %v1709_v40 = vsel %vm1343_vm14, %v829_v31, %v1526_v37  ;;  %v1104_v41 = vpop.f32.mrf.mxu2  ;;  %2236 = vmatmul.msk.f32.gmra.mxu3 %vm206_vm1, %v185_v36 }
 0x117   :  { %1893 = vst.msk [vmem:[%s3965_s3 + $0x88] sm:$0xff] %vm1875_vm2, %v1709_v40  ;;  %v1755_v42 = vsel %vm1389_vm15, %v967_v32, %v1572_v38  ;;  %v1846_v43 = vsel %vm1480_vm0, %v1240_v35, %v1663_v39  ;;  %v1105_v44 = vadd.f32 %v3141_v10, %v1104_v41 }
 0x118   :  { %1939 = vst.msk [vmem:[%s3965_s3 + $0x1f8] sm:$0xff] %vm1875_vm2, %v1755_v42  ;;  %v143_v42 = vld [vmem:[%s3963_s0 + $0x408] sm:$0xff] }
 0x119   :  { %2030 = vst.msk [vmem:[%s3965_s3 + $0x4d0] sm:$0xff] %vm1875_vm2, %v1846_v43  ;;  %vm1435_vm3 = vcmp.gt.f32.partialorder %v1105_v44, 0.0  ;;  %v1618_v46 = vmul.f32 0.01, %v1105_v44  ;;  %v831_v47 = vpop.f32.mrf.mxu0  ;;  %v969_v48 = vpop.f32.mrf.mxu1 }
 0x11a   :  { %v832_v51 = vadd.f32 %v3141_v10, %v831_v47  ;;  %v970_v52 = vadd.f32 %v3141_v10, %v969_v48  ;;  %v1242_v53 = vpop.f32.mrf.mxu3  ;;  %v97_v47 = vld [vmem:[%s3963_s0 + $0x298] sm:$0xff] }
 0x11b   :  { %v1801_v54 = vsel %vm1435_vm3, %v1105_v44, %v1618_v46  ;;  %2191 = vmatmul.msk.f32.gmra.mxu2 %vm206_vm1, %v140_v45  ;;  %v1243_v55 = vadd.f32 %v3141_v10, %v1242_v53  ;;  %v51_v46 = vld [vmem:[%s3963_s0 + $0x128] sm:$0xff]  ;;  %v189_v53 = vld [vmem:[%s3963_s0 + $0x578] sm:$0xff] }
 0x11c   :  { %1985 = vst.msk [vmem:[%s3965_s3 + $0x368] sm:$0xff] %vm1875_vm2, %v1801_v54  ;;  %vm1344_vm4 = vcmp.gt.f32.partialorder %v832_v51, 0.0  ;;  %v1527_v57 = vmul.f32 0.01, %v832_v51  ;;  %vm1390_vm5 = vcmp.gt.f32.partialorder %v970_v52, 0.0  ;;  %2099 = vmatmul.msk.f32.gmra.mxu0 %vm206_vm1, %v48_v49  ;;  %2145 = vmatmul.msk.f32.gmra.mxu1 %vm206_vm1, %v94_v50 }
 0x11d   :  { %v1573_v58 = vmul.f32 0.01, %v970_v52  ;;  %vm1481_vm6 = vcmp.gt.f32.partialorder %v1243_v55, 0.0  ;;  %v1664_v59 = vmul.f32 0.01, %v1243_v55 }
 0x11e   :  { %v1710_v60 = vsel %vm1344_vm4, %v832_v51, %v1527_v57  ;;  %v1107_v61 = vpop.f32.mrf.mxu2  ;;  %2237 = vmatmul.msk.f32.gmra.mxu3 %vm206_vm1, %v186_v56 }
 0x11f   :  { %1894 = vst.msk [vmem:[%s3965_s3 + $0x90] sm:$0xff] %vm1875_vm2, %v1710_v60  ;;  %v1756_v62 = vsel %vm1390_vm5, %v970_v52, %v1573_v58  ;;  %v1847_v63 = vsel %vm1481_vm6, %v1243_v55, %v1664_v59  ;;  %v1108_v0 = vadd.f32 %v3141_v10, %v1107_v61 }
 0x120   :  { %1940 = vst.msk [vmem:[%s3965_s3 + $0x200] sm:$0xff] %vm1875_vm2, %v1756_v62  ;;  %v144_v62 = vld [vmem:[%s3963_s0 + $0x410] sm:$0xff] }
 0x121   :  { %2031 = vst.msk [vmem:[%s3965_s3 + $0x4d8] sm:$0xff] %vm1875_vm2, %v1847_v63  ;;  %vm1436_vm7 = vcmp.gt.f32.partialorder %v1108_v0, 0.0  ;;  %v1619_v2 = vmul.f32 0.01, %v1108_v0  ;;  %v834_v3 = vpop.f32.mrf.mxu0  ;;  %v972_v4 = vpop.f32.mrf.mxu1 }
 0x122   :  { %v835_v8 = vadd.f32 %v3141_v10, %v834_v3  ;;  %v973_v5 = vadd.f32 %v3141_v10, %v972_v4  ;;  %v1245_v9 = vpop.f32.mrf.mxu3  ;;  %v98_v3 = vld [vmem:[%s3963_s0 + $0x2a0] sm:$0xff] }
 0x123   :  { %v1802_v11 = vsel %vm1436_vm7, %v1108_v0, %v1619_v2  ;;  %2192 = vmatmul.msk.f32.gmra.mxu2 %vm206_vm1, %v141_v1  ;;  %v1246_v12 = vadd.f32 %v3141_v10, %v1245_v9  ;;  %v52_v2 = vld [vmem:[%s3963_s0 + $0x130] sm:$0xff]  ;;  %v190_v9 = vld [vmem:[%s3963_s0 + $0x580] sm:$0xff] }
 0x124   :  { %1986 = vst.msk [vmem:[%s3965_s3 + $0x370] sm:$0xff] %vm1875_vm2, %v1802_v11  ;;  %vm1345_vm8 = vcmp.gt.f32.partialorder %v835_v8, 0.0  ;;  %v1528_v14 = vmul.f32 0.01, %v835_v8  ;;  %vm1391_vm9 = vcmp.gt.f32.partialorder %v973_v5, 0.0  ;;  %2100 = vmatmul.msk.f32.gmra.mxu0 %vm206_vm1, %v49_v6  ;;  %2146 = vmatmul.msk.f32.gmra.mxu1 %vm206_vm1, %v95_v7 }
 0x125   :  { %v1574_v15 = vmul.f32 0.01, %v973_v5  ;;  %vm1482_vm10 = vcmp.gt.f32.partialorder %v1246_v12, 0.0  ;;  %v1665_v16 = vmul.f32 0.01, %v1246_v12 }
 0x126   :  { %v1711_v17 = vsel %vm1345_vm8, %v835_v8, %v1528_v14  ;;  %v1110_v18 = vpop.f32.mrf.mxu2  ;;  %2238 = vmatmul.msk.f32.gmra.mxu3 %vm206_vm1, %v187_v13 }
 0x127   :  { %1895 = vst.msk [vmem:[%s3965_s3 + $0x98] sm:$0xff] %vm1875_vm2, %v1711_v17  ;;  %v1757_v19 = vsel %vm1391_vm9, %v973_v5, %v1574_v15  ;;  %v1848_v20 = vsel %vm1482_vm10, %v1246_v12, %v1665_v16  ;;  %v1111_v21 = vadd.f32 %v3141_v10, %v1110_v18 }
 0x128   :  { %1941 = vst.msk [vmem:[%s3965_s3 + $0x208] sm:$0xff] %vm1875_vm2, %v1757_v19  ;;  %v145_v19 = vld [vmem:[%s3963_s0 + $0x418] sm:$0xff] }
 0x129   :  { %2032 = vst.msk [vmem:[%s3965_s3 + $0x4e0] sm:$0xff] %vm1875_vm2, %v1848_v20  ;;  %vm1437_vm11 = vcmp.gt.f32.partialorder %v1111_v21, 0.0  ;;  %v1620_v23 = vmul.f32 0.01, %v1111_v21  ;;  %v837_v24 = vpop.f32.mrf.mxu0  ;;  %v975_v25 = vpop.f32.mrf.mxu1 }
 0x12a   :  { %v838_v28 = vadd.f32 %v3141_v10, %v837_v24  ;;  %v976_v29 = vadd.f32 %v3141_v10, %v975_v25  ;;  %v1248_v30 = vpop.f32.mrf.mxu3  ;;  %v99_v24 = vld [vmem:[%s3963_s0 + $0x2a8] sm:$0xff] }
 0x12b   :  { %v1803_v31 = vsel %vm1437_vm11, %v1111_v21, %v1620_v23  ;;  %2193 = vmatmul.msk.f32.gmra.mxu2 %vm206_vm1, %v142_v22  ;;  %v1249_v32 = vadd.f32 %v3141_v10, %v1248_v30  ;;  %v53_v23 = vld [vmem:[%s3963_s0 + $0x138] sm:$0xff]  ;;  %v191_v30 = vld [vmem:[%s3963_s0 + $0x588] sm:$0xff] }
 0x12c   :  { %1987 = vst.msk [vmem:[%s3965_s3 + $0x378] sm:$0xff] %vm1875_vm2, %v1803_v31  ;;  %vm1346_vm12 = vcmp.gt.f32.partialorder %v838_v28, 0.0  ;;  %v1529_v34 = vmul.f32 0.01, %v838_v28  ;;  %vm1392_vm13 = vcmp.gt.f32.partialorder %v976_v29, 0.0  ;;  %2101 = vmatmul.msk.f32.gmra.mxu0 %vm206_vm1, %v50_v26  ;;  %2147 = vmatmul.msk.f32.gmra.mxu1 %vm206_vm1, %v96_v27 }
 0x12d   :  { %v1575_v35 = vmul.f32 0.01, %v976_v29  ;;  %vm1483_vm14 = vcmp.gt.f32.partialorder %v1249_v32, 0.0  ;;  %v1666_v36 = vmul.f32 0.01, %v1249_v32 }
 0x12e   :  { %v1712_v37 = vsel %vm1346_vm12, %v838_v28, %v1529_v34  ;;  %v1113_v38 = vpop.f32.mrf.mxu2  ;;  %2239 = vmatmul.msk.f32.gmra.mxu3 %vm206_vm1, %v188_v33 }
 0x12f   :  { %1896 = vst.msk [vmem:[%s3965_s3 + $0xa0] sm:$0xff] %vm1875_vm2, %v1712_v37  ;;  %v1758_v39 = vsel %vm1392_vm13, %v976_v29, %v1575_v35  ;;  %v1849_v40 = vsel %vm1483_vm14, %v1249_v32, %v1666_v36  ;;  %v1114_v41 = vadd.f32 %v3141_v10, %v1113_v38 }
 0x130   :  { %1942 = vst.msk [vmem:[%s3965_s3 + $0x210] sm:$0xff] %vm1875_vm2, %v1758_v39  ;;  %v146_v39 = vld [vmem:[%s3963_s0 + $0x420] sm:$0xff] }
 0x131   :  { %2033 = vst.msk [vmem:[%s3965_s3 + $0x4e8] sm:$0xff] %vm1875_vm2, %v1849_v40  ;;  %vm1438_vm15 = vcmp.gt.f32.partialorder %v1114_v41, 0.0  ;;  %v1621_v43 = vmul.f32 0.01, %v1114_v41  ;;  %v840_v44 = vpop.f32.mrf.mxu0  ;;  %v978_v45 = vpop.f32.mrf.mxu1 }
 0x132   :  { %v841_v48 = vadd.f32 %v3141_v10, %v840_v44  ;;  %v979_v49 = vadd.f32 %v3141_v10, %v978_v45  ;;  %v1251_v50 = vpop.f32.mrf.mxu3  ;;  %v100_v44 = vld [vmem:[%s3963_s0 + $0x2b0] sm:$0xff] }
 0x133   :  { %v1804_v51 = vsel %vm1438_vm15, %v1114_v41, %v1621_v43  ;;  %2194 = vmatmul.msk.f32.gmra.mxu2 %vm206_vm1, %v143_v42  ;;  %v1252_v52 = vadd.f32 %v3141_v10, %v1251_v50  ;;  %v54_v43 = vld [vmem:[%s3963_s0 + $0x140] sm:$0xff]  ;;  %v192_v50 = vld [vmem:[%s3963_s0 + $0x590] sm:$0xff] }
 0x134   :  { %1988 = vst.msk [vmem:[%s3965_s3 + $0x380] sm:$0xff] %vm1875_vm2, %v1804_v51  ;;  %vm1347_vm0 = vcmp.gt.f32.partialorder %v841_v48, 0.0  ;;  %v1530_v54 = vmul.f32 0.01, %v841_v48  ;;  %vm1393_vm3 = vcmp.gt.f32.partialorder %v979_v49, 0.0  ;;  %2102 = vmatmul.msk.f32.gmra.mxu0 %vm206_vm1, %v51_v46  ;;  %2148 = vmatmul.msk.f32.gmra.mxu1 %vm206_vm1, %v97_v47 }
 0x135   :  { %v1576_v55 = vmul.f32 0.01, %v979_v49  ;;  %vm1484_vm4 = vcmp.gt.f32.partialorder %v1252_v52, 0.0  ;;  %v1667_v56 = vmul.f32 0.01, %v1252_v52 }
 0x136   :  { %v1713_v57 = vsel %vm1347_vm0, %v841_v48, %v1530_v54  ;;  %v1116_v58 = vpop.f32.mrf.mxu2  ;;  %2240 = vmatmul.msk.f32.gmra.mxu3 %vm206_vm1, %v189_v53 }
 0x137   :  { %1897 = vst.msk [vmem:[%s3965_s3 + $0xa8] sm:$0xff] %vm1875_vm2, %v1713_v57  ;;  %v1759_v59 = vsel %vm1393_vm3, %v979_v49, %v1576_v55  ;;  %v1850_v60 = vsel %vm1484_vm4, %v1252_v52, %v1667_v56  ;;  %v1117_v61 = vadd.f32 %v3141_v10, %v1116_v58 }
 0x138   :  { %1943 = vst.msk [vmem:[%s3965_s3 + $0x218] sm:$0xff] %vm1875_vm2, %v1759_v59  ;;  %v147_v59 = vld [vmem:[%s3963_s0 + $0x428] sm:$0xff] }
 0x139   :  { %2034 = vst.msk [vmem:[%s3965_s3 + $0x4f0] sm:$0xff] %vm1875_vm2, %v1850_v60  ;;  %vm1439_vm5 = vcmp.gt.f32.partialorder %v1117_v61, 0.0  ;;  %v1622_v63 = vmul.f32 0.01, %v1117_v61  ;;  %v843_v0 = vpop.f32.mrf.mxu0  ;;  %v981_v1 = vpop.f32.mrf.mxu1 }
 0x13a   :  { %v844_v4 = vadd.f32 %v3141_v10, %v843_v0  ;;  %v982_v6 = vadd.f32 %v3141_v10, %v981_v1  ;;  %v1254_v7 = vpop.f32.mrf.mxu3  ;;  %v101_v0 = vld [vmem:[%s3963_s0 + $0x2b8] sm:$0xff] }
 0x13b   :  { %v1805_v8 = vsel %vm1439_vm5, %v1117_v61, %v1622_v63  ;;  %2195 = vmatmul.msk.f32.gmra.mxu2 %vm206_vm1, %v144_v62  ;;  %v1255_v5 = vadd.f32 %v3141_v10, %v1254_v7  ;;  %v55_v63 = vld [vmem:[%s3963_s0 + $0x148] sm:$0xff]  ;;  %v193_v7 = vld [vmem:[%s3963_s0 + $0x598] sm:$0xff] }
 0x13c   :  { %1989 = vst.msk [vmem:[%s3965_s3 + $0x388] sm:$0xff] %vm1875_vm2, %v1805_v8  ;;  %vm1348_vm6 = vcmp.gt.f32.partialorder %v844_v4, 0.0  ;;  %v1531_v11 = vmul.f32 0.01, %v844_v4  ;;  %vm1394_vm7 = vcmp.gt.f32.partialorder %v982_v6, 0.0  ;;  %2103 = vmatmul.msk.f32.gmra.mxu0 %vm206_vm1, %v52_v2  ;;  %2149 = vmatmul.msk.f32.gmra.mxu1 %vm206_vm1, %v98_v3 }
 0x13d   :  { %v1577_v12 = vmul.f32 0.01, %v982_v6  ;;  %vm1485_vm8 = vcmp.gt.f32.partialorder %v1255_v5, 0.0  ;;  %v1668_v13 = vmul.f32 0.01, %v1255_v5 }
 0x13e   :  { %v1714_v14 = vsel %vm1348_vm6, %v844_v4, %v1531_v11  ;;  %v1119_v15 = vpop.f32.mrf.mxu2  ;;  %2241 = vmatmul.msk.f32.gmra.mxu3 %vm206_vm1, %v190_v9 }
 0x13f   :  { %1898 = vst.msk [vmem:[%s3965_s3 + $0xb0] sm:$0xff] %vm1875_vm2, %v1714_v14  ;;  %v1760_v16 = vsel %vm1394_vm7, %v982_v6, %v1577_v12  ;;  %v1851_v17 = vsel %vm1485_vm8, %v1255_v5, %v1668_v13  ;;  %v1120_v18 = vadd.f32 %v3141_v10, %v1119_v15 }
 0x140   :  { %1944 = vst.msk [vmem:[%s3965_s3 + $0x220] sm:$0xff] %vm1875_vm2, %v1760_v16  ;;  %v148_v16 = vld [vmem:[%s3963_s0 + $0x430] sm:$0xff] }
 0x141   :  { %2035 = vst.msk [vmem:[%s3965_s3 + $0x4f8] sm:$0xff] %vm1875_vm2, %v1851_v17  ;;  %vm1440_vm9 = vcmp.gt.f32.partialorder %v1120_v18, 0.0  ;;  %v1623_v20 = vmul.f32 0.01, %v1120_v18  ;;  %v846_v21 = vpop.f32.mrf.mxu0  ;;  %v984_v22 = vpop.f32.mrf.mxu1 }
 0x142   :  { %v847_v25 = vadd.f32 %v3141_v10, %v846_v21  ;;  %v985_v26 = vadd.f32 %v3141_v10, %v984_v22  ;;  %v1257_v27 = vpop.f32.mrf.mxu3  ;;  %v102_v21 = vld [vmem:[%s3963_s0 + $0x2c0] sm:$0xff] }
 0x143   :  { %v1806_v28 = vsel %vm1440_vm9, %v1120_v18, %v1623_v20  ;;  %2196 = vmatmul.msk.f32.gmra.mxu2 %vm206_vm1, %v145_v19  ;;  %v1258_v29 = vadd.f32 %v3141_v10, %v1257_v27  ;;  %v56_v20 = vld [vmem:[%s3963_s0 + $0x150] sm:$0xff]  ;;  %v194_v27 = vld [vmem:[%s3963_s0 + $0x5a0] sm:$0xff] }
 0x144   :  { %1990 = vst.msk [vmem:[%s3965_s3 + $0x390] sm:$0xff] %vm1875_vm2, %v1806_v28  ;;  %vm1349_vm10 = vcmp.gt.f32.partialorder %v847_v25, 0.0  ;;  %v1532_v31 = vmul.f32 0.01, %v847_v25  ;;  %vm1395_vm11 = vcmp.gt.f32.partialorder %v985_v26, 0.0  ;;  %2104 = vmatmul.msk.f32.gmra.mxu0 %vm206_vm1, %v53_v23  ;;  %2150 = vmatmul.msk.f32.gmra.mxu1 %vm206_vm1, %v99_v24 }
 0x145   :  { %v1578_v32 = vmul.f32 0.01, %v985_v26  ;;  %vm1486_vm12 = vcmp.gt.f32.partialorder %v1258_v29, 0.0  ;;  %v1669_v33 = vmul.f32 0.01, %v1258_v29 }
 0x146   :  { %v1715_v34 = vsel %vm1349_vm10, %v847_v25, %v1532_v31  ;;  %v1122_v35 = vpop.f32.mrf.mxu2  ;;  %2242 = vmatmul.msk.f32.gmra.mxu3 %vm206_vm1, %v191_v30 }
 0x147   :  { %1899 = vst.msk [vmem:[%s3965_s3 + $0xb8] sm:$0xff] %vm1875_vm2, %v1715_v34  ;;  %v1761_v36 = vsel %vm1395_vm11, %v985_v26, %v1578_v32  ;;  %v1852_v37 = vsel %vm1486_vm12, %v1258_v29, %v1669_v33  ;;  %v1123_v38 = vadd.f32 %v3141_v10, %v1122_v35 }
 0x148   :  { %1945 = vst.msk [vmem:[%s3965_s3 + $0x228] sm:$0xff] %vm1875_vm2, %v1761_v36  ;;  %v149_v36 = vld [vmem:[%s3963_s0 + $0x438] sm:$0xff] }
 0x149   :  { %2036 = vst.msk [vmem:[%s3965_s3 + $0x500] sm:$0xff] %vm1875_vm2, %v1852_v37  ;;  %vm1441_vm13 = vcmp.gt.f32.partialorder %v1123_v38, 0.0  ;;  %v1624_v40 = vmul.f32 0.01, %v1123_v38  ;;  %v849_v41 = vpop.f32.mrf.mxu0  ;;  %v987_v42 = vpop.f32.mrf.mxu1 }
 0x14a   :  { %v850_v45 = vadd.f32 %v3141_v10, %v849_v41  ;;  %v988_v46 = vadd.f32 %v3141_v10, %v987_v42  ;;  %v1260_v47 = vpop.f32.mrf.mxu3  ;;  %v103_v41 = vld [vmem:[%s3963_s0 + $0x2c8] sm:$0xff] }
 0x14b   :  { %v1807_v48 = vsel %vm1441_vm13, %v1123_v38, %v1624_v40  ;;  %2197 = vmatmul.msk.f32.gmra.mxu2 %vm206_vm1, %v146_v39  ;;  %v1261_v49 = vadd.f32 %v3141_v10, %v1260_v47  ;;  %v57_v40 = vld [vmem:[%s3963_s0 + $0x158] sm:$0xff]  ;;  %v195_v47 = vld [vmem:[%s3963_s0 + $0x5a8] sm:$0xff] }
 0x14c   :  { %1991 = vst.msk [vmem:[%s3965_s3 + $0x398] sm:$0xff] %vm1875_vm2, %v1807_v48  ;;  %vm1350_vm14 = vcmp.gt.f32.partialorder %v850_v45, 0.0  ;;  %v1533_v51 = vmul.f32 0.01, %v850_v45  ;;  %vm1396_vm15 = vcmp.gt.f32.partialorder %v988_v46, 0.0  ;;  %2105 = vmatmul.msk.f32.gmra.mxu0 %vm206_vm1, %v54_v43  ;;  %2151 = vmatmul.msk.f32.gmra.mxu1 %vm206_vm1, %v100_v44 }
 0x14d   :  { %v1579_v52 = vmul.f32 0.01, %v988_v46  ;;  %vm1487_vm0 = vcmp.gt.f32.partialorder %v1261_v49, 0.0  ;;  %v1670_v53 = vmul.f32 0.01, %v1261_v49 }
 0x14e   :  { %v1716_v54 = vsel %vm1350_vm14, %v850_v45, %v1533_v51  ;;  %v1125_v55 = vpop.f32.mrf.mxu2  ;;  %2243 = vmatmul.msk.f32.gmra.mxu3 %vm206_vm1, %v192_v50 }
 0x14f   :  { %1900 = vst.msk [vmem:[%s3965_s3 + $0xc0] sm:$0xff] %vm1875_vm2, %v1716_v54  ;;  %v1762_v56 = vsel %vm1396_vm15, %v988_v46, %v1579_v52  ;;  %v1853_v57 = vsel %vm1487_vm0, %v1261_v49, %v1670_v53  ;;  %v1126_v58 = vadd.f32 %v3141_v10, %v1125_v55 }
 0x150   :  { %1946 = vst.msk [vmem:[%s3965_s3 + $0x230] sm:$0xff] %vm1875_vm2, %v1762_v56  ;;  %v150_v56 = vld [vmem:[%s3963_s0 + $0x440] sm:$0xff] }
 0x151   :  { %2037 = vst.msk [vmem:[%s3965_s3 + $0x508] sm:$0xff] %vm1875_vm2, %v1853_v57  ;;  %vm1442_vm3 = vcmp.gt.f32.partialorder %v1126_v58, 0.0  ;;  %v1625_v60 = vmul.f32 0.01, %v1126_v58  ;;  %v852_v61 = vpop.f32.mrf.mxu0  ;;  %v990_v62 = vpop.f32.mrf.mxu1 }
 0x152   :  { %v853_v1 = vadd.f32 %v3141_v10, %v852_v61  ;;  %v991_v2 = vadd.f32 %v3141_v10, %v990_v62  ;;  %v1263_v3 = vpop.f32.mrf.mxu3  ;;  %v104_v61 = vld [vmem:[%s3963_s0 + $0x2d0] sm:$0xff] }
 0x153   :  { %v1808_v4 = vsel %vm1442_vm3, %v1126_v58, %v1625_v60  ;;  %2198 = vmatmul.msk.f32.gmra.mxu2 %vm206_vm1, %v147_v59  ;;  %v1264_v6 = vadd.f32 %v3141_v10, %v1263_v3  ;;  %v58_v60 = vld [vmem:[%s3963_s0 + $0x160] sm:$0xff]  ;;  %v196_v3 = vld [vmem:[%s3963_s0 + $0x5b0] sm:$0x3] }
 0x154   :  { %1992 = vst.msk [vmem:[%s3965_s3 + $0x3a0] sm:$0xff] %vm1875_vm2, %v1808_v4  ;;  %vm1351_vm4 = vcmp.gt.f32.partialorder %v853_v1, 0.0  ;;  %v1534_v8 = vmul.f32 0.01, %v853_v1  ;;  %vm1397_vm5 = vcmp.gt.f32.partialorder %v991_v2, 0.0  ;;  %2106 = vmatmul.msk.f32.gmra.mxu0 %vm206_vm1, %v55_v63  ;;  %2152 = vmatmul.msk.f32.gmra.mxu1 %vm206_vm1, %v101_v0 }
 0x155   :  { %v1580_v5 = vmul.f32 0.01, %v991_v2  ;;  %vm1488_vm6 = vcmp.gt.f32.partialorder %v1264_v6, 0.0  ;;  %v1671_v9 = vmul.f32 0.01, %v1264_v6 }
 0x156   :  { %v1717_v11 = vsel %vm1351_vm4, %v853_v1, %v1534_v8  ;;  %v1128_v12 = vpop.f32.mrf.mxu2  ;;  %2244 = vmatmul.msk.f32.gmra.mxu3 %vm206_vm1, %v193_v7 }
 0x157   :  { %1901 = vst.msk [vmem:[%s3965_s3 + $0xc8] sm:$0xff] %vm1875_vm2, %v1717_v11  ;;  %v1763_v13 = vsel %vm1397_vm5, %v991_v2, %v1580_v5  ;;  %v1854_v14 = vsel %vm1488_vm6, %v1264_v6, %v1671_v9  ;;  %v1129_v15 = vadd.f32 %v3141_v10, %v1128_v12 }
 0x158   :  { %1947 = vst.msk [vmem:[%s3965_s3 + $0x238] sm:$0xff] %vm1875_vm2, %v1763_v13  ;;  %v151_v13 = vld [vmem:[%s3963_s0 + $0x448] sm:$0xff] }
 0x159   :  { %2038 = vst.msk [vmem:[%s3965_s3 + $0x510] sm:$0xff] %vm1875_vm2, %v1854_v14  ;;  %vm1443_vm7 = vcmp.gt.f32.partialorder %v1129_v15, 0.0  ;;  %v1626_v17 = vmul.f32 0.01, %v1129_v15  ;;  %v855_v18 = vpop.f32.mrf.mxu0  ;;  %v993_v19 = vpop.f32.mrf.mxu1 }
 0x15a   :  { %v856_v22 = vadd.f32 %v3141_v10, %v855_v18  ;;  %v994_v23 = vadd.f32 %v3141_v10, %v993_v19  ;;  %v1266_v24 = vpop.f32.mrf.mxu3  ;;  %v105_v18 = vld [vmem:[%s3963_s0 + $0x2d8] sm:$0xff] }
 0x15b   :  { %v1809_v25 = vsel %vm1443_vm7, %v1129_v15, %v1626_v17  ;;  %2199 = vmatmul.msk.f32.gmra.mxu2 %vm206_vm1, %v148_v16  ;;  %v1267_v26 = vadd.f32 %v3141_v10, %v1266_v24  ;;  %v59_v17 = vld [vmem:[%s3963_s0 + $0x168] sm:$0xff] }
 0x15c   :  { %1993 = vst.msk [vmem:[%s3965_s3 + $0x3a8] sm:$0xff] %vm1875_vm2, %v1809_v25  ;;  %vm1352_vm8 = vcmp.gt.f32.partialorder %v856_v22, 0.0  ;;  %v1535_v28 = vmul.f32 0.01, %v856_v22  ;;  %vm1398_vm9 = vcmp.gt.f32.partialorder %v994_v23, 0.0  ;;  %2107 = vmatmul.msk.f32.gmra.mxu0 %vm206_vm1, %v56_v20  ;;  %2153 = vmatmul.msk.f32.gmra.mxu1 %vm206_vm1, %v102_v21 }
 0x15d   :  { %v1581_v29 = vmul.f32 0.01, %v994_v23  ;;  %vm1489_vm10 = vcmp.gt.f32.partialorder %v1267_v26, 0.0  ;;  %v1672_v30 = vmul.f32 0.01, %v1267_v26 }
 0x15e   :  { %v1718_v31 = vsel %vm1352_vm8, %v856_v22, %v1535_v28  ;;  %v1131_v32 = vpop.f32.mrf.mxu2  ;;  %2245 = vmatmul.msk.f32.gmra.mxu3 %vm206_vm1, %v194_v27 }
 0x15f   :  { %1902 = vst.msk [vmem:[%s3965_s3 + $0xd0] sm:$0xff] %vm1875_vm2, %v1718_v31  ;;  %v1764_v33 = vsel %vm1398_vm9, %v994_v23, %v1581_v29  ;;  %v1855_v34 = vsel %vm1489_vm10, %v1267_v26, %v1672_v30  ;;  %v1132_v35 = vadd.f32 %v3141_v10, %v1131_v32 }
 0x160   :  { %1948 = vst.msk [vmem:[%s3965_s3 + $0x240] sm:$0xff] %vm1875_vm2, %v1764_v33 }
 0x161   :  { %2039 = vst.msk [vmem:[%s3965_s3 + $0x518] sm:$0xff] %vm1875_vm2, %v1855_v34  ;;  %vm1444_vm11 = vcmp.gt.f32.partialorder %v1132_v35, 0.0  ;;  %v1627_v37 = vmul.f32 0.01, %v1132_v35  ;;  %v858_v38 = vpop.f32.mrf.mxu0  ;;  %v996_v39 = vpop.f32.mrf.mxu1 }
 0x162   :  { %v859_v42 = vadd.f32 %v3141_v10, %v858_v38  ;;  %v997_v43 = vadd.f32 %v3141_v10, %v996_v39  ;;  %v1269_v44 = vpop.f32.mrf.mxu3 }
 0x163   :  { %v1810_v45 = vsel %vm1444_vm11, %v1132_v35, %v1627_v37  ;;  %2200 = vmatmul.msk.f32.gmra.mxu2 %vm206_vm1, %v149_v36  ;;  %v1270_v46 = vadd.f32 %v3141_v10, %v1269_v44 }
 0x164   :  { %1994 = vst.msk [vmem:[%s3965_s3 + $0x3b0] sm:$0xff] %vm1875_vm2, %v1810_v45  ;;  %vm1353_vm12 = vcmp.gt.f32.partialorder %v859_v42, 0.0  ;;  %v1536_v48 = vmul.f32 0.01, %v859_v42  ;;  %vm1399_vm13 = vcmp.gt.f32.partialorder %v997_v43, 0.0  ;;  %2108 = vmatmul.msk.f32.gmra.mxu0 %vm206_vm1, %v57_v40  ;;  %2154 = vmatmul.msk.f32.gmra.mxu1 %vm206_vm1, %v103_v41 }
 0x165   :  { %v1582_v49 = vmul.f32 0.01, %v997_v43  ;;  %vm1490_vm14 = vcmp.gt.f32.partialorder %v1270_v46, 0.0  ;;  %v1673_v50 = vmul.f32 0.01, %v1270_v46 }
 0x166   :  { %v1719_v51 = vsel %vm1353_vm12, %v859_v42, %v1536_v48  ;;  %v1134_v52 = vpop.f32.mrf.mxu2  ;;  %2246 = vmatmul.msk.f32.gmra.mxu3 %vm206_vm1, %v195_v47 }
 0x167   :  { %1903 = vst.msk [vmem:[%s3965_s3 + $0xd8] sm:$0xff] %vm1875_vm2, %v1719_v51  ;;  %v1765_v53 = vsel %vm1399_vm13, %v997_v43, %v1582_v49  ;;  %v1856_v54 = vsel %vm1490_vm14, %v1270_v46, %v1673_v50  ;;  %v1135_v55 = vadd.f32 %v3141_v10, %v1134_v52 }
 0x168   :  { %1949 = vst.msk [vmem:[%s3965_s3 + $0x248] sm:$0xff] %vm1875_vm2, %v1765_v53 }
 0x169   :  { %2040 = vst.msk [vmem:[%s3965_s3 + $0x520] sm:$0xff] %vm1875_vm2, %v1856_v54  ;;  %vm1445_vm15 = vcmp.gt.f32.partialorder %v1135_v55, 0.0  ;;  %v1628_v57 = vmul.f32 0.01, %v1135_v55  ;;  %v861_v58 = vpop.f32.mrf.mxu0  ;;  %v999_v59 = vpop.f32.mrf.mxu1 }
 0x16a   :  { %v862_v62 = vadd.f32 %v3141_v10, %v861_v58  ;;  %v1000_v63 = vadd.f32 %v3141_v10, %v999_v59  ;;  %v1272_v0 = vpop.f32.mrf.mxu3 }
 0x16b   :  { %v1811_v1 = vsel %vm1445_vm15, %v1135_v55, %v1628_v57  ;;  %2201 = vmatmul.msk.f32.gmra.mxu2 %vm206_vm1, %v150_v56  ;;  %v1273_v2 = vadd.f32 %v3141_v10, %v1272_v0 }
 0x16c   :  { %1995 = vst.msk [vmem:[%s3965_s3 + $0x3b8] sm:$0xff] %vm1875_vm2, %v1811_v1  ;;  %vm1354_vm0 = vcmp.gt.f32.partialorder %v862_v62, 0.0  ;;  %v1537_v4 = vmul.f32 0.01, %v862_v62  ;;  %vm1400_vm3 = vcmp.gt.f32.partialorder %v1000_v63, 0.0  ;;  %2109 = vmatmul.msk.f32.gmra.mxu0 %vm206_vm1, %v58_v60  ;;  %2155 = vmatmul.msk.f32.gmra.mxu1 %vm206_vm1, %v104_v61 }
 0x16d   :  { %v1583_v6 = vmul.f32 0.01, %v1000_v63  ;;  %vm1491_vm4 = vcmp.gt.f32.partialorder %v1273_v2, 0.0  ;;  %v1674_v7 = vmul.f32 0.01, %v1273_v2 }
 0x16e   :  { %v1720_v8 = vsel %vm1354_vm0, %v862_v62, %v1537_v4  ;;  %v1137_v5 = vpop.f32.mrf.mxu2  ;;  %2247 = vmatmul.msk.f32.gmra.mxu3 %vm206_vm1, %v196_v3 }
 0x16f   :  { %1904 = vst.msk [vmem:[%s3965_s3 + $0xe0] sm:$0xff] %vm1875_vm2, %v1720_v8  ;;  %v1766_v9 = vsel %vm1400_vm3, %v1000_v63, %v1583_v6  ;;  %v1857_v11 = vsel %vm1491_vm4, %v1273_v2, %v1674_v7  ;;  %v1138_v12 = vadd.f32 %v3141_v10, %v1137_v5 }
 0x170   :  { %1950 = vst.msk [vmem:[%s3965_s3 + $0x250] sm:$0xff] %vm1875_vm2, %v1766_v9 }
 0x171   :  { %2041 = vst.msk [vmem:[%s3965_s3 + $0x528] sm:$0xff] %vm1875_vm2, %v1857_v11  ;;  %vm1446_vm5 = vcmp.gt.f32.partialorder %v1138_v12, 0.0  ;;  %v1629_v14 = vmul.f32 0.01, %v1138_v12  ;;  %v864_v15 = vpop.f32.mrf.mxu0  ;;  %v1002_v16 = vpop.f32.mrf.mxu1 }
 0x172   :  { %v865_v19 = vadd.f32 %v3141_v10, %v864_v15  ;;  %v1003_v20 = vadd.f32 %v3141_v10, %v1002_v16  ;;  %v1275_v21 = vpop.f32.mrf.mxu3 }
 0x173   :  { %v1812_v22 = vsel %vm1446_vm5, %v1138_v12, %v1629_v14  ;;  %2202 = vmatmul.msk.f32.gmra.mxu2 %vm206_vm1, %v151_v13  ;;  %v1276_v23 = vadd.f32 %v3141_v10, %v1275_v21 }
 0x174   :  { %1996 = vst.msk [vmem:[%s3965_s3 + $0x3c0] sm:$0xff] %vm1875_vm2, %v1812_v22  ;;  %vm1355_vm6 = vcmp.gt.f32.partialorder %v865_v19, 0.0  ;;  %v1538_v24 = vmul.f32 0.01, %v865_v19  ;;  %vm1401_vm7 = vcmp.gt.f32.partialorder %v1003_v20, 0.0  ;;  %2110 = vmatmul.msk.f32.gmra.mxu0 %vm206_vm1, %v59_v17  ;;  %2156 = vmatmul.msk.f32.gmra.mxu1 %vm206_vm1, %v105_v18 }
 0x175   :  { %v1584_v25 = vmul.f32 0.01, %v1003_v20  ;;  %vm1492_vm8 = vcmp.gt.f32.partialorder %v1276_v23, 0.0  ;;  %v1675_v26 = vmul.f32 0.01, %v1276_v23 }
 0x176   :  { %v1721_v27 = vsel %vm1355_vm6, %v865_v19, %v1538_v24  ;;  %v1140_v28 = vpop.f32.mrf.mxu2 }
 0x177   :  { %1905 = vst.msk [vmem:[%s3965_s3 + $0xe8] sm:$0xff] %vm1875_vm2, %v1721_v27  ;;  %v1767_v29 = vsel %vm1401_vm7, %v1003_v20, %v1584_v25  ;;  %v1858_v30 = vsel %vm1492_vm8, %v1276_v23, %v1675_v26  ;;  %v1141_v31 = vadd.f32 %v3141_v10, %v1140_v28  ;;  %v3697_v20 = vld [vmem:[%s3964_s2] ss:$0 sm:$0xff] }
 0x178   :  { %1951 = vst.msk [vmem:[%s3965_s3 + $0x258] sm:$0xff] %vm1875_vm2, %v1767_v29 }
 0x179   :  { %2042 = vst.msk [vmem:[%s3965_s3 + $0x530] sm:$0xff] %vm1875_vm2, %v1858_v30  ;;  %vm1447_vm1 = vcmp.gt.f32.partialorder %v1141_v31, 0.0  ;;  %v1630_v32 = vmul.f32 0.01, %v1141_v31  ;;  %v867_v33 = vpop.f32.mrf.mxu0  ;;  %v1005_v34 = vpop.f32.mrf.mxu1 }
 0x17a   :  { %v868_v35 = vadd.f32 %v3141_v10, %v867_v33  ;;  %v1006_v36 = vadd.f32 %v3141_v10, %v1005_v34  ;;  %v1278_v37 = vpop.f32.mrf.mxu3 }
 0x17b   :  { %v1813_v38 = vsel %vm1447_vm1, %v1141_v31, %v1630_v32  ;;  %v1279_v39 = vadd.f32 %v3141_v10, %v1278_v37 }
 0x17c   :  { %1997 = vst.msk [vmem:[%s3965_s3 + $0x3c8] sm:$0xff] %vm1875_vm2, %v1813_v38  ;;  %vm1356_vm9 = vcmp.gt.f32.partialorder %v868_v35, 0.0  ;;  %v1539_v40 = vmul.f32 0.01, %v868_v35  ;;  %vm1402_vm10 = vcmp.gt.f32.partialorder %v1006_v36, 0.0 }
 0x17d   :  { %v1585_v41 = vmul.f32 0.01, %v1006_v36  ;;  %vm1493_vm11 = vcmp.gt.f32.partialorder %v1279_v39, 0.0  ;;  %v1676_v42 = vmul.f32 0.01, %v1279_v39 }
 0x17e   :  { %v1722_v43 = vsel %vm1356_vm9, %v868_v35, %v1539_v40  ;;  %v1143_v44 = vpop.f32.mrf.mxu2 }
 0x17f   :  { %1906 = vst.msk [vmem:[%s3965_s3 + $0xf0] sm:$0xff] %vm1875_vm2, %v1722_v43  ;;  %v1768_v45 = vsel %vm1402_vm10, %v1006_v36, %v1585_v41  ;;  %v1859_v46 = vsel %vm1493_vm11, %v1279_v39, %v1676_v42  ;;  %v1144_v47 = vadd.f32 %v3141_v10, %v1143_v44 }
 0x180   :  { %1952 = vst.msk [vmem:[%s3965_s3 + $0x260] sm:$0xff] %vm1875_vm2, %v1768_v45 }
 0x181   :  { %2043 = vst.msk [vmem:[%s3965_s3 + $0x538] sm:$0xff] %vm1875_vm2, %v1859_v46  ;;  %vm1448_vm12 = vcmp.gt.f32.partialorder %v1144_v47, 0.0  ;;  %v1631_v48 = vmul.f32 0.01, %v1144_v47  ;;  %v870_v49 = vpop.f32.mrf.mxu0  ;;  %v1008_v50 = vpop.f32.mrf.mxu1 }
 0x182   :  { %v871_v51 = vadd.f32 %v3141_v10, %v870_v49  ;;  %v1009_v52 = vadd.f32 %v3141_v10, %v1008_v50  ;;  %v1281_v53 = vpop.f32.mrf.mxu3 }
 0x183   :  { %v1814_v54 = vsel %vm1448_vm12, %v1144_v47, %v1631_v48  ;;  %v1282_v55 = vadd.f32 %v3141_v10, %v1281_v53 }
 0x184   :  { %1998 = vst.msk [vmem:[%s3965_s3 + $0x3d0] sm:$0xff] %vm1875_vm2, %v1814_v54  ;;  %vm1357_vm13 = vcmp.gt.f32.partialorder %v871_v51, 0.0  ;;  %v1540_v56 = vmul.f32 0.01, %v871_v51  ;;  %vm1403_vm14 = vcmp.gt.f32.partialorder %v1009_v52, 0.0 }
 0x185   :  { %v1586_v57 = vmul.f32 0.01, %v1009_v52  ;;  %vm1494_vm15 = vcmp.gt.f32.partialorder %v1282_v55, 0.0  ;;  %v1677_v58 = vmul.f32 0.01, %v1282_v55 }
 0x186   :  { %v1723_v59 = vsel %vm1357_vm13, %v871_v51, %v1540_v56  ;;  %v1146_v60 = vpop.f32.mrf.mxu2 }
 0x187   :  { %1907 = vst.msk [vmem:[%s3965_s3 + $0xf8] sm:$0xff] %vm1875_vm2, %v1723_v59  ;;  %v1769_v61 = vsel %vm1403_vm14, %v1009_v52, %v1586_v57  ;;  %v1860_v62 = vsel %vm1494_vm15, %v1282_v55, %v1677_v58  ;;  %v1147_v63 = vadd.f32 %v3141_v10, %v1146_v60 }
 0x188   :  { %1953 = vst.msk [vmem:[%s3965_s3 + $0x268] sm:$0xff] %vm1875_vm2, %v1769_v61 }
 0x189   :  { %2044 = vst.msk [vmem:[%s3965_s3 + $0x540] sm:$0xff] %vm1875_vm2, %v1860_v62  ;;  %vm1449_vm0 = vcmp.gt.f32.partialorder %v1147_v63, 0.0  ;;  %v1632_v0 = vmul.f32 0.01, %v1147_v63  ;;  %v873_v1 = vpop.f32.mrf.mxu0  ;;  %v1011_v2 = vpop.f32.mrf.mxu1 }
 0x18a   :  { %v874_v3 = vadd.f32 %v3141_v10, %v873_v1  ;;  %v1012_v4 = vadd.f32 %v3141_v10, %v1011_v2  ;;  %v1284_v6 = vpop.f32.mrf.mxu3 }
 0x18b   :  { %v1815_v7 = vsel %vm1449_vm0, %v1147_v63, %v1632_v0  ;;  %v1285_v8 = vadd.f32 %v3141_v10, %v1284_v6 }
 0x18c   :  { %1999 = vst.msk [vmem:[%s3965_s3 + $0x3d8] sm:$0xff] %vm1875_vm2, %v1815_v7  ;;  %vm1358_vm3 = vcmp.gt.f32.partialorder %v874_v3, 0.0  ;;  %v1541_v5 = vmul.f32 0.01, %v874_v3  ;;  %vm1404_vm4 = vcmp.gt.f32.partialorder %v1012_v4, 0.0 }
 0x18d   :  { %v1587_v9 = vmul.f32 0.01, %v1012_v4  ;;  %vm1495_vm5 = vcmp.gt.f32.partialorder %v1285_v8, 0.0  ;;  %v1678_v11 = vmul.f32 0.01, %v1285_v8 }
 0x18e   :  { %v1724_v12 = vsel %vm1358_vm3, %v874_v3, %v1541_v5  ;;  %v1149_v13 = vpop.f32.mrf.mxu2 }
 0x18f   :  { %1908 = vst.msk [vmem:[%s3965_s3 + $0x100] sm:$0xff] %vm1875_vm2, %v1724_v12  ;;  %v1770_v14 = vsel %vm1404_vm4, %v1012_v4, %v1587_v9  ;;  %v1861_v15 = vsel %vm1495_vm5, %v1285_v8, %v1678_v11  ;;  %v1150_v16 = vadd.f32 %v3141_v10, %v1149_v13 }
 0x190   :  { %1954 = vst.msk [vmem:[%s3965_s3 + $0x270] sm:$0xff] %vm1875_vm2, %v1770_v14 }
 0x191   :  { %2045 = vst.msk [vmem:[%s3965_s3 + $0x548] sm:$0xff] %vm1875_vm2, %v1861_v15  ;;  %vm1450_vm6 = vcmp.gt.f32.partialorder %v1150_v16, 0.0  ;;  %v1633_v17 = vmul.f32 0.01, %v1150_v16  ;;  %v876_v18 = vpop.f32.mrf.mxu0  ;;  %v1014_v19 = vpop.f32.mrf.mxu1 }
 0x192   :  { %v877_v10 = vadd.f32 %v3697_v20, %v876_v18  ;;  %v1015_v21 = vadd.f32 %v3697_v20, %v1014_v19  ;;  %v1287_v22 = vpop.f32.mrf.mxu3 }
 0x193   :  { %v1816_v23 = vsel %vm1450_vm6, %v1150_v16, %v1633_v17  ;;  %v1288_v24 = vadd.f32 %v3697_v20, %v1287_v22 }
 0x194   :  { %2000 = vst.msk [vmem:[%s3965_s3 + $0x3e0] sm:$0xff] %vm1875_vm2, %v1816_v23  ;;  %vm1359_vm7 = vcmp.gt.f32.partialorder %v877_v10, 0.0  ;;  %v1542_v25 = vmul.f32 0.01, %v877_v10  ;;  %vm1405_vm8 = vcmp.gt.f32.partialorder %v1015_v21, 0.0 }
 0x195   :  { %v1588_v26 = vmul.f32 0.01, %v1015_v21  ;;  %vm1496_vm1 = vcmp.gt.f32.partialorder %v1288_v24, 0.0  ;;  %v1679_v27 = vmul.f32 0.01, %v1288_v24 }
 0x196   :  { %v1725_v28 = vsel %vm1359_vm7, %v877_v10, %v1542_v25  ;;  %v1152_v29 = vpop.f32.mrf.mxu2 }
 0x197   :  { %1909 = vst.msk [vmem:[%s3965_s3 + $0x108] sm:$0xff] %vm1875_vm2, %v1725_v28  ;;  %v1771_v30 = vsel %vm1405_vm8, %v1015_v21, %v1588_v26  ;;  %v1862_v31 = vsel %vm1496_vm1, %v1288_v24, %v1679_v27  ;;  %v1153_v32 = vadd.f32 %v3697_v20, %v1152_v29 }
 0x198   :  { %1955 = vst.msk [vmem:[%s3965_s3 + $0x278] sm:$0xff] %vm1875_vm2, %v1771_v30 }
 0x199   :  { %2046 = vst.msk [vmem:[%s3965_s3 + $0x550] sm:$0xff] %vm1875_vm2, %v1862_v31  ;;  %vm1451_vm9 = vcmp.gt.f32.partialorder %v1153_v32, 0.0  ;;  %v1634_v33 = vmul.f32 0.01, %v1153_v32  ;;  %v879_v34 = vpop.f32.mrf.mxu0  ;;  %v1017_v35 = vpop.f32.mrf.mxu1 }
 0x19a   :  { %v880_v36 = vadd.f32 %v3697_v20, %v879_v34  ;;  %v1018_v37 = vadd.f32 %v3697_v20, %v1017_v35  ;;  %v1290_v38 = vpop.f32.mrf.mxu3 }
 0x19b   :  { %v1817_v39 = vsel %vm1451_vm9, %v1153_v32, %v1634_v33  ;;  %v1291_v40 = vadd.f32 %v3697_v20, %v1290_v38 }
 0x19c   :  { %2001 = vst.msk [vmem:[%s3965_s3 + $0x3e8] sm:$0xff] %vm1875_vm2, %v1817_v39  ;;  %vm1360_vm10 = vcmp.gt.f32.partialorder %v880_v36, 0.0  ;;  %v1543_v41 = vmul.f32 0.01, %v880_v36  ;;  %vm1406_vm11 = vcmp.gt.f32.partialorder %v1018_v37, 0.0 }
 0x19d   :  { %v1589_v42 = vmul.f32 0.01, %v1018_v37  ;;  %vm1497_vm12 = vcmp.gt.f32.partialorder %v1291_v40, 0.0  ;;  %v1680_v43 = vmul.f32 0.01, %v1291_v40 }
 0x19e   :  { %v1726_v44 = vsel %vm1360_vm10, %v880_v36, %v1543_v41  ;;  %v1155_v45 = vpop.f32.mrf.mxu2 }
 0x19f   :  { %1910 = vst.msk [vmem:[%s3965_s3 + $0x110] sm:$0xff] %vm1875_vm2, %v1726_v44  ;;  %v1772_v46 = vsel %vm1406_vm11, %v1018_v37, %v1589_v42  ;;  %v1863_v47 = vsel %vm1497_vm12, %v1291_v40, %v1680_v43  ;;  %v1156_v48 = vadd.f32 %v3697_v20, %v1155_v45 }
 0x1a0   :  { %1956 = vst.msk [vmem:[%s3965_s3 + $0x280] sm:$0xff] %vm1875_vm2, %v1772_v46 }
 0x1a1   :  { %2047 = vst.msk [vmem:[%s3965_s3 + $0x558] sm:$0xff] %vm1875_vm2, %v1863_v47  ;;  %vm1452_vm13 = vcmp.gt.f32.partialorder %v1156_v48, 0.0  ;;  %v1635_v49 = vmul.f32 0.01, %v1156_v48  ;;  %v882_v50 = vpop.f32.mrf.mxu0  ;;  %v1020_v51 = vpop.f32.mrf.mxu1 }
 0x1a2   :  { %v883_v52 = vadd.f32 %v3697_v20, %v882_v50  ;;  %v1021_v53 = vadd.f32 %v3697_v20, %v1020_v51  ;;  %v1293_v54 = vpop.f32.mrf.mxu3 }
 0x1a3   :  { %v1818_v55 = vsel %vm1452_vm13, %v1156_v48, %v1635_v49  ;;  %v1294_v56 = vadd.f32 %v3697_v20, %v1293_v54 }
 0x1a4   :  { %2002 = vst.msk [vmem:[%s3965_s3 + $0x3f0] sm:$0xff] %vm1875_vm2, %v1818_v55  ;;  %vm1361_vm14 = vcmp.gt.f32.partialorder %v883_v52, 0.0  ;;  %v1544_v57 = vmul.f32 0.01, %v883_v52  ;;  %vm1407_vm15 = vcmp.gt.f32.partialorder %v1021_v53, 0.0 }
 0x1a5   :  { %v1590_v58 = vmul.f32 0.01, %v1021_v53  ;;  %vm1498_vm0 = vcmp.gt.f32.partialorder %v1294_v56, 0.0  ;;  %v1681_v59 = vmul.f32 0.01, %v1294_v56 }
 0x1a6   :  { %v1727_v60 = vsel %vm1361_vm14, %v883_v52, %v1544_v57  ;;  %v1158_v61 = vpop.f32.mrf.mxu2 }
 0x1a7   :  { %1911 = vst.msk [vmem:[%s3965_s3 + $0x118] sm:$0xff] %vm1875_vm2, %v1727_v60  ;;  %v1773_v62 = vsel %vm1407_vm15, %v1021_v53, %v1590_v58  ;;  %v1864_v63 = vsel %vm1498_vm0, %v1294_v56, %v1681_v59  ;;  %v1159_v0 = vadd.f32 %v3697_v20, %v1158_v61 }
 0x1a8   :  { %1957 = vst.msk [vmem:[%s3965_s3 + $0x288] sm:$0xff] %vm1875_vm2, %v1773_v62 }
 0x1a9   :  { %2048 = vst.msk [vmem:[%s3965_s3 + $0x560] sm:$0xff] %vm1875_vm2, %v1864_v63  ;;  %vm1453_vm3 = vcmp.gt.f32.partialorder %v1159_v0, 0.0  ;;  %v1636_v1 = vmul.f32 0.01, %v1159_v0  ;;  %v885_v2 = vpop.f32.mrf.mxu0  ;;  %v1023_v3 = vpop.f32.mrf.mxu1 }
 0x1aa   :  { %v886_v4 = vadd.f32 %v3697_v20, %v885_v2  ;;  %v1024_v6 = vadd.f32 %v3697_v20, %v1023_v3  ;;  %v1296_v7 = vpop.f32.mrf.mxu3 }
 0x1ab   :  { %v1819_v8 = vsel %vm1453_vm3, %v1159_v0, %v1636_v1  ;;  %v1297_v5 = vadd.f32 %v3697_v20, %v1296_v7 }
 0x1ac   :  { %2003 = vst.msk [vmem:[%s3965_s3 + $0x3f8] sm:$0xff] %vm1875_vm2, %v1819_v8  ;;  %vm1362_vm4 = vcmp.gt.f32.partialorder %v886_v4, 0.0  ;;  %v1545_v9 = vmul.f32 0.01, %v886_v4  ;;  %vm1408_vm5 = vcmp.gt.f32.partialorder %v1024_v6, 0.0 }
 0x1ad   :  { %v1591_v11 = vmul.f32 0.01, %v1024_v6  ;;  %vm1499_vm6 = vcmp.gt.f32.partialorder %v1297_v5, 0.0  ;;  %v1682_v12 = vmul.f32 0.01, %v1297_v5 }
 0x1ae   :  { %v1728_v13 = vsel %vm1362_vm4, %v886_v4, %v1545_v9  ;;  %v1161_v14 = vpop.f32.mrf.mxu2 }
 0x1af   :  { %1912 = vst.msk [vmem:[%s3965_s3 + $0x120] sm:$0xff] %vm1875_vm2, %v1728_v13  ;;  %v1774_v15 = vsel %vm1408_vm5, %v1024_v6, %v1591_v11  ;;  %v1865_v16 = vsel %vm1499_vm6, %v1297_v5, %v1682_v12  ;;  %v1162_v17 = vadd.f32 %v3697_v20, %v1161_v14 }
 0x1b0   :  { %1958 = vst.msk [vmem:[%s3965_s3 + $0x290] sm:$0xff] %vm1875_vm2, %v1774_v15 }
 0x1b1   :  { %2049 = vst.msk [vmem:[%s3965_s3 + $0x568] sm:$0xff] %vm1875_vm2, %v1865_v16  ;;  %vm1454_vm7 = vcmp.gt.f32.partialorder %v1162_v17, 0.0  ;;  %v1637_v18 = vmul.f32 0.01, %v1162_v17  ;;  %v888_v19 = vpop.f32.mrf.mxu0  ;;  %v1026_v10 = vpop.f32.mrf.mxu1 }
 0x1b2   :  { %v889_v21 = vadd.f32 %v3697_v20, %v888_v19  ;;  %v1027_v22 = vadd.f32 %v3697_v20, %v1026_v10  ;;  %v1299_v23 = vpop.f32.mrf.mxu3 }
 0x1b3   :  { %v1820_v24 = vsel %vm1454_vm7, %v1162_v17, %v1637_v18  ;;  %v1300_v25 = vadd.f32 %v3697_v20, %v1299_v23 }
 0x1b4   :  { %2004 = vst.msk [vmem:[%s3965_s3 + $0x400] sm:$0xff] %vm1875_vm2, %v1820_v24  ;;  %vm1363_vm8 = vcmp.gt.f32.partialorder %v889_v21, 0.0  ;;  %v1546_v26 = vmul.f32 0.01, %v889_v21  ;;  %vm1409_vm1 = vcmp.gt.f32.partialorder %v1027_v22, 0.0 }
 0x1b5   :  { %v1592_v27 = vmul.f32 0.01, %v1027_v22  ;;  %vm1500_vm9 = vcmp.gt.f32.partialorder %v1300_v25, 0.0  ;;  %v1683_v28 = vmul.f32 0.01, %v1300_v25 }
 0x1b6   :  { %v1729_v29 = vsel %vm1363_vm8, %v889_v21, %v1546_v26  ;;  %v1164_v30 = vpop.f32.mrf.mxu2 }
 0x1b7   :  { %1913 = vst.msk [vmem:[%s3965_s3 + $0x128] sm:$0xff] %vm1875_vm2, %v1729_v29  ;;  %v1775_v31 = vsel %vm1409_vm1, %v1027_v22, %v1592_v27  ;;  %v1866_v32 = vsel %vm1500_vm9, %v1300_v25, %v1683_v28  ;;  %v1165_v33 = vadd.f32 %v3697_v20, %v1164_v30 }
 0x1b8   :  { %1959 = vst.msk [vmem:[%s3965_s3 + $0x298] sm:$0xff] %vm1875_vm2, %v1775_v31 }
 0x1b9   :  { %2050 = vst.msk [vmem:[%s3965_s3 + $0x570] sm:$0xff] %vm1875_vm2, %v1866_v32  ;;  %vm1455_vm10 = vcmp.gt.f32.partialorder %v1165_v33, 0.0  ;;  %v1638_v34 = vmul.f32 0.01, %v1165_v33  ;;  %v891_v35 = vpop.f32.mrf.mxu0  ;;  %v1029_v36 = vpop.f32.mrf.mxu1 }
 0x1ba   :  { %v892_v37 = vadd.f32 %v3697_v20, %v891_v35  ;;  %v1030_v38 = vadd.f32 %v3697_v20, %v1029_v36  ;;  %v1302_v39 = vpop.f32.mrf.mxu3 }
 0x1bb   :  { %v1821_v40 = vsel %vm1455_vm10, %v1165_v33, %v1638_v34  ;;  %v1303_v41 = vadd.f32 %v3697_v20, %v1302_v39 }
 0x1bc   :  { %2005 = vst.msk [vmem:[%s3965_s3 + $0x408] sm:$0xff] %vm1875_vm2, %v1821_v40  ;;  %vm1364_vm11 = vcmp.gt.f32.partialorder %v892_v37, 0.0  ;;  %v1547_v42 = vmul.f32 0.01, %v892_v37  ;;  %vm1410_vm12 = vcmp.gt.f32.partialorder %v1030_v38, 0.0 }
 0x1bd   :  { %v1593_v43 = vmul.f32 0.01, %v1030_v38  ;;  %vm1501_vm13 = vcmp.gt.f32.partialorder %v1303_v41, 0.0  ;;  %v1684_v44 = vmul.f32 0.01, %v1303_v41 }
 0x1be   :  { %v1730_v45 = vsel %vm1364_vm11, %v892_v37, %v1547_v42  ;;  %v1167_v46 = vpop.f32.mrf.mxu2 }
 0x1bf   :  { %1914 = vst.msk [vmem:[%s3965_s3 + $0x130] sm:$0xff] %vm1875_vm2, %v1730_v45  ;;  %v1776_v47 = vsel %vm1410_vm12, %v1030_v38, %v1593_v43  ;;  %v1867_v48 = vsel %vm1501_vm13, %v1303_v41, %v1684_v44  ;;  %v1168_v49 = vadd.f32 %v3697_v20, %v1167_v46 }
 0x1c0   :  { %1960 = vst.msk [vmem:[%s3965_s3 + $0x2a0] sm:$0xff] %vm1875_vm2, %v1776_v47 }
 0x1c1   :  { %2051 = vst.msk [vmem:[%s3965_s3 + $0x578] sm:$0xff] %vm1875_vm2, %v1867_v48  ;;  %vm1456_vm14 = vcmp.gt.f32.partialorder %v1168_v49, 0.0  ;;  %v1639_v50 = vmul.f32 0.01, %v1168_v49  ;;  %v894_v51 = vpop.f32.mrf.mxu0  ;;  %v1032_v52 = vpop.f32.mrf.mxu1 }
 0x1c2   :  { %v895_v53 = vadd.f32 %v3697_v20, %v894_v51  ;;  %v1033_v54 = vadd.f32 %v3697_v20, %v1032_v52  ;;  %v1305_v55 = vpop.f32.mrf.mxu3 }
 0x1c3   :  { %v1822_v56 = vsel %vm1456_vm14, %v1168_v49, %v1639_v50  ;;  %v1306_v57 = vadd.f32 %v3697_v20, %v1305_v55 }
 0x1c4   :  { %2006 = vst.msk [vmem:[%s3965_s3 + $0x410] sm:$0xff] %vm1875_vm2, %v1822_v56  ;;  %vm1365_vm15 = vcmp.gt.f32.partialorder %v895_v53, 0.0  ;;  %v1548_v58 = vmul.f32 0.01, %v895_v53  ;;  %vm1411_vm0 = vcmp.gt.f32.partialorder %v1033_v54, 0.0 }
 0x1c5   :  { %v1594_v59 = vmul.f32 0.01, %v1033_v54  ;;  %vm1502_vm3 = vcmp.gt.f32.partialorder %v1306_v57, 0.0  ;;  %v1685_v60 = vmul.f32 0.01, %v1306_v57 }
 0x1c6   :  { %v1731_v61 = vsel %vm1365_vm15, %v895_v53, %v1548_v58  ;;  %v1170_v62 = vpop.f32.mrf.mxu2 }
 0x1c7   :  { %1915 = vst.msk [vmem:[%s3965_s3 + $0x138] sm:$0xff] %vm1875_vm2, %v1731_v61  ;;  %v1777_v63 = vsel %vm1411_vm0, %v1033_v54, %v1594_v59  ;;  %v1868_v0 = vsel %vm1502_vm3, %v1306_v57, %v1685_v60  ;;  %v1171_v1 = vadd.f32 %v3697_v20, %v1170_v62 }
 0x1c8   :  { %1961 = vst.msk [vmem:[%s3965_s3 + $0x2a8] sm:$0xff] %vm1875_vm2, %v1777_v63 }
 0x1c9   :  { %2052 = vst.msk [vmem:[%s3965_s3 + $0x580] sm:$0xff] %vm1875_vm2, %v1868_v0  ;;  %vm1457_vm4 = vcmp.gt.f32.partialorder %v1171_v1, 0.0  ;;  %v1640_v2 = vmul.f32 0.01, %v1171_v1  ;;  %v897_v3 = vpop.f32.mrf.mxu0  ;;  %v1035_v4 = vpop.f32.mrf.mxu1 }
 0x1ca   :  { %v898_v6 = vadd.f32 %v3697_v20, %v897_v3  ;;  %v1036_v7 = vadd.f32 %v3697_v20, %v1035_v4  ;;  %v1308_v8 = vpop.f32.mrf.mxu3 }
 0x1cb   :  { %v1823_v5 = vsel %vm1457_vm4, %v1171_v1, %v1640_v2  ;;  %v1309_v9 = vadd.f32 %v3697_v20, %v1308_v8 }
 0x1cc   :  { %2007 = vst.msk [vmem:[%s3965_s3 + $0x418] sm:$0xff] %vm1875_vm2, %v1823_v5  ;;  %vm1366_vm5 = vcmp.gt.f32.partialorder %v898_v6, 0.0  ;;  %v1549_v11 = vmul.f32 0.01, %v898_v6  ;;  %vm1412_vm6 = vcmp.gt.f32.partialorder %v1036_v7, 0.0 }
 0x1cd   :  { %v1595_v12 = vmul.f32 0.01, %v1036_v7  ;;  %vm1503_vm7 = vcmp.gt.f32.partialorder %v1309_v9, 0.0  ;;  %v1686_v13 = vmul.f32 0.01, %v1309_v9 }
 0x1ce   :  { %v1732_v14 = vsel %vm1366_vm5, %v898_v6, %v1549_v11  ;;  %v1173_v15 = vpop.f32.mrf.mxu2 }
 0x1cf   :  { %1916 = vst.msk [vmem:[%s3965_s3 + $0x140] sm:$0xff] %vm1875_vm2, %v1732_v14  ;;  %v1778_v16 = vsel %vm1412_vm6, %v1036_v7, %v1595_v12  ;;  %v1869_v17 = vsel %vm1503_vm7, %v1309_v9, %v1686_v13  ;;  %v1174_v18 = vadd.f32 %v3697_v20, %v1173_v15 }
 0x1d0   :  { %1962 = vst.msk [vmem:[%s3965_s3 + $0x2b0] sm:$0xff] %vm1875_vm2, %v1778_v16 }
 0x1d1   :  { %2053 = vst.msk [vmem:[%s3965_s3 + $0x588] sm:$0xff] %vm1875_vm2, %v1869_v17  ;;  %vm1458_vm8 = vcmp.gt.f32.partialorder %v1174_v18, 0.0  ;;  %v1641_v19 = vmul.f32 0.01, %v1174_v18  ;;  %v900_v10 = vpop.f32.mrf.mxu0  ;;  %v1038_v21 = vpop.f32.mrf.mxu1 }
 0x1d2   :  { %v901_v22 = vadd.f32 %v3697_v20, %v900_v10  ;;  %v1039_v23 = vadd.f32 %v3697_v20, %v1038_v21  ;;  %v1311_v24 = vpop.f32.mrf.mxu3 }
 0x1d3   :  { %v1824_v25 = vsel %vm1458_vm8, %v1174_v18, %v1641_v19  ;;  %v1312_v26 = vadd.f32 %v3697_v20, %v1311_v24 }
 0x1d4   :  { %2008 = vst.msk [vmem:[%s3965_s3 + $0x420] sm:$0xff] %vm1875_vm2, %v1824_v25  ;;  %vm1367_vm1 = vcmp.gt.f32.partialorder %v901_v22, 0.0  ;;  %v1550_v27 = vmul.f32 0.01, %v901_v22  ;;  %vm1413_vm9 = vcmp.gt.f32.partialorder %v1039_v23, 0.0 }
 0x1d5   :  { %v1596_v28 = vmul.f32 0.01, %v1039_v23  ;;  %vm1504_vm10 = vcmp.gt.f32.partialorder %v1312_v26, 0.0  ;;  %v1687_v29 = vmul.f32 0.01, %v1312_v26 }
 0x1d6   :  { %v1733_v30 = vsel %vm1367_vm1, %v901_v22, %v1550_v27  ;;  %v1176_v31 = vpop.f32.mrf.mxu2 }
 0x1d7   :  { %1917 = vst.msk [vmem:[%s3965_s3 + $0x148] sm:$0xff] %vm1875_vm2, %v1733_v30  ;;  %v1779_v32 = vsel %vm1413_vm9, %v1039_v23, %v1596_v28  ;;  %v1870_v33 = vsel %vm1504_vm10, %v1312_v26, %v1687_v29  ;;  %v1177_v34 = vadd.f32 %v3697_v20, %v1176_v31 }
 0x1d8   :  { %1963 = vst.msk [vmem:[%s3965_s3 + $0x2b8] sm:$0xff] %vm1875_vm2, %v1779_v32 }
 0x1d9   :  { %2054 = vst.msk [vmem:[%s3965_s3 + $0x590] sm:$0xff] %vm1875_vm2, %v1870_v33  ;;  %vm1459_vm11 = vcmp.gt.f32.partialorder %v1177_v34, 0.0  ;;  %v1642_v35 = vmul.f32 0.01, %v1177_v34  ;;  %v903_v36 = vpop.f32.mrf.mxu0  ;;  %v1041_v37 = vpop.f32.mrf.mxu1 }
 0x1da   :  { %v904_v38 = vadd.f32 %v3697_v20, %v903_v36  ;;  %v1042_v39 = vadd.f32 %v3697_v20, %v1041_v37  ;;  %v1314_v40 = vpop.f32.mrf.mxu3 }
 0x1db   :  { %v1825_v41 = vsel %vm1459_vm11, %v1177_v34, %v1642_v35  ;;  %v1315_v42 = vadd.f32 %v3697_v20, %v1314_v40 }
 0x1dc   :  { %2009 = vst.msk [vmem:[%s3965_s3 + $0x428] sm:$0xff] %vm1875_vm2, %v1825_v41  ;;  %vm1368_vm12 = vcmp.gt.f32.partialorder %v904_v38, 0.0  ;;  %v1551_v43 = vmul.f32 0.01, %v904_v38  ;;  %vm1414_vm13 = vcmp.gt.f32.partialorder %v1042_v39, 0.0 }
 0x1dd   :  { %v1597_v44 = vmul.f32 0.01, %v1042_v39  ;;  %vm1505_vm14 = vcmp.gt.f32.partialorder %v1315_v42, 0.0  ;;  %v1688_v45 = vmul.f32 0.01, %v1315_v42 }
 0x1de   :  { %v1734_v46 = vsel %vm1368_vm12, %v904_v38, %v1551_v43  ;;  %v1179_v47 = vpop.f32.mrf.mxu2  ;;  %vm2058_vm12 = vcmask 254976  }
 0x1df   :  { %1918 = vst.msk [vmem:[%s3965_s3 + $0x150] sm:$0xff] %vm1875_vm2, %v1734_v46  ;;  %v1780_v48 = vsel %vm1414_vm13, %v1042_v39, %v1597_v44  ;;  %v1871_v49 = vsel %vm1505_vm14, %v1315_v42, %v1688_v45  ;;  %v1180_v50 = vadd.f32 %v3697_v20, %v1179_v47 }
 0x1e0   :  { %1964 = vst.msk [vmem:[%s3965_s3 + $0x2c0] sm:$0xff] %vm1875_vm2, %v1780_v48 }
 0x1e1   :  { %2055 = vst.msk [vmem:[%s3965_s3 + $0x598] sm:$0xff] %vm1875_vm2, %v1871_v49  ;;  %vm1460_vm15 = vcmp.gt.f32.partialorder %v1180_v50, 0.0  ;;  %v1643_v51 = vmul.f32 0.01, %v1180_v50  ;;  %v906_v52 = vpop.f32.mrf.mxu0  ;;  %v1044_v53 = vpop.f32.mrf.mxu1 }
 0x1e2   :  { %v907_v54 = vadd.f32 %v3697_v20, %v906_v52  ;;  %v1045_v55 = vadd.f32 %v3697_v20, %v1044_v53  ;;  %v1317_v56 = vpop.f32.mrf.mxu3 }
 0x1e3   :  { %v1826_v57 = vsel %vm1460_vm15, %v1180_v50, %v1643_v51  ;;  %v1318_v58 = vadd.f32 %v3697_v20, %v1317_v56 }
 0x1e4   :  { %2010 = vst.msk [vmem:[%s3965_s3 + $0x430] sm:$0xff] %vm1875_vm2, %v1826_v57  ;;  %vm1369_vm0 = vcmp.gt.f32.partialorder %v907_v54, 0.0  ;;  %v1552_v59 = vmul.f32 0.01, %v907_v54  ;;  %vm1415_vm3 = vcmp.gt.f32.partialorder %v1045_v55, 0.0 }
 0x1e5   :  { %v1598_v60 = vmul.f32 0.01, %v1045_v55  ;;  %vm1506_vm4 = vcmp.gt.f32.partialorder %v1318_v58, 0.0  ;;  %v1689_v61 = vmul.f32 0.01, %v1318_v58 }
 0x1e6   :  { %v1735_v62 = vsel %vm1369_vm0, %v907_v54, %v1552_v59  ;;  %v1182_v63 = vpop.f32.mrf.mxu2 }
 0x1e7   :  { %1919 = vst.msk [vmem:[%s3965_s3 + $0x158] sm:$0xff] %vm1875_vm2, %v1735_v62  ;;  %v1781_v0 = vsel %vm1415_vm3, %v1045_v55, %v1598_v60  ;;  %v1872_v1 = vsel %vm1506_vm4, %v1318_v58, %v1689_v61  ;;  %v1183_v2 = vadd.f32 %v3697_v20, %v1182_v63 }
 0x1e8   :  { %1965 = vst.msk [vmem:[%s3965_s3 + $0x2c8] sm:$0xff] %vm1875_vm2, %v1781_v0 }
 0x1e9   :  { %2056 = vst.msk [vmem:[%s3965_s3 + $0x5a0] sm:$0xff] %vm1875_vm2, %v1872_v1  ;;  %vm1461_vm5 = vcmp.gt.f32.partialorder %v1183_v2, 0.0  ;;  %v1644_v3 = vmul.f32 0.01, %v1183_v2  ;;  %v909_v4 = vpop.f32.mrf.mxu0  ;;  %v1047_v6 = vpop.f32.mrf.mxu1 }
 0x1ea   :  { %v910_v7 = vadd.f32 %v3697_v20, %v909_v4  ;;  %v1048_v8 = vadd.f32 %v3697_v20, %v1047_v6  ;;  %v1320_v5 = vpop.f32.mrf.mxu3 }
 0x1eb   :  { %v1827_v9 = vsel %vm1461_vm5, %v1183_v2, %v1644_v3  ;;  %v1321_v11 = vadd.f32 %v3697_v20, %v1320_v5 }
 0x1ec   :  { %2011 = vst.msk [vmem:[%s3965_s3 + $0x438] sm:$0xff] %vm1875_vm2, %v1827_v9  ;;  %vm1370_vm6 = vcmp.gt.f32.partialorder %v910_v7, 0.0  ;;  %v1553_v12 = vmul.f32 0.01, %v910_v7  ;;  %vm1416_vm7 = vcmp.gt.f32.partialorder %v1048_v8, 0.0 }
 0x1ed   :  { %v1599_v13 = vmul.f32 0.01, %v1048_v8  ;;  %vm1507_vm8 = vcmp.gt.f32.partialorder %v1321_v11, 0.0  ;;  %v1690_v14 = vmul.f32 0.01, %v1321_v11 }
 0x1ee   :  { %v1736_v15 = vsel %vm1370_vm6, %v910_v7, %v1553_v12  ;;  %v1185_v16 = vpop.f32.mrf.mxu2 }
 0x1ef   :  { %1920 = vst.msk [vmem:[%s3965_s3 + $0x160] sm:$0xff] %vm1875_vm2, %v1736_v15  ;;  %v1782_v17 = vsel %vm1416_vm7, %v1048_v8, %v1599_v13  ;;  %v1873_v18 = vsel %vm1507_vm8, %v1321_v11, %v1690_v14  ;;  %v1186_v19 = vadd.f32 %v3697_v20, %v1185_v16 }
 0x1f0   :  { %1966 = vst.msk [vmem:[%s3965_s3 + $0x2d0] sm:$0xff] %vm1875_vm2, %v1782_v17 }
 0x1f1   :  { %2057 = vst.msk [vmem:[%s3965_s3 + $0x5a8] sm:$0xff] %vm1875_vm2, %v1873_v18  ;;  %vm1462_vm1 = vcmp.gt.f32.partialorder %v1186_v19, 0.0  ;;  %v1645_v10 = vmul.f32 0.01, %v1186_v19  ;;  %v912_v21 = vpop.f32.mrf.mxu0  ;;  %v1050_v22 = vpop.f32.mrf.mxu1 }
 0x1f2   :  { %v913_v23 = vadd.f32 %v3697_v20, %v912_v21  ;;  %v1051_v24 = vadd.f32 %v3697_v20, %v1050_v22  ;;  %v1323_v25 = vpop.f32.mrf.mxu3 }
 0x1f3   :  { %v1828_v26 = vsel %vm1462_vm1, %v1186_v19, %v1645_v10  ;;  %v1324_v27 = vadd.f32 %v3697_v20, %v1323_v25 }
 0x1f4   :  { %2012 = vst.msk [vmem:[%s3965_s3 + $0x440] sm:$0xff] %vm1875_vm2, %v1828_v26  ;;  %vm1371_vm9 = vcmp.gt.f32.partialorder %v913_v23, 0.0  ;;  %v1554_v28 = vmul.f32 0.01, %v913_v23  ;;  %vm1417_vm10 = vcmp.gt.f32.partialorder %v1051_v24, 0.0 }
 0x1f5   :  { %v1600_v29 = vmul.f32 0.01, %v1051_v24  ;;  %vm1508_vm11 = vcmp.gt.f32.partialorder %v1324_v27, 0.0  ;;  %v1691_v30 = vmul.f32 0.01, %v1324_v27 }
 0x1f6   :  { %v1737_v31 = vsel %vm1371_vm9, %v913_v23, %v1554_v28  ;;  %v1188_v32 = vpop.f32.mrf.mxu2 }
 0x1f7   :  { %1921 = vst.msk [vmem:[%s3965_s3 + $0x168] sm:$0xff] %vm1875_vm2, %v1737_v31  ;;  %v1783_v33 = vsel %vm1417_vm10, %v1051_v24, %v1600_v29  ;;  %v1874_v34 = vsel %vm1508_vm11, %v1324_v27, %v1691_v30  ;;  %v1189_v35 = vadd.f32 %v3697_v20, %v1188_v32 }
 0x1f8   :  { %1967 = vst.msk [vmem:[%s3965_s3 + $0x2d8] sm:$0xff] %vm1875_vm2, %v1783_v33 }
 0x1f9   :  { %2059 = vst.msk [vmem:[%s3965_s3 + $0x5b0] sm:$0x3] %vm2058_vm12, %v1874_v34  ;;  %vm1463_vm13 = vcmp.gt.f32.partialorder %v1189_v35, 0.0  ;;  %v1646_v36 = vmul.f32 0.01, %v1189_v35 }
 0x1fb   :  { %v1829_v37 = vsel %vm1463_vm13, %v1189_v35, %v1646_v36 }
 0x1fc   :  { %2013 = vst.msk [vmem:[%s3965_s3 + $0x448] sm:$0xff] %vm1875_vm2, %v1829_v37 }

// kernel: agent_network_forward.5
= control target key start
LH: loop header
LB: loop body
LE: loop exit
PB: predicated region body
PF: predicated region fallthrough
CT: control target
= control target key end

     0   :  { %vm183_vm0 = vcmask 261120   ;;  %vm880_vm2 = vcmask 523264   ;;  %s1922_s1 = inlined_call_operand.vmem [shape: f32[288,64], index: 1, kind: input, shape index: {}]   ;;  %s1923_s0 = inlined_call_operand.vmem [shape: f32[338,288], index: 0, kind: input, shape index: {}]   ;;  %s1924_s2 = inlined_call_operand.vmem [shape: f32[1,64], index: 2, kind: input, shape index: {}]   ;;  %s1925_s3 = inlined_call_operand.vmem [shape: f32[338,64], index: 3, kind: output, shape index: {}]  }
   0x1   :  { %v158_v0 = vld [vmem:[%s1922_s1 + $0x78] sm:$0xff]  ;;  %v157_v2 = vld [vmem:[%s1922_s1 + $0x70] sm:$0xff]  ;;  %v156_v5 = vld [vmem:[%s1922_s1 + $0x68] sm:$0xff] }
   0x2   :  { %v1036_v1 = vld [vmem:[%s1922_s1 + $0x118] sm:$0xff]  ;;  %313 = vmatpush.msra.mxu0 %v158_v0  ;;  %972 = vmatpush.msra.mxu3 %v158_v0  ;;  %v1049_v4 = vld [vmem:[%s1922_s1 + $0x110] sm:$0xff]  ;;  %v1064_v7 = vld [vmem:[%s1922_s1 + $0x108] sm:$0xff] }
   0x3   :  { %v1044_v3 = vld [vmem:[%s1922_s1 + $0xf8] sm:$0xff]  ;;  %617 = vmatpush.msra.mxu2 %v1036_v1  ;;  %v1059_v6 = vld [vmem:[%s1922_s1 + $0xf0] sm:$0xff]  ;;  %v1069_v8 = vld [vmem:[%s1922_s1 + $0xe8] sm:$0xff] }
   0x4   :  { %459 = vmatpush.msra.mxu1 %v1044_v3  ;;  %314 = vmatpush.msra.mxu0 %v157_v2  ;;  %v155_v9 = vld [vmem:[%s1922_s1 + $0x60] sm:$0xff]  ;;  %v16_v12 = vld [vmem:[%s1923_s0 + $0x10] sm:$0xff]  ;;  %v154_v13 = vld [vmem:[%s1922_s1 + $0x58] sm:$0xff] }
   0x5   :  { %973 = vmatpush.msra.mxu3 %v157_v2  ;;  %618 = vmatpush.msra.mxu2 %v1049_v4  ;;  %v1079_v10 = vld [vmem:[%s1922_s1 + $0x100] sm:$0xff]  ;;  %v1097_v14 = vld [vmem:[%s1922_s1 + $0xd8] sm:$0xff]  ;;  %v153_v15 = vld [vmem:[%s1922_s1 + $0x50] sm:$0xff] }
   0x6   :  { %460 = vmatpush.msra.mxu1 %v1059_v6  ;;  %315 = vmatpush.msra.mxu0 %v156_v5  ;;  %v1084_v11 = vld [vmem:[%s1922_s1 + $0xe0] sm:$0xff]  ;;  %v1108_v16 = vld [vmem:[%s1922_s1 + $0xd0] sm:$0xff]  ;;  %v152_v17 = vld [vmem:[%s1922_s1 + $0x48] sm:$0xff] }
   0x7   :  { %974 = vmatpush.msra.mxu3 %v156_v5  ;;  %619 = vmatpush.msra.mxu2 %v1064_v7  ;;  %v1117_v18 = vld [vmem:[%s1922_s1 + $0xc8] sm:$0xff]  ;;  %v151_v19 = vld [vmem:[%s1922_s1 + $0x40] sm:$0xff]  ;;  %v150_v22 = vld [vmem:[%s1922_s1 + $0x38] sm:$0xff] }
   0x8   :  { %461 = vmatpush.msra.mxu1 %v1069_v8  ;;  %316 = vmatpush.msra.mxu0 %v155_v9  ;;  %v1126_v20 = vld [vmem:[%s1922_s1 + $0xc0] sm:$0xff]  ;;  %v19_v21 = vld [vmem:[%s1923_s0 + $0x28] sm:$0xff]  ;;  %v1138_v23 = vld [vmem:[%s1922_s1 + $0xb8] sm:$0xff] }
   0x9   :  { %975 = vmatpush.msra.mxu3 %v155_v9  ;;  %620 = vmatpush.msra.mxu2 %v1079_v10  ;;  %v149_v24 = vld [vmem:[%s1922_s1 + $0x30] sm:$0xff]  ;;  %v148_v26 = vld [vmem:[%s1922_s1 + $0x28] sm:$0xff]  ;;  %v147_v28 = vld [vmem:[%s1922_s1 + $0x20] sm:$0xff] }
   0xa   :  { %462 = vmatpush.msra.mxu1 %v1084_v11  ;;  %929 = vmatmul.msk.f32.vlgmr.msra.gmra.mxu2 %vm183_vm0, %v16_v12  ;;  %v1148_v25 = vld [vmem:[%s1922_s1 + $0xb0] sm:$0xff]  ;;  %v1157_v27 = vld [vmem:[%s1922_s1 + $0xa8] sm:$0xff]  ;;  %v1166_v29 = vld [vmem:[%s1922_s1 + $0xa0] sm:$0xff] }
   0xb   :  { %317 = vmatpush.msra.mxu0 %v154_v13  ;;  %976 = vmatpush.msra.mxu3 %v154_v13  ;;  %v22_v30 = vld [vmem:[%s1923_s0 + $0x40] sm:$0xff]  ;;  %v146_v31 = vld [vmem:[%s1922_s1 + $0x18] sm:$0xff]  ;;  %v145_v33 = vld [vmem:[%s1922_s1 + $0x10] sm:$0xff] }
   0xc   :  { %463 = vmatpush.msra.mxu1 %v1097_v14  ;;  %v1178_v32 = vld [vmem:[%s1922_s1 + $0x98] sm:$0xff]  ;;  %v161_v34 = vld [vmem:[%s1922_s1 + $0x90] sm:$0xff]  ;;  %v144_v35 = vld [vmem:[%s1922_s1 + $0x8] sm:$0xff] }
   0xd   :  { %318 = vmatpush.msra.mxu0 %v153_v15  ;;  %977 = vmatpush.msra.mxu3 %v153_v15  ;;  %v160_v36 = vld [vmem:[%s1922_s1 + $0x88] sm:$0xff]  ;;  %v143_v37 = vld [vmem:[%s1922_s1] sm:$0xff]  ;;  %v25_v40 = vld [vmem:[%s1923_s0 + $0x58] sm:$0xff] }
   0xe   :  { %464 = vmatpush.msra.mxu1 %v1108_v16  ;;  %v14_v38 = vld [vmem:[%s1923_s0] sm:$0xff]  ;;  %v15_v42 = vld [vmem:[%s1923_s0 + $0x8] sm:$0xff]  ;;  %v17_v43 = vld [vmem:[%s1923_s0 + $0x18] sm:$0xff] }
   0xf   :  { %319 = vmatpush.msra.mxu0 %v152_v17  ;;  %978 = vmatpush.msra.mxu3 %v152_v17  ;;  %v110_v39 = vld [vmem:[%s1923_s0 + $0x300] sm:$0xff]  ;;  %v113_v44 = vld [vmem:[%s1923_s0 + $0x318] sm:$0xff]  ;;  %v28_v45 = vld [vmem:[%s1923_s0 + $0x70] sm:$0xff] }
  0x10   :  { %465 = vmatpush.msra.mxu1 %v1117_v18  ;;  %v159_v41 = vld [vmem:[%s1922_s1 + $0x80] sm:$0xff]  ;;  %v20_v47 = vld [vmem:[%s1923_s0 + $0x30] sm:$0xff]  ;;  %v31_v49 = vld [vmem:[%s1923_s0 + $0x88] sm:$0xff] }
  0x11   :  { %320 = vmatpush.msra.mxu0 %v151_v19  ;;  %979 = vmatpush.msra.mxu3 %v151_v19  ;;  %v18_v46 = vld [vmem:[%s1923_s0 + $0x20] sm:$0xff]  ;;  %v116_v48 = vld [vmem:[%s1923_s0 + $0x330] sm:$0xff]  ;;  %v21_v50 = vld [vmem:[%s1923_s0 + $0x38] sm:$0xff] }
  0x12   :  { %466 = vmatpush.msra.mxu1 %v1126_v20  ;;  %930 = vmatmul.msk.f32.gmra.mxu2 %vm183_vm0, %v19_v21  ;;  %v23_v51 = vld [vmem:[%s1923_s0 + $0x48] sm:$0xff]  ;;  %v34_v53 = vld [vmem:[%s1923_s0 + $0xa0] sm:$0xff]  ;;  %v24_v54 = vld [vmem:[%s1923_s0 + $0x50] sm:$0xff] }
  0x13   :  { %321 = vmatpush.msra.mxu0 %v150_v22  ;;  %980 = vmatpush.msra.mxu3 %v150_v22  ;;  %v119_v52 = vld [vmem:[%s1923_s0 + $0x348] sm:$0xff]  ;;  %v26_v55 = vld [vmem:[%s1923_s0 + $0x60] sm:$0xff]  ;;  %v37_v57 = vld [vmem:[%s1923_s0 + $0xb8] sm:$0xff] }
  0x14   :  { %467 = vmatpush.msra.mxu1 %v1138_v23  ;;  %v122_v56 = vld [vmem:[%s1923_s0 + $0x360] sm:$0xff]  ;;  %v27_v58 = vld [vmem:[%s1923_s0 + $0x68] sm:$0xff]  ;;  %v29_v59 = vld [vmem:[%s1923_s0 + $0x78] sm:$0xff] }
  0x15   :  { %322 = vmatpush.msra.mxu0 %v149_v24  ;;  %981 = vmatpush.msra.mxu3 %v149_v24  ;;  %v125_v60 = vld [vmem:[%s1923_s0 + $0x378] sm:$0xff]  ;;  %v40_v61 = vld [vmem:[%s1923_s0 + $0xd0] sm:$0xff]  ;;  %v30_v62 = vld [vmem:[%s1923_s0 + $0x80] sm:$0xff] }
  0x16   :  { %468 = vmatpush.msra.mxu1 %v1148_v25  ;;  %v32_v63 = vld [vmem:[%s1923_s0 + $0x90] sm:$0xff]  ;;  %v33_v2 = vld [vmem:[%s1923_s0 + $0x98] sm:$0xff]  ;;  %v46_v5 = vld [vmem:[%s1923_s0 + $0x100] sm:$0xff] }
  0x17   :  { %323 = vmatpush.msra.mxu0 %v148_v26  ;;  %982 = vmatpush.msra.mxu3 %v148_v26  ;;  %v128_v0 = vld [vmem:[%s1923_s0 + $0x390] sm:$0xff]  ;;  %v49_v9 = vld [vmem:[%s1923_s0 + $0x118] sm:$0xff]  ;;  %v55_v17 = vld [vmem:[%s1923_s0 + $0x148] sm:$0xff] }
  0x18   :  { %469 = vmatpush.msra.mxu1 %v1157_v27  ;;  %v137_v12 = vld [vmem:[%s1923_s0 + $0x3d8] sm:$0xff]  ;;  %v52_v13 = vld [vmem:[%s1923_s0 + $0x130] sm:$0xff]  ;;  %v47_v19 = vld [vmem:[%s1923_s0 + $0x108] sm:$0xff] }
  0x19   :  { %324 = vmatpush.msra.mxu0 %v147_v28  ;;  %983 = vmatpush.msra.mxu3 %v147_v28  ;;  %v44_v15 = vld [vmem:[%s1923_s0 + $0xf0] sm:$0xff]  ;;  %v58_v21 = vld [vmem:[%s1923_s0 + $0x160] sm:$0xff]  ;;  %v51_v26 = vld [vmem:[%s1923_s0 + $0x128] sm:$0xff] }
  0x1a   :  { %470 = vmatpush.msra.mxu1 %v1166_v29  ;;  %931 = vmatmul.msk.f32.gmra.mxu2 %vm183_vm0, %v22_v30  ;;  %v48_v22 = vld [vmem:[%s1923_s0 + $0x110] sm:$0xff]  ;;  %v114_v24 = vld [vmem:[%s1923_s0 + $0x320] sm:$0xff]  ;;  %v117_v28 = vld [vmem:[%s1923_s0 + $0x338] sm:$0xff] }
  0x1b   :  { %325 = vmatpush.msra.mxu0 %v146_v31  ;;  %984 = vmatpush.msra.mxu3 %v146_v31  ;;  %v54_v30 = vld [vmem:[%s1923_s0 + $0x140] sm:$0xff] }
  0x1c   :  { %471 = vmatpush.msra.mxu1 %v1178_v32 }
  0x1d   :  { %326 = vmatpush.msra.mxu0 %v145_v33  ;;  %985 = vmatpush.msra.mxu3 %v145_v33  ;;  %v120_v33 = vld [vmem:[%s1923_s0 + $0x350] sm:$0xff] }
  0x1e   :  { %472 = vmatpush.msra.mxu1 %v161_v34 }
  0x1f   :  { %327 = vmatpush.msra.mxu0 %v144_v35  ;;  %986 = vmatpush.msra.mxu3 %v144_v35  ;;  %v57_v35 = vld [vmem:[%s1923_s0 + $0x158] sm:$0xff] }
  0x20   :  { %473 = vmatpush.msra.mxu1 %v160_v36 }
  0x21   :  { %328 = vmatpush.msra.mxu0 %v143_v37  ;;  %987 = vmatpush.msra.mxu3 %v143_v37  ;;  %v59_v37 = vld [vmem:[%s1923_s0 + $0x168] sm:$0xff] }
  0x22   :  { %329 = vmatmul.f32.vlgmr.msra.gmra.mxu0 %v14_v38  ;;  %425 = vmatmul.f32.vlgmr.msra.gmra.mxu3 %v110_v39  ;;  %v123_v38 = vld [vmem:[%s1923_s0 + $0x368] sm:$0xff]  ;;  %v70_v39 = vld [vmem:[%s1923_s0 + $0x1c0] sm:$0xff] }
  0x23   :  { %932 = vmatmul.msk.f32.gmra.mxu2 %vm183_vm0, %v25_v40  ;;  %474 = vmatpush.msra.mxu1 %v159_v41  ;;  %v60_v40 = vld [vmem:[%s1923_s0 + $0x170] sm:$0xff] }
  0x24   :  { %988 = vmatpush.msrb.mxu3 %v1044_v3  ;;  %475 = vmatmul.f32.vlgmr.msra.gmra.mxu1 %v15_v42  ;;  %v35_v3 = vld [vmem:[%s1923_s0 + $0xa8] sm:$0xff] }
  0x26   :  { %989 = vmatpush.msrb.mxu3 %v1059_v6  ;;  %v36_v6 = vld [vmem:[%s1923_s0 + $0xb0] sm:$0xff] }
  0x28   :  { %990 = vmatpush.msrb.mxu3 %v1069_v8  ;;  %v134_v8 = vld [vmem:[%s1923_s0 + $0x3c0] sm:$0xff] }
  0x2a   :  { %332 = vmatmul.f32.gmra.mxu0 %v17_v43  ;;  %991 = vmatpush.msrb.mxu3 %v1084_v11  ;;  %v41_v11 = vld [vmem:[%s1923_s0 + $0xd8] sm:$0xff] }
  0x2b   :  { %428 = vmatmul.f32.gmra.mxu3 %v113_v44  ;;  %933 = vmatmul.msk.f32.gmra.mxu2 %vm183_vm0, %v28_v45  ;;  %v62_v44 = vld [vmem:[%s1923_s0 + $0x180] sm:$0xff] }
  0x2c   :  { %992 = vmatpush.msrb.mxu3 %v1097_v14  ;;  %478 = vmatmul.f32.gmra.mxu1 %v18_v46  ;;  %v42_v14 = vld [vmem:[%s1923_s0 + $0xe0] sm:$0xff] }
  0x2d   :  { %v126_v46 = vld [vmem:[%s1923_s0 + $0x380] sm:$0xff] }
  0x2e   :  { %993 = vmatpush.msrb.mxu3 %v1108_v16  ;;  %v140_v16 = vld [vmem:[%s1923_s0 + $0x3f0] sm:$0x3] }
  0x30   :  { %994 = vmatpush.msrb.mxu3 %v1117_v18  ;;  %v45_v18 = vld [vmem:[%s1923_s0 + $0xf8] sm:$0xff] }
  0x32   :  { %335 = vmatmul.f32.gmra.mxu0 %v20_v47  ;;  %995 = vmatpush.msrb.mxu3 %v1126_v20  ;;  %v111_v20 = vld [vmem:[%s1923_s0 + $0x308] sm:$0xff]  ;;  %v73_v47 = vld [vmem:[%s1923_s0 + $0x1d8] sm:$0xff] }
  0x33   :  { %431 = vmatmul.f32.gmra.mxu3 %v116_v48  ;;  %934 = vmatmul.msk.f32.gmra.mxu2 %vm183_vm0, %v31_v49  ;;  %v63_v49 = vld [vmem:[%s1923_s0 + $0x188] sm:$0xff] }
  0x34   :  { %996 = vmatpush.msrb.mxu3 %v1138_v23  ;;  %481 = vmatmul.f32.gmra.mxu1 %v21_v50  ;;  %v50_v23 = vld [vmem:[%s1923_s0 + $0x120] sm:$0xff] }
  0x36   :  { %997 = vmatpush.msrb.mxu3 %v1148_v25  ;;  %v61_v25 = vld [vmem:[%s1923_s0 + $0x178] sm:$0xff] }
  0x38   :  { %998 = vmatpush.msrb.mxu3 %v1157_v27  ;;  %v53_v27 = vld [vmem:[%s1923_s0 + $0x138] sm:$0xff] }
  0x3a   :  { %338 = vmatmul.f32.gmra.mxu0 %v23_v51  ;;  %999 = vmatpush.msrb.mxu3 %v1166_v29  ;;  %v64_v29 = vld [vmem:[%s1923_s0 + $0x190] sm:$0xff] }
  0x3b   :  { %434 = vmatmul.f32.gmra.mxu3 %v119_v52  ;;  %935 = vmatmul.msk.f32.gmra.mxu2 %vm183_vm0, %v34_v53 }
  0x3c   :  { %1000 = vmatpush.msrb.mxu3 %v1178_v32  ;;  %484 = vmatmul.f32.gmra.mxu1 %v24_v54  ;;  %v56_v32 = vld [vmem:[%s1923_s0 + $0x150] sm:$0xff] }
  0x3e   :  { %1001 = vmatpush.msrb.mxu3 %v161_v34  ;;  %v67_v34 = vld [vmem:[%s1923_s0 + $0x1a8] sm:$0xff] }
  0x40   :  { %1002 = vmatpush.msrb.mxu3 %v160_v36 }
  0x42   :  { %341 = vmatmul.f32.gmra.mxu0 %v26_v55  ;;  %1003 = vmatpush.msrb.mxu3 %v159_v41  ;;  %v1429_v41 = vld [vmem:[%s1924_s2] ss:$0 sm:$0xff] }
  0x43   :  { %437 = vmatmul.f32.gmra.mxu3 %v122_v56  ;;  %936 = vmatmul.msk.f32.gmra.mxu2 %vm183_vm0, %v37_v57  ;;  %v65_v56 = vld [vmem:[%s1923_s0 + $0x198] sm:$0xff] }
  0x44   :  { %1004 = vmatpush.msra.mxu3 %v1036_v1  ;;  %487 = vmatmul.f32.gmra.mxu1 %v27_v58  ;;  %v43_v1 = vld [vmem:[%s1923_s0 + $0xe8] sm:$0xff]  ;;  %v129_v58 = vld [vmem:[%s1923_s0 + $0x398] sm:$0xff] }
  0x46   :  { %1005 = vmatpush.msra.mxu3 %v1049_v4  ;;  %v131_v4 = vld [vmem:[%s1923_s0 + $0x3a8] sm:$0xff] }
  0x48   :  { %1006 = vmatpush.msra.mxu3 %v1064_v7  ;;  %v38_v7 = vld [vmem:[%s1923_s0 + $0xc0] sm:$0xff] }
  0x4a   :  { %344 = vmatmul.f32.gmra.mxu0 %v29_v59  ;;  %1007 = vmatpush.msra.mxu3 %v1079_v10  ;;  %v39_v10 = vld [vmem:[%s1923_s0 + $0xc8] sm:$0xff]  ;;  %v76_v59 = vld [vmem:[%s1923_s0 + $0x1f0] sm:$0xff] }
  0x4b   :  { %440 = vmatmul.f32.gmra.mxu3 %v125_v60  ;;  %937 = vmatmul.msk.f32.gmra.mxu2 %vm183_vm0, %v40_v61 }
  0x4c   :  { %490 = vmatmul.f32.gmra.mxu1 %v30_v62  ;;  %v66_v62 = vld [vmem:[%s1923_s0 + $0x1a0] sm:$0xff] }
  0x52   :  { %347 = vmatmul.f32.gmra.mxu0 %v32_v63 }
  0x53   :  { %443 = vmatmul.f32.gmra.mxu3 %v128_v0  ;;  %938 = vmatmul.msk.f32.gmra.mxu2 %vm183_vm0, %v43_v1 }
  0x54   :  { %493 = vmatmul.f32.gmra.mxu1 %v33_v2 }
  0x5a   :  { %350 = vmatmul.f32.gmra.mxu0 %v35_v3 }
  0x5b   :  { %446 = vmatmul.f32.gmra.mxu3 %v131_v4  ;;  %939 = vmatmul.msk.f32.gmra.mxu2 %vm183_vm0, %v46_v5  ;;  %v68_v5 = vld [vmem:[%s1923_s0 + $0x1b0] sm:$0xff] }
  0x5c   :  { %496 = vmatmul.f32.gmra.mxu1 %v36_v6 }
  0x62   :  { %353 = vmatmul.f32.gmra.mxu0 %v38_v7  ;;  %v132_v7 = vld [vmem:[%s1923_s0 + $0x3b0] sm:$0xff] }
  0x63   :  { %449 = vmatmul.f32.gmra.mxu3 %v134_v8  ;;  %940 = vmatmul.msk.f32.gmra.mxu2 %vm183_vm0, %v49_v9  ;;  %v79_v8 = vld [vmem:[%s1923_s0 + $0x208] sm:$0xff] }
  0x64   :  { %499 = vmatmul.f32.gmra.mxu1 %v39_v10 }
  0x6a   :  { %356 = vmatmul.f32.gmra.mxu0 %v41_v11  ;;  %v69_v11 = vld [vmem:[%s1923_s0 + $0x1b8] sm:$0xff] }
  0x6b   :  { %452 = vmatmul.f32.gmra.mxu3 %v137_v12  ;;  %941 = vmatmul.msk.f32.gmra.mxu2 %vm183_vm0, %v52_v13 }
  0x6c   :  { %502 = vmatmul.f32.gmra.mxu1 %v42_v14 }
  0x72   :  { %359 = vmatmul.f32.gmra.mxu0 %v44_v15 }
  0x73   :  { %455 = vmatmul.f32.gmra.mxu3 %v140_v16  ;;  %942 = vmatmul.msk.f32.gmra.mxu2 %vm183_vm0, %v55_v17 }
  0x74   :  { %505 = vmatmul.f32.gmra.mxu1 %v45_v18  ;;  %v71_v18 = vld [vmem:[%s1923_s0 + $0x1c8] sm:$0xff] }
  0x7a   :  { %362 = vmatmul.f32.gmra.mxu0 %v47_v19 }
  0x7b   :  { %571 = vmatmul.f32.vlgmr.msrb.gmra.mxu3 %v111_v20  ;;  %943 = vmatmul.msk.f32.gmra.mxu2 %vm183_vm0, %v58_v21  ;;  %v135_v20 = vld [vmem:[%s1923_s0 + $0x3c8] sm:$0xff]  ;;  %v82_v21 = vld [vmem:[%s1923_s0 + $0x220] sm:$0xff] }
  0x7c   :  { %508 = vmatmul.f32.gmra.mxu1 %v48_v22 }
  0x82   :  { %365 = vmatmul.f32.gmra.mxu0 %v50_v23 }
  0x83   :  { %574 = vmatmul.f32.gmra.mxu3 %v114_v24  ;;  %944 = vmatmul.msk.f32.gmra.mxu2 %vm183_vm0, %v61_v25  ;;  %v72_v24 = vld [vmem:[%s1923_s0 + $0x1d0] sm:$0xff] }
  0x84   :  { %511 = vmatmul.f32.gmra.mxu1 %v51_v26 }
  0x8a   :  { %368 = vmatmul.f32.gmra.mxu0 %v53_v27 }
  0x8b   :  { %577 = vmatmul.f32.gmra.mxu3 %v117_v28  ;;  %945 = vmatmul.msk.f32.gmra.mxu2 %vm183_vm0, %v64_v29 }
  0x8c   :  { %514 = vmatmul.f32.gmra.mxu1 %v54_v30 }
  0x8d   :  { %v622_v31 = vpop.f32.mrf.mxu2 }
  0x92   :  { %371 = vmatmul.f32.gmra.mxu0 %v56_v32 }
  0x93   :  { %580 = vmatmul.f32.gmra.mxu3 %v120_v33  ;;  %946 = vmatmul.msk.f32.gmra.mxu2 %vm183_vm0, %v67_v34  ;;  %v138_v33 = vld [vmem:[%s1923_s0 + $0x3e0] sm:$0xff]  ;;  %v85_v34 = vld [vmem:[%s1923_s0 + $0x238] sm:$0xff] }
  0x94   :  { %517 = vmatmul.f32.gmra.mxu1 %v57_v35 }
  0x95   :  { %v625_v36 = vpop.f32.mrf.mxu2 }
  0x9a   :  { %374 = vmatmul.f32.gmra.mxu0 %v59_v37  ;;  %v75_v37 = vld [vmem:[%s1923_s0 + $0x1e8] sm:$0xff] }
  0x9b   :  { %583 = vmatmul.f32.gmra.mxu3 %v123_v38  ;;  %947 = vmatmul.msk.f32.gmra.mxu2 %vm183_vm0, %v70_v39 }
  0x9c   :  { %520 = vmatmul.f32.gmra.mxu1 %v60_v40 }
  0x9d   :  { %v628_v42 = vpop.f32.mrf.mxu2 }
  0x9f   :  { %v330_v43 = vpop.f32.mrf.mxu0 }
  0xa0   :  { %v331_v45 = vadd.f32 %v1429_v41, %v330_v43 }
  0xa1   :  { %v476_v48 = vpop.f32.mrf.mxu1 }
  0xa2   :  { %377 = vmatmul.f32.gmra.mxu0 %v62_v44  ;;  %v477_v50 = vadd.f32 %v476_v48, %v331_v45  ;;  %v77_v45 = vld [vmem:[%s1923_s0 + $0x1f8] sm:$0xff]  ;;  %v88_v48 = vld [vmem:[%s1923_s0 + $0x250] sm:$0xff] }
  0xa3   :  { %586 = vmatmul.f32.gmra.mxu3 %v126_v46  ;;  %948 = vmatmul.msk.f32.gmra.mxu2 %vm183_vm0, %v73_v47  ;;  %v141_v47 = vld [vmem:[%s1923_s0 + $0x3f8] sm:$0x3] }
  0xa4   :  { %v623_v51 = vadd.f32 %v622_v31, %v477_v50  ;;  %523 = vmatmul.f32.gmra.mxu1 %v63_v49  ;;  %v74_v31 = vld [vmem:[%s1923_s0 + $0x1e0] sm:$0xff] }
  0xa5   :  { %v1445_v52 = vpop.f32.mrf.mxu3 }
  0xa6   :  { %v631_v53 = vpop.f32.mrf.mxu2  ;;  %vm751_vm1 = vcmp.gt.f32.partialorder %v623_v51, 0.0  ;;  %v794_v54 = vmul.f32 0.01, %v623_v51 }
  0xa7   :  { %v333_v55 = vpop.f32.mrf.mxu0 }
  0xa8   :  { %v334_v57 = vadd.f32 %v1429_v41, %v333_v55  ;;  %v837_v60 = vsel %vm751_vm1, %v623_v51, %v794_v54  ;;  %v78_v51 = vld [vmem:[%s1923_s0 + $0x200] sm:$0xff] }
  0xa9   :  { %881 = vst.msk [vmem:[%s1925_s3] sm:$0xff] %vm880_vm2, %v837_v60  ;;  %v479_v61 = vpop.f32.mrf.mxu1 }
  0xaa   :  { %380 = vmatmul.f32.gmra.mxu0 %v65_v56  ;;  %v480_v63 = vadd.f32 %v479_v61, %v334_v57  ;;  %v91_v61 = vld [vmem:[%s1923_s0 + $0x268] sm:$0xff] }
  0xab   :  { %589 = vmatmul.f32.gmra.mxu3 %v129_v58  ;;  %949 = vmatmul.msk.f32.gmra.mxu2 %vm183_vm0, %v76_v59  ;;  %v80_v59 = vld [vmem:[%s1923_s0 + $0x210] sm:$0xff] }
  0xac   :  { %v626_v0 = vadd.f32 %v625_v36, %v480_v63  ;;  %526 = vmatmul.f32.gmra.mxu1 %v66_v62  ;;  %v121_v62 = vld [vmem:[%s1923_s0 + $0x358] sm:$0xff] }
  0xae   :  { %v1465_v1 = vpop.f32.mrf.mxu3  ;;  %v634_v2 = vpop.f32.mrf.mxu2  ;;  %vm752_vm3 = vcmp.gt.f32.partialorder %v626_v0, 0.0  ;;  %v795_v3 = vmul.f32 0.01, %v626_v0 }
  0xaf   :  { %v336_v4 = vpop.f32.mrf.mxu0 }
  0xb0   :  { %v337_v6 = vadd.f32 %v1429_v41, %v336_v4  ;;  %v838_v9 = vsel %vm752_vm3, %v626_v0, %v795_v3 }
  0xb1   :  { %882 = vst.msk [vmem:[%s1925_s3 + $0x8] sm:$0xff] %vm880_vm2, %v838_v9  ;;  %v482_v10 = vpop.f32.mrf.mxu1  ;;  %v83_v9 = vld [vmem:[%s1923_s0 + $0x228] sm:$0xff] }
  0xb2   :  { %383 = vmatmul.f32.gmra.mxu0 %v68_v5  ;;  %v483_v12 = vadd.f32 %v482_v10, %v337_v6 }
  0xb3   :  { %592 = vmatmul.f32.gmra.mxu3 %v132_v7  ;;  %950 = vmatmul.msk.f32.gmra.mxu2 %vm183_vm0, %v79_v8 }
  0xb4   :  { %v629_v13 = vadd.f32 %v628_v42, %v483_v12  ;;  %529 = vmatmul.f32.gmra.mxu1 %v69_v11  ;;  %v94_v11 = vld [vmem:[%s1923_s0 + $0x280] sm:$0xff]  ;;  %v124_v12 = vld [vmem:[%s1923_s0 + $0x370] sm:$0xff] }
  0xb6   :  { %v1485_v14 = vpop.f32.mrf.mxu3  ;;  %v637_v15 = vpop.f32.mrf.mxu2  ;;  %vm753_vm4 = vcmp.gt.f32.partialorder %v629_v13, 0.0  ;;  %v796_v16 = vmul.f32 0.01, %v629_v13 }
  0xb7   :  { %v339_v17 = vpop.f32.mrf.mxu0 }
  0xb8   :  { %v340_v19 = vadd.f32 %v1429_v41, %v339_v17  ;;  %v839_v22 = vsel %vm753_vm4, %v629_v13, %v796_v16  ;;  %v84_v16 = vld [vmem:[%s1923_s0 + $0x230] sm:$0xff] }
  0xb9   :  { %883 = vst.msk [vmem:[%s1925_s3 + $0x10] sm:$0xff] %vm880_vm2, %v839_v22  ;;  %v485_v23 = vpop.f32.mrf.mxu1 }
  0xba   :  { %386 = vmatmul.f32.gmra.mxu0 %v71_v18  ;;  %v486_v25 = vadd.f32 %v485_v23, %v340_v19  ;;  %v86_v23 = vld [vmem:[%s1923_s0 + $0x240] sm:$0xff] }
  0xbb   :  { %595 = vmatmul.f32.gmra.mxu3 %v135_v20  ;;  %951 = vmatmul.msk.f32.gmra.mxu2 %vm183_vm0, %v82_v21 }
  0xbc   :  { %v632_v26 = vadd.f32 %v631_v53, %v486_v25  ;;  %532 = vmatmul.f32.gmra.mxu1 %v72_v24  ;;  %v97_v25 = vld [vmem:[%s1923_s0 + $0x298] sm:$0xff] }
  0xbe   :  { %v1505_v27 = vpop.f32.mrf.mxu3  ;;  %v640_v28 = vpop.f32.mrf.mxu2  ;;  %vm754_vm5 = vcmp.gt.f32.partialorder %v632_v26, 0.0  ;;  %v797_v29 = vmul.f32 0.01, %v632_v26 }
  0xbf   :  { %v342_v30 = vpop.f32.mrf.mxu0 }
  0xc0   :  { %v343_v32 = vadd.f32 %v1429_v41, %v342_v30  ;;  %v840_v35 = vsel %vm754_vm5, %v632_v26, %v797_v29  ;;  %v127_v26 = vld [vmem:[%s1923_s0 + $0x388] sm:$0xff] }
  0xc1   :  { %884 = vst.msk [vmem:[%s1925_s3 + $0x18] sm:$0xff] %vm880_vm2, %v840_v35  ;;  %v488_v36 = vpop.f32.mrf.mxu1  ;;  %v87_v30 = vld [vmem:[%s1923_s0 + $0x248] sm:$0xff] }
  0xc2   :  { %389 = vmatmul.f32.gmra.mxu0 %v74_v31  ;;  %v489_v38 = vadd.f32 %v488_v36, %v343_v32 }
  0xc3   :  { %598 = vmatmul.f32.gmra.mxu3 %v138_v33  ;;  %952 = vmatmul.msk.f32.gmra.mxu2 %vm183_vm0, %v85_v34 }
  0xc4   :  { %v635_v39 = vadd.f32 %v634_v2, %v489_v38  ;;  %535 = vmatmul.f32.gmra.mxu1 %v75_v37  ;;  %v81_v2 = vld [vmem:[%s1923_s0 + $0x218] sm:$0xff] }
  0xc5   :  { %v89_v37 = vld [vmem:[%s1923_s0 + $0x258] sm:$0xff] }
  0xc6   :  { %v1525_v40 = vpop.f32.mrf.mxu3  ;;  %v643_v42 = vpop.f32.mrf.mxu2  ;;  %vm755_vm6 = vcmp.gt.f32.partialorder %v635_v39, 0.0  ;;  %v798_v43 = vmul.f32 0.01, %v635_v39 }
  0xc7   :  { %v345_v44 = vpop.f32.mrf.mxu0 }
  0xc8   :  { %v346_v46 = vadd.f32 %v1429_v41, %v345_v44  ;;  %v841_v49 = vsel %vm755_vm6, %v635_v39, %v798_v43  ;;  %v100_v39 = vld [vmem:[%s1923_s0 + $0x2b0] sm:$0xff] }
  0xc9   :  { %885 = vst.msk [vmem:[%s1925_s3 + $0x20] sm:$0xff] %vm880_vm2, %v841_v49  ;;  %v491_v50 = vpop.f32.mrf.mxu1 }
  0xca   :  { %392 = vmatmul.f32.gmra.mxu0 %v77_v45  ;;  %v492_v53 = vadd.f32 %v491_v50, %v346_v46  ;;  %v90_v45 = vld [vmem:[%s1923_s0 + $0x260] sm:$0xff] }
  0xcb   :  { %601 = vmatmul.f32.gmra.mxu3 %v141_v47  ;;  %953 = vmatmul.msk.f32.gmra.mxu2 %vm183_vm0, %v88_v48 }
  0xcc   :  { %v638_v54 = vadd.f32 %v637_v15, %v492_v53  ;;  %538 = vmatmul.f32.gmra.mxu1 %v78_v51  ;;  %v92_v53 = vld [vmem:[%s1923_s0 + $0x270] sm:$0xff] }
  0xce   :  { %v1545_v55 = vpop.f32.mrf.mxu3  ;;  %v646_v56 = vpop.f32.mrf.mxu2  ;;  %vm756_vm7 = vcmp.gt.f32.partialorder %v638_v54, 0.0  ;;  %v799_v57 = vmul.f32 0.01, %v638_v54 }
  0xcf   :  { %v348_v58 = vpop.f32.mrf.mxu0 }
  0xd0   :  { %v349_v60 = vadd.f32 %v1429_v41, %v348_v58  ;;  %v842_v63 = vsel %vm756_vm7, %v638_v54, %v799_v57  ;;  %v133_v57 = vld [vmem:[%s1923_s0 + $0x3b8] sm:$0xff] }
  0xd1   :  { %886 = vst.msk [vmem:[%s1925_s3 + $0x28] sm:$0xff] %vm880_vm2, %v842_v63  ;;  %v494_v0 = vpop.f32.mrf.mxu1 }
  0xd2   :  { %395 = vmatmul.f32.gmra.mxu0 %v80_v59  ;;  %v495_v3 = vadd.f32 %v494_v0, %v349_v60  ;;  %v93_v60 = vld [vmem:[%s1923_s0 + $0x278] sm:$0xff] }
  0xd3   :  { %954 = vmatmul.msk.f32.gmra.mxu2 %vm183_vm0, %v91_v61  ;;  %964 = vmatmul.msk.f32.vlgmr.msra.gmra.mxu3 %vm183_vm0, %v121_v62 }
  0xd4   :  { %v641_v4 = vadd.f32 %v640_v28, %v495_v3  ;;  %541 = vmatmul.f32.gmra.mxu1 %v81_v2 }
  0xd6   :  { %v1566_v5 = vpop.f32.mrf.mxu3  ;;  %v649_v6 = vpop.f32.mrf.mxu2  ;;  %vm757_vm8 = vcmp.gt.f32.partialorder %v641_v4, 0.0  ;;  %v800_v7 = vmul.f32 0.01, %v641_v4 }
  0xd7   :  { %v351_v8 = vpop.f32.mrf.mxu0 }
  0xd8   :  { %v352_v10 = vadd.f32 %v1429_v41, %v351_v8  ;;  %v843_v13 = vsel %vm757_vm8, %v641_v4, %v800_v7  ;;  %v95_v4 = vld [vmem:[%s1923_s0 + $0x288] sm:$0xff]  ;;  %v106_v7 = vld [vmem:[%s1923_s0 + $0x2e0] sm:$0xff]  ;;  %v136_v8 = vld [vmem:[%s1923_s0 + $0x3d0] sm:$0xff] }
  0xd9   :  { %887 = vst.msk [vmem:[%s1925_s3 + $0x30] sm:$0xff] %vm880_vm2, %v843_v13  ;;  %v497_v15 = vpop.f32.mrf.mxu1  ;;  %v427_v13 = vadd.f32 %v1429_v41, %v1445_v52  ;;  %v139_v52 = vld [vmem:[%s1923_s0 + $0x3e8] sm:$0xff] }
  0xda   :  { %398 = vmatmul.f32.gmra.mxu0 %v83_v9  ;;  %v498_v17 = vadd.f32 %v497_v15, %v352_v10 }
  0xdb   :  { %955 = vmatmul.msk.f32.gmra.mxu2 %vm183_vm0, %v94_v11  ;;  %965 = vmatmul.msk.f32.gmra.mxu3 %vm183_vm0, %v124_v12  ;;  %v96_v11 = vld [vmem:[%s1923_s0 + $0x290] sm:$0xff] }
  0xdc   :  { %v644_v18 = vadd.f32 %v643_v42, %v498_v17  ;;  %544 = vmatmul.f32.gmra.mxu1 %v84_v16  ;;  %v130_v42 = vld [vmem:[%s1923_s0 + $0x3a0] sm:$0xff] }
  0xde   :  { %v1587_v19 = vpop.f32.mrf.mxu3  ;;  %v652_v20 = vpop.f32.mrf.mxu2  ;;  %vm758_vm9 = vcmp.gt.f32.partialorder %v644_v18, 0.0  ;;  %v801_v21 = vmul.f32 0.01, %v644_v18 }
  0xdf   :  { %v354_v22 = vpop.f32.mrf.mxu0 }
  0xe0   :  { %v355_v24 = vadd.f32 %v1429_v41, %v354_v22  ;;  %v844_v28 = vsel %vm758_vm9, %v644_v18, %v801_v21  ;;  %v98_v22 = vld [vmem:[%s1923_s0 + $0x2a0] sm:$0xff] }
  0xe1   :  { %888 = vst.msk [vmem:[%s1925_s3 + $0x38] sm:$0xff] %vm880_vm2, %v844_v28  ;;  %v500_v29 = vpop.f32.mrf.mxu1  ;;  %v99_v28 = vld [vmem:[%s1923_s0 + $0x2a8] sm:$0xff] }
  0xe2   :  { %401 = vmatmul.f32.gmra.mxu0 %v86_v23  ;;  %v501_v31 = vadd.f32 %v500_v29, %v355_v24  ;;  %v109_v24 = vld [vmem:[%s1923_s0 + $0x2f8] sm:$0xff] }
  0xe3   :  { %956 = vmatmul.msk.f32.gmra.mxu2 %vm183_vm0, %v97_v25  ;;  %966 = vmatmul.msk.f32.gmra.mxu3 %vm183_vm0, %v127_v26 }
  0xe4   :  { %v647_v32 = vadd.f32 %v646_v56, %v501_v31  ;;  %547 = vmatmul.f32.gmra.mxu1 %v87_v30  ;;  %v103_v56 = vld [vmem:[%s1923_s0 + $0x2c8] sm:$0xff]  ;;  %v430_v30 = vadd.f32 %v1429_v41, %v1465_v1  ;;  %v142_v1 = vld [vmem:[%s1923_s0 + $0x400] sm:$0x3] }
  0xe6   :  { %v1608_v33 = vpop.f32.mrf.mxu3  ;;  %v655_v34 = vpop.f32.mrf.mxu2  ;;  %vm759_vm10 = vcmp.gt.f32.partialorder %v647_v32, 0.0  ;;  %v802_v35 = vmul.f32 0.01, %v647_v32 }
  0xe7   :  { %v357_v36 = vpop.f32.mrf.mxu0 }
  0xe8   :  { %v358_v38 = vadd.f32 %v1429_v41, %v357_v36  ;;  %v845_v43 = vsel %vm759_vm10, %v647_v32, %v802_v35 }
  0xe9   :  { %889 = vst.msk [vmem:[%s1925_s3 + $0x40] sm:$0xff] %vm880_vm2, %v845_v43  ;;  %v503_v44 = vpop.f32.mrf.mxu1 }
  0xea   :  { %404 = vmatmul.f32.gmra.mxu0 %v89_v37  ;;  %v504_v46 = vadd.f32 %v503_v44, %v358_v38  ;;  %v101_v38 = vld [vmem:[%s1923_s0 + $0x2b8] sm:$0xff] }
  0xeb   :  { %957 = vmatmul.msk.f32.gmra.mxu2 %vm183_vm0, %v100_v39  ;;  %967 = vmatmul.msk.f32.gmra.mxu3 %vm183_vm0, %v130_v42  ;;  %v112_v42 = vld [vmem:[%s1923_s0 + $0x310] sm:$0xff] }
  0xec   :  { %v650_v47 = vadd.f32 %v649_v6, %v504_v46  ;;  %550 = vmatmul.f32.gmra.mxu1 %v90_v45  ;;  %v102_v45 = vld [vmem:[%s1923_s0 + $0x2c0] sm:$0xff] }
  0xee   :  { %v1629_v48 = vpop.f32.mrf.mxu3  ;;  %v658_v49 = vpop.f32.mrf.mxu2  ;;  %vm760_vm11 = vcmp.gt.f32.partialorder %v650_v47, 0.0  ;;  %v803_v50 = vmul.f32 0.01, %v650_v47 }
  0xef   :  { %v360_v51 = vpop.f32.mrf.mxu0 }
  0xf0   :  { %v361_v54 = vadd.f32 %v1429_v41, %v360_v51  ;;  %v846_v58 = vsel %vm760_vm11, %v650_v47, %v803_v50  ;;  %v433_v47 = vadd.f32 %v1429_v41, %v1485_v14 }
  0xf1   :  { %890 = vst.msk [vmem:[%s1925_s3 + $0x48] sm:$0xff] %vm880_vm2, %v846_v58  ;;  %v506_v59 = vpop.f32.mrf.mxu1 }
  0xf2   :  { %407 = vmatmul.f32.gmra.mxu0 %v92_v53  ;;  %v507_v61 = vadd.f32 %v506_v59, %v361_v54  ;;  %v115_v59 = vld [vmem:[%s1923_s0 + $0x328] sm:$0xff] }
  0xf3   :  { %958 = vmatmul.msk.f32.gmra.mxu2 %vm183_vm0, %v103_v56  ;;  %968 = vmatmul.msk.f32.gmra.mxu3 %vm183_vm0, %v133_v57  ;;  %v104_v57 = vld [vmem:[%s1923_s0 + $0x2d0] sm:$0xff] }
  0xf4   :  { %v653_v62 = vadd.f32 %v652_v20, %v507_v61  ;;  %553 = vmatmul.f32.gmra.mxu1 %v93_v60  ;;  %v105_v61 = vld [vmem:[%s1923_s0 + $0x2d8] sm:$0xff] }
  0xf6   :  { %v1650_v63 = vpop.f32.mrf.mxu3  ;;  %v661_v0 = vpop.f32.mrf.mxu2  ;;  %vm761_vm12 = vcmp.gt.f32.partialorder %v653_v62, 0.0  ;;  %v804_v2 = vmul.f32 0.01, %v653_v62 }
  0xf7   :  { %v363_v3 = vpop.f32.mrf.mxu0 }
  0xf8   :  { %v364_v6 = vadd.f32 %v1429_v41, %v363_v3  ;;  %v847_v9 = vsel %vm761_vm12, %v653_v62, %v804_v2 }
  0xf9   :  { %891 = vst.msk [vmem:[%s1925_s3 + $0x50] sm:$0xff] %vm880_vm2, %v847_v9  ;;  %v509_v10 = vpop.f32.mrf.mxu1  ;;  %v118_v9 = vld [vmem:[%s1923_s0 + $0x340] sm:$0xff] }
  0xfa   :  { %410 = vmatmul.f32.gmra.mxu0 %v95_v4  ;;  %v510_v12 = vadd.f32 %v509_v10, %v364_v6 }
  0xfb   :  { %959 = vmatmul.msk.f32.gmra.mxu2 %vm183_vm0, %v106_v7  ;;  %969 = vmatmul.msk.f32.gmra.mxu3 %vm183_vm0, %v136_v8  ;;  %v107_v7 = vld [vmem:[%s1923_s0 + $0x2e8] sm:$0xff] }
  0xfc   :  { %v656_v15 = vadd.f32 %v655_v34, %v510_v12  ;;  %556 = vmatmul.f32.gmra.mxu1 %v96_v11  ;;  %v108_v12 = vld [vmem:[%s1923_s0 + $0x2f0] sm:$0xff] }
  0xfe   :  { %v572_v16 = vpop.f32.mrf.mxu3  ;;  %v664_v17 = vpop.f32.mrf.mxu2  ;;  %vm762_vm13 = vcmp.gt.f32.partialorder %v656_v15, 0.0  ;;  %v805_v18 = vmul.f32 0.01, %v656_v15 }
  0xff   :  { %v1673_v20 = vadd.f32 %v572_v16, %v427_v13  ;;  %v366_v21 = vpop.f32.mrf.mxu0 }
 0x100   :  { %v367_v23 = vadd.f32 %v1429_v41, %v366_v21  ;;  %v848_v25 = vsel %vm762_vm13, %v656_v15, %v805_v18 }
 0x101   :  { %892 = vst.msk [vmem:[%s1925_s3 + $0x58] sm:$0xff] %vm880_vm2, %v848_v25  ;;  %v512_v26 = vpop.f32.mrf.mxu1 }
 0x102   :  { %413 = vmatmul.f32.gmra.mxu0 %v98_v22  ;;  %v513_v29 = vadd.f32 %v512_v26, %v367_v23 }
 0x103   :  { %960 = vmatmul.msk.f32.gmra.mxu2 %vm183_vm0, %v109_v24  ;;  %970 = vmatmul.msk.f32.gmra.mxu3 %vm183_vm0, %v139_v52 }
 0x104   :  { %v659_v31 = vadd.f32 %v658_v49, %v513_v29  ;;  %559 = vmatmul.f32.gmra.mxu1 %v99_v28 }
 0x106   :  { %v575_v32 = vpop.f32.mrf.mxu3  ;;  %v667_v34 = vpop.f32.mrf.mxu2  ;;  %vm763_vm14 = vcmp.gt.f32.partialorder %v659_v31, 0.0  ;;  %v806_v35 = vmul.f32 0.01, %v659_v31 }
 0x107   :  { %v1696_v36 = vadd.f32 %v575_v32, %v430_v30  ;;  %v369_v37 = vpop.f32.mrf.mxu0 }
 0x108   :  { %v370_v39 = vadd.f32 %v1429_v41, %v369_v37  ;;  %v849_v43 = vsel %vm763_vm14, %v659_v31, %v806_v35 }
 0x109   :  { %893 = vst.msk [vmem:[%s1925_s3 + $0x60] sm:$0xff] %vm880_vm2, %v849_v43  ;;  %v515_v44 = vpop.f32.mrf.mxu1 }
 0x10a   :  { %416 = vmatmul.f32.gmra.mxu0 %v101_v38  ;;  %v516_v46 = vadd.f32 %v515_v44, %v370_v39 }
 0x10b   :  { %961 = vmatmul.msk.f32.gmra.mxu2 %vm183_vm0, %v112_v42  ;;  %971 = vmatmul.msk.f32.gmra.mxu3 %vm183_vm0, %v142_v1 }
 0x10c   :  { %v662_v49 = vadd.f32 %v661_v0, %v516_v46  ;;  %562 = vmatmul.f32.gmra.mxu1 %v102_v45 }
 0x10e   :  { %v578_v50 = vpop.f32.mrf.mxu3  ;;  %v670_v51 = vpop.f32.mrf.mxu2  ;;  %vm764_vm15 = vcmp.gt.f32.partialorder %v662_v49, 0.0  ;;  %v807_v53 = vmul.f32 0.01, %v662_v49 }
 0x10f   :  { %v1719_v54 = vadd.f32 %v578_v50, %v433_v47  ;;  %v372_v56 = vpop.f32.mrf.mxu0 }
 0x110   :  { %v373_v58 = vadd.f32 %v1429_v41, %v372_v56  ;;  %v850_v14 = vsel %vm764_vm15, %v662_v49, %v807_v53 }
 0x111   :  { %894 = vst.msk [vmem:[%s1925_s3 + $0x68] sm:$0xff] %vm880_vm2, %v850_v14  ;;  %v518_v60 = vpop.f32.mrf.mxu1 }
 0x112   :  { %419 = vmatmul.f32.gmra.mxu0 %v104_v57  ;;  %v519_v62 = vadd.f32 %v518_v60, %v373_v58 }
 0x113   :  { %962 = vmatmul.msk.f32.gmra.mxu2 %vm183_vm0, %v115_v59 }
 0x114   :  { %v665_v0 = vadd.f32 %v664_v17, %v519_v62  ;;  %565 = vmatmul.f32.gmra.mxu1 %v105_v61 }
 0x116   :  { %v1736_v2 = vpop.f32.mrf.mxu3  ;;  %v673_v3 = vpop.f32.mrf.mxu2  ;;  %vm765_vm1 = vcmp.gt.f32.partialorder %v665_v0, 0.0  ;;  %v808_v4 = vmul.f32 0.01, %v665_v0 }
 0x117   :  { %v375_v6 = vpop.f32.mrf.mxu0 }
 0x118   :  { %v376_v8 = vadd.f32 %v1429_v41, %v375_v6  ;;  %v851_v10 = vsel %vm765_vm1, %v665_v0, %v808_v4 }
 0x119   :  { %895 = vst.msk [vmem:[%s1925_s3 + $0x70] sm:$0xff] %vm880_vm2, %v851_v10  ;;  %v521_v11 = vpop.f32.mrf.mxu1 }
 0x11a   :  { %422 = vmatmul.f32.gmra.mxu0 %v107_v7  ;;  %v522_v13 = vadd.f32 %v521_v11, %v376_v8 }
 0x11b   :  { %963 = vmatmul.msk.f32.gmra.mxu2 %vm183_vm0, %v118_v9 }
 0x11c   :  { %v668_v15 = vadd.f32 %v667_v34, %v522_v13  ;;  %568 = vmatmul.f32.gmra.mxu1 %v108_v12 }
 0x11e   :  { %v1753_v16 = vpop.f32.mrf.mxu3  ;;  %v676_v17 = vpop.f32.mrf.mxu2  ;;  %vm766_vm3 = vcmp.gt.f32.partialorder %v668_v15, 0.0  ;;  %v809_v18 = vmul.f32 0.01, %v668_v15 }
 0x11f   :  { %v378_v21 = vpop.f32.mrf.mxu0 }
 0x120   :  { %v379_v22 = vadd.f32 %v1429_v41, %v378_v21  ;;  %v852_v23 = vsel %vm766_vm3, %v668_v15, %v809_v18 }
 0x121   :  { %896 = vst.msk [vmem:[%s1925_s3 + $0x78] sm:$0xff] %vm880_vm2, %v852_v23  ;;  %v524_v24 = vpop.f32.mrf.mxu1 }
 0x122   :  { %v525_v52 = vadd.f32 %v524_v24, %v379_v22 }
 0x124   :  { %v671_v25 = vadd.f32 %v670_v51, %v525_v52 }
 0x126   :  { %v1760_v26 = vpop.f32.mrf.mxu3  ;;  %v679_v28 = vpop.f32.mrf.mxu2  ;;  %vm767_vm0 = vcmp.gt.f32.partialorder %v671_v25, 0.0  ;;  %v810_v29 = vmul.f32 0.01, %v671_v25 }
 0x127   :  { %v381_v30 = vpop.f32.mrf.mxu0 }
 0x128   :  { %v382_v31 = vadd.f32 %v1429_v41, %v381_v30  ;;  %v853_v32 = vsel %vm767_vm0, %v671_v25, %v810_v29  ;;  %v436_v30 = vadd.f32 %v1429_v41, %v1505_v27 }
 0x129   :  { %897 = vst.msk [vmem:[%s1925_s3 + $0x80] sm:$0xff] %vm880_vm2, %v853_v32  ;;  %v527_v34 = vpop.f32.mrf.mxu1 }
 0x12a   :  { %v528_v35 = vadd.f32 %v527_v34, %v382_v31  ;;  %v582_v32 = vadd.f32 %v1736_v2, %v436_v30  ;;  %v439_v2 = vadd.f32 %v1429_v41, %v1525_v40 }
 0x12c   :  { %v674_v37 = vadd.f32 %v673_v3, %v528_v35 }
 0x12e   :  { %v1767_v38 = vpop.f32.mrf.mxu3  ;;  %v682_v39 = vpop.f32.mrf.mxu2  ;;  %vm768_vm4 = vcmp.gt.f32.partialorder %v674_v37, 0.0  ;;  %v811_v42 = vmul.f32 0.01, %v674_v37 }
 0x12f   :  { %v384_v1 = vpop.f32.mrf.mxu0 }
 0x130   :  { %v385_v43 = vadd.f32 %v1429_v41, %v384_v1  ;;  %v854_v44 = vsel %vm768_vm4, %v674_v37, %v811_v42 }
 0x131   :  { %898 = vst.msk [vmem:[%s1925_s3 + $0x88] sm:$0xff] %vm880_vm2, %v854_v44  ;;  %v530_v45 = vpop.f32.mrf.mxu1 }
 0x132   :  { %v531_v46 = vadd.f32 %v530_v45, %v385_v43 }
 0x134   :  { %v677_v47 = vadd.f32 %v676_v17, %v531_v46 }
 0x136   :  { %v1774_v49 = vpop.f32.mrf.mxu3  ;;  %v685_v50 = vpop.f32.mrf.mxu2  ;;  %vm769_vm5 = vcmp.gt.f32.partialorder %v677_v47, 0.0  ;;  %v812_v51 = vmul.f32 0.01, %v677_v47 }
 0x137   :  { %v387_v53 = vpop.f32.mrf.mxu0 }
 0x138   :  { %v388_v56 = vadd.f32 %v1429_v41, %v387_v53  ;;  %v855_v57 = vsel %vm769_vm5, %v677_v47, %v812_v51 }
 0x139   :  { %899 = vst.msk [vmem:[%s1925_s3 + $0x90] sm:$0xff] %vm880_vm2, %v855_v57  ;;  %v533_v58 = vpop.f32.mrf.mxu1 }
 0x13a   :  { %v534_v59 = vadd.f32 %v533_v58, %v388_v56 }
 0x13c   :  { %v680_v14 = vadd.f32 %v679_v28, %v534_v59 }
 0x13e   :  { %v1781_v60 = vpop.f32.mrf.mxu3  ;;  %v688_v61 = vpop.f32.mrf.mxu2  ;;  %vm770_vm6 = vcmp.gt.f32.partialorder %v680_v14, 0.0  ;;  %v813_v62 = vmul.f32 0.01, %v680_v14 }
 0x13f   :  { %v390_v0 = vpop.f32.mrf.mxu0 }
 0x140   :  { %v391_v3 = vadd.f32 %v1429_v41, %v390_v0  ;;  %v856_v4 = vsel %vm770_vm6, %v680_v14, %v813_v62 }
 0x141   :  { %900 = vst.msk [vmem:[%s1925_s3 + $0x98] sm:$0xff] %vm880_vm2, %v856_v4  ;;  %v536_v6 = vpop.f32.mrf.mxu1 }
 0x142   :  { %v537_v7 = vadd.f32 %v536_v6, %v391_v3 }
 0x144   :  { %v683_v8 = vadd.f32 %v682_v39, %v537_v7 }
 0x146   :  { %v1788_v9 = vpop.f32.mrf.mxu3  ;;  %v691_v10 = vpop.f32.mrf.mxu2  ;;  %vm771_vm7 = vcmp.gt.f32.partialorder %v683_v8, 0.0  ;;  %v814_v11 = vmul.f32 0.01, %v683_v8 }
 0x147   :  { %v393_v12 = vpop.f32.mrf.mxu0 }
 0x148   :  { %v394_v13 = vadd.f32 %v1429_v41, %v393_v12  ;;  %v857_v15 = vsel %vm771_vm7, %v683_v8, %v814_v11 }
 0x149   :  { %901 = vst.msk [vmem:[%s1925_s3 + $0xa0] sm:$0xff] %vm880_vm2, %v857_v15  ;;  %v539_v17 = vpop.f32.mrf.mxu1 }
 0x14a   :  { %v540_v18 = vadd.f32 %v539_v17, %v394_v13 }
 0x14c   :  { %v686_v21 = vadd.f32 %v685_v50, %v540_v18  ;;  %v585_v50 = vadd.f32 %v1753_v16, %v439_v2  ;;  %v442_v16 = vadd.f32 %v1429_v41, %v1545_v55 }
 0x14e   :  { %v1795_v22 = vpop.f32.mrf.mxu3  ;;  %v694_v23 = vpop.f32.mrf.mxu2  ;;  %vm772_vm8 = vcmp.gt.f32.partialorder %v686_v21, 0.0  ;;  %v815_v24 = vmul.f32 0.01, %v686_v21  ;;  %v588_v4 = vadd.f32 %v1760_v26, %v442_v16  ;;  %v445_v26 = vadd.f32 %v1429_v41, %v1566_v5 }
 0x14f   :  { %v396_v52 = vpop.f32.mrf.mxu0 }
 0x150   :  { %v397_v25 = vadd.f32 %v1429_v41, %v396_v52  ;;  %v858_v28 = vsel %vm772_vm8, %v686_v21, %v815_v24 }
 0x151   :  { %902 = vst.msk [vmem:[%s1925_s3 + $0xa8] sm:$0xff] %vm880_vm2, %v858_v28  ;;  %v542_v29 = vpop.f32.mrf.mxu1 }
 0x152   :  { %v543_v31 = vadd.f32 %v542_v29, %v397_v25 }
 0x154   :  { %v689_v34 = vadd.f32 %v688_v61, %v543_v31 }
 0x156   :  { %v697_v35 = vpop.f32.mrf.mxu2  ;;  %v727_v37 = vpop.f32.mrf.mxu3  ;;  %vm773_vm9 = vcmp.gt.f32.partialorder %v689_v34, 0.0  ;;  %v816_v39 = vmul.f32 0.01, %v689_v34 }
 0x157   :  { %v728_v42 = vadd.f32 %v727_v37, %v582_v32  ;;  %v399_v1 = vpop.f32.mrf.mxu0 }
 0x158   :  { %v400_v43 = vadd.f32 %v1429_v41, %v399_v1  ;;  %v859_v44 = vsel %vm773_vm9, %v689_v34, %v816_v39 }
 0x159   :  { %vm786_vm10 = vcmp.gt.f32.partialorder %v728_v42, 0.0  ;;  %v829_v45 = vmul.f32 0.01, %v728_v42  ;;  %903 = vst.msk [vmem:[%s1925_s3 + $0xb0] sm:$0xff] %vm880_vm2, %v859_v44  ;;  %v545_v27 = vpop.f32.mrf.mxu1 }
 0x15a   :  { %v546_v47 = vadd.f32 %v545_v27, %v400_v43 }
 0x15b   :  { %v872_v46 = vsel %vm786_vm10, %v728_v42, %v829_v45 }
 0x15c   :  { %916 = vst.msk [vmem:[%s1925_s3 + $0x118] sm:$0xff] %vm880_vm2, %v872_v46  ;;  %v692_v51 = vadd.f32 %v691_v10, %v546_v47 }
 0x15e   :  { %v700_v53 = vpop.f32.mrf.mxu2  ;;  %v730_v56 = vpop.f32.mrf.mxu3  ;;  %vm774_vm11 = vcmp.gt.f32.partialorder %v692_v51, 0.0  ;;  %v817_v57 = vmul.f32 0.01, %v692_v51 }
 0x15f   :  { %v731_v58 = vadd.f32 %v730_v56, %v585_v50  ;;  %v402_v59 = vpop.f32.mrf.mxu0 }
 0x160   :  { %v403_v14 = vadd.f32 %v1429_v41, %v402_v59  ;;  %v860_v61 = vsel %vm774_vm11, %v692_v51, %v817_v57  ;;  %vm923_vm11 = vcmask 517120  }
 0x161   :  { %vm787_vm12 = vcmp.gt.f32.partialorder %v731_v58, 0.0  ;;  %v830_v40 = vmul.f32 0.01, %v731_v58  ;;  %904 = vst.msk [vmem:[%s1925_s3 + $0xb8] sm:$0xff] %vm880_vm2, %v860_v61  ;;  %v548_v62 = vpop.f32.mrf.mxu1 }
 0x162   :  { %v549_v3 = vadd.f32 %v548_v62, %v403_v14 }
 0x163   :  { %v873_v0 = vsel %vm787_vm12, %v731_v58, %v830_v40 }
 0x164   :  { %917 = vst.msk [vmem:[%s1925_s3 + $0x120] sm:$0xff] %vm880_vm2, %v873_v0  ;;  %v695_v6 = vadd.f32 %v694_v23, %v549_v3  ;;  %v591_v23 = vadd.f32 %v1767_v38, %v445_v26  ;;  %v448_v38 = vadd.f32 %v1429_v41, %v1587_v19 }
 0x166   :  { %v703_v7 = vpop.f32.mrf.mxu2  ;;  %v733_v8 = vpop.f32.mrf.mxu3  ;;  %vm775_vm13 = vcmp.gt.f32.partialorder %v695_v6, 0.0  ;;  %v818_v10 = vmul.f32 0.01, %v695_v6  ;;  %v594_v39 = vadd.f32 %v1774_v49, %v448_v38  ;;  %v451_v49 = vadd.f32 %v1429_v41, %v1608_v33 }
 0x167   :  { %v734_v11 = vadd.f32 %v733_v8, %v588_v4  ;;  %v405_v12 = vpop.f32.mrf.mxu0 }
 0x168   :  { %v406_v13 = vadd.f32 %v1429_v41, %v405_v12  ;;  %v861_v15 = vsel %vm775_vm13, %v695_v6, %v818_v10 }
 0x169   :  { %vm788_vm14 = vcmp.gt.f32.partialorder %v734_v11, 0.0  ;;  %v831_v55 = vmul.f32 0.01, %v734_v11  ;;  %905 = vst.msk [vmem:[%s1925_s3 + $0xc0] sm:$0xff] %vm880_vm2, %v861_v15  ;;  %v551_v17 = vpop.f32.mrf.mxu1 }
 0x16a   :  { %v552_v21 = vadd.f32 %v551_v17, %v406_v13 }
 0x16b   :  { %v874_v18 = vsel %vm788_vm14, %v734_v11, %v831_v55 }
 0x16c   :  { %918 = vst.msk [vmem:[%s1925_s3 + $0x128] sm:$0xff] %vm880_vm2, %v874_v18  ;;  %v698_v24 = vadd.f32 %v697_v35, %v552_v21 }
 0x16e   :  { %v706_v52 = vpop.f32.mrf.mxu2  ;;  %v736_v25 = vpop.f32.mrf.mxu3  ;;  %vm776_vm15 = vcmp.gt.f32.partialorder %v698_v24, 0.0  ;;  %v819_v28 = vmul.f32 0.01, %v698_v24 }
 0x16f   :  { %v737_v29 = vadd.f32 %v736_v25, %v591_v23  ;;  %v408_v30 = vpop.f32.mrf.mxu0 }
 0x170   :  { %v409_v31 = vadd.f32 %v1429_v41, %v408_v30  ;;  %v862_v32 = vsel %vm776_vm15, %v698_v24, %v819_v28 }
 0x171   :  { %vm789_vm1 = vcmp.gt.f32.partialorder %v737_v29, 0.0  ;;  %v832_v5 = vmul.f32 0.01, %v737_v29  ;;  %906 = vst.msk [vmem:[%s1925_s3 + $0xc8] sm:$0xff] %vm880_vm2, %v862_v32  ;;  %v554_v34 = vpop.f32.mrf.mxu1 }
 0x172   :  { %v555_v37 = vadd.f32 %v554_v34, %v409_v31 }
 0x173   :  { %v875_v35 = vsel %vm789_vm1, %v737_v29, %v832_v5 }
 0x174   :  { %919 = vst.msk [vmem:[%s1925_s3 + $0x130] sm:$0xff] %vm880_vm2, %v875_v35  ;;  %v701_v42 = vadd.f32 %v700_v53, %v555_v37  ;;  %v597_v53 = vadd.f32 %v1781_v60, %v451_v49  ;;  %v454_v60 = vadd.f32 %v1429_v41, %v1629_v48 }
 0x176   :  { %v709_v1 = vpop.f32.mrf.mxu2  ;;  %v739_v43 = vpop.f32.mrf.mxu3  ;;  %vm777_vm3 = vcmp.gt.f32.partialorder %v701_v42, 0.0  ;;  %v820_v44 = vmul.f32 0.01, %v701_v42  ;;  %v600_v4 = vadd.f32 %v1788_v9, %v454_v60  ;;  %v457_v9 = vadd.f32 %v1429_v41, %v1650_v63 }
 0x177   :  { %v740_v45 = vadd.f32 %v739_v43, %v594_v39  ;;  %v411_v27 = vpop.f32.mrf.mxu0 }
 0x178   :  { %v412_v2 = vadd.f32 %v1429_v41, %v411_v27  ;;  %v863_v46 = vsel %vm777_vm3, %v701_v42, %v820_v44  ;;  %v603_v18 = vadd.f32 %v1795_v22, %v457_v9 }
 0x179   :  { %vm790_vm0 = vcmp.gt.f32.partialorder %v740_v45, 0.0  ;;  %v833_v19 = vmul.f32 0.01, %v740_v45  ;;  %907 = vst.msk [vmem:[%s1925_s3 + $0xd0] sm:$0xff] %vm880_vm2, %v863_v46  ;;  %v557_v47 = vpop.f32.mrf.mxu1 }
 0x17a   :  { %v558_v51 = vadd.f32 %v557_v47, %v412_v2 }
 0x17b   :  { %v876_v50 = vsel %vm790_vm0, %v740_v45, %v833_v19 }
 0x17c   :  { %920 = vst.msk [vmem:[%s1925_s3 + $0x138] sm:$0xff] %vm880_vm2, %v876_v50  ;;  %v704_v56 = vadd.f32 %v703_v7, %v558_v51 }
 0x17e   :  { %v712_v57 = vpop.f32.mrf.mxu2  ;;  %v742_v58 = vpop.f32.mrf.mxu3  ;;  %vm778_vm4 = vcmp.gt.f32.partialorder %v704_v56, 0.0  ;;  %v821_v59 = vmul.f32 0.01, %v704_v56 }
 0x17f   :  { %v743_v14 = vadd.f32 %v742_v58, %v597_v53  ;;  %v414_v61 = vpop.f32.mrf.mxu0 }
 0x180   :  { %v415_v40 = vadd.f32 %v1429_v41, %v414_v61  ;;  %v864_v62 = vsel %vm778_vm4, %v704_v56, %v821_v59 }
 0x181   :  { %vm791_vm5 = vcmp.gt.f32.partialorder %v743_v14, 0.0  ;;  %v834_v33 = vmul.f32 0.01, %v743_v14  ;;  %908 = vst.msk [vmem:[%s1925_s3 + $0xd8] sm:$0xff] %vm880_vm2, %v864_v62  ;;  %v560_v16 = vpop.f32.mrf.mxu1 }
 0x182   :  { %v561_v3 = vadd.f32 %v560_v16, %v415_v40 }
 0x183   :  { %v877_v0 = vsel %vm791_vm5, %v743_v14, %v834_v33 }
 0x184   :  { %921 = vst.msk [vmem:[%s1925_s3 + $0x140] sm:$0xff] %vm880_vm2, %v877_v0  ;;  %v707_v6 = vadd.f32 %v706_v52, %v561_v3 }
 0x186   :  { %v715_v7 = vpop.f32.mrf.mxu2  ;;  %v745_v8 = vpop.f32.mrf.mxu3  ;;  %vm779_vm6 = vcmp.gt.f32.partialorder %v707_v6, 0.0  ;;  %v822_v10 = vmul.f32 0.01, %v707_v6 }
 0x187   :  { %v746_v11 = vadd.f32 %v745_v8, %v600_v4  ;;  %v417_v12 = vpop.f32.mrf.mxu0 }
 0x188   :  { %v418_v13 = vadd.f32 %v1429_v41, %v417_v12  ;;  %v865_v15 = vsel %vm779_vm6, %v707_v6, %v822_v10  ;;  %v1009_v41 = vld [vmem:[%s1924_s2] ss:$0 sm:$0xff] }
 0x189   :  { %vm792_vm7 = vcmp.gt.f32.partialorder %v746_v11, 0.0  ;;  %v835_v48 = vmul.f32 0.01, %v746_v11  ;;  %909 = vst.msk [vmem:[%s1925_s3 + $0xe0] sm:$0xff] %vm880_vm2, %v865_v15  ;;  %v563_v55 = vpop.f32.mrf.mxu1 }
 0x18a   :  { %v564_v26 = vadd.f32 %v563_v55, %v418_v13 }
 0x18b   :  { %v878_v17 = vsel %vm792_vm7, %v746_v11, %v835_v48 }
 0x18c   :  { %922 = vst.msk [vmem:[%s1925_s3 + $0x148] sm:$0xff] %vm880_vm2, %v878_v17  ;;  %v710_v21 = vadd.f32 %v709_v1, %v564_v26 }
 0x18e   :  { %v718_v23 = vpop.f32.mrf.mxu2  ;;  %v748_v24 = vpop.f32.mrf.mxu3  ;;  %vm780_vm8 = vcmp.gt.f32.partialorder %v710_v21, 0.0  ;;  %v823_v52 = vmul.f32 0.01, %v710_v21 }
 0x18f   :  { %v719_v25 = vadd.f32 %v718_v23, %v1673_v20  ;;  %v749_v28 = vadd.f32 %v748_v24, %v603_v18  ;;  %v420_v29 = vpop.f32.mrf.mxu0 }
 0x190   :  { %v421_v63 = vadd.f32 %v1009_v41, %v420_v29  ;;  %v866_v30 = vsel %vm780_vm8, %v710_v21, %v823_v52 }
 0x191   :  { %vm783_vm9 = vcmp.gt.f32.partialorder %v719_v25, 0.0  ;;  %v826_v31 = vmul.f32 0.01, %v719_v25  ;;  %vm793_vm10 = vcmp.gt.f32.partialorder %v749_v28, 0.0  ;;  %910 = vst.msk [vmem:[%s1925_s3 + $0xe8] sm:$0xff] %vm880_vm2, %v866_v30  ;;  %v566_v32 = vpop.f32.mrf.mxu1 }
 0x192   :  { %v836_v22 = vmul.f32 0.01, %v749_v28  ;;  %v567_v5 = vadd.f32 %v566_v32, %v421_v63 }
 0x193   :  { %v869_v20 = vsel %vm783_vm9, %v719_v25, %v826_v31 }
 0x194   :  { %913 = vst.msk [vmem:[%s1925_s3 + $0x100] sm:$0xff] %vm880_vm2, %v869_v20  ;;  %v879_v34 = vsel %vm793_vm10, %v749_v28, %v836_v22  ;;  %v713_v38 = vadd.f32 %v712_v57, %v567_v5 }
 0x195   :  { %924 = vst.msk [vmem:[%s1925_s3 + $0x150] sm:$0x3] %vm923_vm11, %v879_v34 }
 0x196   :  { %v721_v35 = vpop.f32.mrf.mxu2  ;;  %vm781_vm12 = vcmp.gt.f32.partialorder %v713_v38, 0.0  ;;  %v824_v37 = vmul.f32 0.01, %v713_v38 }
 0x197   :  { %v722_v39 = vadd.f32 %v721_v35, %v1696_v36  ;;  %v423_v42 = vpop.f32.mrf.mxu0 }
 0x198   :  { %v424_v1 = vadd.f32 %v1009_v41, %v423_v42  ;;  %v867_v43 = vsel %vm781_vm12, %v713_v38, %v824_v37 }
 0x199   :  { %vm784_vm13 = vcmp.gt.f32.partialorder %v722_v39, 0.0  ;;  %v827_v44 = vmul.f32 0.01, %v722_v39  ;;  %911 = vst.msk [vmem:[%s1925_s3 + $0xf0] sm:$0xff] %vm880_vm2, %v867_v43  ;;  %v569_v45 = vpop.f32.mrf.mxu1 }
 0x19a   :  { %v570_v2 = vadd.f32 %v569_v45, %v424_v1 }
 0x19b   :  { %v870_v27 = vsel %vm784_vm13, %v722_v39, %v827_v44 }
 0x19c   :  { %914 = vst.msk [vmem:[%s1925_s3 + $0x108] sm:$0xff] %vm880_vm2, %v870_v27  ;;  %v716_v46 = vadd.f32 %v715_v7, %v570_v2 }
 0x19e   :  { %v724_v36 = vpop.f32.mrf.mxu2  ;;  %vm782_vm14 = vcmp.gt.f32.partialorder %v716_v46, 0.0  ;;  %v825_v19 = vmul.f32 0.01, %v716_v46 }
 0x19f   :  { %v725_v47 = vadd.f32 %v724_v36, %v1719_v54 }
 0x1a0   :  { %v868_v49 = vsel %vm782_vm14, %v716_v46, %v825_v19 }
 0x1a1   :  { %vm785_vm15 = vcmp.gt.f32.partialorder %v725_v47, 0.0  ;;  %v828_v50 = vmul.f32 0.01, %v725_v47  ;;  %912 = vst.msk [vmem:[%s1925_s3 + $0xf8] sm:$0xff] %vm880_vm2, %v868_v49 }
 0x1a3   :  { %v871_v51 = vsel %vm785_vm15, %v725_v47, %v828_v50 }
 0x1a4   :  { %915 = vst.msk [vmem:[%s1925_s3 + $0x110] sm:$0xff] %vm880_vm2, %v871_v51 }

// kernel: agent_network_forward.6
= control target key start
LH: loop header
LB: loop body
LE: loop exit
PB: predicated region body
PF: predicated region fallthrough
CT: control target
= control target key end

     0   :  { %vm245_vm0 = vcmask 523264   ;;  %vm982_vm2 = vcmask 261120   ;;  %s2083_s1 = inlined_call_operand.vmem [shape: f32[576,32], index: 1, kind: input, shape index: {}]   ;;  %s2084_s0 = inlined_call_operand.vmem [shape: f32[242,576], index: 0, kind: input, shape index: {}]   ;;  %s2085_s2 = inlined_call_operand.vmem [shape: f32[1,32], index: 2, kind: input, shape index: {}]   ;;  %s2086_s3 = inlined_call_operand.vmem [shape: f32[242,32], index: 3, kind: output, shape index: {}]  }
   0x1   :  { %v184_v0 = vld [vmem:[%s2083_s1 + $0x78] sm:$0xff]  ;;  %v183_v1 = vld [vmem:[%s2083_s1 + $0x70] sm:$0xff]  ;;  %v182_v2 = vld [vmem:[%s2083_s1 + $0x68] sm:$0xff] }
   0x2   :  { %1050 = vmatpush.msra.mxu1 %v184_v0  ;;  %1051 = vmatpush.msra.mxu2 %v184_v0  ;;  %v181_v3 = vld [vmem:[%s2083_s1 + $0x60] sm:$0xff]  ;;  %v180_v4 = vld [vmem:[%s2083_s1 + $0x58] sm:$0xff]  ;;  %v179_v5 = vld [vmem:[%s2083_s1 + $0x50] sm:$0xff] }
   0x3   :  { %339 = vmatpush.msra.mxu0 %v184_v0  ;;  %1052 = vmatpush.msra.mxu3 %v184_v0  ;;  %v178_v6 = vld [vmem:[%s2083_s1 + $0x48] sm:$0xff]  ;;  %v177_v7 = vld [vmem:[%s2083_s1 + $0x40] sm:$0xff]  ;;  %v176_v8 = vld [vmem:[%s2083_s1 + $0x38] sm:$0xff] }
   0x4   :  { %1053 = vmatpush.msra.mxu1 %v183_v1  ;;  %1054 = vmatpush.msra.mxu2 %v183_v1  ;;  %v175_v9 = vld [vmem:[%s2083_s1 + $0x30] sm:$0xff]  ;;  %v174_v10 = vld [vmem:[%s2083_s1 + $0x28] sm:$0xff]  ;;  %v173_v11 = vld [vmem:[%s2083_s1 + $0x20] sm:$0xff] }
   0x5   :  { %340 = vmatpush.msra.mxu0 %v183_v1  ;;  %1055 = vmatpush.msra.mxu3 %v183_v1  ;;  %v172_v12 = vld [vmem:[%s2083_s1 + $0x18] sm:$0xff]  ;;  %v171_v13 = vld [vmem:[%s2083_s1 + $0x10] sm:$0xff]  ;;  %v170_v14 = vld [vmem:[%s2083_s1 + $0x8] sm:$0xff] }
   0x6   :  { %1056 = vmatpush.msra.mxu1 %v182_v2  ;;  %1057 = vmatpush.msra.mxu2 %v182_v2  ;;  %v169_v15 = vld [vmem:[%s2083_s1] sm:$0xff]  ;;  %v216_v18 = vld [vmem:[%s2083_s1 + $0x178] sm:$0xff]  ;;  %v215_v20 = vld [vmem:[%s2083_s1 + $0x170] sm:$0xff] }
   0x7   :  { %341 = vmatpush.msra.mxu0 %v182_v2  ;;  %1058 = vmatpush.msra.mxu3 %v182_v2  ;;  %v54_v16 = vld [vmem:[%s2084_s0 + $0x140] sm:$0xff]  ;;  %v200_v19 = vld [vmem:[%s2083_s1 + $0xf8] sm:$0xff]  ;;  %v199_v21 = vld [vmem:[%s2083_s1 + $0xf0] sm:$0xff] }
   0x8   :  { %1059 = vmatpush.msra.mxu1 %v181_v3  ;;  %1060 = vmatpush.msra.mxu2 %v181_v3  ;;  %v94_v17 = vld [vmem:[%s2084_s0 + $0x280] sm:$0xff]  ;;  %v214_v24 = vld [vmem:[%s2083_s1 + $0x168] sm:$0xff]  ;;  %v232_v25 = vld [vmem:[%s2083_s1 + $0x1f8] sm:$0xff] }
   0x9   :  { %342 = vmatpush.msra.mxu0 %v181_v3  ;;  %1061 = vmatpush.msra.mxu3 %v181_v3  ;;  %v14_v22 = vld [vmem:[%s2084_s0] sm:$0xff]  ;;  %v240_v26 = vld [vmem:[%s2083_s1 + $0x238] sm:$0xff]  ;;  %v198_v27 = vld [vmem:[%s2083_s1 + $0xe8] sm:$0xff] }
   0xa   :  { %1062 = vmatpush.msra.mxu1 %v180_v4  ;;  %1063 = vmatpush.msra.mxu2 %v180_v4  ;;  %v134_v23 = vld [vmem:[%s2084_s0 + $0x3c0] sm:$0xff]  ;;  %v231_v29 = vld [vmem:[%s2083_s1 + $0x1f0] sm:$0xff]  ;;  %v59_v30 = vld [vmem:[%s2084_s0 + $0x168] sm:$0xff] }
   0xb   :  { %343 = vmatpush.msra.mxu0 %v180_v4  ;;  %1064 = vmatpush.msra.mxu3 %v180_v4  ;;  %v213_v28 = vld [vmem:[%s2083_s1 + $0x160] sm:$0xff]  ;;  %v99_v31 = vld [vmem:[%s2084_s0 + $0x2a8] sm:$0xff]  ;;  %v212_v33 = vld [vmem:[%s2083_s1 + $0x158] sm:$0xff] }
   0xc   :  { %1065 = vmatpush.msra.mxu1 %v179_v5  ;;  %1066 = vmatpush.msra.mxu2 %v179_v5  ;;  %v197_v32 = vld [vmem:[%s2083_s1 + $0xe0] sm:$0xff]  ;;  %v230_v34 = vld [vmem:[%s2083_s1 + $0x1e8] sm:$0xff]  ;;  %v239_v35 = vld [vmem:[%s2083_s1 + $0x230] sm:$0xff] }
   0xd   :  { %344 = vmatpush.msra.mxu0 %v179_v5  ;;  %1067 = vmatpush.msra.mxu3 %v179_v5  ;;  %v196_v36 = vld [vmem:[%s2083_s1 + $0xd8] sm:$0xff]  ;;  %v211_v37 = vld [vmem:[%s2083_s1 + $0x150] sm:$0xff]  ;;  %v19_v38 = vld [vmem:[%s2084_s0 + $0x28] sm:$0xff] }
   0xe   :  { %1068 = vmatpush.msra.mxu1 %v178_v6  ;;  %1069 = vmatpush.msra.mxu2 %v178_v6  ;;  %v139_v39 = vld [vmem:[%s2084_s0 + $0x3e8] sm:$0xff]  ;;  %v229_v40 = vld [vmem:[%s2083_s1 + $0x1e0] sm:$0xff]  ;;  %v195_v41 = vld [vmem:[%s2083_s1 + $0xd0] sm:$0xff] }
   0xf   :  { %345 = vmatpush.msra.mxu0 %v178_v6  ;;  %1070 = vmatpush.msra.mxu3 %v178_v6  ;;  %v210_v42 = vld [vmem:[%s2083_s1 + $0x148] sm:$0xff]  ;;  %v228_v44 = vld [vmem:[%s2083_s1 + $0x1d8] sm:$0xff]  ;;  %v64_v46 = vld [vmem:[%s2084_s0 + $0x190] sm:$0xff] }
  0x10   :  { %1071 = vmatpush.msra.mxu1 %v177_v7  ;;  %1072 = vmatpush.msra.mxu2 %v177_v7  ;;  %v238_v43 = vld [vmem:[%s2083_s1 + $0x228] sm:$0xff]  ;;  %v104_v47 = vld [vmem:[%s2084_s0 + $0x2d0] sm:$0xff]  ;;  %v209_v48 = vld [vmem:[%s2083_s1 + $0x140] sm:$0xff] }
  0x11   :  { %346 = vmatpush.msra.mxu0 %v177_v7  ;;  %1073 = vmatpush.msra.mxu3 %v177_v7  ;;  %v194_v45 = vld [vmem:[%s2083_s1 + $0xc8] sm:$0xff]  ;;  %v227_v49 = vld [vmem:[%s2083_s1 + $0x1d0] sm:$0xff]  ;;  %v193_v50 = vld [vmem:[%s2083_s1 + $0xc0] sm:$0xff] }
  0x12   :  { %1074 = vmatpush.msra.mxu1 %v176_v8  ;;  %1075 = vmatpush.msra.mxu2 %v176_v8  ;;  %v237_v51 = vld [vmem:[%s2083_s1 + $0x220] sm:$0xff]  ;;  %v226_v52 = vld [vmem:[%s2083_s1 + $0x1c8] sm:$0xff]  ;;  %v208_v53 = vld [vmem:[%s2083_s1 + $0x138] sm:$0xff] }
  0x13   :  { %347 = vmatpush.msra.mxu0 %v176_v8  ;;  %1076 = vmatpush.msra.mxu3 %v176_v8  ;;  %v24_v54 = vld [vmem:[%s2084_s0 + $0x50] sm:$0xff]  ;;  %v225_v56 = vld [vmem:[%s2083_s1 + $0x1c0] sm:$0xff]  ;;  %v192_v57 = vld [vmem:[%s2083_s1 + $0xb8] sm:$0xff] }
  0x14   :  { %1077 = vmatpush.msra.mxu1 %v175_v9  ;;  %1078 = vmatpush.msra.mxu2 %v175_v9  ;;  %v144_v55 = vld [vmem:[%s2084_s0 + $0x410] sm:$0xff]  ;;  %v236_v59 = vld [vmem:[%s2083_s1 + $0x218] sm:$0xff]  ;;  %v206_v0 = vld [vmem:[%s2083_s1 + $0x128] sm:$0xff] }
  0x15   :  { %348 = vmatpush.msra.mxu0 %v175_v9  ;;  %1079 = vmatpush.msra.mxu3 %v175_v9  ;;  %v207_v58 = vld [vmem:[%s2083_s1 + $0x130] sm:$0xff]  ;;  %v224_v60 = vld [vmem:[%s2083_s1 + $0x1b8] sm:$0xff]  ;;  %v190_v2 = vld [vmem:[%s2083_s1 + $0xa8] sm:$0xff] }
  0x16   :  { %1080 = vmatpush.msra.mxu1 %v174_v10  ;;  %1081 = vmatpush.msra.mxu2 %v174_v10  ;;  %v191_v61 = vld [vmem:[%s2083_s1 + $0xb0] sm:$0xff]  ;;  %v69_v62 = vld [vmem:[%s2084_s0 + $0x1b8] sm:$0xff]  ;;  %v205_v4 = vld [vmem:[%s2083_s1 + $0x120] sm:$0xff] }
  0x17   :  { %349 = vmatpush.msra.mxu0 %v174_v10  ;;  %1082 = vmatpush.msra.mxu3 %v174_v10  ;;  %v109_v63 = vld [vmem:[%s2084_s0 + $0x2f8] sm:$0xff]  ;;  %v223_v1 = vld [vmem:[%s2083_s1 + $0x1b0] sm:$0xff]  ;;  %v222_v5 = vld [vmem:[%s2083_s1 + $0x1a8] sm:$0xff] }
  0x18   :  { %1083 = vmatpush.msra.mxu1 %v173_v11  ;;  %1084 = vmatpush.msra.mxu2 %v173_v11  ;;  %v235_v3 = vld [vmem:[%s2083_s1 + $0x210] sm:$0xff]  ;;  %v29_v6 = vld [vmem:[%s2084_s0 + $0x78] sm:$0xff]  ;;  %v189_v8 = vld [vmem:[%s2083_s1 + $0xa0] sm:$0xff] }
  0x19   :  { %350 = vmatpush.msra.mxu0 %v173_v11  ;;  %1085 = vmatpush.msra.mxu3 %v173_v11  ;;  %v149_v7 = vld [vmem:[%s2084_s0 + $0x438] sm:$0xff]  ;;  %v221_v10 = vld [vmem:[%s2083_s1 + $0x1a0] sm:$0xff]  ;;  %v234_v11 = vld [vmem:[%s2083_s1 + $0x208] sm:$0xff] }
  0x1a   :  { %1086 = vmatpush.msra.mxu1 %v172_v12  ;;  %1087 = vmatpush.msra.mxu2 %v172_v12  ;;  %v204_v9 = vld [vmem:[%s2083_s1 + $0x118] sm:$0xff] }
  0x1b   :  { %351 = vmatpush.msra.mxu0 %v172_v12  ;;  %1088 = vmatpush.msra.mxu3 %v172_v12  ;;  %v188_v12 = vld [vmem:[%s2083_s1 + $0x98] sm:$0xff] }
  0x1c   :  { %1089 = vmatpush.msra.mxu1 %v171_v13  ;;  %1090 = vmatpush.msra.mxu2 %v171_v13 }
  0x1d   :  { %352 = vmatpush.msra.mxu0 %v171_v13  ;;  %1091 = vmatpush.msra.mxu3 %v171_v13  ;;  %v203_v13 = vld [vmem:[%s2083_s1 + $0x110] sm:$0xff] }
  0x1e   :  { %1092 = vmatpush.msra.mxu1 %v170_v14  ;;  %1093 = vmatpush.msra.mxu2 %v170_v14 }
  0x1f   :  { %353 = vmatpush.msra.mxu0 %v170_v14  ;;  %1094 = vmatpush.msra.mxu3 %v170_v14  ;;  %v74_v14 = vld [vmem:[%s2084_s0 + $0x1e0] sm:$0xff] }
  0x20   :  { %1095 = vmatpush.msra.mxu1 %v169_v15  ;;  %1096 = vmatpush.msra.mxu2 %v169_v15 }
  0x21   :  { %379 = vmatmul.f32.vlgmr.msra.gmra.mxu1 %v54_v16  ;;  %403 = vmatmul.f32.vlgmr.msra.gmra.mxu2 %v94_v17  ;;  %v220_v16 = vld [vmem:[%s2083_s1 + $0x198] sm:$0xff]  ;;  %v187_v17 = vld [vmem:[%s2083_s1 + $0x90] sm:$0xff] }
  0x22   :  { %559 = vmatpush.msrb.mxu2 %v216_v18  ;;  %449 = vmatpush.msrb.mxu1 %v200_v19  ;;  %v202_v18 = vld [vmem:[%s2083_s1 + $0x108] sm:$0xff]  ;;  %v219_v19 = vld [vmem:[%s2083_s1 + $0x190] sm:$0xff] }
  0x23   :  { %354 = vmatpush.msra.mxu0 %v169_v15  ;;  %1097 = vmatpush.msra.mxu3 %v169_v15  ;;  %v114_v15 = vld [vmem:[%s2084_s0 + $0x320] sm:$0xff] }
  0x24   :  { %560 = vmatpush.msrb.mxu2 %v215_v20  ;;  %450 = vmatpush.msrb.mxu1 %v199_v21  ;;  %v186_v20 = vld [vmem:[%s2083_s1 + $0x88] sm:$0xff]  ;;  %v233_v21 = vld [vmem:[%s2083_s1 + $0x200] sm:$0xff] }
  0x25   :  { %355 = vmatmul.f32.vlgmr.msra.gmra.mxu0 %v14_v22  ;;  %427 = vmatmul.f32.vlgmr.msra.gmra.mxu3 %v134_v23  ;;  %v34_v22 = vld [vmem:[%s2084_s0 + $0xa0] sm:$0xff] }
  0x26   :  { %561 = vmatpush.msrb.mxu2 %v214_v24  ;;  %669 = vmatpush.msrb.mxu3 %v232_v25  ;;  %v154_v23 = vld [vmem:[%s2084_s0 + $0x460] sm:$0xff]  ;;  %v218_v24 = vld [vmem:[%s2083_s1 + $0x188] sm:$0xff] }
  0x27   :  { %787 = vmatpush.msrb.mxu0 %v240_v26  ;;  %451 = vmatpush.msrb.mxu1 %v198_v27  ;;  %v201_v25 = vld [vmem:[%s2083_s1 + $0x100] sm:$0xff] }
  0x28   :  { %562 = vmatpush.msrb.mxu2 %v213_v28  ;;  %670 = vmatpush.msrb.mxu3 %v231_v29  ;;  %v185_v26 = vld [vmem:[%s2083_s1 + $0x80] sm:$0xff]  ;;  %v79_v28 = vld [vmem:[%s2084_s0 + $0x208] sm:$0xff] }
  0x29   :  { %382 = vmatmul.f32.gmra.mxu1 %v59_v30  ;;  %406 = vmatmul.f32.gmra.mxu2 %v99_v31  ;;  %v217_v27 = vld [vmem:[%s2083_s1 + $0x180] sm:$0xff]  ;;  %v119_v29 = vld [vmem:[%s2084_s0 + $0x348] sm:$0xff] }
  0x2a   :  { %452 = vmatpush.msrb.mxu1 %v197_v32  ;;  %563 = vmatpush.msrb.mxu2 %v212_v33  ;;  %v39_v30 = vld [vmem:[%s2084_s0 + $0xc8] sm:$0xff]  ;;  %v84_v32 = vld [vmem:[%s2084_s0 + $0x230] sm:$0xff] }
  0x2b   :  { %671 = vmatpush.msrb.mxu3 %v230_v34  ;;  %788 = vmatpush.msrb.mxu0 %v239_v35  ;;  %v159_v31 = vld [vmem:[%s2084_s0 + $0x488] sm:$0xff]  ;;  %v124_v33 = vld [vmem:[%s2084_s0 + $0x370] sm:$0xff] }
  0x2c   :  { %453 = vmatpush.msrb.mxu1 %v196_v36  ;;  %564 = vmatpush.msrb.mxu2 %v211_v37  ;;  %v44_v34 = vld [vmem:[%s2084_s0 + $0xf0] sm:$0xff]  ;;  %v89_v36 = vld [vmem:[%s2084_s0 + $0x258] sm:$0xff] }
  0x2d   :  { %358 = vmatmul.f32.gmra.mxu0 %v19_v38  ;;  %430 = vmatmul.f32.gmra.mxu3 %v139_v39  ;;  %v164_v35 = vld [vmem:[%s2084_s0 + $0x4b0] sm:$0x3]  ;;  %v129_v37 = vld [vmem:[%s2084_s0 + $0x398] sm:$0xff] }
  0x2e   :  { %672 = vmatpush.msrb.mxu3 %v229_v40  ;;  %454 = vmatpush.msrb.mxu1 %v195_v41  ;;  %v49_v38 = vld [vmem:[%s2084_s0 + $0x118] sm:$0xff]  ;;  %v15_v40 = vld [vmem:[%s2084_s0 + $0x8] sm:$0xff]  ;;  %v16_v41 = vld [vmem:[%s2084_s0 + $0x10] sm:$0xff] }
  0x2f   :  { %565 = vmatpush.msrb.mxu2 %v210_v42  ;;  %789 = vmatpush.msrb.mxu0 %v238_v43  ;;  %v17_v39 = vld [vmem:[%s2084_s0 + $0x18] sm:$0xff]  ;;  %v22_v42 = vld [vmem:[%s2084_s0 + $0x40] sm:$0xff] }
  0x30   :  { %673 = vmatpush.msrb.mxu3 %v228_v44  ;;  %455 = vmatpush.msrb.mxu1 %v194_v45  ;;  %v18_v43 = vld [vmem:[%s2084_s0 + $0x20] sm:$0xff]  ;;  %v20_v44 = vld [vmem:[%s2084_s0 + $0x30] sm:$0xff]  ;;  %v21_v45 = vld [vmem:[%s2084_s0 + $0x38] sm:$0xff] }
  0x31   :  { %385 = vmatmul.f32.gmra.mxu1 %v64_v46  ;;  %409 = vmatmul.f32.gmra.mxu2 %v104_v47  ;;  %v27_v46 = vld [vmem:[%s2084_s0 + $0x68] sm:$0xff] }
  0x32   :  { %566 = vmatpush.msrb.mxu2 %v209_v48  ;;  %674 = vmatpush.msrb.mxu3 %v227_v49  ;;  %v23_v47 = vld [vmem:[%s2084_s0 + $0x48] sm:$0xff]  ;;  %v25_v48 = vld [vmem:[%s2084_s0 + $0x58] sm:$0xff]  ;;  %v26_v49 = vld [vmem:[%s2084_s0 + $0x60] sm:$0xff] }
  0x33   :  { %456 = vmatpush.msrb.mxu1 %v193_v50  ;;  %790 = vmatpush.msrb.mxu0 %v237_v51  ;;  %v32_v50 = vld [vmem:[%s2084_s0 + $0x90] sm:$0xff] }
  0x34   :  { %675 = vmatpush.msrb.mxu3 %v226_v52  ;;  %567 = vmatpush.msrb.mxu2 %v208_v53  ;;  %v28_v51 = vld [vmem:[%s2084_s0 + $0x70] sm:$0xff]  ;;  %v30_v52 = vld [vmem:[%s2084_s0 + $0x80] sm:$0xff]  ;;  %v31_v53 = vld [vmem:[%s2084_s0 + $0x88] sm:$0xff] }
  0x35   :  { %361 = vmatmul.f32.gmra.mxu0 %v24_v54  ;;  %433 = vmatmul.f32.gmra.mxu3 %v144_v55  ;;  %v37_v54 = vld [vmem:[%s2084_s0 + $0xb8] sm:$0xff] }
  0x36   :  { %676 = vmatpush.msrb.mxu3 %v225_v56  ;;  %457 = vmatpush.msrb.mxu1 %v192_v57  ;;  %v33_v55 = vld [vmem:[%s2084_s0 + $0x98] sm:$0xff]  ;;  %v35_v56 = vld [vmem:[%s2084_s0 + $0xa8] sm:$0xff]  ;;  %v36_v57 = vld [vmem:[%s2084_s0 + $0xb0] sm:$0xff] }
  0x37   :  { %568 = vmatpush.msrb.mxu2 %v207_v58  ;;  %791 = vmatpush.msrb.mxu0 %v236_v59  ;;  %v42_v58 = vld [vmem:[%s2084_s0 + $0xe0] sm:$0xff] }
  0x38   :  { %677 = vmatpush.msrb.mxu3 %v224_v60  ;;  %458 = vmatpush.msrb.mxu1 %v191_v61  ;;  %v38_v59 = vld [vmem:[%s2084_s0 + $0xc0] sm:$0xff]  ;;  %v40_v60 = vld [vmem:[%s2084_s0 + $0xd0] sm:$0xff]  ;;  %v41_v61 = vld [vmem:[%s2084_s0 + $0xd8] sm:$0xff] }
  0x39   :  { %388 = vmatmul.f32.gmra.mxu1 %v69_v62  ;;  %412 = vmatmul.f32.gmra.mxu2 %v109_v63  ;;  %v47_v62 = vld [vmem:[%s2084_s0 + $0x108] sm:$0xff] }
  0x3a   :  { %569 = vmatpush.msrb.mxu2 %v206_v0  ;;  %678 = vmatpush.msrb.mxu3 %v223_v1  ;;  %v43_v63 = vld [vmem:[%s2084_s0 + $0xe8] sm:$0xff]  ;;  %v45_v0 = vld [vmem:[%s2084_s0 + $0xf8] sm:$0xff]  ;;  %v46_v1 = vld [vmem:[%s2084_s0 + $0x100] sm:$0xff] }
  0x3b   :  { %459 = vmatpush.msrb.mxu1 %v190_v2  ;;  %792 = vmatpush.msrb.mxu0 %v235_v3  ;;  %v52_v2 = vld [vmem:[%s2084_s0 + $0x130] sm:$0xff] }
  0x3c   :  { %570 = vmatpush.msrb.mxu2 %v205_v4  ;;  %679 = vmatpush.msrb.mxu3 %v222_v5  ;;  %v48_v3 = vld [vmem:[%s2084_s0 + $0x110] sm:$0xff]  ;;  %v50_v4 = vld [vmem:[%s2084_s0 + $0x120] sm:$0xff]  ;;  %v51_v5 = vld [vmem:[%s2084_s0 + $0x128] sm:$0xff] }
  0x3d   :  { %364 = vmatmul.f32.gmra.mxu0 %v29_v6  ;;  %436 = vmatmul.f32.gmra.mxu3 %v149_v7  ;;  %v57_v6 = vld [vmem:[%s2084_s0 + $0x158] sm:$0xff] }
  0x3e   :  { %460 = vmatpush.msrb.mxu1 %v189_v8  ;;  %571 = vmatpush.msrb.mxu2 %v204_v9  ;;  %v53_v7 = vld [vmem:[%s2084_s0 + $0x138] sm:$0xff]  ;;  %v55_v9 = vld [vmem:[%s2084_s0 + $0x148] sm:$0xff] }
  0x3f   :  { %680 = vmatpush.msrb.mxu3 %v221_v10  ;;  %793 = vmatpush.msrb.mxu0 %v234_v11  ;;  %v56_v10 = vld [vmem:[%s2084_s0 + $0x150] sm:$0xff] }
  0x40   :  { %461 = vmatpush.msrb.mxu1 %v188_v12  ;;  %572 = vmatpush.msrb.mxu2 %v203_v13  ;;  %v62_v12 = vld [vmem:[%s2084_s0 + $0x180] sm:$0xff] }
  0x41   :  { %391 = vmatmul.f32.gmra.mxu1 %v74_v14  ;;  %415 = vmatmul.f32.gmra.mxu2 %v114_v15  ;;  %v58_v13 = vld [vmem:[%s2084_s0 + $0x160] sm:$0xff] }
  0x42   :  { %681 = vmatpush.msrb.mxu3 %v220_v16  ;;  %462 = vmatpush.msrb.mxu1 %v187_v17  ;;  %v1554_v14 = vld [vmem:[%s2085_s2] ss:$0 sm:$0xff] }
  0x43   :  { %573 = vmatpush.msrb.mxu2 %v202_v18  ;;  %794 = vmatpush.msrb.mxu0 %v233_v21  ;;  %v60_v18 = vld [vmem:[%s2084_s0 + $0x170] sm:$0xff] }
  0x44   :  { %682 = vmatpush.msrb.mxu3 %v219_v19  ;;  %463 = vmatpush.msrb.mxu1 %v186_v20  ;;  %v61_v19 = vld [vmem:[%s2084_s0 + $0x178] sm:$0xff] }
  0x45   :  { %367 = vmatmul.f32.gmra.mxu0 %v34_v22  ;;  %439 = vmatmul.f32.gmra.mxu3 %v154_v23  ;;  %v67_v23 = vld [vmem:[%s2084_s0 + $0x1a8] sm:$0xff] }
  0x46   :  { %683 = vmatpush.msrb.mxu3 %v218_v24  ;;  %574 = vmatpush.msrb.mxu2 %v201_v25  ;;  %v63_v24 = vld [vmem:[%s2084_s0 + $0x188] sm:$0xff] }
  0x47   :  { %464 = vmatpush.msrb.mxu1 %v185_v26 }
  0x48   :  { %684 = vmatpush.msrb.mxu3 %v217_v27 }
  0x49   :  { %394 = vmatmul.f32.gmra.mxu1 %v79_v28  ;;  %418 = vmatmul.f32.gmra.mxu2 %v119_v29  ;;  %v65_v28 = vld [vmem:[%s2084_s0 + $0x198] sm:$0xff]  ;;  %v66_v29 = vld [vmem:[%s2084_s0 + $0x1a0] sm:$0xff] }
  0x4d   :  { %370 = vmatmul.f32.gmra.mxu0 %v39_v30  ;;  %442 = vmatmul.f32.gmra.mxu3 %v159_v31 }
  0x51   :  { %397 = vmatmul.f32.gmra.mxu1 %v84_v32  ;;  %421 = vmatmul.f32.gmra.mxu2 %v124_v33  ;;  %v72_v33 = vld [vmem:[%s2084_s0 + $0x1d0] sm:$0xff] }
  0x55   :  { %373 = vmatmul.f32.gmra.mxu0 %v44_v34  ;;  %445 = vmatmul.f32.gmra.mxu3 %v164_v35  ;;  %v68_v34 = vld [vmem:[%s2084_s0 + $0x1b0] sm:$0xff] }
  0x59   :  { %400 = vmatmul.f32.gmra.mxu1 %v89_v36  ;;  %424 = vmatmul.f32.gmra.mxu2 %v129_v37 }
  0x5d   :  { %376 = vmatmul.f32.gmra.mxu0 %v49_v38  ;;  %685 = vmatmul.f32.vlgmr.msrb.gmra.mxu3 %v17_v39  ;;  %v70_v38 = vld [vmem:[%s2084_s0 + $0x1c0] sm:$0xff]  ;;  %v71_v39 = vld [vmem:[%s2084_s0 + $0x1c8] sm:$0xff] }
  0x61   :  { %465 = vmatmul.f32.vlgmr.msrb.gmra.mxu1 %v15_v40  ;;  %575 = vmatmul.f32.vlgmr.msrb.gmra.mxu2 %v16_v41 }
  0x65   :  { %688 = vmatmul.f32.gmra.mxu3 %v22_v42  ;;  %1019 = vmatmul.msk.f32.vlgmr.msrb.gmra.mxu0 %vm245_vm0, %v18_v43  ;;  %v77_v43 = vld [vmem:[%s2084_s0 + $0x1f8] sm:$0xff] }
  0x69   :  { %468 = vmatmul.f32.gmra.mxu1 %v20_v44  ;;  %578 = vmatmul.f32.gmra.mxu2 %v21_v45  ;;  %v73_v44 = vld [vmem:[%s2084_s0 + $0x1d8] sm:$0xff] }
  0x6d   :  { %691 = vmatmul.f32.gmra.mxu3 %v27_v46  ;;  %1020 = vmatmul.msk.f32.gmra.mxu0 %vm245_vm0, %v23_v47 }
  0x71   :  { %471 = vmatmul.f32.gmra.mxu1 %v25_v48  ;;  %581 = vmatmul.f32.gmra.mxu2 %v26_v49  ;;  %v75_v48 = vld [vmem:[%s2084_s0 + $0x1e8] sm:$0xff]  ;;  %v76_v49 = vld [vmem:[%s2084_s0 + $0x1f0] sm:$0xff] }
  0x75   :  { %694 = vmatmul.f32.gmra.mxu3 %v32_v50  ;;  %1021 = vmatmul.msk.f32.gmra.mxu0 %vm245_vm0, %v28_v51 }
  0x79   :  { %474 = vmatmul.f32.gmra.mxu1 %v30_v52  ;;  %584 = vmatmul.f32.gmra.mxu2 %v31_v53  ;;  %v82_v53 = vld [vmem:[%s2084_s0 + $0x220] sm:$0xff] }
  0x7d   :  { %697 = vmatmul.f32.gmra.mxu3 %v37_v54  ;;  %1022 = vmatmul.msk.f32.gmra.mxu0 %vm245_vm0, %v33_v55  ;;  %v78_v54 = vld [vmem:[%s2084_s0 + $0x200] sm:$0xff] }
  0x81   :  { %477 = vmatmul.f32.gmra.mxu1 %v35_v56  ;;  %587 = vmatmul.f32.gmra.mxu2 %v36_v57 }
  0x85   :  { %700 = vmatmul.f32.gmra.mxu3 %v42_v58  ;;  %1023 = vmatmul.msk.f32.gmra.mxu0 %vm245_vm0, %v38_v59  ;;  %v80_v58 = vld [vmem:[%s2084_s0 + $0x210] sm:$0xff]  ;;  %v81_v59 = vld [vmem:[%s2084_s0 + $0x218] sm:$0xff] }
  0x89   :  { %480 = vmatmul.f32.gmra.mxu1 %v40_v60  ;;  %590 = vmatmul.f32.gmra.mxu2 %v41_v61 }
  0x8d   :  { %703 = vmatmul.f32.gmra.mxu3 %v47_v62  ;;  %1024 = vmatmul.msk.f32.gmra.mxu0 %vm245_vm0, %v43_v63  ;;  %v87_v63 = vld [vmem:[%s2084_s0 + $0x248] sm:$0xff] }
  0x91   :  { %483 = vmatmul.f32.gmra.mxu1 %v45_v0  ;;  %593 = vmatmul.f32.gmra.mxu2 %v46_v1  ;;  %v83_v0 = vld [vmem:[%s2084_s0 + $0x228] sm:$0xff] }
  0x95   :  { %706 = vmatmul.f32.gmra.mxu3 %v52_v2  ;;  %1025 = vmatmul.msk.f32.gmra.mxu0 %vm245_vm0, %v48_v3 }
  0x99   :  { %486 = vmatmul.f32.gmra.mxu1 %v50_v4  ;;  %596 = vmatmul.f32.gmra.mxu2 %v51_v5  ;;  %v85_v4 = vld [vmem:[%s2084_s0 + $0x238] sm:$0xff]  ;;  %v86_v5 = vld [vmem:[%s2084_s0 + $0x240] sm:$0xff] }
  0x9d   :  { %709 = vmatmul.f32.gmra.mxu3 %v57_v6  ;;  %1026 = vmatmul.msk.f32.gmra.mxu0 %vm245_vm0, %v53_v7 }
  0x9e   :  { %v1535_v8 = vpop.f32.mrf.mxu1 }
  0xa1   :  { %489 = vmatmul.f32.gmra.mxu1 %v55_v9  ;;  %599 = vmatmul.f32.gmra.mxu2 %v56_v10  ;;  %v92_v10 = vld [vmem:[%s2084_s0 + $0x270] sm:$0xff] }
  0xa2   :  { %v1543_v11 = vpop.f32.mrf.mxu0 }
  0xa4   :  { %v404_v15 = vpop.f32.mrf.mxu2 }
  0xa5   :  { %v1557_v16 = vadd.f32 %v1554_v14, %v404_v15  ;;  %712 = vmatmul.f32.gmra.mxu3 %v62_v12  ;;  %1027 = vmatmul.msk.f32.gmra.mxu0 %vm245_vm0, %v58_v13  ;;  %v88_v12 = vld [vmem:[%s2084_s0 + $0x250] sm:$0xff] }
  0xa6   :  { %v1560_v17 = vpop.f32.mrf.mxu1 }
  0xa8   :  { %v428_v20 = vpop.f32.mrf.mxu3 }
  0xa9   :  { %492 = vmatmul.f32.gmra.mxu1 %v60_v18  ;;  %602 = vmatmul.f32.gmra.mxu2 %v61_v19  ;;  %v1569_v21 = vadd.f32 %v1554_v14, %v428_v20  ;;  %v90_v19 = vld [vmem:[%s2084_s0 + $0x260] sm:$0xff]  ;;  %v91_v20 = vld [vmem:[%s2084_s0 + $0x268] sm:$0xff] }
  0xaa   :  { %v1571_v22 = vpop.f32.mrf.mxu0 }
  0xac   :  { %v407_v25 = vpop.f32.mrf.mxu2 }
  0xad   :  { %v1580_v26 = vadd.f32 %v1554_v14, %v407_v25  ;;  %715 = vmatmul.f32.gmra.mxu3 %v67_v23  ;;  %1028 = vmatmul.msk.f32.gmra.mxu0 %vm245_vm0, %v63_v24 }
  0xae   :  { %v1583_v27 = vpop.f32.mrf.mxu1 }
  0xb0   :  { %v431_v30 = vpop.f32.mrf.mxu3 }
  0xb1   :  { %495 = vmatmul.f32.gmra.mxu1 %v65_v28  ;;  %605 = vmatmul.f32.gmra.mxu2 %v66_v29  ;;  %v1592_v31 = vadd.f32 %v1554_v14, %v431_v30  ;;  %v97_v28 = vld [vmem:[%s2084_s0 + $0x298] sm:$0xff] }
  0xb2   :  { %v1594_v32 = vpop.f32.mrf.mxu0  ;;  %v93_v29 = vld [vmem:[%s2084_s0 + $0x278] sm:$0xff] }
  0xb4   :  { %v410_v35 = vpop.f32.mrf.mxu2 }
  0xb5   :  { %v1603_v36 = vadd.f32 %v1554_v14, %v410_v35  ;;  %718 = vmatmul.f32.gmra.mxu3 %v72_v33  ;;  %1029 = vmatmul.msk.f32.gmra.mxu0 %vm245_vm0, %v68_v34  ;;  %v95_v35 = vld [vmem:[%s2084_s0 + $0x288] sm:$0xff] }
  0xb6   :  { %v1606_v37 = vpop.f32.mrf.mxu1 }
  0xb8   :  { %v434_v40 = vpop.f32.mrf.mxu3 }
  0xb9   :  { %498 = vmatmul.f32.gmra.mxu1 %v70_v38  ;;  %608 = vmatmul.f32.gmra.mxu2 %v71_v39  ;;  %v1615_v41 = vadd.f32 %v1554_v14, %v434_v40  ;;  %v96_v38 = vld [vmem:[%s2084_s0 + $0x290] sm:$0xff]  ;;  %v357_v40 = vadd.f32 %v1554_v14, %v1543_v11 }
  0xba   :  { %v1617_v42 = vpop.f32.mrf.mxu0  ;;  %v100_v11 = vld [vmem:[%s2084_s0 + $0x2b0] sm:$0xff] }
  0xbc   :  { %v413_v45 = vpop.f32.mrf.mxu2 }
  0xbd   :  { %v1626_v46 = vadd.f32 %v1554_v14, %v413_v45  ;;  %721 = vmatmul.f32.gmra.mxu3 %v77_v43  ;;  %1030 = vmatmul.msk.f32.gmra.mxu0 %vm245_vm0, %v73_v44  ;;  %v102_v44 = vld [vmem:[%s2084_s0 + $0x2c0] sm:$0xff] }
  0xbe   :  { %v1629_v47 = vpop.f32.mrf.mxu1  ;;  %v98_v45 = vld [vmem:[%s2084_s0 + $0x2a0] sm:$0xff] }
  0xc0   :  { %v437_v50 = vpop.f32.mrf.mxu3 }
  0xc1   :  { %501 = vmatmul.f32.gmra.mxu1 %v75_v48  ;;  %611 = vmatmul.f32.gmra.mxu2 %v76_v49  ;;  %v1638_v51 = vadd.f32 %v1554_v14, %v437_v50 }
  0xc2   :  { %v1640_v52 = vpop.f32.mrf.mxu0 }
  0xc4   :  { %v416_v55 = vpop.f32.mrf.mxu2 }
  0xc5   :  { %v1649_v56 = vadd.f32 %v1554_v14, %v416_v55  ;;  %724 = vmatmul.f32.gmra.mxu3 %v82_v53  ;;  %1031 = vmatmul.msk.f32.gmra.mxu0 %vm245_vm0, %v78_v54  ;;  %v101_v54 = vld [vmem:[%s2084_s0 + $0x2b8] sm:$0xff] }
  0xc6   :  { %v1652_v57 = vpop.f32.mrf.mxu1 }
  0xc8   :  { %v440_v60 = vpop.f32.mrf.mxu3 }
  0xc9   :  { %504 = vmatmul.f32.gmra.mxu1 %v80_v58  ;;  %614 = vmatmul.f32.gmra.mxu2 %v81_v59  ;;  %v1661_v61 = vadd.f32 %v1554_v14, %v440_v60  ;;  %v360_v59 = vadd.f32 %v1554_v14, %v1571_v22 }
  0xca   :  { %v1663_v62 = vpop.f32.mrf.mxu0 }
  0xcc   :  { %v419_v1 = vpop.f32.mrf.mxu2 }
  0xcd   :  { %v1672_v2 = vadd.f32 %v1554_v14, %v419_v1  ;;  %727 = vmatmul.f32.gmra.mxu3 %v87_v63  ;;  %1032 = vmatmul.msk.f32.gmra.mxu0 %vm245_vm0, %v83_v0  ;;  %v107_v0 = vld [vmem:[%s2084_s0 + $0x2e8] sm:$0xff] }
  0xce   :  { %v1675_v3 = vpop.f32.mrf.mxu1  ;;  %v103_v1 = vld [vmem:[%s2084_s0 + $0x2c8] sm:$0xff] }
  0xd0   :  { %v443_v6 = vpop.f32.mrf.mxu3 }
  0xd1   :  { %507 = vmatmul.f32.gmra.mxu1 %v85_v4  ;;  %617 = vmatmul.f32.gmra.mxu2 %v86_v5  ;;  %v1684_v7 = vadd.f32 %v1554_v14, %v443_v6 }
  0xd2   :  { %v1686_v9 = vpop.f32.mrf.mxu0 }
  0xd4   :  { %v422_v13 = vpop.f32.mrf.mxu2 }
  0xd5   :  { %v1695_v15 = vadd.f32 %v1554_v14, %v422_v13  ;;  %730 = vmatmul.f32.gmra.mxu3 %v92_v10  ;;  %1033 = vmatmul.msk.f32.gmra.mxu0 %vm245_vm0, %v88_v12  ;;  %v105_v13 = vld [vmem:[%s2084_s0 + $0x2d8] sm:$0xff] }
  0xd6   :  { %v1698_v18 = vpop.f32.mrf.mxu1 }
  0xd8   :  { %v446_v23 = vpop.f32.mrf.mxu3 }
  0xd9   :  { %510 = vmatmul.f32.gmra.mxu1 %v90_v19  ;;  %620 = vmatmul.f32.gmra.mxu2 %v91_v20  ;;  %v1707_v24 = vadd.f32 %v1554_v14, %v446_v23  ;;  %v106_v19 = vld [vmem:[%s2084_s0 + $0x2e0] sm:$0xff] }
  0xda   :  { %v1709_v25 = vpop.f32.mrf.mxu0 }
  0xdc   :  { %v425_v30 = vpop.f32.mrf.mxu2 }
  0xdd   :  { %v1718_v33 = vadd.f32 %v1554_v14, %v425_v30  ;;  %733 = vmatmul.f32.gmra.mxu3 %v97_v28  ;;  %1034 = vmatmul.msk.f32.gmra.mxu0 %vm245_vm0, %v93_v29  ;;  %v363_v28 = vadd.f32 %v1554_v14, %v1594_v32 }
  0xde   :  { %v466_v34 = vpop.f32.mrf.mxu1 }
  0xdf   :  { %v467_v48 = vadd.f32 %v466_v34, %v357_v40  ;;  %v112_v34 = vld [vmem:[%s2084_s0 + $0x310] sm:$0xff] }
  0xe0   :  { %v686_v39 = vpop.f32.mrf.mxu3 }
  0xe1   :  { %513 = vmatmul.f32.gmra.mxu1 %v95_v35  ;;  %623 = vmatmul.f32.gmra.mxu2 %v96_v38  ;;  %v108_v35 = vld [vmem:[%s2084_s0 + $0x2f0] sm:$0xff] }
  0xe2   :  { %v796_v43 = vpop.f32.mrf.mxu0 }
  0xe4   :  { %v576_v49 = vpop.f32.mrf.mxu2 }
  0xe5   :  { %v577_v50 = vadd.f32 %v576_v49, %v467_v48  ;;  %736 = vmatmul.f32.gmra.mxu3 %v102_v44  ;;  %1035 = vmatmul.msk.f32.gmra.mxu0 %vm245_vm0, %v98_v45  ;;  %v110_v45 = vld [vmem:[%s2084_s0 + $0x300] sm:$0xff]  ;;  %v111_v48 = vld [vmem:[%s2084_s0 + $0x308] sm:$0xff] }
  0xe6   :  { %v469_v53 = vpop.f32.mrf.mxu1 }
  0xe7   :  { %v687_v55 = vadd.f32 %v686_v39, %v577_v50  ;;  %v470_v4 = vadd.f32 %v469_v53, %v360_v59  ;;  %v366_v53 = vadd.f32 %v1554_v14, %v1617_v42 }
  0xe8   :  { %v689_v58 = vpop.f32.mrf.mxu3 }
  0xe9   :  { %v797_v60 = vadd.f32 %v796_v43, %v687_v55  ;;  %516 = vmatmul.f32.gmra.mxu1 %v100_v11  ;;  %626 = vmatmul.f32.gmra.mxu2 %v101_v54  ;;  %v117_v55 = vld [vmem:[%s2084_s0 + $0x338] sm:$0xff] }
  0xea   :  { %v799_v63 = vpop.f32.mrf.mxu0 }
  0xeb   :  { %vm889_vm1 = vcmp.gt.f32.partialorder %v797_v60, 0.0  ;;  %v920_v5 = vmul.f32 0.01, %v797_v60 }
  0xec   :  { %v579_v6 = vpop.f32.mrf.mxu2 }
  0xed   :  { %v951_v10 = vsel %vm889_vm1, %v797_v60, %v920_v5  ;;  %v580_v12 = vadd.f32 %v579_v6, %v470_v4  ;;  %739 = vmatmul.f32.gmra.mxu3 %v107_v0  ;;  %1036 = vmatmul.msk.f32.gmra.mxu0 %vm245_vm0, %v103_v1  ;;  %v115_v4 = vld [vmem:[%s2084_s0 + $0x328] sm:$0xff]  ;;  %v116_v5 = vld [vmem:[%s2084_s0 + $0x330] sm:$0xff] }
  0xee   :  { %983 = vst.msk [vmem:[%s2086_s3] sm:$0xff] %vm982_vm2, %v951_v10  ;;  %v472_v22 = vpop.f32.mrf.mxu1 }
  0xef   :  { %v690_v20 = vadd.f32 %v689_v58, %v580_v12  ;;  %v473_v38 = vadd.f32 %v472_v22, %v363_v28  ;;  %v113_v58 = vld [vmem:[%s2084_s0 + $0x318] sm:$0xff]  ;;  %v369_v12 = vadd.f32 %v1554_v14, %v1640_v52 }
  0xf0   :  { %v692_v23 = vpop.f32.mrf.mxu3 }
  0xf1   :  { %v800_v29 = vadd.f32 %v799_v63, %v690_v20  ;;  %519 = vmatmul.f32.gmra.mxu1 %v105_v13  ;;  %629 = vmatmul.f32.gmra.mxu2 %v106_v19  ;;  %v122_v19 = vld [vmem:[%s2084_s0 + $0x360] sm:$0xff] }
  0xf2   :  { %v802_v30 = vpop.f32.mrf.mxu0  ;;  %v118_v20 = vld [vmem:[%s2084_s0 + $0x340] sm:$0xff] }
  0xf3   :  { %vm890_vm3 = vcmp.gt.f32.partialorder %v800_v29, 0.0  ;;  %v921_v39 = vmul.f32 0.01, %v800_v29 }
  0xf4   :  { %v582_v40 = vpop.f32.mrf.mxu2 }
  0xf5   :  { %v952_v43 = vsel %vm890_vm3, %v800_v29, %v921_v39  ;;  %v583_v44 = vadd.f32 %v582_v40, %v473_v38  ;;  %742 = vmatmul.f32.gmra.mxu3 %v112_v34  ;;  %1037 = vmatmul.msk.f32.gmra.mxu0 %vm245_vm0, %v108_v35  ;;  %v120_v35 = vld [vmem:[%s2084_s0 + $0x350] sm:$0xff]  ;;  %v121_v38 = vld [vmem:[%s2084_s0 + $0x358] sm:$0xff] }
  0xf6   :  { %984 = vst.msk [vmem:[%s2086_s3 + $0x8] sm:$0xff] %vm982_vm2, %v952_v43  ;;  %v475_v32 = vpop.f32.mrf.mxu1  ;;  %v372_v43 = vadd.f32 %v1554_v14, %v1663_v62 }
  0xf7   :  { %v693_v49 = vadd.f32 %v692_v23, %v583_v44  ;;  %v476_v59 = vadd.f32 %v475_v32, %v366_v53 }
  0xf8   :  { %v695_v50 = vpop.f32.mrf.mxu3 }
  0xf9   :  { %v803_v11 = vadd.f32 %v802_v30, %v693_v49  ;;  %522 = vmatmul.f32.gmra.mxu1 %v110_v45  ;;  %632 = vmatmul.f32.gmra.mxu2 %v111_v48  ;;  %v127_v45 = vld [vmem:[%s2084_s0 + $0x388] sm:$0xff] }
  0xfa   :  { %v805_v54 = vpop.f32.mrf.mxu0  ;;  %v123_v48 = vld [vmem:[%s2084_s0 + $0x368] sm:$0xff] }
  0xfb   :  { %vm891_vm4 = vcmp.gt.f32.partialorder %v803_v11, 0.0  ;;  %v922_v60 = vmul.f32 0.01, %v803_v11 }
  0xfc   :  { %v585_v63 = vpop.f32.mrf.mxu2 }
  0xfd   :  { %v953_v0 = vsel %vm891_vm4, %v803_v11, %v922_v60  ;;  %v586_v1 = vadd.f32 %v585_v63, %v476_v59  ;;  %745 = vmatmul.f32.gmra.mxu3 %v117_v55  ;;  %1038 = vmatmul.msk.f32.gmra.mxu0 %vm245_vm0, %v113_v58  ;;  %v125_v55 = vld [vmem:[%s2084_s0 + $0x378] sm:$0xff]  ;;  %v126_v58 = vld [vmem:[%s2084_s0 + $0x380] sm:$0xff]  ;;  %v375_v63 = vadd.f32 %v1554_v14, %v1686_v9 }
  0xfe   :  { %985 = vst.msk [vmem:[%s2086_s3 + $0x10] sm:$0xff] %vm982_vm2, %v953_v0  ;;  %v478_v42 = vpop.f32.mrf.mxu1 }
  0xff   :  { %v696_v6 = vadd.f32 %v695_v50, %v586_v1  ;;  %v479_v23 = vadd.f32 %v478_v42, %v369_v12  ;;  %v132_v42 = vld [vmem:[%s2084_s0 + $0x3b0] sm:$0xff] }
 0x100   :  { %v698_v10 = vpop.f32.mrf.mxu3 }
 0x101   :  { %v806_v22 = vadd.f32 %v805_v54, %v696_v6  ;;  %525 = vmatmul.f32.gmra.mxu1 %v115_v4  ;;  %635 = vmatmul.f32.gmra.mxu2 %v116_v5  ;;  %v128_v4 = vld [vmem:[%s2084_s0 + $0x390] sm:$0xff] }
 0x102   :  { %v808_v13 = vpop.f32.mrf.mxu0 }
 0x103   :  { %vm892_vm5 = vcmp.gt.f32.partialorder %v806_v22, 0.0  ;;  %v923_v28 = vmul.f32 0.01, %v806_v22 }
 0x104   :  { %v588_v29 = vpop.f32.mrf.mxu2 }
 0x105   :  { %v954_v30 = vsel %vm892_vm5, %v806_v22, %v923_v28  ;;  %v589_v34 = vadd.f32 %v588_v29, %v479_v23  ;;  %748 = vmatmul.f32.gmra.mxu3 %v122_v19  ;;  %1039 = vmatmul.msk.f32.gmra.mxu0 %vm245_vm0, %v118_v20  ;;  %v131_v19 = vld [vmem:[%s2084_s0 + $0x3a8] sm:$0xff]  ;;  %v378_v28 = vadd.f32 %v1554_v14, %v1709_v25 }
 0x106   :  { %986 = vst.msk [vmem:[%s2086_s3 + $0x18] sm:$0xff] %vm982_vm2, %v954_v30  ;;  %v481_v52 = vpop.f32.mrf.mxu1 }
 0x107   :  { %v699_v39 = vadd.f32 %v698_v10, %v589_v34  ;;  %v482_v49 = vadd.f32 %v481_v52, %v372_v43  ;;  %v137_v34 = vld [vmem:[%s2084_s0 + $0x3d8] sm:$0xff] }
 0x108   :  { %v701_v40 = vpop.f32.mrf.mxu3  ;;  %v133_v52 = vld [vmem:[%s2084_s0 + $0x3b8] sm:$0xff] }
 0x109   :  { %v809_v44 = vadd.f32 %v808_v13, %v699_v39  ;;  %528 = vmatmul.f32.gmra.mxu1 %v120_v35  ;;  %638 = vmatmul.f32.gmra.mxu2 %v121_v38  ;;  %v130_v13 = vld [vmem:[%s2084_s0 + $0x3a0] sm:$0xff] }
 0x10a   :  { %v811_v32 = vpop.f32.mrf.mxu0 }
 0x10b   :  { %vm893_vm6 = vcmp.gt.f32.partialorder %v809_v44, 0.0  ;;  %v924_v50 = vmul.f32 0.01, %v809_v44 }
 0x10c   :  { %v591_v53 = vpop.f32.mrf.mxu2 }
 0x10d   :  { %v955_v11 = vsel %vm893_vm6, %v809_v44, %v924_v50  ;;  %v592_v54 = vadd.f32 %v591_v53, %v482_v49  ;;  %751 = vmatmul.f32.gmra.mxu3 %v127_v45  ;;  %1040 = vmatmul.msk.f32.gmra.mxu0 %vm245_vm0, %v123_v48  ;;  %v135_v44 = vld [vmem:[%s2084_s0 + $0x3c8] sm:$0xff]  ;;  %v381_v49 = vadd.f32 %v1554_v14, %v1535_v8 }
 0x10e   :  { %987 = vst.msk [vmem:[%s2086_s3 + $0x20] sm:$0xff] %vm982_vm2, %v955_v11  ;;  %v484_v62 = vpop.f32.mrf.mxu1  ;;  %v142_v11 = vld [vmem:[%s2084_s0 + $0x400] sm:$0xff] }
 0x10f   :  { %v702_v59 = vadd.f32 %v701_v40, %v592_v54  ;;  %v485_v5 = vadd.f32 %v484_v62, %v375_v63  ;;  %v138_v54 = vld [vmem:[%s2084_s0 + $0x3e0] sm:$0xff]  ;;  %v140_v63 = vld [vmem:[%s2084_s0 + $0x3f0] sm:$0xff] }
 0x110   :  { %v704_v60 = vpop.f32.mrf.mxu3 }
 0x111   :  { %v812_v0 = vadd.f32 %v811_v32, %v702_v59  ;;  %531 = vmatmul.f32.gmra.mxu1 %v125_v55  ;;  %641 = vmatmul.f32.gmra.mxu2 %v126_v58  ;;  %v136_v32 = vld [vmem:[%s2084_s0 + $0x3d0] sm:$0xff] }
 0x112   :  { %v814_v1 = vpop.f32.mrf.mxu0 }
 0x113   :  { %vm894_vm7 = vcmp.gt.f32.partialorder %v812_v0, 0.0  ;;  %v925_v6 = vmul.f32 0.01, %v812_v0 }
 0x114   :  { %v594_v10 = vpop.f32.mrf.mxu2 }
 0x115   :  { %v956_v12 = vsel %vm894_vm7, %v812_v0, %v925_v6  ;;  %v595_v22 = vadd.f32 %v594_v10, %v485_v5  ;;  %754 = vmatmul.f32.gmra.mxu3 %v132_v42  ;;  %1041 = vmatmul.msk.f32.gmra.mxu0 %vm245_vm0, %v128_v4  ;;  %v141_v0 = vld [vmem:[%s2084_s0 + $0x3f8] sm:$0xff]  ;;  %v384_v4 = vadd.f32 %v1554_v14, %v1560_v17  ;;  %v147_v10 = vld [vmem:[%s2084_s0 + $0x428] sm:$0xff] }
 0x116   :  { %988 = vst.msk [vmem:[%s2086_s3 + $0x28] sm:$0xff] %vm982_vm2, %v956_v12  ;;  %v487_v9 = vpop.f32.mrf.mxu1  ;;  %v143_v12 = vld [vmem:[%s2084_s0 + $0x408] sm:$0xff] }
 0x117   :  { %v705_v20 = vadd.f32 %v704_v60, %v595_v22  ;;  %v488_v35 = vadd.f32 %v487_v9, %v378_v28  ;;  %v146_v28 = vld [vmem:[%s2084_s0 + $0x420] sm:$0xff] }
 0x118   :  { %v707_v23 = vpop.f32.mrf.mxu3 }
 0x119   :  { %v815_v29 = vadd.f32 %v814_v1, %v705_v20  ;;  %534 = vmatmul.f32.gmra.mxu1 %v130_v13  ;;  %644 = vmatmul.f32.gmra.mxu2 %v131_v19 }
 0x11a   :  { %v817_v30 = vpop.f32.mrf.mxu0 }
 0x11b   :  { %vm895_vm8 = vcmp.gt.f32.partialorder %v815_v29, 0.0  ;;  %v926_v38 = vmul.f32 0.01, %v815_v29 }
 0x11c   :  { %v597_v39 = vpop.f32.mrf.mxu2 }
 0x11d   :  { %v957_v40 = vsel %vm895_vm8, %v815_v29, %v926_v38  ;;  %v598_v43 = vadd.f32 %v597_v39, %v488_v35  ;;  %757 = vmatmul.f32.gmra.mxu3 %v137_v34  ;;  %1042 = vmatmul.msk.f32.gmra.mxu0 %vm245_vm0, %v133_v52  ;;  %v387_v34 = vadd.f32 %v1554_v14, %v1583_v27  ;;  %v152_v38 = vld [vmem:[%s2084_s0 + $0x450] sm:$0xff] }
 0x11e   :  { %989 = vst.msk [vmem:[%s2086_s3 + $0x30] sm:$0xff] %vm982_vm2, %v957_v40  ;;  %v490_v25 = vpop.f32.mrf.mxu1  ;;  %v148_v39 = vld [vmem:[%s2084_s0 + $0x430] sm:$0xff] }
 0x11f   :  { %v708_v45 = vadd.f32 %v707_v23, %v598_v43  ;;  %v491_v62 = vadd.f32 %v490_v25, %v381_v49  ;;  %v145_v23 = vld [vmem:[%s2084_s0 + $0x418] sm:$0xff] }
 0x120   :  { %v710_v48 = vpop.f32.mrf.mxu3 }
 0x121   :  { %v818_v50 = vadd.f32 %v817_v30, %v708_v45  ;;  %537 = vmatmul.f32.gmra.mxu1 %v135_v44  ;;  %647 = vmatmul.f32.gmra.mxu2 %v136_v32  ;;  %v150_v45 = vld [vmem:[%s2084_s0 + $0x440] sm:$0xff] }
 0x122   :  { %v820_v53 = vpop.f32.mrf.mxu0 }
 0x123   :  { %vm896_vm9 = vcmp.gt.f32.partialorder %v818_v50, 0.0  ;;  %v927_v55 = vmul.f32 0.01, %v818_v50 }
 0x124   :  { %v600_v58 = vpop.f32.mrf.mxu2 }
 0x125   :  { %v958_v59 = vsel %vm896_vm9, %v818_v50, %v927_v55  ;;  %v601_v60 = vadd.f32 %v600_v58, %v491_v62  ;;  %760 = vmatmul.f32.gmra.mxu3 %v142_v11  ;;  %1043 = vmatmul.msk.f32.gmra.mxu0 %vm245_vm0, %v138_v54  ;;  %v157_v62 = vld [vmem:[%s2084_s0 + $0x478] sm:$0xff] }
 0x126   :  { %990 = vst.msk [vmem:[%s2086_s3 + $0x38] sm:$0xff] %vm982_vm2, %v958_v59  ;;  %v493_v8 = vpop.f32.mrf.mxu1  ;;  %v153_v55 = vld [vmem:[%s2084_s0 + $0x458] sm:$0xff] }
 0x127   :  { %v711_v1 = vadd.f32 %v710_v48, %v601_v60  ;;  %v494_v22 = vadd.f32 %v493_v8, %v384_v4  ;;  %v151_v48 = vld [vmem:[%s2084_s0 + $0x448] sm:$0xff] }
 0x128   :  { %v713_v42 = vpop.f32.mrf.mxu3 }
 0x129   :  { %v821_v5 = vadd.f32 %v820_v53, %v711_v1  ;;  %540 = vmatmul.f32.gmra.mxu1 %v140_v63  ;;  %650 = vmatmul.f32.gmra.mxu2 %v141_v0  ;;  %v390_v53 = vadd.f32 %v1554_v14, %v1606_v37  ;;  %v155_v0 = vld [vmem:[%s2084_s0 + $0x468] sm:$0xff]  ;;  %v156_v1 = vld [vmem:[%s2084_s0 + $0x470] sm:$0xff] }
 0x12a   :  { %v823_v6 = vpop.f32.mrf.mxu0 }
 0x12b   :  { %vm897_vm10 = vcmp.gt.f32.partialorder %v821_v5, 0.0  ;;  %v928_v9 = vmul.f32 0.01, %v821_v5 }
 0x12c   :  { %v603_v13 = vpop.f32.mrf.mxu2 }
 0x12d   :  { %v959_v19 = vsel %vm897_vm10, %v821_v5, %v928_v9  ;;  %v604_v20 = vadd.f32 %v603_v13, %v494_v22  ;;  %763 = vmatmul.f32.gmra.mxu3 %v147_v10  ;;  %1044 = vmatmul.msk.f32.gmra.mxu0 %vm245_vm0, %v143_v12  ;;  %v393_v5 = vadd.f32 %v1554_v14, %v1629_v47  ;;  %v162_v12 = vld [vmem:[%s2084_s0 + $0x4a0] sm:$0xff] }
 0x12e   :  { %991 = vst.msk [vmem:[%s2086_s3 + $0x40] sm:$0xff] %vm982_vm2, %v959_v19  ;;  %v496_v17 = vpop.f32.mrf.mxu1  ;;  %v158_v22 = vld [vmem:[%s2084_s0 + $0x480] sm:$0xff] }
 0x12f   :  { %v714_v29 = vadd.f32 %v713_v42, %v604_v20  ;;  %v497_v40 = vadd.f32 %v496_v17, %v387_v34  ;;  %v396_v34 = vadd.f32 %v1554_v14, %v1652_v57 }
 0x130   :  { %v716_v30 = vpop.f32.mrf.mxu3 }
 0x131   :  { %v824_v52 = vadd.f32 %v823_v6, %v714_v29  ;;  %543 = vmatmul.f32.gmra.mxu1 %v145_v23  ;;  %653 = vmatmul.f32.gmra.mxu2 %v146_v28  ;;  %v160_v23 = vld [vmem:[%s2084_s0 + $0x490] sm:$0xff]  ;;  %v161_v28 = vld [vmem:[%s2084_s0 + $0x498] sm:$0xff] }
 0x132   :  { %v826_v35 = vpop.f32.mrf.mxu0 }
 0x133   :  { %vm898_vm11 = vcmp.gt.f32.partialorder %v824_v52, 0.0  ;;  %v929_v43 = vmul.f32 0.01, %v824_v52 }
 0x134   :  { %v606_v25 = vpop.f32.mrf.mxu2 }
 0x135   :  { %v960_v44 = vsel %vm898_vm11, %v824_v52, %v929_v43  ;;  %v607_v32 = vadd.f32 %v606_v25, %v497_v40  ;;  %766 = vmatmul.f32.gmra.mxu3 %v152_v38  ;;  %1045 = vmatmul.msk.f32.gmra.mxu0 %vm245_vm0, %v148_v39  ;;  %v167_v38 = vld [vmem:[%s2084_s0 + $0x4c8] sm:$0x3] }
 0x136   :  { %992 = vst.msk [vmem:[%s2086_s3 + $0x48] sm:$0xff] %vm982_vm2, %v960_v44  ;;  %v499_v27 = vpop.f32.mrf.mxu1  ;;  %v163_v39 = vld [vmem:[%s2084_s0 + $0x4a8] sm:$0xff] }
 0x137   :  { %v717_v49 = vadd.f32 %v716_v30, %v607_v32  ;;  %v500_v58 = vadd.f32 %v499_v27, %v390_v53  ;;  %v165_v27 = vld [vmem:[%s2084_s0 + $0x4b8] sm:$0x3] }
 0x138   :  { %v719_v50 = vpop.f32.mrf.mxu3 }
 0x139   :  { %v827_v11 = vadd.f32 %v826_v35, %v717_v49  ;;  %546 = vmatmul.f32.gmra.mxu1 %v150_v45  ;;  %656 = vmatmul.f32.gmra.mxu2 %v151_v48  ;;  %v166_v45 = vld [vmem:[%s2084_s0 + $0x4c0] sm:$0x3] }
 0x13a   :  { %v829_v54 = vpop.f32.mrf.mxu0 }
 0x13b   :  { %vm899_vm12 = vcmp.gt.f32.partialorder %v827_v11, 0.0  ;;  %v930_v59 = vmul.f32 0.01, %v827_v11 }
 0x13c   :  { %v609_v60 = vpop.f32.mrf.mxu2 }
 0x13d   :  { %v961_v8 = vsel %vm899_vm12, %v827_v11, %v930_v59  ;;  %v610_v63 = vadd.f32 %v609_v60, %v500_v58  ;;  %769 = vmatmul.f32.gmra.mxu3 %v157_v62  ;;  %1046 = vmatmul.msk.f32.gmra.mxu0 %vm245_vm0, %v153_v55 }
 0x13e   :  { %993 = vst.msk [vmem:[%s2086_s3 + $0x50] sm:$0xff] %vm982_vm2, %v961_v8  ;;  %v502_v37 = vpop.f32.mrf.mxu1 }
 0x13f   :  { %v720_v42 = vadd.f32 %v719_v50, %v610_v63  ;;  %v503_v9 = vadd.f32 %v502_v37, %v393_v5  ;;  %v399_v50 = vadd.f32 %v1554_v14, %v1675_v3  ;;  %v402_v37 = vadd.f32 %v1554_v14, %v1698_v18 }
 0x140   :  { %v722_v4 = vpop.f32.mrf.mxu3 }
 0x141   :  { %v830_v6 = vadd.f32 %v829_v54, %v720_v42  ;;  %549 = vmatmul.f32.gmra.mxu1 %v155_v0  ;;  %659 = vmatmul.f32.gmra.mxu2 %v156_v1  ;;  %v168_v54 = vld [vmem:[%s2084_s0 + $0x4d0] sm:$0x3] }
 0x142   :  { %v832_v10 = vpop.f32.mrf.mxu0 }
 0x143   :  { %vm900_vm13 = vcmp.gt.f32.partialorder %v830_v6, 0.0  ;;  %v931_v13 = vmul.f32 0.01, %v830_v6 }
 0x144   :  { %v612_v19 = vpop.f32.mrf.mxu2 }
 0x145   :  { %v962_v20 = vsel %vm900_vm13, %v830_v6, %v931_v13  ;;  %v613_v17 = vadd.f32 %v612_v19, %v503_v9  ;;  %772 = vmatmul.f32.gmra.mxu3 %v162_v12  ;;  %1047 = vmatmul.msk.f32.gmra.mxu0 %vm245_vm0, %v158_v22 }
 0x146   :  { %994 = vst.msk [vmem:[%s2086_s3 + $0x58] sm:$0xff] %vm982_vm2, %v962_v20  ;;  %v505_v47 = vpop.f32.mrf.mxu1 }
 0x147   :  { %v723_v29 = vadd.f32 %v722_v4, %v613_v17  ;;  %v506_v40 = vadd.f32 %v505_v47, %v396_v34 }
 0x148   :  { %v725_v30 = vpop.f32.mrf.mxu3 }
 0x149   :  { %v833_v52 = vadd.f32 %v832_v10, %v723_v29  ;;  %552 = vmatmul.f32.gmra.mxu1 %v160_v23  ;;  %662 = vmatmul.f32.gmra.mxu2 %v161_v28 }
 0x14a   :  { %v835_v35 = vpop.f32.mrf.mxu0 }
 0x14b   :  { %vm901_vm14 = vcmp.gt.f32.partialorder %v833_v52, 0.0  ;;  %v932_v43 = vmul.f32 0.01, %v833_v52 }
 0x14c   :  { %v615_v25 = vpop.f32.mrf.mxu2 }
 0x14d   :  { %v963_v44 = vsel %vm901_vm14, %v833_v52, %v932_v43  ;;  %v616_v32 = vadd.f32 %v615_v25, %v506_v40  ;;  %775 = vmatmul.f32.gmra.mxu3 %v167_v38  ;;  %1048 = vmatmul.msk.f32.gmra.mxu0 %vm245_vm0, %v163_v39 }
 0x14e   :  { %995 = vst.msk [vmem:[%s2086_s3 + $0x60] sm:$0xff] %vm982_vm2, %v963_v44  ;;  %v508_v57 = vpop.f32.mrf.mxu1 }
 0x14f   :  { %v726_v48 = vadd.f32 %v725_v30, %v616_v32  ;;  %v509_v62 = vadd.f32 %v508_v57, %v399_v50 }
 0x150   :  { %v728_v49 = vpop.f32.mrf.mxu3 }
 0x151   :  { %v836_v53 = vadd.f32 %v835_v35, %v726_v48  ;;  %555 = vmatmul.f32.gmra.mxu1 %v165_v27  ;;  %665 = vmatmul.f32.gmra.mxu2 %v166_v45 }
 0x152   :  { %v838_v11 = vpop.f32.mrf.mxu0 }
 0x153   :  { %vm902_vm15 = vcmp.gt.f32.partialorder %v836_v53, 0.0  ;;  %v933_v55 = vmul.f32 0.01, %v836_v53 }
 0x154   :  { %v618_v58 = vpop.f32.mrf.mxu2 }
 0x155   :  { %v964_v59 = vsel %vm902_vm15, %v836_v53, %v933_v55  ;;  %v619_v60 = vadd.f32 %v618_v58, %v509_v62  ;;  %1049 = vmatmul.msk.f32.gmra.mxu0 %vm245_vm0, %v168_v54 }
 0x156   :  { %996 = vst.msk [vmem:[%s2086_s3 + $0x68] sm:$0xff] %vm982_vm2, %v964_v59  ;;  %v511_v3 = vpop.f32.mrf.mxu1 }
 0x157   :  { %v729_v8 = vadd.f32 %v728_v49, %v619_v60  ;;  %v512_v42 = vadd.f32 %v511_v3, %v402_v37 }
 0x158   :  { %v731_v63 = vpop.f32.mrf.mxu3 }
 0x159   :  { %v839_v0 = vadd.f32 %v838_v11, %v729_v8 }
 0x15a   :  { %v841_v1 = vpop.f32.mrf.mxu0 }
 0x15b   :  { %vm903_vm1 = vcmp.gt.f32.partialorder %v839_v0, 0.0  ;;  %v934_v4 = vmul.f32 0.01, %v839_v0 }
 0x15c   :  { %v621_v5 = vpop.f32.mrf.mxu2 }
 0x15d   :  { %v965_v6 = vsel %vm903_vm1, %v839_v0, %v934_v4  ;;  %v622_v10 = vadd.f32 %v621_v5, %v512_v42 }
 0x15e   :  { %997 = vst.msk [vmem:[%s2086_s3 + $0x70] sm:$0xff] %vm982_vm2, %v965_v6  ;;  %v514_v12 = vpop.f32.mrf.mxu1 }
 0x15f   :  { %v732_v22 = vadd.f32 %v731_v63, %v622_v10  ;;  %v515_v14 = vadd.f32 %v514_v12, %v1557_v16 }
 0x160   :  { %v734_v9 = vpop.f32.mrf.mxu3 }
 0x161   :  { %v842_v13 = vadd.f32 %v841_v1, %v732_v22 }
 0x162   :  { %v844_v19 = vpop.f32.mrf.mxu0 }
 0x163   :  { %vm904_vm0 = vcmp.gt.f32.partialorder %v842_v13, 0.0  ;;  %v935_v18 = vmul.f32 0.01, %v842_v13 }
 0x164   :  { %v624_v20 = vpop.f32.mrf.mxu2 }
 0x165   :  { %v966_v17 = vsel %vm904_vm0, %v842_v13, %v935_v18  ;;  %v625_v47 = vadd.f32 %v624_v20, %v515_v14 }
 0x166   :  { %998 = vst.msk [vmem:[%s2086_s3 + $0x78] sm:$0xff] %vm982_vm2, %v966_v17  ;;  %v517_v23 = vpop.f32.mrf.mxu1 }
 0x167   :  { %v735_v28 = vadd.f32 %v734_v9, %v625_v47  ;;  %v518_v52 = vadd.f32 %v517_v23, %v1580_v26 }
 0x168   :  { %v737_v29 = vpop.f32.mrf.mxu3 }
 0x169   :  { %v845_v30 = vadd.f32 %v844_v19, %v735_v28 }
 0x16a   :  { %v847_v34 = vpop.f32.mrf.mxu0 }
 0x16b   :  { %vm905_vm3 = vcmp.gt.f32.partialorder %v845_v30, 0.0  ;;  %v936_v35 = vmul.f32 0.01, %v845_v30 }
 0x16c   :  { %v627_v16 = vpop.f32.mrf.mxu2 }
 0x16d   :  { %v967_v38 = vsel %vm905_vm3, %v845_v30, %v936_v35  ;;  %v628_v39 = vadd.f32 %v627_v16, %v518_v52  ;;  %vm1013_vm3 = vcmask 254976  }
 0x16e   :  { %999 = vst.msk [vmem:[%s2086_s3 + $0x80] sm:$0xff] %vm982_vm2, %v967_v38  ;;  %v520_v40 = vpop.f32.mrf.mxu1 }
 0x16f   :  { %v738_v43 = vadd.f32 %v737_v29, %v628_v39  ;;  %v521_v57 = vadd.f32 %v520_v40, %v1603_v36 }
 0x170   :  { %v740_v25 = vpop.f32.mrf.mxu3 }
 0x171   :  { %v848_v44 = vadd.f32 %v847_v34, %v738_v43 }
 0x172   :  { %v850_v32 = vpop.f32.mrf.mxu0 }
 0x173   :  { %vm906_vm4 = vcmp.gt.f32.partialorder %v848_v44, 0.0  ;;  %v937_v27 = vmul.f32 0.01, %v848_v44 }
 0x174   :  { %v630_v26 = vpop.f32.mrf.mxu2 }
 0x175   :  { %v968_v45 = vsel %vm906_vm4, %v848_v44, %v937_v27  ;;  %v631_v48 = vadd.f32 %v630_v26, %v521_v57 }
 0x176   :  { %1000 = vst.msk [vmem:[%s2086_s3 + $0x88] sm:$0xff] %vm982_vm2, %v968_v45  ;;  %v523_v49 = vpop.f32.mrf.mxu1 }
 0x177   :  { %v741_v50 = vadd.f32 %v740_v25, %v631_v48  ;;  %v524_v62 = vadd.f32 %v523_v49, %v1626_v46 }
 0x178   :  { %v743_v53 = vpop.f32.mrf.mxu3 }
 0x179   :  { %v851_v11 = vadd.f32 %v850_v32, %v741_v50 }
 0x17a   :  { %v853_v54 = vpop.f32.mrf.mxu0 }
 0x17b   :  { %vm907_vm5 = vcmp.gt.f32.partialorder %v851_v11, 0.0  ;;  %v938_v55 = vmul.f32 0.01, %v851_v11 }
 0x17c   :  { %v633_v36 = vpop.f32.mrf.mxu2 }
 0x17d   :  { %v969_v58 = vsel %vm907_vm5, %v851_v11, %v938_v55  ;;  %v634_v59 = vadd.f32 %v633_v36, %v524_v62 }
 0x17e   :  { %1001 = vst.msk [vmem:[%s2086_s3 + $0x90] sm:$0xff] %vm982_vm2, %v969_v58  ;;  %v526_v60 = vpop.f32.mrf.mxu1 }
 0x17f   :  { %v744_v3 = vadd.f32 %v743_v53, %v634_v59  ;;  %v527_v0 = vadd.f32 %v526_v60, %v1649_v56 }
 0x180   :  { %v746_v8 = vpop.f32.mrf.mxu3 }
 0x181   :  { %v854_v63 = vadd.f32 %v853_v54, %v744_v3 }
 0x182   :  { %v856_v37 = vpop.f32.mrf.mxu0 }
 0x183   :  { %vm908_vm6 = vcmp.gt.f32.partialorder %v854_v63, 0.0  ;;  %v939_v1 = vmul.f32 0.01, %v854_v63 }
 0x184   :  { %v636_v46 = vpop.f32.mrf.mxu2 }
 0x185   :  { %v970_v42 = vsel %vm908_vm6, %v854_v63, %v939_v1  ;;  %v637_v4 = vadd.f32 %v636_v46, %v527_v0 }
 0x186   :  { %1002 = vst.msk [vmem:[%s2086_s3 + $0x98] sm:$0xff] %vm982_vm2, %v970_v42  ;;  %v529_v5 = vpop.f32.mrf.mxu1 }
 0x187   :  { %v747_v6 = vadd.f32 %v746_v8, %v637_v4  ;;  %v530_v9 = vadd.f32 %v529_v5, %v1672_v2 }
 0x188   :  { %v749_v10 = vpop.f32.mrf.mxu3 }
 0x189   :  { %v857_v12 = vadd.f32 %v856_v37, %v747_v6 }
 0x18a   :  { %v859_v22 = vpop.f32.mrf.mxu0 }
 0x18b   :  { %vm909_vm7 = vcmp.gt.f32.partialorder %v857_v12, 0.0  ;;  %v940_v13 = vmul.f32 0.01, %v857_v12 }
 0x18c   :  { %v639_v56 = vpop.f32.mrf.mxu2 }
 0x18d   :  { %v971_v19 = vsel %vm909_vm7, %v857_v12, %v940_v13  ;;  %v640_v14 = vadd.f32 %v639_v56, %v530_v9 }
 0x18e   :  { %1003 = vst.msk [vmem:[%s2086_s3 + $0xa0] sm:$0xff] %vm982_vm2, %v971_v19  ;;  %v532_v18 = vpop.f32.mrf.mxu1 }
 0x18f   :  { %v750_v20 = vadd.f32 %v749_v10, %v640_v14  ;;  %v533_v28 = vadd.f32 %v532_v18, %v1695_v15 }
 0x190   :  { %v752_v17 = vpop.f32.mrf.mxu3 }
 0x191   :  { %v860_v47 = vadd.f32 %v859_v22, %v750_v20 }
 0x192   :  { %v862_v23 = vpop.f32.mrf.mxu0 }
 0x193   :  { %vm910_vm8 = vcmp.gt.f32.partialorder %v860_v47, 0.0  ;;  %v941_v29 = vmul.f32 0.01, %v860_v47 }
 0x194   :  { %v642_v2 = vpop.f32.mrf.mxu2 }
 0x195   :  { %v972_v30 = vsel %vm910_vm8, %v860_v47, %v941_v29  ;;  %v643_v34 = vadd.f32 %v642_v2, %v533_v28 }
 0x196   :  { %1004 = vst.msk [vmem:[%s2086_s3 + $0xa8] sm:$0xff] %vm982_vm2, %v972_v30  ;;  %v535_v52 = vpop.f32.mrf.mxu1 }
 0x197   :  { %v753_v35 = vadd.f32 %v752_v17, %v643_v34  ;;  %v536_v40 = vadd.f32 %v535_v52, %v1718_v33 }
 0x198   :  { %v755_v16 = vpop.f32.mrf.mxu3 }
 0x199   :  { %v863_v38 = vadd.f32 %v862_v23, %v753_v35 }
 0x19a   :  { %v865_v39 = vpop.f32.mrf.mxu0 }
 0x19b   :  { %vm911_vm9 = vcmp.gt.f32.partialorder %v863_v38, 0.0  ;;  %v942_v43 = vmul.f32 0.01, %v863_v38 }
 0x19c   :  { %v645_v15 = vpop.f32.mrf.mxu2 }
 0x19d   :  { %v973_v25 = vsel %vm911_vm9, %v863_v38, %v942_v43  ;;  %v646_v44 = vadd.f32 %v645_v15, %v536_v40 }
 0x19e   :  { %1005 = vst.msk [vmem:[%s2086_s3 + $0xb0] sm:$0xff] %vm982_vm2, %v973_v25  ;;  %v538_v32 = vpop.f32.mrf.mxu1 }
 0x19f   :  { %v756_v57 = vadd.f32 %v755_v16, %v646_v44  ;;  %v539_v48 = vadd.f32 %v538_v32, %v1569_v21 }
 0x1a0   :  { %v758_v27 = vpop.f32.mrf.mxu3 }
 0x1a1   :  { %v866_v26 = vadd.f32 %v865_v39, %v756_v57 }
 0x1a2   :  { %v868_v45 = vpop.f32.mrf.mxu0 }
 0x1a3   :  { %vm912_vm10 = vcmp.gt.f32.partialorder %v866_v26, 0.0  ;;  %v943_v49 = vmul.f32 0.01, %v866_v26 }
 0x1a4   :  { %v648_v33 = vpop.f32.mrf.mxu2 }
 0x1a5   :  { %v974_v50 = vsel %vm912_vm10, %v866_v26, %v943_v49  ;;  %v649_v53 = vadd.f32 %v648_v33, %v539_v48 }
 0x1a6   :  { %1006 = vst.msk [vmem:[%s2086_s3 + $0xb8] sm:$0xff] %vm982_vm2, %v974_v50  ;;  %v541_v11 = vpop.f32.mrf.mxu1 }
 0x1a7   :  { %v759_v54 = vadd.f32 %v758_v27, %v649_v53  ;;  %v542_v58 = vadd.f32 %v541_v11, %v1592_v31 }
 0x1a8   :  { %v761_v62 = vpop.f32.mrf.mxu3 }
 0x1a9   :  { %v869_v55 = vadd.f32 %v868_v45, %v759_v54 }
 0x1aa   :  { %v871_v36 = vpop.f32.mrf.mxu0 }
 0x1ab   :  { %vm913_vm11 = vcmp.gt.f32.partialorder %v869_v55, 0.0  ;;  %v944_v59 = vmul.f32 0.01, %v869_v55 }
 0x1ac   :  { %v651_v21 = vpop.f32.mrf.mxu2 }
 0x1ad   :  { %v975_v60 = vsel %vm913_vm11, %v869_v55, %v944_v59  ;;  %v652_v3 = vadd.f32 %v651_v21, %v542_v58 }
 0x1ae   :  { %1007 = vst.msk [vmem:[%s2086_s3 + $0xc0] sm:$0xff] %vm982_vm2, %v975_v60  ;;  %v544_v8 = vpop.f32.mrf.mxu1 }
 0x1af   :  { %v762_v63 = vadd.f32 %v761_v62, %v652_v3  ;;  %v545_v46 = vadd.f32 %v544_v8, %v1615_v41 }
 0x1b0   :  { %v764_v37 = vpop.f32.mrf.mxu3 }
 0x1b1   :  { %v872_v0 = vadd.f32 %v871_v36, %v762_v63 }
 0x1b2   :  { %v874_v1 = vpop.f32.mrf.mxu0 }
 0x1b3   :  { %vm914_vm12 = vcmp.gt.f32.partialorder %v872_v0, 0.0  ;;  %v945_v42 = vmul.f32 0.01, %v872_v0 }
 0x1b4   :  { %v654_v31 = vpop.f32.mrf.mxu2 }
 0x1b5   :  { %v976_v4 = vsel %vm914_vm12, %v872_v0, %v945_v42  ;;  %v655_v5 = vadd.f32 %v654_v31, %v545_v46 }
 0x1b6   :  { %1008 = vst.msk [vmem:[%s2086_s3 + $0xc8] sm:$0xff] %vm982_vm2, %v976_v4  ;;  %v547_v6 = vpop.f32.mrf.mxu1 }
 0x1b7   :  { %v765_v10 = vadd.f32 %v764_v37, %v655_v5  ;;  %v548_v13 = vadd.f32 %v547_v6, %v1638_v51 }
 0x1b8   :  { %v767_v12 = vpop.f32.mrf.mxu3 }
 0x1b9   :  { %v875_v22 = vadd.f32 %v874_v1, %v765_v10 }
 0x1ba   :  { %v877_v9 = vpop.f32.mrf.mxu0 }
 0x1bb   :  { %vm915_vm13 = vcmp.gt.f32.partialorder %v875_v22, 0.0  ;;  %v946_v56 = vmul.f32 0.01, %v875_v22 }
 0x1bc   :  { %v657_v41 = vpop.f32.mrf.mxu2 }
 0x1bd   :  { %v977_v19 = vsel %vm915_vm13, %v875_v22, %v946_v56  ;;  %v658_v14 = vadd.f32 %v657_v41, %v548_v13 }
 0x1be   :  { %1009 = vst.msk [vmem:[%s2086_s3 + $0xd0] sm:$0xff] %vm982_vm2, %v977_v19  ;;  %v550_v18 = vpop.f32.mrf.mxu1 }
 0x1bf   :  { %v768_v20 = vadd.f32 %v767_v12, %v658_v14  ;;  %v551_v28 = vadd.f32 %v550_v18, %v1661_v61 }
 0x1c0   :  { %v770_v17 = vpop.f32.mrf.mxu3 }
 0x1c1   :  { %v878_v47 = vadd.f32 %v877_v9, %v768_v20 }
 0x1c2   :  { %v880_v23 = vpop.f32.mrf.mxu0 }
 0x1c3   :  { %vm916_vm14 = vcmp.gt.f32.partialorder %v878_v47, 0.0  ;;  %v947_v29 = vmul.f32 0.01, %v878_v47 }
 0x1c4   :  { %v660_v51 = vpop.f32.mrf.mxu2 }
 0x1c5   :  { %v978_v2 = vsel %vm916_vm14, %v878_v47, %v947_v29  ;;  %v661_v30 = vadd.f32 %v660_v51, %v551_v28 }
 0x1c6   :  { %1010 = vst.msk [vmem:[%s2086_s3 + $0xd8] sm:$0xff] %vm982_vm2, %v978_v2  ;;  %v553_v34 = vpop.f32.mrf.mxu1 }
 0x1c7   :  { %v771_v52 = vadd.f32 %v770_v17, %v661_v30  ;;  %v554_v38 = vadd.f32 %v553_v34, %v1684_v7 }
 0x1c8   :  { %v773_v16 = vpop.f32.mrf.mxu3 }
 0x1c9   :  { %v881_v35 = vadd.f32 %v880_v23, %v771_v52 }
 0x1ca   :  { %v883_v61 = vpop.f32.mrf.mxu0 }
 0x1cb   :  { %vm917_vm15 = vcmp.gt.f32.partialorder %v881_v35, 0.0  ;;  %v948_v39 = vmul.f32 0.01, %v881_v35 }
 0x1cc   :  { %v663_v40 = vpop.f32.mrf.mxu2 }
 0x1cd   :  { %v979_v43 = vsel %vm917_vm15, %v881_v35, %v948_v39  ;;  %v664_v15 = vadd.f32 %v663_v40, %v554_v38 }
 0x1ce   :  { %1011 = vst.msk [vmem:[%s2086_s3 + $0xe0] sm:$0xff] %vm982_vm2, %v979_v43  ;;  %v556_v44 = vpop.f32.mrf.mxu1 }
 0x1cf   :  { %v774_v25 = vadd.f32 %v773_v16, %v664_v15  ;;  %v557_v57 = vadd.f32 %v556_v44, %v1707_v24 }
 0x1d0   :  { %v776_v7 = vpop.f32.mrf.mxu3 }
 0x1d1   :  { %v884_v32 = vadd.f32 %v883_v61, %v774_v25 }
 0x1d2   :  { %v886_v49 = vpop.f32.mrf.mxu0 }
 0x1d3   :  { %vm918_vm1 = vcmp.gt.f32.partialorder %v884_v32, 0.0  ;;  %v949_v27 = vmul.f32 0.01, %v884_v32 }
 0x1d4   :  { %v666_v26 = vpop.f32.mrf.mxu2 }
 0x1d5   :  { %v980_v45 = vsel %vm918_vm1, %v884_v32, %v949_v27  ;;  %v667_v48 = vadd.f32 %v666_v26, %v557_v57 }
 0x1d6   :  { %1012 = vst.msk [vmem:[%s2086_s3 + $0xe8] sm:$0xff] %vm982_vm2, %v980_v45 }
 0x1d7   :  { %v777_v33 = vadd.f32 %v776_v7, %v667_v48 }
 0x1d9   :  { %v887_v50 = vadd.f32 %v886_v49, %v777_v33 }
 0x1db   :  { %vm919_vm0 = vcmp.gt.f32.partialorder %v887_v50, 0.0  ;;  %v950_v53 = vmul.f32 0.01, %v887_v50 }
 0x1dd   :  { %v981_v11 = vsel %vm919_vm0, %v887_v50, %v950_v53 }
 0x1de   :  { %1014 = vst.msk [vmem:[%s2086_s3 + $0xf0] sm:$0x3] %vm1013_vm3, %v981_v11 }

// kernel: agent_network_forward.7
= control target key start
LH: loop header
LB: loop body
LE: loop exit
PB: predicated region body
PF: predicated region fallthrough
CT: control target
= control target key end

     0   :  { %10 = vsyncpa [#allocation4], 0  ;;  %s3859_s18 = smov 0   ;;  %s4670_s0 = inlined_call_operand.vmem [shape: bf16[2,4096], index: 0, kind: input, shape index: {}]   ;;  %s4671_s1 = inlined_call_operand.vmem [shape: bf16[4096,512], index: 1, kind: input, shape index: {}]   ;;  %s4672_s2 = inlined_call_operand.vmem [shape: f32[1,512], index: 2, kind: input, shape index: {}]   ;;  %s4673_s3 = inlined_call_operand.vmem [shape: f32[512,4], index: 3, kind: input, shape index: {}]   ;;  %s4674_s4 = inlined_call_operand.vmem [shape: f32[1,4], index: 4, kind: input, shape index: {}]   ;;  %s4675_s5 = inlined_call_operand.hbm [shape: f32[2,4], index: 5, kind: output, shape index: {}]  }
   0x1 LB: > { %s3865_s19 = sadd.s32 4294967295, %s3825_s18   ;;  %p2470_p0 = scmp.ge.s32.totalorder %s3825_s18, 1  ;;  %s3825_s18 = sphi %s3859_s18, %s16_s18  }
   0x2   : > { %p195_p1 = scmp.lt.s32.totalorder %s3825_s18, 5 }
   0x4   : > { %p196_p2 = pnand %p2470_p0, %p195_p1 }
   0x5   : > { %s2471_s20 = sshll.u32 (!%p196_p2), %s3865_s19, 3  ;;  %s2472_s21 = sshll.u32 (!%p196_p2), %s3865_s19, 7 }
   0x6   : > { %199 = sbr.rel (%p196_p2) target bundleno = 603 (0x25b), region = 40  ;;  %p224_p3 = scmp.lt.s32.totalorder (!%p196_p2), %s2471_s20, 31 }
   0x7   : > { %p229_p4 = scmp.lt.s32.totalorder (!%p196_p2), %s2472_s21, 511  ;;  %p2475_p5 = scmp.ne.s32.totalorder (!%p196_p2), %s3865_s19, 0 }
   0xb   : > { %s4677_s20 = smov (!%p224_p3, %s2471_s20), 31  ;;  %s4679_s21 = smov (!%p229_p4, %s2472_s21), 511 }
   0xc   : > { %s226_s24 = scalar_lea.vmem %s4670_s0, %s4677_s20  ;;  %s3505_s25 = sshll.u32 %s4679_s21, 4 }
   0xd   : > { %s3880_s28 = scalar_lea.vmem %s4671_s1, %s3505_s25  ;;  %238 = sbr.rel (%p2475_p5) target bundleno = 20 (0x14), region = 44 }
  0x12   : > { %v3827_v0 = vmov 0.0  }
  0x13   : > { %239 = vst [vmem:[#allocation2] sm:$0xff] %v3827_v0 }
  0x14 PF: > { %v2590_v1 = vld [vmem:[%s3880_s28 + $0xe0] sm:$0xf]  ;;  %v3536_v2 = vld [vmem:[%s3880_s28 + $0xec] sm:$0xf0]  ;;  %vm2219_vm0 = vcmask 1041408   ;;  %vm2221_vm1 = vcmask 1045508  }
  0x15   : > { %v2718_v3 = vld [vmem:[%s3880_s28 + $0x1e0] sm:$0xf]  ;;  %v2591_v4 = vor.u32 %v3536_v2, %v2590_v1  ;;  %v3568_v5 = vld [vmem:[%s3880_s28 + $0x1ec] sm:$0xf0]  ;;  %vm2223_vm2 = vcmask 1043456   ;;  %p3500_p6 = scmp.ne.s32.totalorder %s3865_s19, 3 }
  0x16   : > { %v2846_v6 = vld [vmem:[%s3880_s28 + $0x2e0] sm:$0xf]  ;;  %v3600_v7 = vld [vmem:[%s3880_s28 + $0x2ec] sm:$0xf0]  ;;  %v2719_v8 = vor.u32 %v3568_v5, %v2718_v3 }
  0x17   : > { %v2847_v9 = vor.u32 %v3600_v7, %v2846_v6  ;;  %v2974_v10 = vld [vmem:[%s3880_s28 + $0x3e0] sm:$0xf]  ;;  %v3632_v11 = vld [vmem:[%s3880_s28 + $0x3ec] sm:$0xf0]  ;;  %1796 = vmatpush.bf16.msra.mxu0 %v2591_v4 }
  0x18   : > { %v2574_v12 = vld [vmem:[%s3880_s28 + $0xc0] sm:$0xf]  ;;  %v2975_v13 = vor.u32 %v3632_v11, %v2974_v10  ;;  %v3532_v14 = vld [vmem:[%s3880_s28 + $0xcc] sm:$0xf0]  ;;  %1809 = vmatpush.bf16.msra.mxu1 %v2719_v8 }
  0x19   : > { %v2702_v15 = vld [vmem:[%s3880_s28 + $0x1c0] sm:$0xf]  ;;  %v3564_v16 = vld [vmem:[%s3880_s28 + $0x1cc] sm:$0xf0]  ;;  %1822 = vmatpush.bf16.msra.mxu2 %v2847_v9  ;;  %v2575_v17 = vor.u32 %v3532_v14, %v2574_v12 }
  0x1a   : > { %v2703_v18 = vor.u32 %v3564_v16, %v2702_v15  ;;  %v2830_v19 = vld [vmem:[%s3880_s28 + $0x2c0] sm:$0xf]  ;;  %v3596_v20 = vld [vmem:[%s3880_s28 + $0x2cc] sm:$0xf0]  ;;  %1835 = vmatpush.bf16.msra.mxu3 %v2975_v13 }
  0x1b   : > { %v2958_v21 = vld [vmem:[%s3880_s28 + $0x3c0] sm:$0xf]  ;;  %v2831_v22 = vor.u32 %v3596_v20, %v2830_v19  ;;  %v3628_v23 = vld [vmem:[%s3880_s28 + $0x3cc] sm:$0xf0]  ;;  %1797 = vmatpush.bf16.msra.mxu0 %v2575_v17 }
  0x1c   : > { %v2558_v24 = vld [vmem:[%s3880_s28 + $0xa0] sm:$0xf]  ;;  %v3528_v25 = vld [vmem:[%s3880_s28 + $0xac] sm:$0xf0]  ;;  %v2959_v26 = vor.u32 %v3628_v23, %v2958_v21  ;;  %1810 = vmatpush.bf16.msra.mxu1 %v2703_v18 }
  0x1d   : > { %v2686_v27 = vld [vmem:[%s3880_s28 + $0x1a0] sm:$0xf]  ;;  %v3560_v28 = vld [vmem:[%s3880_s28 + $0x1ac] sm:$0xf0]  ;;  %v2559_v30 = vor.u32 %v3528_v25, %v2558_v24  ;;  %1823 = vmatpush.bf16.msra.mxu2 %v2831_v22 }
  0x1e   : > { %v2814_v29 = vld [vmem:[%s3880_s28 + $0x2a0] sm:$0xf]  ;;  %v3592_v31 = vld [vmem:[%s3880_s28 + $0x2ac] sm:$0xf0]  ;;  %v2687_v34 = vor.u32 %v3560_v28, %v2686_v27  ;;  %1836 = vmatpush.bf16.msra.mxu3 %v2959_v26 }
  0x1f   : > { %v2942_v32 = vld [vmem:[%s3880_s28 + $0x3a0] sm:$0xf]  ;;  %v3624_v33 = vld [vmem:[%s3880_s28 + $0x3ac] sm:$0xf0]  ;;  %v2815_v35 = vor.u32 %v3592_v31, %v2814_v29  ;;  %1798 = vmatpush.bf16.msra.mxu0 %v2559_v30 }
  0x20   : > { %v2542_v36 = vld [vmem:[%s3880_s28 + $0x80] sm:$0xf]  ;;  %v3524_v37 = vld [vmem:[%s3880_s28 + $0x8c] sm:$0xf0]  ;;  %v2943_v39 = vor.u32 %v3624_v33, %v2942_v32  ;;  %1811 = vmatpush.bf16.msra.mxu1 %v2687_v34 }
  0x21   : > { %v2670_v38 = vld [vmem:[%s3880_s28 + $0x180] sm:$0xf]  ;;  %v3556_v40 = vld [vmem:[%s3880_s28 + $0x18c] sm:$0xf0]  ;;  %v2543_v45 = vor.u32 %v3524_v37, %v2542_v36  ;;  %1824 = vmatpush.bf16.msra.mxu2 %v2815_v35 }
  0x22   : > { %v2798_v41 = vld [vmem:[%s3880_s28 + $0x280] sm:$0xf]  ;;  %v3588_v42 = vld [vmem:[%s3880_s28 + $0x28c] sm:$0xf0]  ;;  %v2671_v46 = vor.u32 %v3556_v40, %v2670_v38  ;;  %1837 = vmatpush.bf16.msra.mxu3 %v2943_v39 }
  0x23   : > { %v2926_v43 = vld [vmem:[%s3880_s28 + $0x380] sm:$0xf]  ;;  %v3620_v44 = vld [vmem:[%s3880_s28 + $0x38c] sm:$0xf0]  ;;  %v2799_v47 = vor.u32 %v3588_v42, %v2798_v41  ;;  %1799 = vmatpush.bf16.msra.mxu0 %v2543_v45 }
  0x24   : > { %v2526_v48 = vld [vmem:[%s3880_s28 + $0x60] sm:$0xf]  ;;  %v3520_v49 = vld [vmem:[%s3880_s28 + $0x6c] sm:$0xf0]  ;;  %v2927_v51 = vor.u32 %v3620_v44, %v2926_v43  ;;  %1812 = vmatpush.bf16.msra.mxu1 %v2671_v46 }
  0x25   : > { %v2654_v50 = vld [vmem:[%s3880_s28 + $0x160] sm:$0xf]  ;;  %v3552_v52 = vld [vmem:[%s3880_s28 + $0x16c] sm:$0xf0]  ;;  %v2527_v57 = vor.u32 %v3520_v49, %v2526_v48  ;;  %1825 = vmatpush.bf16.msra.mxu2 %v2799_v47 }
  0x26   : > { %v2782_v53 = vld [vmem:[%s3880_s28 + $0x260] sm:$0xf]  ;;  %v3584_v54 = vld [vmem:[%s3880_s28 + $0x26c] sm:$0xf0]  ;;  %v2655_v58 = vor.u32 %v3552_v52, %v2654_v50  ;;  %1838 = vmatpush.bf16.msra.mxu3 %v2927_v51 }
  0x27   : > { %v2910_v55 = vld [vmem:[%s3880_s28 + $0x360] sm:$0xf]  ;;  %v3616_v56 = vld [vmem:[%s3880_s28 + $0x36c] sm:$0xf0]  ;;  %v2783_v59 = vor.u32 %v3584_v54, %v2782_v53  ;;  %1800 = vmatpush.bf16.msra.mxu0 %v2527_v57 }
  0x28   : > { %v2510_v60 = vld [vmem:[%s3880_s28 + $0x40] sm:$0xf]  ;;  %v3516_v61 = vld [vmem:[%s3880_s28 + $0x4c] sm:$0xf0]  ;;  %v2911_v63 = vor.u32 %v3616_v56, %v2910_v55  ;;  %1813 = vmatpush.bf16.msra.mxu1 %v2655_v58 }
  0x29   : > { %v2638_v62 = vld [vmem:[%s3880_s28 + $0x140] sm:$0xf]  ;;  %v3548_v0 = vld [vmem:[%s3880_s28 + $0x14c] sm:$0xf0]  ;;  %v2511_v5 = vor.u32 %v3516_v61, %v2510_v60  ;;  %1826 = vmatpush.bf16.msra.mxu2 %v2783_v59 }
  0x2a   : > { %v2766_v1 = vld [vmem:[%s3880_s28 + $0x240] sm:$0xf]  ;;  %v3580_v2 = vld [vmem:[%s3880_s28 + $0x24c] sm:$0xf0]  ;;  %v2639_v6 = vor.u32 %v3548_v0, %v2638_v62  ;;  %1839 = vmatpush.bf16.msra.mxu3 %v2911_v63 }
  0x2b   : > { %v2894_v3 = vld [vmem:[%s3880_s28 + $0x340] sm:$0xf]  ;;  %v3612_v4 = vld [vmem:[%s3880_s28 + $0x34c] sm:$0xf0]  ;;  %v2767_v7 = vor.u32 %v3580_v2, %v2766_v1  ;;  %1801 = vmatpush.bf16.msra.mxu0 %v2511_v5 }
  0x2c   : > { %v2494_v8 = vld [vmem:[%s3880_s28 + $0x20] sm:$0xf]  ;;  %v3512_v9 = vld [vmem:[%s3880_s28 + $0x2c] sm:$0xf0]  ;;  %v2895_v11 = vor.u32 %v3612_v4, %v2894_v3  ;;  %1814 = vmatpush.bf16.msra.mxu1 %v2639_v6 }
  0x2d   : > { %v2622_v10 = vld [vmem:[%s3880_s28 + $0x120] sm:$0xf]  ;;  %v3544_v12 = vld [vmem:[%s3880_s28 + $0x12c] sm:$0xf0]  ;;  %v2495_v17 = vor.u32 %v3512_v9, %v2494_v8  ;;  %1827 = vmatpush.bf16.msra.mxu2 %v2767_v7 }
  0x2e   : > { %v2750_v13 = vld [vmem:[%s3880_s28 + $0x220] sm:$0xf]  ;;  %v3576_v14 = vld [vmem:[%s3880_s28 + $0x22c] sm:$0xf0]  ;;  %v2623_v20 = vor.u32 %v3544_v12, %v2622_v10  ;;  %1840 = vmatpush.bf16.msra.mxu3 %v2895_v11 }
  0x2f   : > { %v2878_v15 = vld [vmem:[%s3880_s28 + $0x320] sm:$0xf]  ;;  %v3608_v16 = vld [vmem:[%s3880_s28 + $0x32c] sm:$0xf0]  ;;  %v2751_v21 = vor.u32 %v3576_v14, %v2750_v13  ;;  %1802 = vmatpush.bf16.msra.mxu0 %v2495_v17 }
  0x30   : > { %v2478_v18 = vld [vmem:[%s3880_s28] sm:$0xf]  ;;  %v3508_v19 = vld [vmem:[%s3880_s28 + $0xc] sm:$0xf0]  ;;  %v2879_v25 = vor.u32 %v3608_v16, %v2878_v15  ;;  %1815 = vmatpush.bf16.msra.mxu1 %v2623_v20 }
  0x31   : > { %v2606_v22 = vld [vmem:[%s3880_s28 + $0x100] sm:$0xf]  ;;  %v3540_v23 = vld [vmem:[%s3880_s28 + $0x10c] sm:$0xf0]  ;;  %v2479_v32 = vor.u32 %v3508_v19, %v2478_v18  ;;  %1828 = vmatpush.bf16.msra.mxu2 %v2751_v21 }
  0x32   : > { %v2734_v24 = vld [vmem:[%s3880_s28 + $0x200] sm:$0xf]  ;;  %v3572_v26 = vld [vmem:[%s3880_s28 + $0x20c] sm:$0xf0]  ;;  %v2607_v36 = vor.u32 %v3540_v23, %v2606_v22  ;;  %1841 = vmatpush.bf16.msra.mxu3 %v2879_v25 }
  0x33   : > { %v2862_v27 = vld [vmem:[%s3880_s28 + $0x300] sm:$0xf]  ;;  %v3604_v28 = vld [vmem:[%s3880_s28 + $0x30c] sm:$0xf0]  ;;  %v2735_v37 = vor.u32 %v3572_v26, %v2734_v24  ;;  %1803 = vmatpush.bf16.msra.mxu0 %v2479_v32 }
  0x34   : > { %v3102_v29 = vld [vmem:[%s3880_s28 + $0x4e0] sm:$0xf]  ;;  %v3664_v30 = vld [vmem:[%s3880_s28 + $0x4ec] sm:$0xf0]  ;;  %v2863_v40 = vor.u32 %v3604_v28, %v2862_v27  ;;  %1816 = vmatpush.bf16.msra.mxu1 %v2607_v36 }
  0x35   : > { %v3230_v31 = vld [vmem:[%s3880_s28 + $0x5e0] sm:$0xf]  ;;  %v3696_v33 = vld [vmem:[%s3880_s28 + $0x5ec] sm:$0xf0]  ;;  %v3103_v41 = vor.u32 %v3664_v30, %v3102_v29  ;;  %1829 = vmatpush.bf16.msra.mxu2 %v2735_v37 }
  0x36   : > { %v3358_v34 = vld [vmem:[%s3880_s28 + $0x6e0] sm:$0xf]  ;;  %v3728_v35 = vld [vmem:[%s3880_s28 + $0x6ec] sm:$0xf0]  ;;  %v3231_v42 = vor.u32 %v3696_v33, %v3230_v31  ;;  %1842 = vmatpush.bf16.msra.mxu3 %v2863_v40 }
  0x37   : > { %v3486_v38 = vld [vmem:[%s3880_s28 + $0x7e0] sm:$0xf]  ;;  %v3760_v39 = vld [vmem:[%s3880_s28 + $0x7ec] sm:$0xf0]  ;;  %v3359_v43 = vor.u32 %v3728_v35, %v3358_v34  ;;  %1848 = vmatpush.bf16.msrb.mxu0 %v3103_v41 }
  0x38   : > { %v3086_v44 = vld [vmem:[%s3880_s28 + $0x4c0] sm:$0xf]  ;;  %v3660_v45 = vld [vmem:[%s3880_s28 + $0x4cc] sm:$0xf0]  ;;  %v3487_v47 = vor.u32 %v3760_v39, %v3486_v38  ;;  %1861 = vmatpush.bf16.msrb.mxu1 %v3231_v42 }
  0x39   : > { %v3214_v46 = vld [vmem:[%s3880_s28 + $0x5c0] sm:$0xf]  ;;  %v3692_v48 = vld [vmem:[%s3880_s28 + $0x5cc] sm:$0xf0]  ;;  %v3087_v53 = vor.u32 %v3660_v45, %v3086_v44  ;;  %1874 = vmatpush.bf16.msrb.mxu2 %v3359_v43 }
  0x3a   : > { %v3342_v49 = vld [vmem:[%s3880_s28 + $0x6c0] sm:$0xf]  ;;  %v3724_v50 = vld [vmem:[%s3880_s28 + $0x6cc] sm:$0xf0]  ;;  %v3215_v56 = vor.u32 %v3692_v48, %v3214_v46  ;;  %1887 = vmatpush.bf16.msrb.mxu3 %v3487_v47 }
  0x3b   : > { %v3470_v51 = vld [vmem:[%s3880_s28 + $0x7c0] sm:$0xf]  ;;  %v3756_v52 = vld [vmem:[%s3880_s28 + $0x7cc] sm:$0xf0]  ;;  %v3343_v57 = vor.u32 %v3724_v50, %v3342_v49  ;;  %1849 = vmatpush.bf16.msrb.mxu0 %v3087_v53 }
  0x3c   : > { %v3070_v54 = vld [vmem:[%s3880_s28 + $0x4a0] sm:$0xf]  ;;  %v3656_v55 = vld [vmem:[%s3880_s28 + $0x4ac] sm:$0xf0]  ;;  %v3471_v61 = vor.u32 %v3756_v52, %v3470_v51  ;;  %1862 = vmatpush.bf16.msrb.mxu1 %v3215_v56 }
  0x3d   : > { %v3198_v58 = vld [vmem:[%s3880_s28 + $0x5a0] sm:$0xf]  ;;  %v3688_v59 = vld [vmem:[%s3880_s28 + $0x5ac] sm:$0xf0]  ;;  %v3071_v2 = vor.u32 %v3656_v55, %v3070_v54  ;;  %1875 = vmatpush.bf16.msrb.mxu2 %v3343_v57 }
  0x3e   : > { %v241_v60 = vld [vmem:[%s226_s24] sm:$0xff]  ;;  %v3720_v63 = vld [vmem:[%s3880_s28 + $0x6ac] sm:$0xf0]  ;;  %v3199_v3 = vor.u32 %v3688_v59, %v3198_v58  ;;  %1888 = vmatpush.bf16.msrb.mxu3 %v3471_v61 }
  0x3f   : > { %v3326_v62 = vld [vmem:[%s3880_s28 + $0x6a0] sm:$0xf]  ;;  %499 = vst [vmem:[#allocation1] ss:$9 sm:$0xff] %v241_v60  ;;  %v3752_v1 = vld [vmem:[%s3880_s28 + $0x7ac] sm:$0xf0]  ;;  %1850 = vmatpush.bf16.msrb.mxu0 %v3071_v2 }
  0x40   : > { %v3454_v0 = vld [vmem:[%s3880_s28 + $0x7a0] sm:$0xf]  ;;  %v3327_v4 = vor.u32 %v3720_v63, %v3326_v62  ;;  %v3652_v6 = vld [vmem:[%s3880_s28 + $0x48c] sm:$0xf0]  ;;  %1863 = vmatpush.bf16.msrb.mxu1 %v3199_v3  ;;  %v3534_v2 = vld [vmem:[%s3880_s28 + $0xe4] sm:$0xf] }
  0x41   : > { %v3054_v5 = vld [vmem:[%s3880_s28 + $0x480] sm:$0xf]  ;;  %v3455_v8 = vor.u32 %v3752_v1, %v3454_v0  ;;  %v3684_v9 = vld [vmem:[%s3880_s28 + $0x58c] sm:$0xf0]  ;;  %v2592_v3 = vld [vmem:[%s3880_s28 + $0xf0] sm:$0xf0] }
  0x42   : > { %v3182_v7 = vld [vmem:[%s3880_s28 + $0x580] sm:$0xf]  ;;  %v3716_v11 = vld [vmem:[%s3880_s28 + $0x68c] sm:$0xf0]  ;;  %v3055_v15 = vor.u32 %v3652_v6, %v3054_v5  ;;  %1876 = vmatpush.bf16.msrb.mxu2 %v3327_v4  ;;  %v3566_v4 = vld [vmem:[%s3880_s28 + $0x1e4] sm:$0xf] }
  0x43   : > { %v3310_v10 = vld [vmem:[%s3880_s28 + $0x680] sm:$0xf]  ;;  %v3748_v13 = vld [vmem:[%s3880_s28 + $0x78c] sm:$0xf0]  ;;  %v3183_v19 = vor.u32 %v3684_v9, %v3182_v7  ;;  %1889 = vmatpush.bf16.msrb.mxu3 %v3455_v8  ;;  %v2720_v6 = vld [vmem:[%s3880_s28 + $0x1f0] sm:$0xf0] }
  0x44   : > { %v3438_v12 = vld [vmem:[%s3880_s28 + $0x780] sm:$0xf]  ;;  %v3648_v16 = vld [vmem:[%s3880_s28 + $0x46c] sm:$0xf0]  ;;  %v3311_v20 = vor.u32 %v3716_v11, %v3310_v10  ;;  %1851 = vmatpush.bf16.msrb.mxu0 %v3055_v15  ;;  %v3598_v7 = vld [vmem:[%s3880_s28 + $0x2e4] sm:$0xf]  ;;  %v2723_v15 = vor.u32 %v3566_v4, %v2720_v6 }
  0x45   : > { %v3038_v14 = vld [vmem:[%s3880_s28 + $0x460] sm:$0xf]  ;;  %v3680_v18 = vld [vmem:[%s3880_s28 + $0x56c] sm:$0xf0]  ;;  %v3439_v24 = vor.u32 %v3748_v13, %v3438_v12  ;;  %1864 = vmatpush.bf16.msrb.mxu1 %v3183_v19  ;;  %v2848_v8 = vld [vmem:[%s3880_s28 + $0x2f0] sm:$0xf0] }
  0x46   : > { %v3166_v17 = vld [vmem:[%s3880_s28 + $0x560] sm:$0xf]  ;;  %v3988_v21 = vld [vmem:[#allocation1 + $0x12] sm:$0xff]  ;;  %v3997_v27 = vld [vmem:[#allocation1 + $0x9] sm:$0xff]  ;;  %v3039_v30 = vor.u32 %v3648_v16, %v3038_v14  ;;  %1877 = vmatpush.bf16.msrb.mxu2 %v3311_v20  ;;  %v2595_v14 = vor.u32 %v3534_v2, %v2592_v3  ;;  %v2851_v16 = vor.u32 %v3598_v7, %v2848_v8 }
  0x47   : > { %v3990_v22 = vld [vmem:[#allocation1] sm:$0xff]  ;;  %v3712_v26 = vld [vmem:[%s3880_s28 + $0x66c] sm:$0xf0]  ;;  %1830 = vmatmul.bf16.vlgmr.msra.gmra.mxu2 %v3988_v21  ;;  %1817 = vmatmul.bf16.vlgmr.msra.gmra.mxu1 %v3997_v27  ;;  %v3167_v31 = vor.u32 %v3680_v18, %v3166_v17  ;;  %v2976_v12 = vld [vmem:[%s3880_s28 + $0x3f0] sm:$0xf0] }
  0x48   : > { %v3992_v23 = vld [vmem:[#allocation1 + $0x1b] sm:$0xff]  ;;  %v3744_v29 = vld [vmem:[%s3880_s28 + $0x76c] sm:$0xf0]  ;;  %1804 = vmatmul.bf16.vlgmr.msra.gmra.mxu0 %v3990_v22  ;;  %1890 = vmatpush.bf16.msrb.mxu3 %v3439_v24  ;;  %v3630_v11 = vld [vmem:[%s3880_s28 + $0x3e4] sm:$0xf] }
  0x49   : > { %v3294_v25 = vld [vmem:[%s3880_s28 + $0x660] sm:$0xf]  ;;  %1843 = vmatmul.bf16.vlgmr.msra.gmra.mxu3 %v3992_v23  ;;  %v3644_v34 = vld [vmem:[%s3880_s28 + $0x44c] sm:$0xf0]  ;;  %1852 = vmatpush.bf16.msrb.mxu0 %v3039_v30  ;;  %v3530_v17 = vld [vmem:[%s3880_s28 + $0xc4] sm:$0xf]  ;;  %v2979_v20 = vor.u32 %v3630_v11, %v2976_v12 }
  0x4a   : > { %v3422_v28 = vld [vmem:[%s3880_s28 + $0x760] sm:$0xf]  ;;  %v3295_v32 = vor.u32 %v3712_v26, %v3294_v25  ;;  %v3676_v37 = vld [vmem:[%s3880_s28 + $0x54c] sm:$0xf0]  ;;  %1865 = vmatpush.bf16.msrb.mxu1 %v3167_v31  ;;  %v2576_v18 = vld [vmem:[%s3880_s28 + $0xd0] sm:$0xf0] }
  0x4b   : > { %v3022_v33 = vld [vmem:[%s3880_s28 + $0x440] sm:$0xf]  ;;  %v3423_v36 = vor.u32 %v3744_v29, %v3422_v28  ;;  %v3708_v39 = vld [vmem:[%s3880_s28 + $0x64c] sm:$0xf0]  ;;  %v3562_v19 = vld [vmem:[%s3880_s28 + $0x1c4] sm:$0xf]  ;;  %v2579_v31 = vor.u32 %v3530_v17, %v2576_v18 }
  0x4c   : > { %v3150_v35 = vld [vmem:[%s3880_s28 + $0x540] sm:$0xf]  ;;  %v3740_v41 = vld [vmem:[%s3880_s28 + $0x74c] sm:$0xf0]  ;;  %v3023_v42 = vor.u32 %v3644_v34, %v3022_v33  ;;  %1878 = vmatpush.bf16.msrb.mxu2 %v3295_v32  ;;  %v2704_v24 = vld [vmem:[%s3880_s28 + $0x1d0] sm:$0xf0] }
  0x4d   : > { %v3278_v38 = vld [vmem:[%s3880_s28 + $0x640] sm:$0xf]  ;;  %v3151_v43 = vor.u32 %v3676_v37, %v3150_v35  ;;  %v3640_v46 = vld [vmem:[%s3880_s28 + $0x42c] sm:$0xf0]  ;;  %1891 = vmatpush.bf16.msrb.mxu3 %v3423_v36  ;;  %v3594_v25 = vld [vmem:[%s3880_s28 + $0x2c4] sm:$0xf]  ;;  %v2707_v35 = vor.u32 %v3562_v19, %v2704_v24 }
  0x4e   : > { %v3406_v40 = vld [vmem:[%s3880_s28 + $0x740] sm:$0xf]  ;;  %v3279_v44 = vor.u32 %v3708_v39, %v3278_v38  ;;  %v3672_v49 = vld [vmem:[%s3880_s28 + $0x52c] sm:$0xf0]  ;;  %1853 = vmatpush.bf16.msrb.mxu0 %v3023_v42  ;;  %v2832_v26 = vld [vmem:[%s3880_s28 + $0x2d0] sm:$0xf0] }
  0x4f   : > { %v3006_v45 = vld [vmem:[%s3880_s28 + $0x420] sm:$0xf]  ;;  %v3407_v48 = vor.u32 %v3740_v41, %v3406_v40  ;;  %v3704_v51 = vld [vmem:[%s3880_s28 + $0x62c] sm:$0xf0]  ;;  %1866 = vmatpush.bf16.msrb.mxu1 %v3151_v43  ;;  %v3626_v28 = vld [vmem:[%s3880_s28 + $0x3c4] sm:$0xf]  ;;  %v2835_v36 = vor.u32 %v3594_v25, %v2832_v26 }
  0x50   : > { %v3134_v47 = vld [vmem:[%s3880_s28 + $0x520] sm:$0xf]  ;;  %v3736_v53 = vld [vmem:[%s3880_s28 + $0x72c] sm:$0xf0]  ;;  %v3007_v54 = vor.u32 %v3640_v46, %v3006_v45  ;;  %1879 = vmatpush.bf16.msrb.mxu2 %v3279_v44  ;;  %v2960_v29 = vld [vmem:[%s3880_s28 + $0x3d0] sm:$0xf0] }
  0x51   : > { %v3262_v50 = vld [vmem:[%s3880_s28 + $0x620] sm:$0xf]  ;;  %v3636_v56 = vld [vmem:[%s3880_s28 + $0x40c] sm:$0xf0]  ;;  %v3135_v57 = vor.u32 %v3672_v49, %v3134_v47  ;;  %1892 = vmatpush.bf16.msrb.mxu3 %v3407_v48  ;;  %v4044_v30 = vld [vmem:[#allocation1 + $0x36] sm:$0xff]  ;;  %v2963_v40 = vor.u32 %v3626_v28, %v2960_v29 }
  0x52   : > { %v3390_v52 = vld [vmem:[%s3880_s28 + $0x720] sm:$0xf]  ;;  %v3263_v58 = vor.u32 %v3704_v51, %v3262_v50  ;;  %v3668_v60 = vld [vmem:[%s3880_s28 + $0x50c] sm:$0xf0]  ;;  %1854 = vmatpush.bf16.msrb.mxu0 %v3007_v54  ;;  %v4046_v32 = vld [vmem:[#allocation1 + $0x24] sm:$0xff] }
  0x53   : > { %v2990_v55 = vld [vmem:[%s3880_s28 + $0x400] sm:$0xf]  ;;  %v3391_v62 = vor.u32 %v3736_v53, %v3390_v52  ;;  %v3700_v63 = vld [vmem:[%s3880_s28 + $0x60c] sm:$0xf0]  ;;  %1867 = vmatpush.bf16.msrb.mxu1 %v3135_v57  ;;  %v3526_v34 = vld [vmem:[%s3880_s28 + $0xa4] sm:$0xf] }
  0x54   : > { %v3118_v59 = vld [vmem:[%s3880_s28 + $0x500] sm:$0xf]  ;;  %v3732_v1 = vld [vmem:[%s3880_s28 + $0x70c] sm:$0xf0]  ;;  %v2991_v5 = vor.u32 %v3636_v56, %v2990_v55  ;;  %1880 = vmatpush.bf16.msrb.mxu2 %v3263_v58  ;;  %v2560_v37 = vld [vmem:[%s3880_s28 + $0xb0] sm:$0xf0] }
  0x55   : > { %v3246_v61 = vld [vmem:[%s3880_s28 + $0x600] sm:$0xf]  ;;  %v3119_v9 = vor.u32 %v3668_v60, %v3118_v59  ;;  %1893 = vmatpush.bf16.msrb.mxu3 %v3391_v62  ;;  %v3558_v38 = vld [vmem:[%s3880_s28 + $0x1a4] sm:$0xf]  ;;  %v4053_v39 = vld [vmem:[#allocation1 + $0x2d] sm:$0xff]  ;;  %v2563_v46 = vor.u32 %v3526_v34, %v2560_v37 }
  0x56   : > { %v3374_v0 = vld [vmem:[%s3880_s28 + $0x700] sm:$0xf]  ;;  %v3247_v10 = vor.u32 %v3700_v63, %v3246_v61  ;;  %1855 = vmatpush.bf16.msrb.mxu0 %v2991_v5  ;;  %v2688_v41 = vld [vmem:[%s3880_s28 + $0x1b0] sm:$0xf0]  ;;  %v3590_v42 = vld [vmem:[%s3880_s28 + $0x2a4] sm:$0xf] }
  0x57   : > { %v3375_v13 = vor.u32 %v3732_v1, %v3374_v0  ;;  %1868 = vmatpush.bf16.msrb.mxu1 %v3119_v9  ;;  %v4048_v33 = vld [vmem:[#allocation1 + $0x3f] sm:$0xff]  ;;  %v2816_v43 = vld [vmem:[%s3880_s28 + $0x2b0] sm:$0xf0]  ;;  %v2691_v47 = vor.u32 %v3558_v38, %v2688_v41 }
  0x58   : > { %1881 = vmatpush.bf16.msrb.mxu2 %v3247_v10  ;;  %v3622_v44 = vld [vmem:[%s3880_s28 + $0x3a4] sm:$0xf]  ;;  %v2944_v45 = vld [vmem:[%s3880_s28 + $0x3b0] sm:$0xf0]  ;;  %v2819_v48 = vor.u32 %v3590_v42, %v2816_v43 }
  0x59   : > { %1894 = vmatpush.bf16.msrb.mxu3 %v3375_v13  ;;  %1856 = vmatmul.bf16.vlgmr.msrb.gmra.mxu0 %v4046_v32  ;;  %v3522_v49 = vld [vmem:[%s3880_s28 + $0x84] sm:$0xf]  ;;  %v2544_v50 = vld [vmem:[%s3880_s28 + $0x90] sm:$0xf0]  ;;  %v2947_v52 = vor.u32 %v3622_v44, %v2944_v45 }
  0x5a   : > { %1900 = vmatpush.bf16.msra.mxu0 %v2595_v14  ;;  %1869 = vmatmul.bf16.vlgmr.msrb.gmra.mxu1 %v4053_v39  ;;  %v3554_v51 = vld [vmem:[%s3880_s28 + $0x184] sm:$0xf]  ;;  %v2672_v53 = vld [vmem:[%s3880_s28 + $0x190] sm:$0xf0]  ;;  %v2547_v58 = vor.u32 %v3522_v49, %v2544_v50 }
  0x5b   : > { %1913 = vmatpush.bf16.msra.mxu1 %v2723_v15  ;;  %1882 = vmatmul.bf16.vlgmr.msrb.gmra.mxu2 %v4044_v30  ;;  %v3586_v54 = vld [vmem:[%s3880_s28 + $0x284] sm:$0xf]  ;;  %v2800_v55 = vld [vmem:[%s3880_s28 + $0x290] sm:$0xf0]  ;;  %v2675_v59 = vor.u32 %v3554_v51, %v2672_v53 }
  0x5c   : > { %1926 = vmatpush.bf16.msra.mxu2 %v2851_v16  ;;  %1895 = vmatmul.bf16.vlgmr.msrb.gmra.mxu3 %v4048_v33  ;;  %v3618_v56 = vld [vmem:[%s3880_s28 + $0x384] sm:$0xf]  ;;  %v2928_v57 = vld [vmem:[%s3880_s28 + $0x390] sm:$0xf0]  ;;  %v2803_v60 = vor.u32 %v3586_v54, %v2800_v55 }
  0x5d   : > { %1939 = vmatpush.bf16.msra.mxu3 %v2979_v20  ;;  %v3518_v61 = vld [vmem:[%s3880_s28 + $0x64] sm:$0xf]  ;;  %v2528_v62 = vld [vmem:[%s3880_s28 + $0x70] sm:$0xf0]  ;;  %v2931_v0 = vor.u32 %v3618_v56, %v2928_v57 }
  0x5e   : > { %1901 = vmatpush.bf16.msra.mxu0 %v2579_v31  ;;  %v3550_v63 = vld [vmem:[%s3880_s28 + $0x164] sm:$0xf]  ;;  %v2656_v1 = vld [vmem:[%s3880_s28 + $0x170] sm:$0xf0]  ;;  %v2531_v6 = vor.u32 %v3518_v61, %v2528_v62 }
  0x5f   : > { %1914 = vmatpush.bf16.msra.mxu1 %v2707_v35  ;;  %v3582_v2 = vld [vmem:[%s3880_s28 + $0x264] sm:$0xf]  ;;  %v2784_v3 = vld [vmem:[%s3880_s28 + $0x270] sm:$0xf0]  ;;  %v2659_v7 = vor.u32 %v3550_v63, %v2656_v1 }
  0x60   : > { %1927 = vmatpush.bf16.msra.mxu2 %v2835_v36  ;;  %v3614_v4 = vld [vmem:[%s3880_s28 + $0x364] sm:$0xf]  ;;  %v2912_v5 = vld [vmem:[%s3880_s28 + $0x370] sm:$0xf0]  ;;  %v2787_v8 = vor.u32 %v3582_v2, %v2784_v3 }
  0x61   : > { %1940 = vmatpush.bf16.msra.mxu3 %v2963_v40  ;;  %v3514_v9 = vld [vmem:[%s3880_s28 + $0x44] sm:$0xf]  ;;  %v2512_v10 = vld [vmem:[%s3880_s28 + $0x50] sm:$0xf0]  ;;  %v2915_v12 = vor.u32 %v3614_v4, %v2912_v5 }
  0x62   : > { %1902 = vmatpush.bf16.msra.mxu0 %v2563_v46  ;;  %v3546_v11 = vld [vmem:[%s3880_s28 + $0x144] sm:$0xf]  ;;  %v2640_v13 = vld [vmem:[%s3880_s28 + $0x150] sm:$0xf0]  ;;  %v2515_v18 = vor.u32 %v3514_v9, %v2512_v10 }
  0x63   : > { %1915 = vmatpush.bf16.msra.mxu1 %v2691_v47  ;;  %v3578_v14 = vld [vmem:[%s3880_s28 + $0x244] sm:$0xf]  ;;  %v2768_v15 = vld [vmem:[%s3880_s28 + $0x250] sm:$0xf0]  ;;  %v2643_v19 = vor.u32 %v3546_v11, %v2640_v13 }
  0x64   : > { %1928 = vmatpush.bf16.msra.mxu2 %v2819_v48  ;;  %v3610_v16 = vld [vmem:[%s3880_s28 + $0x344] sm:$0xf]  ;;  %v2896_v17 = vld [vmem:[%s3880_s28 + $0x350] sm:$0xf0]  ;;  %v2771_v20 = vor.u32 %v3578_v14, %v2768_v15 }
  0x65   : > { %1941 = vmatpush.bf16.msra.mxu3 %v2947_v52  ;;  %v3510_v24 = vld [vmem:[%s3880_s28 + $0x24] sm:$0xf]  ;;  %v2496_v25 = vld [vmem:[%s3880_s28 + $0x30] sm:$0xf0]  ;;  %v2899_v28 = vor.u32 %v3610_v16, %v2896_v17 }
  0x66   : > { %1903 = vmatpush.bf16.msra.mxu0 %v2547_v58  ;;  %v3542_v26 = vld [vmem:[%s3880_s28 + $0x124] sm:$0xf]  ;;  %v2624_v29 = vld [vmem:[%s3880_s28 + $0x130] sm:$0xf0]  ;;  %v2499_v37 = vor.u32 %v3510_v24, %v2496_v25 }
  0x67   : > { %1916 = vmatpush.bf16.msra.mxu1 %v2675_v59  ;;  %v3574_v31 = vld [vmem:[%s3880_s28 + $0x224] sm:$0xf]  ;;  %v2752_v34 = vld [vmem:[%s3880_s28 + $0x230] sm:$0xf0]  ;;  %v2627_v41 = vor.u32 %v3542_v26, %v2624_v29 }
  0x68   : > { %1929 = vmatpush.bf16.msra.mxu2 %v2803_v60  ;;  %v3606_v35 = vld [vmem:[%s3880_s28 + $0x324] sm:$0xf]  ;;  %v2880_v36 = vld [vmem:[%s3880_s28 + $0x330] sm:$0xf0]  ;;  %v2755_v42 = vor.u32 %v3574_v31, %v2752_v34 }
  0x69   : > { %1942 = vmatpush.bf16.msra.mxu3 %v2931_v0  ;;  %v3506_v38 = vld [vmem:[%s3880_s28 + $0x4] sm:$0xf]  ;;  %v2480_v40 = vld [vmem:[%s3880_s28 + $0x10] sm:$0xf0]  ;;  %v2883_v46 = vor.u32 %v3606_v35, %v2880_v36 }
  0x6a   : > { %1904 = vmatpush.bf16.msra.mxu0 %v2531_v6  ;;  %v3538_v43 = vld [vmem:[%s3880_s28 + $0x104] sm:$0xf]  ;;  %v2608_v44 = vld [vmem:[%s3880_s28 + $0x110] sm:$0xf0]  ;;  %v2483_v53 = vor.u32 %v3506_v38, %v2480_v40 }
  0x6b   : > { %1917 = vmatpush.bf16.msra.mxu1 %v2659_v7  ;;  %v3570_v45 = vld [vmem:[%s3880_s28 + $0x204] sm:$0xf]  ;;  %v2736_v47 = vld [vmem:[%s3880_s28 + $0x210] sm:$0xf0]  ;;  %v2611_v57 = vor.u32 %v3538_v43, %v2608_v44 }
  0x6c   : > { %1930 = vmatpush.bf16.msra.mxu2 %v2787_v8  ;;  %v3602_v48 = vld [vmem:[%s3880_s28 + $0x304] sm:$0xf]  ;;  %v2864_v49 = vld [vmem:[%s3880_s28 + $0x310] sm:$0xf0]  ;;  %v2739_v58 = vor.u32 %v3570_v45, %v2736_v47 }
  0x6d   : > { %1943 = vmatpush.bf16.msra.mxu3 %v2915_v12  ;;  %v3662_v50 = vld [vmem:[%s3880_s28 + $0x4e4] sm:$0xf]  ;;  %v3104_v51 = vld [vmem:[%s3880_s28 + $0x4f0] sm:$0xf0]  ;;  %v2867_v61 = vor.u32 %v3602_v48, %v2864_v49 }
  0x6e   : > { %1905 = vmatpush.bf16.msra.mxu0 %v2515_v18  ;;  %v3694_v52 = vld [vmem:[%s3880_s28 + $0x5e4] sm:$0xf]  ;;  %v3232_v54 = vld [vmem:[%s3880_s28 + $0x5f0] sm:$0xf0]  ;;  %v3107_v62 = vor.u32 %v3662_v50, %v3104_v51 }
  0x6f   : > { %1918 = vmatpush.bf16.msra.mxu1 %v2643_v19  ;;  %v3726_v55 = vld [vmem:[%s3880_s28 + $0x6e4] sm:$0xf]  ;;  %v3360_v56 = vld [vmem:[%s3880_s28 + $0x6f0] sm:$0xf0]  ;;  %v3235_v63 = vor.u32 %v3694_v52, %v3232_v54 }
  0x70   : > { %1931 = vmatpush.bf16.msra.mxu2 %v2771_v20  ;;  %v3758_v59 = vld [vmem:[%s3880_s28 + $0x7e4] sm:$0xf]  ;;  %v3488_v60 = vld [vmem:[%s3880_s28 + $0x7f0] sm:$0xf0]  ;;  %v3363_v0 = vor.u32 %v3726_v55, %v3360_v56 }
  0x71   : > { %1944 = vmatpush.bf16.msra.mxu3 %v2899_v28  ;;  %v3658_v1 = vld [vmem:[%s3880_s28 + $0x4c4] sm:$0xf]  ;;  %v3088_v2 = vld [vmem:[%s3880_s28 + $0x4d0] sm:$0xf0]  ;;  %v3491_v4 = vor.u32 %v3758_v59, %v3488_v60 }
  0x72   : > { %1906 = vmatpush.bf16.msra.mxu0 %v2499_v37  ;;  %v3690_v3 = vld [vmem:[%s3880_s28 + $0x5c4] sm:$0xf]  ;;  %v3216_v5 = vld [vmem:[%s3880_s28 + $0x5d0] sm:$0xf0]  ;;  %v3091_v10 = vor.u32 %v3658_v1, %v3088_v2 }
  0x73   : > { %1919 = vmatpush.bf16.msra.mxu1 %v2627_v41  ;;  %v3722_v6 = vld [vmem:[%s3880_s28 + $0x6c4] sm:$0xf]  ;;  %v3344_v7 = vld [vmem:[%s3880_s28 + $0x6d0] sm:$0xf0]  ;;  %v3219_v11 = vor.u32 %v3690_v3, %v3216_v5 }
  0x74   : > { %1932 = vmatpush.bf16.msra.mxu2 %v2755_v42  ;;  %v3754_v8 = vld [vmem:[%s3880_s28 + $0x7c4] sm:$0xf]  ;;  %v3472_v9 = vld [vmem:[%s3880_s28 + $0x7d0] sm:$0xf0]  ;;  %v3347_v12 = vor.u32 %v3722_v6, %v3344_v7 }
  0x75   : > { %1945 = vmatpush.bf16.msra.mxu3 %v2883_v46  ;;  %v3654_v13 = vld [vmem:[%s3880_s28 + $0x4a4] sm:$0xf]  ;;  %v3072_v14 = vld [vmem:[%s3880_s28 + $0x4b0] sm:$0xf0]  ;;  %v3475_v16 = vor.u32 %v3754_v8, %v3472_v9 }
  0x76   : > { %1907 = vmatpush.bf16.msra.mxu0 %v2483_v53  ;;  %v3686_v15 = vld [vmem:[%s3880_s28 + $0x5a4] sm:$0xf]  ;;  %v3200_v17 = vld [vmem:[%s3880_s28 + $0x5b0] sm:$0xf0]  ;;  %v3075_v25 = vor.u32 %v3654_v13, %v3072_v14 }
  0x77   : > { %1920 = vmatpush.bf16.msra.mxu1 %v2611_v57  ;;  %v3718_v18 = vld [vmem:[%s3880_s28 + $0x6a4] sm:$0xf]  ;;  %v3328_v19 = vld [vmem:[%s3880_s28 + $0x6b0] sm:$0xf0]  ;;  %v3203_v26 = vor.u32 %v3686_v15, %v3200_v17 }
  0x78   : > { %1933 = vmatpush.bf16.msra.mxu2 %v2739_v58  ;;  %v3750_v20 = vld [vmem:[%s3880_s28 + $0x7a4] sm:$0xf]  ;;  %v3456_v24 = vld [vmem:[%s3880_s28 + $0x7b0] sm:$0xf0]  ;;  %v3331_v28 = vor.u32 %v3718_v18, %v3328_v19 }
  0x79   : > { %1946 = vmatpush.bf16.msra.mxu3 %v2867_v61  ;;  %1908 = vmatmul.bf16.vlgmr.msra.gmra.mxu0 %v3990_v22  ;;  %v3650_v29 = vld [vmem:[%s3880_s28 + $0x484] sm:$0xf]  ;;  %v3056_v31 = vld [vmem:[%s3880_s28 + $0x490] sm:$0xf0]  ;;  %v3459_v35 = vor.u32 %v3750_v20, %v3456_v24 }
  0x7a   : > { %1952 = vmatpush.bf16.msrb.mxu0 %v3107_v62  ;;  %1921 = vmatmul.bf16.vlgmr.msra.gmra.mxu1 %v3997_v27  ;;  %v3682_v34 = vld [vmem:[%s3880_s28 + $0x584] sm:$0xf]  ;;  %v3184_v36 = vld [vmem:[%s3880_s28 + $0x590] sm:$0xf0]  ;;  %v3059_v42 = vor.u32 %v3650_v29, %v3056_v31  ;;  %v2598_v31 = vld [vmem:[%s3880_s28 + $0xe8] sm:$0xf] }
  0x7b   : > { %1965 = vmatpush.bf16.msrb.mxu1 %v3235_v63  ;;  %1934 = vmatmul.bf16.vlgmr.msra.gmra.mxu2 %v3988_v21  ;;  %v3714_v37 = vld [vmem:[%s3880_s28 + $0x684] sm:$0xf]  ;;  %v3312_v38 = vld [vmem:[%s3880_s28 + $0x690] sm:$0xf0]  ;;  %v3187_v43 = vor.u32 %v3682_v34, %v3184_v36  ;;  %v3537_v34 = vld [vmem:[%s3880_s28 + $0xf4] sm:$0xf0] }
  0x7c   : > { %1978 = vmatpush.bf16.msrb.mxu2 %v3363_v0  ;;  %1947 = vmatmul.bf16.vlgmr.msra.gmra.mxu3 %v3992_v23  ;;  %v3746_v40 = vld [vmem:[%s3880_s28 + $0x784] sm:$0xf]  ;;  %v3440_v41 = vld [vmem:[%s3880_s28 + $0x790] sm:$0xf0]  ;;  %v3315_v44 = vor.u32 %v3714_v37, %v3312_v38  ;;  %v3569_v37 = vld [vmem:[%s3880_s28 + $0x1f4] sm:$0xf0] }
  0x7d   : > { %1991 = vmatpush.bf16.msrb.mxu3 %v3491_v4  ;;  %v3646_v45 = vld [vmem:[%s3880_s28 + $0x464] sm:$0xf]  ;;  %v3040_v46 = vld [vmem:[%s3880_s28 + $0x470] sm:$0xf0]  ;;  %v3443_v48 = vor.u32 %v3746_v40, %v3440_v41  ;;  %v2854_v38 = vld [vmem:[%s3880_s28 + $0x2e8] sm:$0xf] }
  0x7e   : > { %1953 = vmatpush.bf16.msrb.mxu0 %v3091_v10  ;;  %v3678_v47 = vld [vmem:[%s3880_s28 + $0x564] sm:$0xf]  ;;  %v3168_v49 = vld [vmem:[%s3880_s28 + $0x570] sm:$0xf0]  ;;  %v3043_v54 = vor.u32 %v3646_v45, %v3040_v46  ;;  %v3601_v40 = vld [vmem:[%s3880_s28 + $0x2f4] sm:$0xf0]  ;;  %v2599_v46 = vor.u32 %v3537_v34, %v2598_v31 }
  0x7f   : > { %1966 = vmatpush.bf16.msrb.mxu1 %v3219_v11  ;;  %v3710_v50 = vld [vmem:[%s3880_s28 + $0x664] sm:$0xf]  ;;  %v3296_v51 = vld [vmem:[%s3880_s28 + $0x670] sm:$0xf0]  ;;  %v3171_v55 = vor.u32 %v3678_v47, %v3168_v49  ;;  %v2582_v49 = vld [vmem:[%s3880_s28 + $0xc8] sm:$0xf] }
  0x80   : > { %1979 = vmatpush.bf16.msrb.mxu2 %v3347_v12  ;;  %v3742_v52 = vld [vmem:[%s3880_s28 + $0x764] sm:$0xf]  ;;  %v3424_v53 = vld [vmem:[%s3880_s28 + $0x770] sm:$0xf0]  ;;  %v3299_v56 = vor.u32 %v3710_v50, %v3296_v51  ;;  %v3533_v50 = vld [vmem:[%s3880_s28 + $0xd4] sm:$0xf0] }
  0x81   : > { %1992 = vmatpush.bf16.msrb.mxu3 %v3475_v16  ;;  %v3642_v57 = vld [vmem:[%s3880_s28 + $0x444] sm:$0xf]  ;;  %v3024_v58 = vld [vmem:[%s3880_s28 + $0x450] sm:$0xf0]  ;;  %v3427_v60 = vor.u32 %v3742_v52, %v3424_v53  ;;  %v2710_v51 = vld [vmem:[%s3880_s28 + $0x1c8] sm:$0xf] }
  0x82   : > { %1954 = vmatpush.bf16.msrb.mxu0 %v3075_v25  ;;  %v3674_v59 = vld [vmem:[%s3880_s28 + $0x544] sm:$0xf]  ;;  %v3152_v61 = vld [vmem:[%s3880_s28 + $0x550] sm:$0xf0]  ;;  %v3027_v2 = vor.u32 %v3642_v57, %v3024_v58  ;;  %v3565_v53 = vld [vmem:[%s3880_s28 + $0x1d4] sm:$0xf0]  ;;  %v2583_v58 = vor.u32 %v3533_v50, %v2582_v49 }
  0x83   : > { %1967 = vmatpush.bf16.msrb.mxu1 %v3203_v26  ;;  %v3706_v62 = vld [vmem:[%s3880_s28 + $0x644] sm:$0xf]  ;;  %v3280_v63 = vld [vmem:[%s3880_s28 + $0x650] sm:$0xf0]  ;;  %v3155_v3 = vor.u32 %v3674_v59, %v3152_v61  ;;  %v3629_v57 = vld [vmem:[%s3880_s28 + $0x3d4] sm:$0xf0]  ;;  %v2711_v59 = vor.u32 %v3565_v53, %v2710_v51 }
  0x84   : > { %1980 = vmatpush.bf16.msrb.mxu2 %v3331_v28  ;;  %v3738_v0 = vld [vmem:[%s3880_s28 + $0x744] sm:$0xf]  ;;  %v3408_v1 = vld [vmem:[%s3880_s28 + $0x750] sm:$0xf0]  ;;  %v3283_v4 = vor.u32 %v3706_v62, %v3280_v63  ;;  %v2566_v61 = vld [vmem:[%s3880_s28 + $0xa8] sm:$0xf] }
  0x85   : > { %1993 = vmatpush.bf16.msrb.mxu3 %v3459_v35  ;;  %v3638_v5 = vld [vmem:[%s3880_s28 + $0x424] sm:$0xf]  ;;  %v3008_v6 = vld [vmem:[%s3880_s28 + $0x430] sm:$0xf0]  ;;  %v3411_v8 = vor.u32 %v3738_v0, %v3408_v1  ;;  %v2726_v35 = vld [vmem:[%s3880_s28 + $0x1e8] sm:$0xf] }
  0x86   : > { %1955 = vmatpush.bf16.msrb.mxu0 %v3059_v42  ;;  %v3670_v7 = vld [vmem:[%s3880_s28 + $0x524] sm:$0xf]  ;;  %v3136_v9 = vld [vmem:[%s3880_s28 + $0x530] sm:$0xf0]  ;;  %v3011_v14 = vor.u32 %v3638_v5, %v3008_v6  ;;  %v2727_v47 = vor.u32 %v3569_v37, %v2726_v35  ;;  %v3529_v62 = vld [vmem:[%s3880_s28 + $0xb4] sm:$0xf0] }
  0x87   : > { %1968 = vmatpush.bf16.msrb.mxu1 %v3187_v43  ;;  %v3702_v10 = vld [vmem:[%s3880_s28 + $0x624] sm:$0xf]  ;;  %v3264_v11 = vld [vmem:[%s3880_s28 + $0x630] sm:$0xf0]  ;;  %v3139_v17 = vor.u32 %v3670_v7, %v3136_v9  ;;  %v2982_v43 = vld [vmem:[%s3880_s28 + $0x3e8] sm:$0xf] }
  0x88   : > { %1981 = vmatpush.bf16.msrb.mxu2 %v3315_v44  ;;  %v3734_v12 = vld [vmem:[%s3880_s28 + $0x724] sm:$0xf]  ;;  %v3392_v13 = vld [vmem:[%s3880_s28 + $0x730] sm:$0xf0]  ;;  %v3267_v18 = vor.u32 %v3702_v10, %v3264_v11  ;;  %v3633_v44 = vld [vmem:[%s3880_s28 + $0x3f4] sm:$0xf0] }
  0x89   : > { %1994 = vmatpush.bf16.msrb.mxu3 %v3443_v48  ;;  %v3634_v15 = vld [vmem:[%s3880_s28 + $0x404] sm:$0xf]  ;;  %v2992_v16 = vld [vmem:[%s3880_s28 + $0x410] sm:$0xf0]  ;;  %v3395_v25 = vor.u32 %v3734_v12, %v3392_v13  ;;  %v2855_v48 = vor.u32 %v3601_v40, %v2854_v38  ;;  %v2983_v52 = vor.u32 %v3633_v44, %v2982_v43  ;;  %v2694_v63 = vld [vmem:[%s3880_s28 + $0x1a8] sm:$0xf] }
  0x8a   : > { %1956 = vmatpush.bf16.msrb.mxu0 %v3043_v54  ;;  %v3666_v19 = vld [vmem:[%s3880_s28 + $0x504] sm:$0xf]  ;;  %v3120_v20 = vld [vmem:[%s3880_s28 + $0x510] sm:$0xf0]  ;;  %v2995_v36 = vor.u32 %v3634_v15, %v2992_v16  ;;  %v2838_v54 = vld [vmem:[%s3880_s28 + $0x2c8] sm:$0xf] }
  0x8b   : > { %1969 = vmatpush.bf16.msrb.mxu1 %v3171_v55  ;;  %v3698_v24 = vld [vmem:[%s3880_s28 + $0x604] sm:$0xf]  ;;  %v3248_v26 = vld [vmem:[%s3880_s28 + $0x610] sm:$0xf0]  ;;  %v3123_v41 = vor.u32 %v3666_v19, %v3120_v20  ;;  %v3597_v55 = vld [vmem:[%s3880_s28 + $0x2d4] sm:$0xf0] }
  0x8c   : > { %1982 = vmatpush.bf16.msrb.mxu2 %v3299_v56  ;;  %v3730_v28 = vld [vmem:[%s3880_s28 + $0x704] sm:$0xf]  ;;  %v3376_v29 = vld [vmem:[%s3880_s28 + $0x710] sm:$0xf0]  ;;  %v3251_v42 = vor.u32 %v3698_v24, %v3248_v26  ;;  %v2966_v56 = vld [vmem:[%s3880_s28 + $0x3c8] sm:$0xf] }
  0x8d   : > { %1995 = vmatpush.bf16.msrb.mxu3 %v3427_v60  ;;  %v3379_v45 = vor.u32 %v3730_v28, %v3376_v29  ;;  %v2839_v60 = vor.u32 %v3597_v55, %v2838_v54  ;;  %v2967_v0 = vor.u32 %v3629_v57, %v2966_v56  ;;  %v3561_v1 = vld [vmem:[%s3880_s28 + $0x1b4] sm:$0xf0]  ;;  %v2678_v9 = vld [vmem:[%s3880_s28 + $0x188] sm:$0xf] }
  0x8e   : > { %1957 = vmatpush.bf16.msrb.mxu0 %v3027_v2  ;;  %v2822_v2 = vld [vmem:[%s3880_s28 + $0x2a8] sm:$0xf]  ;;  %v3625_v5 = vld [vmem:[%s3880_s28 + $0x3b4] sm:$0xf0]  ;;  %v2695_v6 = vor.u32 %v3561_v1, %v2694_v63 }
  0x8f   : > { %1970 = vmatpush.bf16.msrb.mxu1 %v3155_v3  ;;  %v3593_v3 = vld [vmem:[%s3880_s28 + $0x2b4] sm:$0xf0]  ;;  %v2806_v11 = vld [vmem:[%s3880_s28 + $0x288] sm:$0xf] }
  0x90   : > { %1983 = vmatpush.bf16.msrb.mxu2 %v3283_v4  ;;  %v2950_v4 = vld [vmem:[%s3880_s28 + $0x3a8] sm:$0xf]  ;;  %v2823_v7 = vor.u32 %v3593_v3, %v2822_v2  ;;  %v3557_v10 = vld [vmem:[%s3880_s28 + $0x194] sm:$0xf0] }
  0x91   : > { %1996 = vmatpush.bf16.msrb.mxu3 %v3411_v8  ;;  %v2550_v8 = vld [vmem:[%s3880_s28 + $0x88] sm:$0xf]  ;;  %v3589_v12 = vld [vmem:[%s3880_s28 + $0x294] sm:$0xf0]  ;;  %v2679_v15 = vor.u32 %v3557_v10, %v2678_v9 }
  0x92   : > { %1958 = vmatpush.bf16.msrb.mxu0 %v3011_v14  ;;  %v3621_v13 = vld [vmem:[%s3880_s28 + $0x394] sm:$0xf0]  ;;  %v2807_v16 = vor.u32 %v3589_v12, %v2806_v11  ;;  %v2662_v19 = vld [vmem:[%s3880_s28 + $0x168] sm:$0xf] }
  0x93   : > { %1971 = vmatpush.bf16.msrb.mxu1 %v3139_v17  ;;  %v2534_v17 = vld [vmem:[%s3880_s28 + $0x68] sm:$0xf]  ;;  %v3553_v24 = vld [vmem:[%s3880_s28 + $0x174] sm:$0xf0] }
  0x94   : > { %1984 = vmatpush.bf16.msrb.mxu2 %v3267_v18  ;;  %v3521_v18 = vld [vmem:[%s3880_s28 + $0x74] sm:$0xf0]  ;;  %v2918_v28 = vld [vmem:[%s3880_s28 + $0x368] sm:$0xf]  ;;  %v2663_v34 = vor.u32 %v3553_v24, %v2662_v19 }
  0x95   : > { %1997 = vmatpush.bf16.msrb.mxu3 %v3395_v25  ;;  %v2790_v25 = vld [vmem:[%s3880_s28 + $0x268] sm:$0xf]  ;;  %v3585_v26 = vld [vmem:[%s3880_s28 + $0x274] sm:$0xf0]  ;;  %v2535_v31 = vor.u32 %v3521_v18, %v2534_v17 }
  0x96   : > { %1959 = vmatpush.bf16.msrb.mxu0 %v2995_v36  ;;  %v3617_v29 = vld [vmem:[%s3880_s28 + $0x374] sm:$0xf0]  ;;  %v2791_v35 = vor.u32 %v3585_v26, %v2790_v25  ;;  %v2518_v36 = vld [vmem:[%s3880_s28 + $0x48] sm:$0xf] }
  0x97   : > { %1972 = vmatpush.bf16.msrb.mxu1 %v3123_v41  ;;  %v3517_v37 = vld [vmem:[%s3880_s28 + $0x54] sm:$0xf0]  ;;  %v2646_v38 = vld [vmem:[%s3880_s28 + $0x148] sm:$0xf]  ;;  %v2919_v40 = vor.u32 %v3617_v29, %v2918_v28 }
  0x98   : > { %1985 = vmatpush.bf16.msrb.mxu2 %v3251_v42  ;;  %v3549_v41 = vld [vmem:[%s3880_s28 + $0x154] sm:$0xf0]  ;;  %v2774_v42 = vld [vmem:[%s3880_s28 + $0x248] sm:$0xf] }
  0x99   : > { %1998 = vmatpush.bf16.msrb.mxu3 %v3379_v45  ;;  %1960 = vmatmul.bf16.vlgmr.msrb.gmra.mxu0 %v4046_v32  ;;  %v3525_v32 = vld [vmem:[%s3880_s28 + $0x94] sm:$0xf0]  ;;  %v2902_v44 = vld [vmem:[%s3880_s28 + $0x348] sm:$0xf] }
  0x9a   : > { %2004 = vmatpush.bf16.msra.mxu0 %v2599_v46  ;;  %1973 = vmatmul.bf16.vlgmr.msrb.gmra.mxu1 %v4053_v39  ;;  %v2934_v39 = vld [vmem:[%s3880_s28 + $0x388] sm:$0xf]  ;;  %v2551_v14 = vor.u32 %v3525_v32, %v2550_v8  ;;  %v3581_v43 = vld [vmem:[%s3880_s28 + $0x254] sm:$0xf0]  ;;  %v2519_v46 = vor.u32 %v3517_v37, %v2518_v36 }
  0x9b   : > { %2017 = vmatpush.bf16.msra.mxu1 %v2727_v47  ;;  %1986 = vmatmul.bf16.vlgmr.msrb.gmra.mxu2 %v4044_v30  ;;  %v2567_v30 = vor.u32 %v3529_v62, %v2566_v61  ;;  %v2935_v20 = vor.u32 %v3621_v13, %v2934_v39  ;;  %v3613_v45 = vld [vmem:[%s3880_s28 + $0x354] sm:$0xf0]  ;;  %v2647_v47 = vor.u32 %v3549_v41, %v2646_v38  ;;  %v2502_v49 = vld [vmem:[%s3880_s28 + $0x28] sm:$0xf] }
  0x9c   : > { %2030 = vmatpush.bf16.msra.mxu2 %v2855_v48  ;;  %1999 = vmatmul.bf16.vlgmr.msrb.gmra.mxu3 %v4048_v33  ;;  %v2951_v33 = vor.u32 %v3625_v5, %v2950_v4  ;;  %v2775_v48 = vor.u32 %v3581_v43, %v2774_v42  ;;  %v3513_v50 = vld [vmem:[%s3880_s28 + $0x34] sm:$0xf0]  ;;  %v2630_v51 = vld [vmem:[%s3880_s28 + $0x128] sm:$0xf] }
  0x9d   : > { %2043 = vmatpush.bf16.msra.mxu3 %v2983_v52  ;;  %v2903_v52 = vor.u32 %v3613_v45, %v2902_v44  ;;  %v3545_v53 = vld [vmem:[%s3880_s28 + $0x134] sm:$0xf0]  ;;  %v2758_v54 = vld [vmem:[%s3880_s28 + $0x228] sm:$0xf] }
  0x9e   : > { %2005 = vmatpush.bf16.msra.mxu0 %v2583_v58  ;;  %v3577_v55 = vld [vmem:[%s3880_s28 + $0x234] sm:$0xf0]  ;;  %v2886_v56 = vld [vmem:[%s3880_s28 + $0x328] sm:$0xf]  ;;  %v2503_v58 = vor.u32 %v3513_v50, %v2502_v49  ;;  %v2631_v61 = vor.u32 %v3545_v53, %v2630_v51 }
  0x9f   : > { %2018 = vmatpush.bf16.msra.mxu1 %v2711_v59  ;;  %v3609_v57 = vld [vmem:[%s3880_s28 + $0x334] sm:$0xf0]  ;;  %v2486_v59 = vld [vmem:[%s3880_s28 + $0x8] sm:$0xf]  ;;  %v2759_v62 = vor.u32 %v3577_v55, %v2758_v54 }
  0xa0   : > { %2031 = vmatpush.bf16.msra.mxu2 %v2839_v60  ;;  %v3509_v60 = vld [vmem:[%s3880_s28 + $0x14] sm:$0xf0]  ;;  %v2614_v63 = vld [vmem:[%s3880_s28 + $0x108] sm:$0xf]  ;;  %v2887_v2 = vor.u32 %v3609_v57, %v2886_v56 }
  0xa1   : > { %2044 = vmatpush.bf16.msra.mxu3 %v2967_v0  ;;  %v3541_v0 = vld [vmem:[%s3880_s28 + $0x114] sm:$0xf0]  ;;  %v2742_v1 = vld [vmem:[%s3880_s28 + $0x208] sm:$0xf]  ;;  %v2487_v8 = vor.u32 %v3509_v60, %v2486_v59 }
  0xa2   : > { %2006 = vmatpush.bf16.msra.mxu0 %v2567_v30  ;;  %v3573_v3 = vld [vmem:[%s3880_s28 + $0x214] sm:$0xf0]  ;;  %v2870_v4 = vld [vmem:[%s3880_s28 + $0x308] sm:$0xf]  ;;  %v2615_v10 = vor.u32 %v3541_v0, %v2614_v63 }
  0xa3   : > { %2019 = vmatpush.bf16.msra.mxu1 %v2695_v6  ;;  %v3605_v5 = vld [vmem:[%s3880_s28 + $0x314] sm:$0xf0]  ;;  %v3110_v30 = vld [vmem:[%s3880_s28 + $0x4e8] sm:$0xf]  ;;  %v2743_v11 = vor.u32 %v3573_v3, %v2742_v1 }
  0xa4   : > { %2032 = vmatpush.bf16.msra.mxu2 %v2823_v7  ;;  %v3665_v6 = vld [vmem:[%s3880_s28 + $0x4f4] sm:$0xf0]  ;;  %v3238_v7 = vld [vmem:[%s3880_s28 + $0x5e8] sm:$0xf]  ;;  %v2871_v13 = vor.u32 %v3605_v5, %v2870_v4 }
  0xa5   : > { %2045 = vmatpush.bf16.msra.mxu3 %v2951_v33  ;;  %v3697_v32 = vld [vmem:[%s3880_s28 + $0x5f4] sm:$0xf0]  ;;  %v3366_v9 = vld [vmem:[%s3880_s28 + $0x6e8] sm:$0xf] }
  0xa6   : > { %2007 = vmatpush.bf16.msra.mxu0 %v2551_v14  ;;  %v3729_v33 = vld [vmem:[%s3880_s28 + $0x6f4] sm:$0xf0]  ;;  %v3494_v12 = vld [vmem:[%s3880_s28 + $0x7e8] sm:$0xf]  ;;  %v3111_v14 = vor.u32 %v3665_v6, %v3110_v30 }
  0xa7   : > { %2020 = vmatpush.bf16.msra.mxu1 %v2679_v15  ;;  %v3761_v39 = vld [vmem:[%s3880_s28 + $0x7f4] sm:$0xf0]  ;;  %v3239_v15 = vor.u32 %v3697_v32, %v3238_v7  ;;  %v3094_v17 = vld [vmem:[%s3880_s28 + $0x4c8] sm:$0xf] }
  0xa8   : > { %2033 = vmatpush.bf16.msra.mxu2 %v2807_v16  ;;  %v3367_v16 = vor.u32 %v3729_v33, %v3366_v9  ;;  %v3661_v18 = vld [vmem:[%s3880_s28 + $0x4d4] sm:$0xf0]  ;;  %v3222_v19 = vld [vmem:[%s3880_s28 + $0x5c8] sm:$0xf] }
  0xa9   : > { %2046 = vmatpush.bf16.msra.mxu3 %v2935_v20  ;;  %v3495_v20 = vor.u32 %v3761_v39, %v3494_v12  ;;  %v3693_v24 = vld [vmem:[%s3880_s28 + $0x5d4] sm:$0xf0]  ;;  %v3350_v25 = vld [vmem:[%s3880_s28 + $0x6c8] sm:$0xf] }
  0xaa   : > { %2008 = vmatpush.bf16.msra.mxu0 %v2535_v31  ;;  %v3725_v26 = vld [vmem:[%s3880_s28 + $0x6d4] sm:$0xf0]  ;;  %v3478_v28 = vld [vmem:[%s3880_s28 + $0x7c8] sm:$0xf]  ;;  %v3095_v31 = vor.u32 %v3661_v18, %v3094_v17 }
  0xab   : > { %2021 = vmatpush.bf16.msra.mxu1 %v2663_v34  ;;  %v3757_v29 = vld [vmem:[%s3880_s28 + $0x7d4] sm:$0xf0]  ;;  %v3223_v34 = vor.u32 %v3693_v24, %v3222_v19  ;;  %v3078_v36 = vld [vmem:[%s3880_s28 + $0x4a8] sm:$0xf] }
  0xac   : > { %2034 = vmatpush.bf16.msra.mxu2 %v2791_v35  ;;  %v3351_v35 = vor.u32 %v3725_v26, %v3350_v25  ;;  %v3657_v37 = vld [vmem:[%s3880_s28 + $0x4b4] sm:$0xf0]  ;;  %v3206_v38 = vld [vmem:[%s3880_s28 + $0x5a8] sm:$0xf] }
  0xad   : > { %2047 = vmatpush.bf16.msra.mxu3 %v2919_v40  ;;  %v3479_v40 = vor.u32 %v3757_v29, %v3478_v28  ;;  %v3689_v41 = vld [vmem:[%s3880_s28 + $0x5b4] sm:$0xf0]  ;;  %v3334_v42 = vld [vmem:[%s3880_s28 + $0x6a8] sm:$0xf] }
  0xae   : > { %2009 = vmatpush.bf16.msra.mxu0 %v2519_v46  ;;  %v3721_v43 = vld [vmem:[%s3880_s28 + $0x6b4] sm:$0xf0]  ;;  %v3462_v44 = vld [vmem:[%s3880_s28 + $0x7a8] sm:$0xf]  ;;  %v3079_v46 = vor.u32 %v3657_v37, %v3078_v36 }
  0xaf   : > { %2022 = vmatpush.bf16.msra.mxu1 %v2647_v47  ;;  %v3753_v45 = vld [vmem:[%s3880_s28 + $0x7b4] sm:$0xf0]  ;;  %v3207_v47 = vor.u32 %v3689_v41, %v3206_v38  ;;  %v3190_v50 = vld [vmem:[%s3880_s28 + $0x588] sm:$0xf] }
  0xb0   : > { %2035 = vmatpush.bf16.msra.mxu2 %v2775_v48  ;;  %v3335_v48 = vor.u32 %v3721_v43, %v3334_v42  ;;  %v3653_v49 = vld [vmem:[%s3880_s28 + $0x494] sm:$0xf0]  ;;  %v3446_v53 = vld [vmem:[%s3880_s28 + $0x788] sm:$0xf] }
  0xb1   : > { %2048 = vmatpush.bf16.msra.mxu3 %v2903_v52  ;;  %v3685_v51 = vld [vmem:[%s3880_s28 + $0x594] sm:$0xf0]  ;;  %v3046_v57 = vld [vmem:[%s3880_s28 + $0x468] sm:$0xf] }
  0xb2   : > { %2010 = vmatpush.bf16.msra.mxu0 %v2503_v58  ;;  %v3717_v52 = vld [vmem:[%s3880_s28 + $0x694] sm:$0xf0]  ;;  %v3191_v55 = vor.u32 %v3685_v51, %v3190_v50  ;;  %v3174_v59 = vld [vmem:[%s3880_s28 + $0x568] sm:$0xf]  ;;  %v3599_v51 = vld [vmem:[%s3880_s28 + $0x2ec] sm:$0xf] }
  0xb3   : > { %2023 = vmatpush.bf16.msra.mxu1 %v2631_v61  ;;  %v3649_v58 = vld [vmem:[%s3880_s28 + $0x474] sm:$0xf0]  ;;  %v3430_v0 = vld [vmem:[%s3880_s28 + $0x768] sm:$0xf] }
  0xb4   : > { %2036 = vmatpush.bf16.msra.mxu2 %v2759_v62  ;;  %v3681_v61 = vld [vmem:[%s3880_s28 + $0x574] sm:$0xf0]  ;;  %v3302_v62 = vld [vmem:[%s3880_s28 + $0x668] sm:$0xf] }
  0xb5   : > { %2049 = vmatpush.bf16.msra.mxu3 %v2887_v2  ;;  %v3713_v63 = vld [vmem:[%s3880_s28 + $0x674] sm:$0xf0]  ;;  %v3047_v2 = vor.u32 %v3649_v58, %v3046_v57  ;;  %v3175_v3 = vor.u32 %v3681_v61, %v3174_v59  ;;  %v3030_v5 = vld [vmem:[%s3880_s28 + $0x448] sm:$0xf] }
  0xb6   : > { %2011 = vmatpush.bf16.msra.mxu0 %v2487_v8  ;;  %v3745_v1 = vld [vmem:[%s3880_s28 + $0x774] sm:$0xf0]  ;;  %v3303_v4 = vor.u32 %v3713_v63, %v3302_v62  ;;  %v3158_v6 = vld [vmem:[%s3880_s28 + $0x548] sm:$0xf]  ;;  %v3531_v62 = vld [vmem:[%s3880_s28 + $0xcc] sm:$0xf] }
  0xb7   : > { %2024 = vmatpush.bf16.msra.mxu1 %v2615_v10  ;;  %v3645_v30 = vld [vmem:[%s3880_s28 + $0x454] sm:$0xf0]  ;;  %v3431_v7 = vor.u32 %v3745_v1, %v3430_v0  ;;  %v3286_v32 = vld [vmem:[%s3880_s28 + $0x648] sm:$0xf]  ;;  %v2584_v63 = vld [vmem:[%s3880_s28 + $0xd8] sm:$0xf0] }
  0xb8   : > { %2037 = vmatpush.bf16.msra.mxu2 %v2743_v11  ;;  %v3677_v8 = vld [vmem:[%s3880_s28 + $0x554] sm:$0xf0]  ;;  %v3414_v33 = vld [vmem:[%s3880_s28 + $0x748] sm:$0xf]  ;;  %v3031_v11 = vor.u32 %v3645_v30, %v3030_v5  ;;  %v3563_v0 = vld [vmem:[%s3880_s28 + $0x1cc] sm:$0xf] }
  0xb9   : > { %2050 = vmatpush.bf16.msra.mxu3 %v2871_v13  ;;  %2012 = vmatmul.bf16.vlgmr.msra.gmra.mxu0 %v3990_v22  ;;  %v3463_v22 = vor.u32 %v3753_v45, %v3462_v44  ;;  %v3709_v9 = vld [vmem:[%s3880_s28 + $0x654] sm:$0xf0]  ;;  %v3159_v39 = vor.u32 %v3677_v8, %v3158_v6  ;;  %v3398_v26 = vld [vmem:[%s3880_s28 + $0x728] sm:$0xf]  ;;  %v3627_v5 = vld [vmem:[%s3880_s28 + $0x3cc] sm:$0xf] }
  0xba   : > { %2056 = vmatpush.bf16.msrb.mxu0 %v3111_v14  ;;  %2025 = vmatmul.bf16.vlgmr.msra.gmra.mxu1 %v3997_v27  ;;  %v3749_v27 = vld [vmem:[%s3880_s28 + $0x794] sm:$0xf0]  ;;  %v3287_v13 = vor.u32 %v3709_v9, %v3286_v32  ;;  %v3014_v14 = vld [vmem:[%s3880_s28 + $0x428] sm:$0xf]  ;;  %v2968_v30 = vld [vmem:[%s3880_s28 + $0x3d8] sm:$0xf0] }
  0xbb   : > { %2069 = vmatpush.bf16.msrb.mxu1 %v3239_v15  ;;  %2038 = vmatmul.bf16.vlgmr.msra.gmra.mxu2 %v3988_v21  ;;  %v3062_v21 = vld [vmem:[%s3880_s28 + $0x488] sm:$0xf]  ;;  %v3447_v60 = vor.u32 %v3749_v27, %v3446_v53  ;;  %v3741_v10 = vld [vmem:[%s3880_s28 + $0x754] sm:$0xf0] }
  0xbc   : > { %2082 = vmatpush.bf16.msrb.mxu2 %v3367_v16  ;;  %2051 = vmatmul.bf16.vlgmr.msra.gmra.mxu3 %v3992_v23  ;;  %v3318_v23 = vld [vmem:[%s3880_s28 + $0x688] sm:$0xf]  ;;  %v3063_v54 = vor.u32 %v3653_v49, %v3062_v21  ;;  %v3641_v15 = vld [vmem:[%s3880_s28 + $0x434] sm:$0xf0]  ;;  %v3415_v18 = vor.u32 %v3741_v10, %v3414_v33  ;;  %v2600_v21 = vld [vmem:[%s3880_s28 + $0xf8] sm:$0xf0] }
  0xbd   : > { %2095 = vmatpush.bf16.msrb.mxu3 %v3495_v20  ;;  %v3319_v56 = vor.u32 %v3717_v52, %v3318_v23  ;;  %v3142_v16 = vld [vmem:[%s3880_s28 + $0x528] sm:$0xf]  ;;  %v3673_v19 = vld [vmem:[%s3880_s28 + $0x534] sm:$0xf0]  ;;  %v3015_v29 = vor.u32 %v3641_v15, %v3014_v14  ;;  %v3567_v49 = vld [vmem:[%s3880_s28 + $0x1ec] sm:$0xf] }
  0xbe   : > { %2057 = vmatpush.bf16.msrb.mxu0 %v3095_v31  ;;  %v3270_v20 = vld [vmem:[%s3880_s28 + $0x628] sm:$0xf]  ;;  %v3705_v24 = vld [vmem:[%s3880_s28 + $0x634] sm:$0xf0]  ;;  %v2856_v23 = vld [vmem:[%s3880_s28 + $0x2f8] sm:$0xf0] }
  0xbf   : > { %2070 = vmatpush.bf16.msrb.mxu1 %v3223_v34  ;;  %v3737_v28 = vld [vmem:[%s3880_s28 + $0x734] sm:$0xf0]  ;;  %v2998_v31 = vld [vmem:[%s3880_s28 + $0x408] sm:$0xf]  ;;  %v3271_v36 = vor.u32 %v3705_v24, %v3270_v20  ;;  %v2859_v61 = vor.u32 %v3599_v51, %v2856_v23  ;;  %v3527_v33 = vld [vmem:[%s3880_s28 + $0xac] sm:$0xf] }
  0xc0   : > { %2083 = vmatpush.bf16.msrb.mxu2 %v3351_v35  ;;  %v3637_v34 = vld [vmem:[%s3880_s28 + $0x414] sm:$0xf0]  ;;  %v3143_v35 = vor.u32 %v3673_v19, %v3142_v16  ;;  %v3126_v37 = vld [vmem:[%s3880_s28 + $0x508] sm:$0xf]  ;;  %v3399_v42 = vor.u32 %v3737_v28, %v3398_v26  ;;  %v2568_v10 = vld [vmem:[%s3880_s28 + $0xb8] sm:$0xf0] }
  0xc1   : > { %2096 = vmatpush.bf16.msrb.mxu3 %v3479_v40  ;;  %v3669_v38 = vld [vmem:[%s3880_s28 + $0x514] sm:$0xf0]  ;;  %v3254_v40 = vld [vmem:[%s3880_s28 + $0x608] sm:$0xf]  ;;  %v2999_v50 = vor.u32 %v3637_v34, %v2998_v31  ;;  %v3591_v14 = vld [vmem:[%s3880_s28 + $0x2ac] sm:$0xf]  ;;  %v2571_v20 = vor.u32 %v3527_v33, %v2568_v10 }
  0xc2   : > { %2058 = vmatpush.bf16.msrb.mxu0 %v3079_v46  ;;  %v3701_v43 = vld [vmem:[%s3880_s28 + $0x614] sm:$0xf0]  ;;  %v3382_v44 = vld [vmem:[%s3880_s28 + $0x708] sm:$0xf]  ;;  %v3127_v27 = vor.u32 %v3669_v38, %v3126_v37  ;;  %v2824_v15 = vld [vmem:[%s3880_s28 + $0x2b8] sm:$0xf0] }
  0xc3   : > { %2071 = vmatpush.bf16.msrb.mxu1 %v3207_v47  ;;  %v3733_v45 = vld [vmem:[%s3880_s28 + $0x714] sm:$0xf0]  ;;  %v4335_v16 = vld [vmem:[#allocation1 + $0x24] sm:$0xff]  ;;  %v2952_v19 = vld [vmem:[%s3880_s28 + $0x3b8] sm:$0xf0]  ;;  %v2827_v26 = vor.u32 %v3591_v14, %v2824_v15 }
  0xc4   : > { %2084 = vmatpush.bf16.msrb.mxu2 %v3335_v48  ;;  %v1818_v17 = vpop.f32.mrf.mxu1  ;;  %v3535_v48 = vld [vmem:[%s3880_s28 + $0xec] sm:$0xf]  ;;  %v3383_v58 = vor.u32 %v3733_v45, %v3382_v44  ;;  %v2808_v37 = vld [vmem:[%s3880_s28 + $0x298] sm:$0xf0] }
  0xc5   : > { %2097 = vmatpush.bf16.msrb.mxu3 %v3463_v22  ;;  %v1805_v12 = vpop.f32.mrf.mxu0  ;;  %v2728_v22 = vld [vmem:[%s3880_s28 + $0x1f8] sm:$0xf0]  ;;  %v2603_v59 = vor.u32 %v3535_v48, %v2600_v21  ;;  %v4343_v24 = vld [vmem:[#allocation1 + $0x2d] sm:$0xff] }
  0xc6   : > { %2059 = vmatpush.bf16.msrb.mxu0 %v3063_v54  ;;  %v1819_v25 = vadd.f32 %v1818_v17, %v1805_v12  ;;  %v3255_v54 = vor.u32 %v3701_v43, %v3254_v40  ;;  %v2971_v12 = vor.u32 %v3627_v5, %v2968_v30  ;;  %v4338_v17 = vld [vmem:[#allocation1 + $0x3f] sm:$0xff]  ;;  %v3523_v28 = vld [vmem:[%s3880_s28 + $0x8c] sm:$0xf] }
  0xc7   : > { %2072 = vmatpush.bf16.msrb.mxu1 %v3191_v55  ;;  %v3631_v55 = vld [vmem:[%s3880_s28 + $0x3ec] sm:$0xf]  ;;  %v2936_v40 = vld [vmem:[%s3880_s28 + $0x398] sm:$0xf0] }
  0xc8   : > { %2085 = vmatpush.bf16.msrb.mxu2 %v3319_v56  ;;  %v2984_v56 = vld [vmem:[%s3880_s28 + $0x3f8] sm:$0xf0]  ;;  %v3555_v31 = vld [vmem:[%s3880_s28 + $0x18c] sm:$0xf] }
  0xc9   : > { %2098 = vmatpush.bf16.msrb.mxu3 %v3447_v60  ;;  %v2731_v60 = vor.u32 %v3567_v49, %v2728_v22  ;;  %v2987_v1 = vor.u32 %v3631_v55, %v2984_v56  ;;  %v3619_v38 = vld [vmem:[%s3880_s28 + $0x38c] sm:$0xf]  ;;  %v2792_v51 = vld [vmem:[%s3880_s28 + $0x278] sm:$0xf0] }
  0xca   : > { %2060 = vmatpush.bf16.msrb.mxu0 %v3047_v2  ;;  %v1831_v41 = vpop.f32.mrf.mxu2  ;;  %v2712_v2 = vld [vmem:[%s3880_s28 + $0x1d8] sm:$0xf0]  ;;  %v3519_v45 = vld [vmem:[%s3880_s28 + $0x6c] sm:$0xf]  ;;  %v2939_v49 = vor.u32 %v3619_v38, %v2936_v40 }
  0xcb   : > { %2073 = vmatpush.bf16.msrb.mxu1 %v3175_v3  ;;  %v1832_v46 = vadd.f32 %v1831_v41, %v1819_v25  ;;  %v3595_v3 = vld [vmem:[%s3880_s28 + $0x2cc] sm:$0xf]  ;;  %v2715_v32 = vor.u32 %v3563_v0, %v2712_v2  ;;  %v2888_v15 = vld [vmem:[%s3880_s28 + $0x338] sm:$0xf0] }
  0xcc   : > { %2086 = vmatpush.bf16.msrb.mxu2 %v3303_v4  ;;  %v1844_v47 = vpop.f32.mrf.mxu3  ;;  %v1820_v57 = vpop.f32.mrf.mxu1  ;;  %v2840_v4 = vld [vmem:[%s3880_s28 + $0x2d8] sm:$0xf0]  ;;  %v3583_v22 = vld [vmem:[%s3880_s28 + $0x26c] sm:$0xf] }
  0xcd   : > { %2099 = vmatpush.bf16.msrb.mxu3 %v3431_v7  ;;  %v4314_v52 = vadd.f32 %v1844_v47, %v1832_v46  ;;  %v1807_v53 = vpop.f32.mrf.mxu0  ;;  %v2587_v7 = vor.u32 %v3531_v62, %v2584_v63  ;;  %v2843_v9 = vor.u32 %v3595_v3, %v2840_v4  ;;  %v2536_v46 = vld [vmem:[%s3880_s28 + $0x78] sm:$0xf0]  ;;  %v3551_v47 = vld [vmem:[%s3880_s28 + $0x16c] sm:$0xf]  ;;  %v2795_v55 = vor.u32 %v3583_v22, %v2792_v51 }
  0xce   : > { %2061 = vmatpush.bf16.msrb.mxu0 %v3031_v11  ;;  %v3559_v11 = vld [vmem:[%s3880_s28 + $0x1ac] sm:$0xf]  ;;  %v2920_v53 = vld [vmem:[%s3880_s28 + $0x378] sm:$0xf0] }
  0xcf   : > { %2074 = vmatpush.bf16.msrb.mxu1 %v3159_v39  ;;  %v4329_v39 = vld [vmem:[#allocation1 + $0x36] sm:$0xff]  ;;  %v3615_v23 = vld [vmem:[%s3880_s28 + $0x36c] sm:$0xf] }
  0xd0   : > { %2087 = vmatpush.bf16.msrb.mxu2 %v3287_v13  ;;  %v2696_v13 = vld [vmem:[%s3880_s28 + $0x1b8] sm:$0xf0]  ;;  %v3515_v56 = vld [vmem:[%s3880_s28 + $0x4c] sm:$0xf] }
  0xd1   : > { %2100 = vmatpush.bf16.msrb.mxu3 %v3415_v18  ;;  %v3623_v18 = vld [vmem:[%s3880_s28 + $0x3ac] sm:$0xf]  ;;  %v2699_v25 = vor.u32 %v3559_v11, %v2696_v13  ;;  %v2520_v57 = vld [vmem:[%s3880_s28 + $0x58] sm:$0xf0] }
  0xd2   : > { %2062 = vmatpush.bf16.msrb.mxu0 %v3015_v29  ;;  %v1833_v6 = vpop.f32.mrf.mxu2  ;;  %v2552_v29 = vld [vmem:[%s3880_s28 + $0x98] sm:$0xf0]  ;;  %v2955_v34 = vor.u32 %v3623_v18, %v2952_v19  ;;  %v3579_v62 = vld [vmem:[%s3880_s28 + $0x24c] sm:$0xf]  ;;  %v2523_v4 = vor.u32 %v3515_v56, %v2520_v57 }
  0xd3   : > { %2075 = vmatpush.bf16.msrb.mxu1 %v3143_v35  ;;  %v2680_v35 = vld [vmem:[%s3880_s28 + $0x198] sm:$0xf0]  ;;  %v2555_v41 = vor.u32 %v3523_v28, %v2552_v29  ;;  %v3611_v2 = vld [vmem:[%s3880_s28 + $0x34c] sm:$0xf] }
  0xd4   : > { %2088 = vmatpush.bf16.msrb.mxu2 %v3271_v36  ;;  %v1846_v8 = vpop.f32.mrf.mxu3  ;;  %v3587_v36 = vld [vmem:[%s3880_s28 + $0x28c] sm:$0xf]  ;;  %v2683_v43 = vor.u32 %v3555_v31, %v2680_v35  ;;  %v2776_v63 = vld [vmem:[%s3880_s28 + $0x258] sm:$0xf0] }
  0xd5   : > { %2101 = vmatpush.bf16.msrb.mxu3 %v3399_v42  ;;  %v2811_v44 = vor.u32 %v3587_v36, %v2808_v37  ;;  %v2904_v3 = vld [vmem:[%s3880_s28 + $0x358] sm:$0xf0]  ;;  %v3511_v8 = vld [vmem:[%s3880_s28 + $0x2c] sm:$0xf] }
  0xd6   : > { %2063 = vmatpush.bf16.msrb.mxu0 %v2999_v50  ;;  %v1857_v42 = vpop.f32.mrf.mxu0  ;;  %v2664_v50 = vld [vmem:[%s3880_s28 + $0x178] sm:$0xf0]  ;;  %v2907_v10 = vor.u32 %v3611_v2, %v2904_v3  ;;  %v3607_v14 = vld [vmem:[%s3880_s28 + $0x32c] sm:$0xf] }
  0xd7   : > { %2076 = vmatpush.bf16.msrb.mxu1 %v3127_v27  ;;  %v1858_v48 = vadd.f32 %v1857_v42, %v4314_v52  ;;  %v1870_v21 = vpop.f32.mrf.mxu1  ;;  %v2667_v52 = vor.u32 %v3551_v47, %v2664_v50  ;;  %v2632_v11 = vld [vmem:[%s3880_s28 + $0x138] sm:$0xf0]  ;;  %v3507_v19 = vld [vmem:[%s3880_s28 + $0xc] sm:$0xf]  ;;  %v2891_v35 = vor.u32 %v3607_v14, %v2888_v15 }
  0xd8   : > { %2089 = vmatpush.bf16.msrb.mxu2 %v3255_v54  ;;  %v2539_v54 = vor.u32 %v3519_v45, %v2536_v46  ;;  %v2760_v13 = vld [vmem:[%s3880_s28 + $0x238] sm:$0xf0]  ;;  %v3539_v28 = vld [vmem:[%s3880_s28 + $0x10c] sm:$0xf] }
  0xd9   : > { %2102 = vmatpush.bf16.msrb.mxu3 %v3383_v58  ;;  %2064 = vmatmul.bf16.vlgmr.msrb.gmra.mxu0 %v4335_v16  ;;  %v1871_v27 = vadd.f32 %v1870_v21, %v1858_v48  ;;  %v3547_v58 = vld [vmem:[%s3880_s28 + $0x14c] sm:$0xf]  ;;  %v2616_v29 = vld [vmem:[%s3880_s28 + $0x118] sm:$0xf0] }
  0xda   : > { %2108 = vmatpush.bf16.msra.mxu0 %v2603_v59  ;;  %2077 = vmatmul.bf16.vlgmr.msrb.gmra.mxu1 %v4343_v24  ;;  %v3571_v31 = vld [vmem:[%s3880_s28 + $0x20c] sm:$0xf]  ;;  %v2744_v36 = vld [vmem:[%s3880_s28 + $0x218] sm:$0xf0]  ;;  %v2619_v48 = vor.u32 %v3539_v28, %v2616_v29 }
  0xdb   : > { %2121 = vmatpush.bf16.msra.mxu1 %v2731_v60  ;;  %2090 = vmatmul.bf16.vlgmr.msrb.gmra.mxu2 %v4329_v39  ;;  %v2923_v60 = vor.u32 %v3615_v23, %v2920_v53  ;;  %v3603_v37 = vld [vmem:[%s3880_s28 + $0x30c] sm:$0xf]  ;;  %v2872_v38 = vld [vmem:[%s3880_s28 + $0x318] sm:$0xf0]  ;;  %v2747_v21 = vor.u32 %v3571_v31, %v2744_v36 }
  0xdc   : > { %2134 = vmatpush.bf16.msra.mxu2 %v2859_v61  ;;  %2103 = vmatmul.bf16.vlgmr.msrb.gmra.mxu3 %v4338_v17  ;;  %v2648_v61 = vld [vmem:[%s3880_s28 + $0x158] sm:$0xf0]  ;;  %v3727_v46 = vld [vmem:[%s3880_s28 + $0x6ec] sm:$0xf]  ;;  %v2875_v22 = vor.u32 %v3603_v37, %v2872_v38 }
  0xdd   : > { %2147 = vmatpush.bf16.msra.mxu3 %v2987_v1  ;;  %v2651_v6 = vor.u32 %v3547_v58, %v2648_v61  ;;  %v3112_v42 = vld [vmem:[%s3880_s28 + $0x4f8] sm:$0xf0]  ;;  %v3723_v57 = vld [vmem:[%s3880_s28 + $0x6cc] sm:$0xf] }
  0xde   : > { %2109 = vmatpush.bf16.msra.mxu0 %v2587_v7  ;;  %v1883_v59 = vpop.f32.mrf.mxu2  ;;  %v1859_v30 = vpop.f32.mrf.mxu0  ;;  %v2779_v7 = vor.u32 %v3579_v62, %v2776_v63  ;;  %v3240_v45 = vld [vmem:[%s3880_s28 + $0x5f8] sm:$0xf0]  ;;  %v3687_v2 = vld [vmem:[%s3880_s28 + $0x5ac] sm:$0xf] }
  0xdf   : > { %2122 = vmatpush.bf16.msra.mxu1 %v2715_v32  ;;  %v1884_v0 = vadd.f32 %v1883_v59, %v1871_v27  ;;  %v1896_v1 = vpop.f32.mrf.mxu3  ;;  %v2504_v32 = vld [vmem:[%s3880_s28 + $0x38] sm:$0xf0]  ;;  %v1872_v33 = vpop.f32.mrf.mxu1  ;;  %v3659_v27 = vld [vmem:[%s3880_s28 + $0x4cc] sm:$0xf] }
  0xe0   : > { %2135 = vmatpush.bf16.msra.mxu2 %v2843_v9  ;;  %v3543_v9 = vld [vmem:[%s3880_s28 + $0x12c] sm:$0xf]  ;;  %v2507_v18 = vor.u32 %v3511_v8, %v2504_v32  ;;  %v3368_v47 = vld [vmem:[%s3880_s28 + $0x6f8] sm:$0xf0] }
  0xe1   : > { %2148 = vmatpush.bf16.msra.mxu3 %v2971_v12  ;;  %v4371_v5 = vadd.f32 %v1896_v1, %v1884_v0  ;;  %v3575_v12 = vld [vmem:[%s3880_s28 + $0x22c] sm:$0xf]  ;;  %v3496_v50 = vld [vmem:[%s3880_s28 + $0x7f8] sm:$0xf0]  ;;  %v3371_v53 = vor.u32 %v3727_v46, %v3368_v47 }
  0xe2   : > { %2110 = vmatpush.bf16.msra.mxu0 %v2571_v20  ;;  %v2488_v20 = vld [vmem:[%s3880_s28 + $0x18] sm:$0xf0]  ;;  %v3755_v59 = vld [vmem:[%s3880_s28 + $0x7cc] sm:$0xf] }
  0xe3   : > { %2123 = vmatpush.bf16.msra.mxu1 %v2699_v25  ;;  %v2635_v25 = vor.u32 %v3543_v9, %v2632_v11  ;;  %v3224_v56 = vld [vmem:[%s3880_s28 + $0x5d8] sm:$0xf0]  ;;  %v3655_v0 = vld [vmem:[%s3880_s28 + $0x4ac] sm:$0xf]  ;;  %v3783_v9 = vld [vmem:[#allocation1] sm:$0xff] }
  0xe4   : > { %2136 = vmatpush.bf16.msra.mxu2 %v2827_v26  ;;  %v2763_v26 = vor.u32 %v3575_v12, %v2760_v13  ;;  %v3352_v58 = vld [vmem:[%s3880_s28 + $0x6d8] sm:$0xf0]  ;;  %v3751_v8 = vld [vmem:[%s3880_s28 + $0x7ac] sm:$0xf] }
  0xe5   : > { %2149 = vmatpush.bf16.msra.mxu3 %v2955_v34  ;;  %v3355_v63 = vor.u32 %v3723_v57, %v3352_v58  ;;  %v3080_v1 = vld [vmem:[%s3880_s28 + $0x4b8] sm:$0xf0]  ;;  %v3785_v11 = vld [vmem:[#allocation1 + $0x9] sm:$0xff] }
  0xe6   : > { %2111 = vmatpush.bf16.msra.mxu0 %v2555_v41  ;;  %v1885_v34 = vpop.f32.mrf.mxu2  ;;  %v3663_v41 = vld [vmem:[%s3880_s28 + $0x4ec] sm:$0xf]  ;;  %v3208_v30 = vld [vmem:[%s3880_s28 + $0x5b8] sm:$0xf0] }
  0xe7   : > { %2124 = vmatpush.bf16.msra.mxu1 %v2683_v43  ;;  %v1898_v40 = vpop.f32.mrf.mxu3  ;;  %v3695_v43 = vld [vmem:[%s3880_s28 + $0x5ec] sm:$0xf]  ;;  %v3115_v51 = vor.u32 %v3663_v41, %v3112_v42  ;;  %v3464_v32 = vld [vmem:[%s3880_s28 + $0x7b8] sm:$0xf0]  ;;  %v3211_v12 = vor.u32 %v3687_v2, %v3208_v30 }
  0xe8   : > { %2137 = vmatpush.bf16.msra.mxu2 %v2811_v44  ;;  %v2491_v44 = vor.u32 %v3507_v19, %v2488_v20  ;;  %v3243_v23 = vor.u32 %v3695_v43, %v3240_v45  ;;  %v3784_v33 = vld [vmem:[#allocation1 + $0x1b] sm:$0xff]  ;;  %v3651_v14 = vld [vmem:[%s3880_s28 + $0x48c] sm:$0xf]  ;;  %v3467_v19 = vor.u32 %v3751_v8, %v3464_v32 }
  0xe9   : > { %2150 = vmatpush.bf16.msra.mxu3 %v2939_v49  ;;  %v3759_v49 = vld [vmem:[%s3880_s28 + $0x7ec] sm:$0xf]  ;;  %v3064_v15 = vld [vmem:[%s3880_s28 + $0x498] sm:$0xf0] }
  0xea   : > { %2112 = vmatpush.bf16.msra.mxu0 %v2539_v54  ;;  %v3096_v54 = vld [vmem:[%s3880_s28 + $0x4d8] sm:$0xf0]  ;;  %v3747_v28 = vld [vmem:[%s3880_s28 + $0x78c] sm:$0xf]  ;;  %v3067_v31 = vor.u32 %v3651_v14, %v3064_v15 }
  0xeb   : > { %2125 = vmatpush.bf16.msra.mxu1 %v2667_v52  ;;  %v3691_v52 = vld [vmem:[%s3880_s28 + $0x5cc] sm:$0xf]  ;;  %v3099_v61 = vor.u32 %v3659_v27, %v3096_v54  ;;  %v3192_v20 = vld [vmem:[%s3880_s28 + $0x598] sm:$0xf0] }
  0xec   : > { %2138 = vmatpush.bf16.msra.mxu2 %v2795_v55  ;;  %v3499_v55 = vor.u32 %v3759_v49, %v3496_v50  ;;  %v3227_v62 = vor.u32 %v3691_v52, %v3224_v56  ;;  %v3448_v29 = vld [vmem:[%s3880_s28 + $0x798] sm:$0xf0]  ;;  %v3647_v37 = vld [vmem:[%s3880_s28 + $0x46c] sm:$0xf] }
  0xed   : > { %2151 = vmatpush.bf16.msra.mxu3 %v2923_v60  ;;  %v3480_v60 = vld [vmem:[%s3880_s28 + $0x7d8] sm:$0xf0]  ;;  %v3679_v40 = vld [vmem:[%s3880_s28 + $0x56c] sm:$0xf]  ;;  %v3451_v42 = vor.u32 %v3747_v28, %v3448_v29 }
  0xee   : > { %2113 = vmatpush.bf16.msra.mxu0 %v2523_v4  ;;  %v3483_v3 = vor.u32 %v3755_v59, %v3480_v60  ;;  %v3782_v4 = vld [vmem:[#allocation1 + $0x12] sm:$0xff]  ;;  %v3048_v38 = vld [vmem:[%s3880_s28 + $0x478] sm:$0xf0]  ;;  %v3743_v47 = vld [vmem:[%s3880_s28 + $0x76c] sm:$0xf] }
  0xef   : > { %2126 = vmatpush.bf16.msra.mxu1 %v2651_v6  ;;  %v3719_v6 = vld [vmem:[%s3880_s28 + $0x6ac] sm:$0xf]  ;;  %v3176_v43 = vld [vmem:[%s3880_s28 + $0x578] sm:$0xf0] }
  0xf0   : > { %2139 = vmatpush.bf16.msra.mxu2 %v2779_v7  ;;  %v3336_v7 = vld [vmem:[%s3880_s28 + $0x6b8] sm:$0xf0]  ;;  %v3179_v49 = vor.u32 %v3679_v40, %v3176_v43  ;;  %v3707_v52 = vld [vmem:[%s3880_s28 + $0x64c] sm:$0xf] }
  0xf1   : > { %2152 = vmatpush.bf16.msra.mxu3 %v2907_v10  ;;  %v3083_v10 = vor.u32 %v3655_v0, %v3080_v1  ;;  %v3339_v13 = vor.u32 %v3719_v6, %v3336_v7  ;;  %v3304_v45 = vld [vmem:[%s3880_s28 + $0x678] sm:$0xf0]  ;;  %v3739_v58 = vld [vmem:[%s3880_s28 + $0x74c] sm:$0xf] }
  0xf2   : > { %2114 = vmatpush.bf16.msra.mxu0 %v2507_v18  ;;  %v3683_v18 = vld [vmem:[%s3880_s28 + $0x58c] sm:$0xf]  ;;  %v3160_v54 = vld [vmem:[%s3880_s28 + $0x558] sm:$0xf0] }
  0xf3   : > { %2127 = vmatpush.bf16.msra.mxu1 %v2635_v25  ;;  %v3715_v25 = vld [vmem:[%s3880_s28 + $0x68c] sm:$0xf]  ;;  %v3416_v59 = vld [vmem:[%s3880_s28 + $0x758] sm:$0xf0] }
  0xf4   : > { %2140 = vmatpush.bf16.msra.mxu2 %v2763_v26  ;;  %v3320_v26 = vld [vmem:[%s3880_s28 + $0x698] sm:$0xf0]  ;;  %v3639_v1 = vld [vmem:[%s3880_s28 + $0x42c] sm:$0xf]  ;;  %v3419_v30 = vor.u32 %v3739_v58, %v3416_v59 }
  0xf5   : > { %2153 = vmatpush.bf16.msra.mxu3 %v2891_v35  ;;  %v3195_v35 = vor.u32 %v3683_v18, %v3192_v20  ;;  %v3323_v36 = vor.u32 %v3715_v25, %v3320_v26  ;;  %v3016_v2 = vld [vmem:[%s3880_s28 + $0x438] sm:$0xf0]  ;;  %v3703_v7 = vld [vmem:[%s3880_s28 + $0x62c] sm:$0xf] }
  0xf6   : > { %2115 = vmatpush.bf16.msra.mxu0 %v2491_v44  ;;  %v1909_v34 = vpop.f32.mrf.mxu0  ;;  %v3711_v44 = vld [vmem:[%s3880_s28 + $0x66c] sm:$0xf]  ;;  %v3144_v6 = vld [vmem:[%s3880_s28 + $0x538] sm:$0xf0] }
  0xf7   : > { %2128 = vmatpush.bf16.msra.mxu1 %v2619_v48  ;;  %v1922_v41 = vpop.f32.mrf.mxu1  ;;  %v3432_v48 = vld [vmem:[%s3880_s28 + $0x778] sm:$0xf0]  ;;  %v3307_v50 = vor.u32 %v3711_v44, %v3304_v45  ;;  %v3735_v32 = vld [vmem:[%s3880_s28 + $0x72c] sm:$0xf] }
  0xf8   : > { %2141 = vmatpush.bf16.msra.mxu2 %v2747_v21  ;;  %v1923_v46 = vadd.f32 %v1922_v41, %v1909_v34  ;;  %v3051_v21 = vor.u32 %v3647_v37, %v3048_v38  ;;  %v3435_v27 = vor.u32 %v3743_v47, %v3432_v48  ;;  %v3272_v8 = vld [vmem:[%s3880_s28 + $0x638] sm:$0xf0]  ;;  %v3667_v14 = vld [vmem:[%s3880_s28 + $0x50c] sm:$0xf] }
  0xf9   : > { %2154 = vmatpush.bf16.msra.mxu3 %v2875_v22  ;;  %2116 = vmatmul.bf16.vlgmr.msra.gmra.mxu0 %v3783_v9  ;;  %v3643_v22 = vld [vmem:[%s3880_s28 + $0x44c] sm:$0xf]  ;;  %v3400_v9 = vld [vmem:[%s3880_s28 + $0x738] sm:$0xf0] }
  0xfa   : > { %2160 = vmatpush.bf16.msrb.mxu0 %v3115_v51  ;;  %2129 = vmatmul.bf16.vlgmr.msra.gmra.mxu1 %v3785_v11  ;;  %v3032_v51 = vld [vmem:[%s3880_s28 + $0x458] sm:$0xf0]  ;;  %v3275_v11 = vor.u32 %v3703_v7, %v3272_v8  ;;  %v3403_v18 = vor.u32 %v3735_v32, %v3400_v9  ;;  %v3699_v20 = vld [vmem:[%s3880_s28 + $0x60c] sm:$0xf] }
  0xfb   : > { %2173 = vmatpush.bf16.msrb.mxu1 %v3243_v23  ;;  %2142 = vmatmul.bf16.vlgmr.msra.gmra.mxu2 %v3782_v4  ;;  %v3675_v23 = vld [vmem:[%s3880_s28 + $0x54c] sm:$0xf]  ;;  %v3035_v60 = vor.u32 %v3643_v22, %v3032_v51  ;;  %v3256_v25 = vld [vmem:[%s3880_s28 + $0x618] sm:$0xf0] }
  0xfc   : > { %2186 = vmatpush.bf16.msrb.mxu2 %v3371_v53  ;;  %2155 = vmatmul.bf16.vlgmr.msra.gmra.mxu3 %v3784_v33  ;;  %v3019_v33 = vor.u32 %v3639_v1, %v3016_v2  ;;  %v3731_v28 = vld [vmem:[%s3880_s28 + $0x70c] sm:$0xf]  ;;  %v3384_v29 = vld [vmem:[%s3880_s28 + $0x718] sm:$0xf0] }
  0xfd   : > { %2199 = vmatpush.bf16.msrb.mxu3 %v3499_v55  ;;  %v3288_v55 = vld [vmem:[%s3880_s28 + $0x658] sm:$0xf0] }
  0xfe   : > { %2161 = vmatpush.bf16.msrb.mxu0 %v3099_v61  ;;  %v1935_v53 = vpop.f32.mrf.mxu2  ;;  %v3291_v0 = vor.u32 %v3707_v52, %v3288_v55 }
  0xff   : > { %2174 = vmatpush.bf16.msrb.mxu1 %v3227_v62  ;;  %v1936_v56 = vadd.f32 %v1935_v53, %v1923_v46  ;;  %v1948_v57 = vpop.f32.mrf.mxu3  ;;  %v1911_v62 = vpop.f32.mrf.mxu0 }
 0x100   : > { %2187 = vmatpush.bf16.msrb.mxu2 %v3355_v63  ;;  %v3163_v63 = vor.u32 %v3675_v23, %v3160_v54  ;;  %v1924_v4 = vpop.f32.mrf.mxu1 }
 0x101   : > { %2200 = vmatpush.bf16.msrb.mxu3 %v3483_v3  ;;  %v1949_v61 = vadd.f32 %v1948_v57, %v1936_v56  ;;  %v3671_v3 = vld [vmem:[%s3880_s28 + $0x52c] sm:$0xf] }
 0x102   : > { %2162 = vmatpush.bf16.msrb.mxu0 %v3083_v10  ;;  %v3147_v10 = vor.u32 %v3671_v3, %v3144_v6 }
 0x103   : > { %2175 = vmatpush.bf16.msrb.mxu1 %v3211_v12  ;;  %v3635_v12 = vld [vmem:[%s3880_s28 + $0x40c] sm:$0xf] }
 0x104   : > { %2188 = vmatpush.bf16.msrb.mxu2 %v3339_v13  ;;  %v3000_v13 = vld [vmem:[%s3880_s28 + $0x418] sm:$0xf0] }
 0x105   : > { %2201 = vmatpush.bf16.msrb.mxu3 %v3467_v19  ;;  %v3128_v19 = vld [vmem:[%s3880_s28 + $0x518] sm:$0xf0] }
 0x106   : > { %2163 = vmatpush.bf16.msrb.mxu0 %v3067_v31  ;;  %v1937_v15 = vpop.f32.mrf.mxu2  ;;  %v3003_v31 = vor.u32 %v3635_v12, %v3000_v13  ;;  %v3131_v34 = vor.u32 %v3667_v14, %v3128_v19 }
 0x107   : > { %2176 = vmatpush.bf16.msrb.mxu1 %v3195_v35  ;;  %v1950_v26 = vpop.f32.mrf.mxu3  ;;  %v3259_v35 = vor.u32 %v3699_v20, %v3256_v25 }
 0x108   : > { %2189 = vmatpush.bf16.msrb.mxu2 %v3323_v36  ;;  %v3387_v36 = vor.u32 %v3731_v28, %v3384_v29 }
 0x109   : > { %2202 = vmatpush.bf16.msrb.mxu3 %v3451_v42 }
 0x10a   : > { %2164 = vmatpush.bf16.msrb.mxu0 %v3051_v21 }
 0x10b   : > { %2177 = vmatpush.bf16.msrb.mxu1 %v3179_v49 }
 0x10c   : > { %2190 = vmatpush.bf16.msrb.mxu2 %v3307_v50 }
 0x10d   : > { %2203 = vmatpush.bf16.msrb.mxu3 %v3435_v27 }
 0x10e   : > { %2165 = vmatpush.bf16.msrb.mxu0 %v3035_v60 }
 0x10f   : > { %2178 = vmatpush.bf16.msrb.mxu1 %v3163_v63 }
 0x110   : > { %2191 = vmatpush.bf16.msrb.mxu2 %v3291_v0 }
 0x111   : > { %2204 = vmatpush.bf16.msrb.mxu3 %v3419_v30 }
 0x112   : > { %2166 = vmatpush.bf16.msrb.mxu0 %v3019_v33 }
 0x113   : > { %2179 = vmatpush.bf16.msrb.mxu1 %v3147_v10 }
 0x114   : > { %2192 = vmatpush.bf16.msrb.mxu2 %v3275_v11 }
 0x115   : > { %2205 = vmatpush.bf16.msrb.mxu3 %v3403_v18 }
 0x116   : > { %2167 = vmatpush.bf16.msrb.mxu0 %v3003_v31  ;;  %v1961_v37 = vpop.f32.mrf.mxu0  ;;  %v240_v31 = vld [vmem:[#allocation2] sm:$0xff] }
 0x117   : > { %2180 = vmatpush.bf16.msrb.mxu1 %v3131_v34  ;;  %v1962_v38 = vadd.f32 %v1961_v37, %v1949_v61  ;;  %v1974_v40 = vpop.f32.mrf.mxu1 }
 0x118   : > { %2193 = vmatpush.bf16.msrb.mxu2 %v3259_v35 }
 0x119   : > { %2206 = vmatpush.bf16.msrb.mxu3 %v3387_v36  ;;  %2168 = vmatmul.bf16.vlgmr.msrb.gmra.mxu0 %v4335_v16  ;;  %v1975_v41 = vadd.f32 %v1974_v40, %v1962_v38 }
 0x11a   : > { %2181 = vmatmul.bf16.vlgmr.msrb.gmra.mxu1 %v4343_v24 }
 0x11b   : > { %2194 = vmatmul.bf16.vlgmr.msrb.gmra.mxu2 %v4329_v39 }
 0x11c   : > { %2207 = vmatmul.bf16.vlgmr.msrb.gmra.mxu3 %v4338_v17 }
 0x11e   : > { %v1987_v42 = vpop.f32.mrf.mxu2  ;;  %v1963_v46 = vpop.f32.mrf.mxu0 }
 0x11f   : > { %v1988_v43 = vadd.f32 %v1987_v42, %v1975_v41  ;;  %v2000_v44 = vpop.f32.mrf.mxu3  ;;  %v1976_v47 = vpop.f32.mrf.mxu1 }
 0x121   : > { %v2001_v45 = vadd.f32 %v2000_v44, %v1988_v43 }
 0x123   : > { %v2216_v48 = vrot.slane %v2001_v45, 6 }
 0x125   : > { %v2220_v16 = vsel %vm2219_vm0, %v4371_v5, %v2216_v48 }
 0x126   : > { %v1989_v24 = vpop.f32.mrf.mxu2 }
 0x127   : > { %v2002_v21 = vpop.f32.mrf.mxu3 }
 0x136   : > { %v2013_v39 = vpop.f32.mrf.mxu0 }
 0x137   : > { %v2026_v49 = vpop.f32.mrf.mxu1 }
 0x138   : > { %v2027_v17 = vadd.f32 %v2026_v49, %v2013_v39 }
 0x13e   : > { %v2039_v50 = vpop.f32.mrf.mxu2  ;;  %v2015_v53 = vpop.f32.mrf.mxu0 }
 0x13f   : > { %v2040_v22 = vadd.f32 %v2039_v50, %v2027_v17  ;;  %v2052_v51 = vpop.f32.mrf.mxu3  ;;  %v2028_v27 = vpop.f32.mrf.mxu1 }
 0x141   : > { %v2053_v23 = vadd.f32 %v2052_v51, %v2040_v22 }
 0x146   : > { %v2041_v54 = vpop.f32.mrf.mxu2 }
 0x147   : > { %v2054_v52 = vpop.f32.mrf.mxu3 }
 0x156   : > { %v2065_v55 = vpop.f32.mrf.mxu0 }
 0x157   : > { %v2078_v56 = vpop.f32.mrf.mxu1  ;;  %v2066_v7 = vadd.f32 %v2065_v55, %v2053_v23 }
 0x159   : > { %v2079_v32 = vadd.f32 %v2078_v56, %v2066_v7 }
 0x15e   : > { %v2091_v57 = vpop.f32.mrf.mxu2  ;;  %v2067_v59 = vpop.f32.mrf.mxu0 }
 0x15f   : > { %v2104_v58 = vpop.f32.mrf.mxu3  ;;  %v2080_v60 = vpop.f32.mrf.mxu1  ;;  %v2092_v12 = vadd.f32 %v2091_v57, %v2079_v32 }
 0x161   : > { %v2105_v15 = vadd.f32 %v2104_v58, %v2092_v12 }
 0x163   : > { %v2217_v28 = vrot.slane %v2105_v15, 4 }
 0x166   : > { %v2093_v5 = vpop.f32.mrf.mxu2 }
 0x167   : > { %v2106_v61 = vpop.f32.mrf.mxu3 }
 0x176   : > { %v2117_v62 = vpop.f32.mrf.mxu0 }
 0x177   : > { %v2130_v63 = vpop.f32.mrf.mxu1 }
 0x178   : > { %v2131_v6 = vadd.f32 %v2130_v63, %v2117_v62 }
 0x17e   : > { %v2143_v0 = vpop.f32.mrf.mxu2  ;;  %v2119_v2 = vpop.f32.mrf.mxu0 }
 0x17f   : > { %v2156_v1 = vpop.f32.mrf.mxu3  ;;  %v2132_v3 = vpop.f32.mrf.mxu1  ;;  %v2144_v8 = vadd.f32 %v2143_v0, %v2131_v6 }
 0x181   : > { %v2157_v9 = vadd.f32 %v2156_v1, %v2144_v8 }
 0x186   : > { %v2145_v4 = vpop.f32.mrf.mxu2 }
 0x187   : > { %v2158_v30 = vpop.f32.mrf.mxu3 }
 0x196   : > { %v2169_v33 = vpop.f32.mrf.mxu0 }
 0x197   : > { %v2182_v10 = vpop.f32.mrf.mxu1  ;;  %v2170_v11 = vadd.f32 %v2169_v33, %v2157_v9 }
 0x199   : > { %v2183_v13 = vadd.f32 %v2182_v10, %v2170_v11 }
 0x19e   : > { %v2195_v14 = vpop.f32.mrf.mxu2  ;;  %v2171_v20 = vpop.f32.mrf.mxu0 }
 0x19f   : > { %v2196_v18 = vadd.f32 %v2195_v14, %v2183_v13  ;;  %v2208_v19 = vpop.f32.mrf.mxu3  ;;  %v2184_v25 = vpop.f32.mrf.mxu1 }
 0x1a1   : > { %v2209_v26 = vadd.f32 %v2208_v19, %v2196_v18 }
 0x1a3   : > { %v2218_v29 = vrot.slane %v2209_v26, 2 }
 0x1a5   : > { %v2222_v34 = vsel %vm2221_vm1, %v2217_v28, %v2218_v29  ;;  %2231 = sbr.rel (%p3500_p6) target bundleno = 598 (0x256), region = 48 }
 0x1a6   : > { %v2224_v35 = vsel %vm2223_vm2, %v2220_v16, %v2222_v34  ;;  %v2197_v36 = vpop.f32.mrf.mxu2 }
 0x1a7   : > { %v2226_v37 = vadd.f32 %v2224_v35, %v240_v31  ;;  %v2210_v38 = vpop.f32.mrf.mxu3 }
 0x1a9   : > { %2227 = vst [vmem:[#allocation2] sm:$0xff] %v2226_v37 }
 0x1aa   : > { %v2297_v40 = vld [vmem:[%s4673_s3 + $0x178] sm:$0xff]  ;;  %v2296_v42 = vld [vmem:[%s4673_s3 + $0x170] sm:$0xff]  ;;  %v2295_v46 = vld [vmem:[%s4673_s3 + $0x168] sm:$0xff]  ;;  %vm2408_vm4 = vcmask 25600  }
 0x1ab   : > { %v2265_v41 = vld [vmem:[%s4673_s3 + $0x78] sm:$0xff]  ;;  %2368 = vmatpush.msra.mxu2 %v2297_v40  ;;  %v2264_v44 = vld [vmem:[%s4673_s3 + $0x70] sm:$0xff]  ;;  %v2263_v48 = vld [vmem:[%s4673_s3 + $0x68] sm:$0xff] }
 0x1ac   : > { %2328 = vmatpush.msra.mxu0 %v2265_v41  ;;  %v2313_v43 = vld [vmem:[%s4673_s3 + $0x1f8] sm:$0xff]  ;;  %v2312_v47 = vld [vmem:[%s4673_s3 + $0x1f0] sm:$0xff]  ;;  %v2311_v24 = vld [vmem:[%s4673_s3 + $0x1e8] sm:$0xff] }
 0x1ad   : > { %v2281_v45 = vld [vmem:[%s4673_s3 + $0xf8] sm:$0xff]  ;;  %2388 = vmatpush.msra.mxu3 %v2313_v43  ;;  %2369 = vmatpush.msra.mxu2 %v2296_v42  ;;  %v2280_v16 = vld [vmem:[%s4673_s3 + $0xf0] sm:$0xff]  ;;  %v2294_v21 = vld [vmem:[%s4673_s3 + $0x160] sm:$0xff] }
 0x1ae   : > { %2348 = vmatpush.msra.mxu1 %v2281_v45  ;;  %2329 = vmatpush.msra.mxu0 %v2264_v44  ;;  %v2262_v39 = vld [vmem:[%s4673_s3 + $0x60] sm:$0xff]  ;;  %v2279_v49 = vld [vmem:[%s4673_s3 + $0xe8] sm:$0xff]  ;;  %v2293_v22 = vld [vmem:[%s4673_s3 + $0x158] sm:$0xff] }
 0x1af   : > { %2389 = vmatpush.msra.mxu3 %v2312_v47  ;;  %2370 = vmatpush.msra.mxu2 %v2295_v46  ;;  %v2310_v17 = vld [vmem:[%s4673_s3 + $0x1e0] sm:$0xff]  ;;  %v2261_v51 = vld [vmem:[%s4673_s3 + $0x58] sm:$0xff]  ;;  %v2292_v27 = vld [vmem:[%s4673_s3 + $0x150] sm:$0xff] }
 0x1b0   : > { %2349 = vmatpush.msra.mxu1 %v2280_v16  ;;  %2330 = vmatpush.msra.mxu0 %v2263_v48  ;;  %v2278_v50 = vld [vmem:[%s4673_s3 + $0xe0] sm:$0xff]  ;;  %v2309_v23 = vld [vmem:[%s4673_s3 + $0x1d8] sm:$0xff]  ;;  %v2260_v54 = vld [vmem:[%s4673_s3 + $0x50] sm:$0xff] }
 0x1b1   : > { %2390 = vmatpush.msra.mxu3 %v2311_v24  ;;  %2371 = vmatpush.msra.mxu2 %v2294_v21  ;;  %v2277_v53 = vld [vmem:[%s4673_s3 + $0xd8] sm:$0xff]  ;;  %v2308_v52 = vld [vmem:[%s4673_s3 + $0x1d0] sm:$0xff]  ;;  %v2291_v56 = vld [vmem:[%s4673_s3 + $0x148] sm:$0xff] }
 0x1b2   : > { %2350 = vmatpush.msra.mxu1 %v2279_v49  ;;  %2331 = vmatpush.msra.mxu0 %v2262_v39  ;;  %v2276_v55 = vld [vmem:[%s4673_s3 + $0xd0] sm:$0xff]  ;;  %v2259_v57 = vld [vmem:[%s4673_s3 + $0x48] sm:$0xff]  ;;  %v2290_v60 = vld [vmem:[%s4673_s3 + $0x140] sm:$0xff] }
 0x1b3   : > { %2391 = vmatpush.msra.mxu3 %v2310_v17  ;;  %2372 = vmatpush.msra.mxu2 %v2293_v22  ;;  %v2307_v58 = vld [vmem:[%s4673_s3 + $0x1c8] sm:$0xff]  ;;  %v2258_v5 = vld [vmem:[%s4673_s3 + $0x40] sm:$0xff]  ;;  %v2289_v63 = vld [vmem:[%s4673_s3 + $0x138] sm:$0xff] }
 0x1b4   : > { %2351 = vmatpush.msra.mxu1 %v2278_v50  ;;  %2332 = vmatpush.msra.mxu0 %v2261_v51  ;;  %v2275_v59 = vld [vmem:[%s4673_s3 + $0xc8] sm:$0xff]  ;;  %v2306_v61 = vld [vmem:[%s4673_s3 + $0x1c0] sm:$0xff]  ;;  %v2257_v0 = vld [vmem:[%s4673_s3 + $0x38] sm:$0xff] }
 0x1b5   : > { %2392 = vmatpush.msra.mxu3 %v2309_v23  ;;  %2373 = vmatpush.msra.mxu2 %v2292_v27  ;;  %v2274_v62 = vld [vmem:[%s4673_s3 + $0xc0] sm:$0xff]  ;;  %v2305_v1 = vld [vmem:[%s4673_s3 + $0x1b8] sm:$0xff]  ;;  %v2288_v3 = vld [vmem:[%s4673_s3 + $0x130] sm:$0xff] }
 0x1b6   : > { %2352 = vmatpush.msra.mxu1 %v2277_v53  ;;  %2333 = vmatpush.msra.mxu0 %v2260_v54  ;;  %v2273_v2 = vld [vmem:[%s4673_s3 + $0xb8] sm:$0xff]  ;;  %v2256_v4 = vld [vmem:[%s4673_s3 + $0x30] sm:$0xff]  ;;  %v2287_v7 = vld [vmem:[%s4673_s3 + $0x128] sm:$0xff] }
 0x1b7   : > { %2393 = vmatpush.msra.mxu3 %v2308_v52  ;;  %2374 = vmatpush.msra.mxu2 %v2291_v56  ;;  %v2304_v30 = vld [vmem:[%s4673_s3 + $0x1b0] sm:$0xff]  ;;  %v2255_v8 = vld [vmem:[%s4673_s3 + $0x28] sm:$0xff]  ;;  %v2286_v33 = vld [vmem:[%s4673_s3 + $0x120] sm:$0xff] }
 0x1b8   : > { %2353 = vmatpush.msra.mxu1 %v2276_v55  ;;  %2334 = vmatpush.msra.mxu0 %v2259_v57  ;;  %v2272_v6 = vld [vmem:[%s4673_s3 + $0xb0] sm:$0xff]  ;;  %v2303_v32 = vld [vmem:[%s4673_s3 + $0x1a8] sm:$0xff]  ;;  %v2254_v10 = vld [vmem:[%s4673_s3 + $0x20] sm:$0xff] }
 0x1b9   : > { %2394 = vmatpush.msra.mxu3 %v2307_v58  ;;  %2375 = vmatpush.msra.mxu2 %v2290_v60  ;;  %v2271_v9 = vld [vmem:[%s4673_s3 + $0xa8] sm:$0xff]  ;;  %v2233_v11 = vld [vmem:[%s4672_s2] sm:$0xf]  ;;  %v2285_v20 = vld [vmem:[%s4673_s3 + $0x118] sm:$0xff] }
 0x1ba   : > { %2354 = vmatpush.msra.mxu1 %v2275_v59  ;;  %2335 = vmatpush.msra.mxu0 %v2258_v5  ;;  %v2302_v12 = vld [vmem:[%s4673_s3 + $0x1a0] sm:$0xff]  ;;  %v2235_v14 = vperm.slane %v2233_v11, 0  ;;  %v2236_v15 = vperm.slane %v2233_v11, 1  ;;  %v2237_v18 = vperm.slane %v2233_v11, 2  ;;  %v2238_v19 = vperm.slane %v2233_v11, 3  ;;  %v2253_v25 = vld [vmem:[%s4673_s3 + $0x18] sm:$0xff] }
 0x1bb   : > { %2395 = vmatpush.msra.mxu3 %v2306_v61  ;;  %2376 = vmatpush.msra.mxu2 %v2289_v63  ;;  %v2270_v13 = vld [vmem:[%s4673_s3 + $0xa0] sm:$0xff]  ;;  %v2301_v26 = vld [vmem:[%s4673_s3 + $0x198] sm:$0xff]  ;;  %v2284_v35 = vld [vmem:[%s4673_s3 + $0x110] sm:$0xff] }
 0x1bc   : > { %2355 = vmatpush.msra.mxu1 %v2274_v62  ;;  %2336 = vmatpush.msra.mxu0 %v2257_v0  ;;  %v2269_v28 = vld [vmem:[%s4673_s3 + $0x98] sm:$0xff]  ;;  %v2239_v29 = vrot.slane %v2236_v15, 6  ;;  %v2240_v31 = vrot.slane %v2237_v18, 4  ;;  %v2241_v34 = vrot.slane %v2238_v19, 2  ;;  %v2252_v36 = vld [vmem:[%s4673_s3 + $0x10] sm:$0xff]  ;;  %v2232_v37 = vld [vmem:[#allocation2] sm:$0xff] }
 0x1bd   : > { %2396 = vmatpush.msra.mxu3 %v2305_v1  ;;  %2377 = vmatpush.msra.mxu2 %v2288_v3  ;;  %v2300_v38 = vld [vmem:[%s4673_s3 + $0x190] sm:$0xff]  ;;  %v2283_v43 = vld [vmem:[%s4673_s3 + $0x108] sm:$0xff]  ;;  %v2282_v16 = vld [vmem:[%s4673_s3 + $0x100] sm:$0xff] }
 0x1be   : > { %2356 = vmatpush.msra.mxu1 %v2273_v2  ;;  %2337 = vmatpush.msra.mxu0 %v2256_v4  ;;  %v2268_v40 = vld [vmem:[%s4673_s3 + $0x90] sm:$0xff]  ;;  %v2242_v41 = vsel %vm2219_vm0, %v2235_v14, %v2239_v29  ;;  %v2243_v42 = vsel %vm2221_vm1, %v2240_v31, %v2241_v34  ;;  %v2251_v44 = vld [vmem:[%s4673_s3 + $0x8] sm:$0xff]  ;;  %v2250_v24 = vld [vmem:[%s4673_s3] sm:$0xff] }
 0x1bf   : > { %2397 = vmatpush.msra.mxu3 %v2304_v30  ;;  %2378 = vmatpush.msra.mxu2 %v2287_v7  ;;  %v2244_v45 = vsel %vm2223_vm2, %v2242_v41, %v2243_v42  ;;  %v2299_v46 = vld [vmem:[%s4673_s3 + $0x188] sm:$0xff]  ;;  %v2298_v39 = vld [vmem:[%s4673_s3 + $0x180] sm:$0xff] }
 0x1c0   : > { %2357 = vmatpush.msra.mxu1 %v2272_v6  ;;  %2338 = vmatpush.msra.mxu0 %v2255_v8  ;;  %v2246_v47 = vadd.f32 %v2244_v45, %v2232_v37  ;;  %v2267_v48 = vld [vmem:[%s4673_s3 + $0x88] sm:$0xff]  ;;  %v2266_v49 = vld [vmem:[%s4673_s3 + $0x80] sm:$0xff] }
 0x1c1   : > { %2398 = vmatpush.msra.mxu3 %v2303_v32  ;;  %2379 = vmatpush.msra.mxu2 %v2286_v33  ;;  %v3786_v53 = vld [vmem:[%s4674_s4] ss:$0 sm:$0xff] }
 0x1c2   : > { %2358 = vmatpush.msra.mxu1 %v2271_v9  ;;  %2339 = vmatpush.msra.mxu0 %v2254_v10  ;;  %vm2247_vm3 = vcmp.gt.f32.partialorder %v2246_v47, 0.0  ;;  %v2248_v21 = vmul.f32 0.01, %v2246_v47 }
 0x1c3   : > { %2399 = vmatpush.msra.mxu3 %v2302_v12  ;;  %2380 = vmatpush.msra.mxu2 %v2285_v20 }
 0x1c4   : > { %2359 = vmatpush.msra.mxu1 %v2270_v13  ;;  %2340 = vmatpush.msra.mxu0 %v2253_v25  ;;  %v2249_v17 = vsel %vm2247_vm3, %v2246_v47, %v2248_v21 }
 0x1c5   : > { %2400 = vmatpush.msra.mxu3 %v2301_v26  ;;  %2381 = vmatpush.msra.mxu2 %v2284_v35  ;;  %2319 = vst [vmem:[#allocation1] ss:$4 sm:$0xff] %v2249_v17 }
 0x1c6   : > { %2360 = vmatpush.msra.mxu1 %v2269_v28  ;;  %2341 = vmatpush.msra.mxu0 %v2252_v36 }
 0x1c7   : > { %2401 = vmatpush.msra.mxu3 %v2300_v38  ;;  %2382 = vmatpush.msra.mxu2 %v2283_v43 }
 0x1c8   : > { %2361 = vmatpush.msra.mxu1 %v2268_v40  ;;  %2342 = vmatpush.msra.mxu0 %v2251_v44 }
 0x1c9   : > { %2402 = vmatpush.msra.mxu3 %v2299_v46  ;;  %2383 = vmatpush.msra.mxu2 %v2282_v16 }
 0x1ca   : > { %2362 = vmatpush.msra.mxu1 %v2267_v48  ;;  %2343 = vmatpush.msra.mxu0 %v2250_v24 }
 0x1cb   : > { %2403 = vmatpush.msra.mxu3 %v2298_v39 }
 0x1cc   : > { %2363 = vmatpush.msra.mxu1 %v2266_v49  ;;  %v2322_v50 = vld.sshfl [vmem:[#allocation1 + $0x10] sm:$0xff pattern:$0x73625140]  ;;  %v2320_v22 = vld.sshfl [vmem:[#allocation1] sm:$0xff pattern:$0x73625140] }
 0x1cd   : > { %2384 = vmatmul.f32.vlgmr.msra.gmra.mxu2 %v2322_v50  ;;  %2344 = vmatmul.f32.vlgmr.msra.gmra.mxu0 %v2320_v22  ;;  %v2323_v51 = vld.sshfl [vmem:[#allocation1 + $0x18] sm:$0xff pattern:$0x73625140]  ;;  %v2321_v23 = vld.sshfl [vmem:[#allocation1 + $0x8] sm:$0xff pattern:$0x73625140] }
 0x1ce   : > { %2404 = vmatmul.f32.vlgmr.msra.gmra.mxu3 %v2323_v51  ;;  %2364 = vmatmul.f32.vlgmr.msra.gmra.mxu1 %v2321_v23 }
 0x24a   : > { %v2345_v27 = vpop.f32.mrf.mxu0 }
 0x24b   : > { %v2346_v54 = vadd.f32 %v3786_v53, %v2345_v27  ;;  %v2365_v52 = vpop.f32.mrf.mxu1 }
 0x24d   : > { %v2366_v55 = vadd.f32 %v2365_v52, %v2346_v54 }
 0x250   : > { %v2385_v56 = vpop.f32.mrf.mxu2 }
 0x251   : > { %v2386_v57 = vadd.f32 %v2385_v56, %v2366_v55  ;;  %v2405_v58 = vpop.f32.mrf.mxu3 }
 0x253   : > { %v2406_v59 = vadd.f32 %v2405_v58, %v2386_v57 }
 0x255   : > { %2409 = vst.msk [vmem:[#allocation3] sm:$0x3] %vm2408_vm4, %v2406_v59 }
 0x256 PF: > { %p3766_p7 = scmp.eq.s32.totalorder %s3865_s19, 3  ;;  %s3828_s25 = smov [#allocation3]  }
 0x257   : > { %s2416_s26 = sshll.u32 %s3828_s25, 4  ;;  %s2418_s29 = sshll.u32 %s4675_s5, 4  ;;  %s2417_s26 = int_to_ptr.vmem [resolvable:$true] %s2416_s26  ;;  %s2419_s29 = int_to_ptr.hbm [resolvable:$true] %s2418_s29 }
 0x258   : > { %3763 = dma.vmem_to_hbm [thread:$0]  (%p3766_p7), %s2417_s26, 32, %s2419_s29, [#allocation4]  }
 0x259   : > { %3820 = dma.done.wait (%p3766_p7), [#allocation4], 32  }
 0x25a   : > { %3822 = vsyncadd (%p3766_p7), [#allocation4], 4294967264 }
 0x25b PF: > { %s16_s18 = sadd.s32 1, %s3825_s18  }
 0x25c   : > { %p13_p8 = scmp.ge.s32.totalorder %s16_s18, 6  }
 0x25e   :  { %15 = sbr.rel (!%p13_p8) target bundleno = 1 (0x1), region = 78 }
 0x263   :  { %2432 = vsyncpa [#allocation4], 1 }
 0x264   :  { %2434 = vsyncpa [#allocation4 + $0x1], 1 }

</bundles_post_ra>
